<compile_context>
chip_gen: v5e
topology: v5e:2x2
jax: 0.10.0
libtpu: 0.0.40
codegen_flags: <defaults>
</compile_context>

<pallas_src>
import functools

import jax
import jax.numpy as jnp
from jax.experimental import pallas as pl
from jax.experimental.pallas import tpu as pltpu

FILTERS = [50, 50, 100, 100, 100, 100, 100, 100, 100, 100, 100, 100, 100]
CPAD = 128  # lane-dense channel padding (vreg lane width)


# ---------------------------------------------------------------------------
# Fused kernel: all layers (convs + classifier-as-conv) for one batch element
# ---------------------------------------------------------------------------
def _fused_kernel(x_ref, *refs, tap_dims, relu_index, compute_dtype):
    """x_ref: (1, d1, h1, w1, CPAD) im2col'd layer-1 input.
    refs:   w0, b0, w1, b1, ..., w_{n-1}, b_{n-1}, o_ref
            w_i: (kd*kh*kw, CPAD, CPAD) in compute_dtype, b_i: (1, CPAD) f32
            o_ref: (1, 1, CPAD) f32  (padded logits)."""
    n = len(tap_dims)
    o_ref = refs[-1]

    act = x_ref[0]                       # (d, h, w, CPAD), compute_dtype
    for li in range(n):
        w_ref = refs[2 * li]
        b_ref = refs[2 * li + 1]
        kd, kh, kw = tap_dims[li]
        d_in, h_in, w_in, c_in = act.shape
        d_out, h_out, w_out = d_in - kd + 1, h_in - kh + 1, w_in - kw + 1
        m = d_out * h_out * w_out
        c_out = w_ref.shape[-1]

        # Shift-and-matmul with padded K = N = 128; f32 accumulation on the MXU.
        # Bias folded into the accumulator init (saves one (m,128) VPU add).
        acc = jnp.broadcast_to(b_ref[...], (m, c_out)).astype(jnp.float32)
        for i in range(kd):
            for j in range(kh):
                for k in range(kw):
                    t = (i * kh + j) * kw + k
                    patch = act[i:i + d_out, j:j + h_out, k:k + w_out, :]
                    acc = acc + jax.lax.dot_general(
                        patch.reshape(m, c_in), w_ref[t],
                        dimension_numbers=(((1,), (0,)), ((), ())),
                        preferred_element_type=jnp.float32)

        if li == relu_index:             # ReLU once, after the last real conv
            acc = jnp.maximum(acc, 0.0)

        if li < n - 1:
            act = acc.reshape(d_out, h_out, w_out, c_out).astype(compute_dtype)
        else:
            # classifier layer spans the whole remaining volume -> m == 1
            o_ref[0] = acc.astype(o_ref.dtype)


# ---------------------------------------------------------------------------
# Parameter packing (padding / layout / classifier permutation) — one-time
# ---------------------------------------------------------------------------
def pack_params(params, in_spatial, compute_dtype):
    convs = params["convs"]
    wc, bc = params["classifier"]

    packed, tap_dims = [], []

    # Layer 1: fold 5x5x5xCin=1 taps into the contraction (matches wrapper im2col).
    w1, b1 = convs[0]
    kd, kh, kw, cin, cout = w1.shape
    assert cin == 1 and kd * kh * kw * cin <= CPAD and cout <= CPAD
    w1m = w1.reshape(kd * kh * kw * cin, cout)
    w1m = jnp.pad(w1m, ((0, CPAD - kd * kh * kw * cin), (0, CPAD - cout)))
    packed.append((w1m.reshape(1, CPAD, CPAD).astype(compute_dtype),
                   jnp.pad(b1, ((0, 0), (0, CPAD - cout))).astype(jnp.float32)))
    tap_dims.append((1, 1, 1))
    s = (in_spatial[0] - kd + 1, in_spatial[1] - kh + 1, in_spatial[2] - kw + 1)
    prev_cout = cout

    # Remaining conv layers: pad Cin/Cout to 128.
    for (w, b) in convs[1:]:
        kd, kh, kw, cin, cout = w.shape
        wp = jnp.pad(w, ((0, 0), (0, 0), (0, 0),
                         (0, CPAD - cin), (0, CPAD - cout)))
        packed.append((wp.reshape(kd * kh * kw, CPAD, CPAD).astype(compute_dtype),
                       jnp.pad(b, ((0, 0), (0, CPAD - cout))).astype(jnp.float32)))
        tap_dims.append((kd, kh, kw))
        s = (s[0] - kd + 1, s[1] - kh + 1, s[2] - kw + 1)
        prev_cout = cout

    # Classifier as a final "conv" spanning the remaining (dL, hL, wL) volume.
    num_classes, num_features = wc.shape
    dL, hL, wL = s
    assert num_features == prev_cout * dL * hL * wL
    assert num_classes <= CPAD
    wct = wc.reshape(num_classes, prev_cout, dL, hL, wL)        # torch (N, C, D, H, W)
    wct = jnp.transpose(wct, (2, 3, 4, 1, 0))                   # (D, H, W, C, N)
    wct = jnp.pad(wct, ((0, 0), (0, 0), (0, 0),
                        (0, CPAD - prev_cout), (0, CPAD - num_classes)))
    packed.append((wct.reshape(dL * hL * wL, CPAD, CPAD).astype(compute_dtype),
                   jnp.pad(bc, ((0, 0), (0, CPAD - num_classes))).astype(jnp.float32)))
    tap_dims.append((dL, hL, wL))
    return packed, tap_dims


def _im2col_first_layer(x_ncdhw, kd, kh, kw):
    """(B, 1, D, H, W) -> (B, d1, h1, w1, CPAD) im2col patches, zero-padded lanes."""
    B, C, D, H, W = x_ncdhw.shape
    assert C == 1
    d1, h1, w1 = D - kd + 1, H - kh + 1, W - kw + 1
    cols = []
    for i in range(kd):
        for j in range(kh):
            for k in range(kw):
                cols.append(x_ncdhw[:, 0, i:i + d1, j:j + h1, k:k + w1])
    p = jnp.stack(cols, axis=-1)                                # (B, d1, h1, w1, kd*kh*kw)
    return jnp.pad(p, ((0, 0),) * 4 + ((0, CPAD - kd * kh * kw),))


# ---------------------------------------------------------------------------
# Forward wrapper (weights packed ONCE, outside the per-call jit)
# ---------------------------------------------------------------------------
def make_forward(params, in_spatial, *, compute_dtype=jnp.bfloat16):
    packed, tap_dims = pack_params(params, in_spatial, compute_dtype)
    tap_dims = tuple(tap_dims)
    kd, kh, kw = params["convs"][0][0].shape[:3]
    num_classes = params["classifier"][0].shape[0]
    n_layers = len(packed)
    relu_index = n_layers - 2                  # after the last real conv

    weights = tuple(w for (w, _) in packed)
    biases = tuple(b for (_, b) in packed)

    @jax.jit
    def _forward(x_ncdhw, weights, biases):
        xp = _im2col_first_layer(x_ncdhw, kd, kh, kw).astype(compute_dtype)
        B = xp.shape[0]

        flat_args = [xp]
        in_specs = [pl.BlockSpec((1,) + xp.shape[1:], lambda b: (b, 0, 0, 0, 0))]
        for w, bvec in zip(weights, biases):
            flat_args += [w, bvec]
            in_specs += [pl.BlockSpec(w.shape, lambda b: (0, 0, 0)),
                         pl.BlockSpec(bvec.shape, lambda b: (0, 0))]

        kernel = functools.partial(_fused_kernel, tap_dims=tap_dims,
                                   relu_index=relu_index,
                                   compute_dtype=compute_dtype)
        out = pl.pallas_call(
            kernel,
            out_shape=jax.ShapeDtypeStruct((B, 1, CPAD), jnp.float32),
            grid=(B,),
            in_specs=in_specs,
            out_specs=pl.BlockSpec((1, 1, CPAD), lambda b: (b, 0, 0)),
            compiler_params=pltpu.CompilerParams(
                dimension_semantics=("parallel",),
                vmem_limit_bytes=64 * 1024 * 1024),
        )(*flat_args)
        return out[:, 0, :num_classes]

    return lambda x: _forward(x, weights, biases)


# ---------------------------------------------------------------------------
# Deterministic parameter initialization (mirrors BaselineModel.__init__)
# ---------------------------------------------------------------------------
def init_params(key, *, num_classes, depth, spatial):
    specs = [(1, FILTERS[0], 5)]
    for i in range(1, depth):
        specs.append((FILTERS[i], FILTERS[i + 1], 3))

    convs = []
    s = spatial
    for (cin, cout, k) in specs:
        key, kw_, kb_ = jax.random.split(key, 3)
        fan_out = cout * k ** 3
        fan_in = cin * k ** 3
        std = (2.0 / fan_out) ** 0.5              # kaiming_normal_(fan_out, relu)
        w = std * jax.random.normal(kw_, (k, k, k, cin, cout), jnp.float32)
        bound = 1.0 / fan_in ** 0.5               # PyTorch Conv3d default bias init
        b = jax.random.uniform(kb_, (1, cout), jnp.float32, -bound, bound)
        convs.append((w, b))
        s = s - k + 1

    num_features = specs[-1][1] * s ** 3
    key, kw_, kb_ = jax.random.split(key, 3)
    bound = 1.0 / num_features ** 0.5             # PyTorch Linear default init
    wc = jax.random.uniform(kw_, (num_classes, num_features), jnp.float32,
                            -bound, bound)
    bc = jax.random.uniform(kb_, (1, num_classes), jnp.float32, -bound, bound)
    return {"convs": convs, "classifier": (wc, bc)}, num_features


# ---------------------------------------------------------------------------
# Pure-JAX reference (fp32) for correctness checks
# ---------------------------------------------------------------------------
def reference_forward(params, x_ncdhw):
    x = x_ncdhw
    n = len(params["convs"])
    for idx, (w, b) in enumerate(params["convs"]):
        x = jax.lax.conv_general_dilated(
            x, w, window_strides=(1, 1, 1), padding="VALID",
            dimension_numbers=("NCDHW", "DHWIO", "NCDHW"),
            precision=jax.lax.Precision.HIGHEST)
        x = x + b[0][None, :, None, None, None]
        if idx == n - 1:
            x = jnp.maximum(x, 0.0)
    B = x.shape[0]
    flat = x.reshape(B, -1)
    wc, bc = params["classifier"]
    out = jax.lax.dot_general(flat, wc, (((1,), (1,)), ((), ())),
                              precision=jax.lax.Precision.HIGHEST)
    return out + bc[0]


if __name__ == "__main__":
    num_classes = 5
    depth = 3          # BaselineModel default depth is 12; small depth for the demo
    batch, spatial = 2, 10

    key = jax.random.PRNGKey(0)
    kx, kp = jax.random.split(key)
    # PyTorch-layout input: (B, C=1, L, H, W)
    x = jax.random.normal(kx, (batch, 1, spatial, spatial, spatial), jnp.float32)

    params, num_features = init_params(kp, num_classes=num_classes,
                                       depth=depth, spatial=spatial)

    ref = reference_forward(params, x)

    # Exactness path: f32 matmul operands, tight tolerance.
    fwd_f32 = make_forward(params, x.shape[2:], compute_dtype=jnp.float32)
    pred_f32 = jax.block_until_ready(fwd_f32(x))
    assert pred_f32.shape == (batch, num_classes)
    assert jnp.allclose(pred_f32, ref, rtol=2e-3, atol=2e-3), (pred_f32, ref)

    # Fast path: bf16 matmul operands, f32 accumulation (v5e/v6e/v7x MXU-native).
    fwd_bf16 = make_forward(params, x.shape[2:], compute_dtype=jnp.bfloat16)
    pred_bf16 = jax.block_until_ready(fwd_bf16(x))
    assert pred_bf16.shape == (batch, num_classes)
    assert jnp.allclose(pred_bf16, ref, rtol=3e-2, atol=3e-2), (pred_bf16, ref)

    print("KERNEL_OK")
</pallas_src>

<mosaic_0001>
module attributes {stable_mosaic.version = 11 : i64} {
  func.func @_fused_kernel(%arg0: i32, %arg1: memref<1x6x6x6x128xf32, #tpu.memory_space<vmem>>, %arg2: memref<1x128x128xf32, #tpu.memory_space<vmem>>, %arg3: memref<1x128xf32, #tpu.memory_space<vmem>>, %arg4: memref<27x128x128xf32, #tpu.memory_space<vmem>>, %arg5: memref<1x128xf32, #tpu.memory_space<vmem>>, %arg6: memref<27x128x128xf32, #tpu.memory_space<vmem>>, %arg7: memref<1x128xf32, #tpu.memory_space<vmem>>, %arg8: memref<8x128x128xf32, #tpu.memory_space<vmem>>, %arg9: memref<1x128xf32, #tpu.memory_space<vmem>>, %arg10: memref<1x1x128xf32, #tpu.memory_space<vmem>>) attributes {dimension_semantics = [#tpu.dimension_semantics<parallel>], iteration_bounds = array<i64: 2>, scalar_prefetch = 0 : i64, scratch_operands = 0 : i64, tpu.core_type = #tpu.core_type<tc>, window_params = [{transform_indices = @transform_0, window_bounds = array<i64: 1, 6, 6, 6, 128>}, {pipeline_mode = #tpu.pipeline_mode<synchronous>, transform_indices = @transform_1, window_bounds = array<i64: 1, 128, 128>}, {pipeline_mode = #tpu.pipeline_mode<synchronous>, transform_indices = @transform_2, window_bounds = array<i64: 1, 128>}, {pipeline_mode = #tpu.pipeline_mode<synchronous>, transform_indices = @transform_3, window_bounds = array<i64: 27, 128, 128>}, {pipeline_mode = #tpu.pipeline_mode<synchronous>, transform_indices = @transform_4, window_bounds = array<i64: 1, 128>}, {pipeline_mode = #tpu.pipeline_mode<synchronous>, transform_indices = @transform_5, window_bounds = array<i64: 27, 128, 128>}, {pipeline_mode = #tpu.pipeline_mode<synchronous>, transform_indices = @transform_6, window_bounds = array<i64: 1, 128>}, {pipeline_mode = #tpu.pipeline_mode<synchronous>, transform_indices = @transform_7, window_bounds = array<i64: 8, 128, 128>}, {pipeline_mode = #tpu.pipeline_mode<synchronous>, transform_indices = @transform_8, window_bounds = array<i64: 1, 128>}, {transform_indices = @transform_9, window_bounds = array<i64: 1, 1, 128>}]} {
    %c0 = arith.constant 0 : index
    %c0_0 = arith.constant 0 : index
    %c0_1 = arith.constant 0 : index
    %c0_2 = arith.constant 0 : index
    %c0_3 = arith.constant 0 : index
    %0 = vector.load %arg1[%c0, %c0_0, %c0_1, %c0_2, %c0_3] : memref<1x6x6x6x128xf32, #tpu.memory_space<vmem>>, vector<1x6x6x6x128xf32>
    %1 = vector.shape_cast %0 : vector<1x6x6x6x128xf32> to vector<6x6x6x128xf32>
    %c0_4 = arith.constant 0 : index
    %c0_5 = arith.constant 0 : index
    %2 = vector.load %arg3[%c0_4, %c0_5] : memref<1x128xf32, #tpu.memory_space<vmem>>, vector<1x128xf32>
    %3 = vector.shape_cast %2 : vector<1x128xf32> to vector<1x128xf32>
    %4 = vector.broadcast %3 : vector<1x128xf32> to vector<216x128xf32>
    %5 = vector.shape_cast %1 : vector<6x6x6x128xf32> to vector<216x128xf32>
    %c0_6 = arith.constant 0 : index
    %c0_7 = arith.constant 0 : index
    %c0_8 = arith.constant 0 : index
    %6 = vector.load %arg2[%c0_6, %c0_7, %c0_8] : memref<1x128x128xf32, #tpu.memory_space<vmem>>, vector<1x128x128xf32>
    %7 = vector.shape_cast %6 : vector<1x128x128xf32> to vector<128x128xf32>
    %cst = arith.constant dense<0.000000e+00> : vector<216x128xf32>
    %8 = tpu.matmul %5, %7, %cst {dimension_numbers = #tpu.dot_dimension_numbers<[1], [0], [0], [1], [0, 0, 1, 1], [], []>} : vector<216x128xf32>, vector<128x128xf32>, vector<216x128xf32> -> vector<216x128xf32>
    %9 = arith.addf %4, %8 : vector<216x128xf32>
    %10 = vector.shape_cast %9 : vector<216x128xf32> to vector<6x6x6x128xf32>
    %c0_9 = arith.constant 0 : index
    %c0_10 = arith.constant 0 : index
    %11 = vector.load %arg5[%c0_9, %c0_10] : memref<1x128xf32, #tpu.memory_space<vmem>>, vector<1x128xf32>
    %12 = vector.shape_cast %11 : vector<1x128xf32> to vector<1x128xf32>
    %13 = vector.broadcast %12 : vector<1x128xf32> to vector<64x128xf32>
    %14 = vector.extract_strided_slice %10 {offsets = [0, 0, 0, 0], sizes = [4, 4, 4, 128], strides = [1, 1, 1, 1]} : vector<6x6x6x128xf32> to vector<4x4x4x128xf32>
    %15 = vector.shape_cast %14 : vector<4x4x4x128xf32> to vector<64x128xf32>
    %c0_11 = arith.constant 0 : index
    %c0_12 = arith.constant 0 : index
    %c0_13 = arith.constant 0 : index
    %16 = vector.load %arg4[%c0_11, %c0_12, %c0_13] : memref<27x128x128xf32, #tpu.memory_space<vmem>>, vector<1x128x128xf32>
    %17 = vector.shape_cast %16 : vector<1x128x128xf32> to vector<128x128xf32>
    %cst_14 = arith.constant dense<0.000000e+00> : vector<64x128xf32>
    %18 = tpu.matmul %15, %17, %cst_14 {dimension_numbers = #tpu.dot_dimension_numbers<[1], [0], [0], [1], [0, 0, 1, 1], [], []>} : vector<64x128xf32>, vector<128x128xf32>, vector<64x128xf32> -> vector<64x128xf32>
    %19 = arith.addf %13, %18 : vector<64x128xf32>
    %20 = vector.extract_strided_slice %10 {offsets = [0, 0, 1, 0], sizes = [4, 4, 4, 128], strides = [1, 1, 1, 1]} : vector<6x6x6x128xf32> to vector<4x4x4x128xf32>
    %21 = vector.shape_cast %20 : vector<4x4x4x128xf32> to vector<64x128xf32>
    %c1 = arith.constant 1 : index
    %c0_15 = arith.constant 0 : index
    %c0_16 = arith.constant 0 : index
    %22 = vector.load %arg4[%c1, %c0_15, %c0_16] : memref<27x128x128xf32, #tpu.memory_space<vmem>>, vector<1x128x128xf32>
    %23 = vector.shape_cast %22 : vector<1x128x128xf32> to vector<128x128xf32>
    %cst_17 = arith.constant dense<0.000000e+00> : vector<64x128xf32>
    %24 = tpu.matmul %21, %23, %cst_17 {dimension_numbers = #tpu.dot_dimension_numbers<[1], [0], [0], [1], [0, 0, 1, 1], [], []>} : vector<64x128xf32>, vector<128x128xf32>, vector<64x128xf32> -> vector<64x128xf32>
    %25 = arith.addf %19, %24 : vector<64x128xf32>
    %26 = vector.extract_strided_slice %10 {offsets = [0, 0, 2, 0], sizes = [4, 4, 4, 128], strides = [1, 1, 1, 1]} : vector<6x6x6x128xf32> to vector<4x4x4x128xf32>
    %27 = vector.shape_cast %26 : vector<4x4x4x128xf32> to vector<64x128xf32>
    %c2 = arith.constant 2 : index
    %c0_18 = arith.constant 0 : index
    %c0_19 = arith.constant 0 : index
    %28 = vector.load %arg4[%c2, %c0_18, %c0_19] : memref<27x128x128xf32, #tpu.memory_space<vmem>>, vector<1x128x128xf32>
    %29 = vector.shape_cast %28 : vector<1x128x128xf32> to vector<128x128xf32>
    %cst_20 = arith.constant dense<0.000000e+00> : vector<64x128xf32>
    %30 = tpu.matmul %27, %29, %cst_20 {dimension_numbers = #tpu.dot_dimension_numbers<[1], [0], [0], [1], [0, 0, 1, 1], [], []>} : vector<64x128xf32>, vector<128x128xf32>, vector<64x128xf32> -> vector<64x128xf32>
    %31 = arith.addf %25, %30 : vector<64x128xf32>
    %32 = vector.extract_strided_slice %10 {offsets = [0, 1, 0, 0], sizes = [4, 4, 4, 128], strides = [1, 1, 1, 1]} : vector<6x6x6x128xf32> to vector<4x4x4x128xf32>
    %33 = vector.shape_cast %32 : vector<4x4x4x128xf32> to vector<64x128xf32>
    %c3 = arith.constant 3 : index
    %c0_21 = arith.constant 0 : index
    %c0_22 = arith.constant 0 : index
    %34 = vector.load %arg4[%c3, %c0_21, %c0_22] : memref<27x128x128xf32, #tpu.memory_space<vmem>>, vector<1x128x128xf32>
    %35 = vector.shape_cast %34 : vector<1x128x128xf32> to vector<128x128xf32>
    %cst_23 = arith.constant dense<0.000000e+00> : vector<64x128xf32>
    %36 = tpu.matmul %33, %35, %cst_23 {dimension_numbers = #tpu.dot_dimension_numbers<[1], [0], [0], [1], [0, 0, 1, 1], [], []>} : vector<64x128xf32>, vector<128x128xf32>, vector<64x128xf32> -> vector<64x128xf32>
    %37 = arith.addf %31, %36 : vector<64x128xf32>
    %38 = vector.extract_strided_slice %10 {offsets = [0, 1, 1, 0], sizes = [4, 4, 4, 128], strides = [1, 1, 1, 1]} : vector<6x6x6x128xf32> to vector<4x4x4x128xf32>
    %39 = vector.shape_cast %38 : vector<4x4x4x128xf32> to vector<64x128xf32>
    %c4 = arith.constant 4 : index
    %c0_24 = arith.constant 0 : index
    %c0_25 = arith.constant 0 : index
    %40 = vector.load %arg4[%c4, %c0_24, %c0_25] : memref<27x128x128xf32, #tpu.memory_space<vmem>>, vector<1x128x128xf32>
    %41 = vector.shape_cast %40 : vector<1x128x128xf32> to vector<128x128xf32>
    %cst_26 = arith.constant dense<0.000000e+00> : vector<64x128xf32>
    %42 = tpu.matmul %39, %41, %cst_26 {dimension_numbers = #tpu.dot_dimension_numbers<[1], [0], [0], [1], [0, 0, 1, 1], [], []>} : vector<64x128xf32>, vector<128x128xf32>, vector<64x128xf32> -> vector<64x128xf32>
    %43 = arith.addf %37, %42 : vector<64x128xf32>
    %44 = vector.extract_strided_slice %10 {offsets = [0, 1, 2, 0], sizes = [4, 4, 4, 128], strides = [1, 1, 1, 1]} : vector<6x6x6x128xf32> to vector<4x4x4x128xf32>
    %45 = vector.shape_cast %44 : vector<4x4x4x128xf32> to vector<64x128xf32>
    %c5 = arith.constant 5 : index
    %c0_27 = arith.constant 0 : index
    %c0_28 = arith.constant 0 : index
    %46 = vector.load %arg4[%c5, %c0_27, %c0_28] : memref<27x128x128xf32, #tpu.memory_space<vmem>>, vector<1x128x128xf32>
    %47 = vector.shape_cast %46 : vector<1x128x128xf32> to vector<128x128xf32>
    %cst_29 = arith.constant dense<0.000000e+00> : vector<64x128xf32>
    %48 = tpu.matmul %45, %47, %cst_29 {dimension_numbers = #tpu.dot_dimension_numbers<[1], [0], [0], [1], [0, 0, 1, 1], [], []>} : vector<64x128xf32>, vector<128x128xf32>, vector<64x128xf32> -> vector<64x128xf32>
    %49 = arith.addf %43, %48 : vector<64x128xf32>
    %50 = vector.extract_strided_slice %10 {offsets = [0, 2, 0, 0], sizes = [4, 4, 4, 128], strides = [1, 1, 1, 1]} : vector<6x6x6x128xf32> to vector<4x4x4x128xf32>
    %51 = vector.shape_cast %50 : vector<4x4x4x128xf32> to vector<64x128xf32>
    %c6 = arith.constant 6 : index
    %c0_30 = arith.constant 0 : index
    %c0_31 = arith.constant 0 : index
    %52 = vector.load %arg4[%c6, %c0_30, %c0_31] : memref<27x128x128xf32, #tpu.memory_space<vmem>>, vector<1x128x128xf32>
    %53 = vector.shape_cast %52 : vector<1x128x128xf32> to vector<128x128xf32>
    %cst_32 = arith.constant dense<0.000000e+00> : vector<64x128xf32>
    %54 = tpu.matmul %51, %53, %cst_32 {dimension_numbers = #tpu.dot_dimension_numbers<[1], [0], [0], [1], [0, 0, 1, 1], [], []>} : vector<64x128xf32>, vector<128x128xf32>, vector<64x128xf32> -> vector<64x128xf32>
    %55 = arith.addf %49, %54 : vector<64x128xf32>
    %56 = vector.extract_strided_slice %10 {offsets = [0, 2, 1, 0], sizes = [4, 4, 4, 128], strides = [1, 1, 1, 1]} : vector<6x6x6x128xf32> to vector<4x4x4x128xf32>
    %57 = vector.shape_cast %56 : vector<4x4x4x128xf32> to vector<64x128xf32>
    %c7 = arith.constant 7 : index
    %c0_33 = arith.constant 0 : index
    %c0_34 = arith.constant 0 : index
    %58 = vector.load %arg4[%c7, %c0_33, %c0_34] : memref<27x128x128xf32, #tpu.memory_space<vmem>>, vector<1x128x128xf32>
    %59 = vector.shape_cast %58 : vector<1x128x128xf32> to vector<128x128xf32>
    %cst_35 = arith.constant dense<0.000000e+00> : vector<64x128xf32>
    %60 = tpu.matmul %57, %59, %cst_35 {dimension_numbers = #tpu.dot_dimension_numbers<[1], [0], [0], [1], [0, 0, 1, 1], [], []>} : vector<64x128xf32>, vector<128x128xf32>, vector<64x128xf32> -> vector<64x128xf32>
    %61 = arith.addf %55, %60 : vector<64x128xf32>
    %62 = vector.extract_strided_slice %10 {offsets = [0, 2, 2, 0], sizes = [4, 4, 4, 128], strides = [1, 1, 1, 1]} : vector<6x6x6x128xf32> to vector<4x4x4x128xf32>
    %63 = vector.shape_cast %62 : vector<4x4x4x128xf32> to vector<64x128xf32>
    %c8 = arith.constant 8 : index
    %c0_36 = arith.constant 0 : index
    %c0_37 = arith.constant 0 : index
    %64 = vector.load %arg4[%c8, %c0_36, %c0_37] : memref<27x128x128xf32, #tpu.memory_space<vmem>>, vector<1x128x128xf32>
    %65 = vector.shape_cast %64 : vector<1x128x128xf32> to vector<128x128xf32>
    %cst_38 = arith.constant dense<0.000000e+00> : vector<64x128xf32>
    %66 = tpu.matmul %63, %65, %cst_38 {dimension_numbers = #tpu.dot_dimension_numbers<[1], [0], [0], [1], [0, 0, 1, 1], [], []>} : vector<64x128xf32>, vector<128x128xf32>, vector<64x128xf32> -> vector<64x128xf32>
    %67 = arith.addf %61, %66 : vector<64x128xf32>
    %68 = vector.extract_strided_slice %10 {offsets = [1, 0, 0, 0], sizes = [4, 4, 4, 128], strides = [1, 1, 1, 1]} : vector<6x6x6x128xf32> to vector<4x4x4x128xf32>
    %69 = vector.shape_cast %68 : vector<4x4x4x128xf32> to vector<64x128xf32>
    %c9 = arith.constant 9 : index
    %c0_39 = arith.constant 0 : index
    %c0_40 = arith.constant 0 : index
    %70 = vector.load %arg4[%c9, %c0_39, %c0_40] : memref<27x128x128xf32, #tpu.memory_space<vmem>>, vector<1x128x128xf32>
    %71 = vector.shape_cast %70 : vector<1x128x128xf32> to vector<128x128xf32>
    %cst_41 = arith.constant dense<0.000000e+00> : vector<64x128xf32>
    %72 = tpu.matmul %69, %71, %cst_41 {dimension_numbers = #tpu.dot_dimension_numbers<[1], [0], [0], [1], [0, 0, 1, 1], [], []>} : vector<64x128xf32>, vector<128x128xf32>, vector<64x128xf32> -> vector<64x128xf32>
    %73 = arith.addf %67, %72 : vector<64x128xf32>
    %74 = vector.extract_strided_slice %10 {offsets = [1, 0, 1, 0], sizes = [4, 4, 4, 128], strides = [1, 1, 1, 1]} : vector<6x6x6x128xf32> to vector<4x4x4x128xf32>
    %75 = vector.shape_cast %74 : vector<4x4x4x128xf32> to vector<64x128xf32>
    %c10 = arith.constant 10 : index
    %c0_42 = arith.constant 0 : index
    %c0_43 = arith.constant 0 : index
    %76 = vector.load %arg4[%c10, %c0_42, %c0_43] : memref<27x128x128xf32, #tpu.memory_space<vmem>>, vector<1x128x128xf32>
    %77 = vector.shape_cast %76 : vector<1x128x128xf32> to vector<128x128xf32>
    %cst_44 = arith.constant dense<0.000000e+00> : vector<64x128xf32>
    %78 = tpu.matmul %75, %77, %cst_44 {dimension_numbers = #tpu.dot_dimension_numbers<[1], [0], [0], [1], [0, 0, 1, 1], [], []>} : vector<64x128xf32>, vector<128x128xf32>, vector<64x128xf32> -> vector<64x128xf32>
    %79 = arith.addf %73, %78 : vector<64x128xf32>
    %80 = vector.extract_strided_slice %10 {offsets = [1, 0, 2, 0], sizes = [4, 4, 4, 128], strides = [1, 1, 1, 1]} : vector<6x6x6x128xf32> to vector<4x4x4x128xf32>
    %81 = vector.shape_cast %80 : vector<4x4x4x128xf32> to vector<64x128xf32>
    %c11 = arith.constant 11 : index
    %c0_45 = arith.constant 0 : index
    %c0_46 = arith.constant 0 : index
    %82 = vector.load %arg4[%c11, %c0_45, %c0_46] : memref<27x128x128xf32, #tpu.memory_space<vmem>>, vector<1x128x128xf32>
    %83 = vector.shape_cast %82 : vector<1x128x128xf32> to vector<128x128xf32>
    %cst_47 = arith.constant dense<0.000000e+00> : vector<64x128xf32>
    %84 = tpu.matmul %81, %83, %cst_47 {dimension_numbers = #tpu.dot_dimension_numbers<[1], [0], [0], [1], [0, 0, 1, 1], [], []>} : vector<64x128xf32>, vector<128x128xf32>, vector<64x128xf32> -> vector<64x128xf32>
    %85 = arith.addf %79, %84 : vector<64x128xf32>
    %86 = vector.extract_strided_slice %10 {offsets = [1, 1, 0, 0], sizes = [4, 4, 4, 128], strides = [1, 1, 1, 1]} : vector<6x6x6x128xf32> to vector<4x4x4x128xf32>
    %87 = vector.shape_cast %86 : vector<4x4x4x128xf32> to vector<64x128xf32>
    %c12 = arith.constant 12 : index
    %c0_48 = arith.constant 0 : index
    %c0_49 = arith.constant 0 : index
    %88 = vector.load %arg4[%c12, %c0_48, %c0_49] : memref<27x128x128xf32, #tpu.memory_space<vmem>>, vector<1x128x128xf32>
    %89 = vector.shape_cast %88 : vector<1x128x128xf32> to vector<128x128xf32>
    %cst_50 = arith.constant dense<0.000000e+00> : vector<64x128xf32>
    %90 = tpu.matmul %87, %89, %cst_50 {dimension_numbers = #tpu.dot_dimension_numbers<[1], [0], [0], [1], [0, 0, 1, 1], [], []>} : vector<64x128xf32>, vector<128x128xf32>, vector<64x128xf32> -> vector<64x128xf32>
    %91 = arith.addf %85, %90 : vector<64x128xf32>
    %92 = vector.extract_strided_slice %10 {offsets = [1, 1, 1, 0], sizes = [4, 4, 4, 128], strides = [1, 1, 1, 1]} : vector<6x6x6x128xf32> to vector<4x4x4x128xf32>
    %93 = vector.shape_cast %92 : vector<4x4x4x128xf32> to vector<64x128xf32>
    %c13 = arith.constant 13 : index
    %c0_51 = arith.constant 0 : index
    %c0_52 = arith.constant 0 : index
    %94 = vector.load %arg4[%c13, %c0_51, %c0_52] : memref<27x128x128xf32, #tpu.memory_space<vmem>>, vector<1x128x128xf32>
    %95 = vector.shape_cast %94 : vector<1x128x128xf32> to vector<128x128xf32>
    %cst_53 = arith.constant dense<0.000000e+00> : vector<64x128xf32>
    %96 = tpu.matmul %93, %95, %cst_53 {dimension_numbers = #tpu.dot_dimension_numbers<[1], [0], [0], [1], [0, 0, 1, 1], [], []>} : vector<64x128xf32>, vector<128x128xf32>, vector<64x128xf32> -> vector<64x128xf32>
    %97 = arith.addf %91, %96 : vector<64x128xf32>
    %98 = vector.extract_strided_slice %10 {offsets = [1, 1, 2, 0], sizes = [4, 4, 4, 128], strides = [1, 1, 1, 1]} : vector<6x6x6x128xf32> to vector<4x4x4x128xf32>
    %99 = vector.shape_cast %98 : vector<4x4x4x128xf32> to vector<64x128xf32>
    %c14 = arith.constant 14 : index
    %c0_54 = arith.constant 0 : index
    %c0_55 = arith.constant 0 : index
    %100 = vector.load %arg4[%c14, %c0_54, %c0_55] : memref<27x128x128xf32, #tpu.memory_space<vmem>>, vector<1x128x128xf32>
    %101 = vector.shape_cast %100 : vector<1x128x128xf32> to vector<128x128xf32>
    %cst_56 = arith.constant dense<0.000000e+00> : vector<64x128xf32>
    %102 = tpu.matmul %99, %101, %cst_56 {dimension_numbers = #tpu.dot_dimension_numbers<[1], [0], [0], [1], [0, 0, 1, 1], [], []>} : vector<64x128xf32>, vector<128x128xf32>, vector<64x128xf32> -> vector<64x128xf32>
    %103 = arith.addf %97, %102 : vector<64x128xf32>
    %104 = vector.extract_strided_slice %10 {offsets = [1, 2, 0, 0], sizes = [4, 4, 4, 128], strides = [1, 1, 1, 1]} : vector<6x6x6x128xf32> to vector<4x4x4x128xf32>
    %105 = vector.shape_cast %104 : vector<4x4x4x128xf32> to vector<64x128xf32>
    %c15 = arith.constant 15 : index
    %c0_57 = arith.constant 0 : index
    %c0_58 = arith.constant 0 : index
    %106 = vector.load %arg4[%c15, %c0_57, %c0_58] : memref<27x128x128xf32, #tpu.memory_space<vmem>>, vector<1x128x128xf32>
    %107 = vector.shape_cast %106 : vector<1x128x128xf32> to vector<128x128xf32>
    %cst_59 = arith.constant dense<0.000000e+00> : vector<64x128xf32>
    %108 = tpu.matmul %105, %107, %cst_59 {dimension_numbers = #tpu.dot_dimension_numbers<[1], [0], [0], [1], [0, 0, 1, 1], [], []>} : vector<64x128xf32>, vector<128x128xf32>, vector<64x128xf32> -> vector<64x128xf32>
    %109 = arith.addf %103, %108 : vector<64x128xf32>
    %110 = vector.extract_strided_slice %10 {offsets = [1, 2, 1, 0], sizes = [4, 4, 4, 128], strides = [1, 1, 1, 1]} : vector<6x6x6x128xf32> to vector<4x4x4x128xf32>
    %111 = vector.shape_cast %110 : vector<4x4x4x128xf32> to vector<64x128xf32>
    %c16 = arith.constant 16 : index
    %c0_60 = arith.constant 0 : index
    %c0_61 = arith.constant 0 : index
    %112 = vector.load %arg4[%c16, %c0_60, %c0_61] : memref<27x128x128xf32, #tpu.memory_space<vmem>>, vector<1x128x128xf32>
    %113 = vector.shape_cast %112 : vector<1x128x128xf32> to vector<128x128xf32>
    %cst_62 = arith.constant dense<0.000000e+00> : vector<64x128xf32>
    %114 = tpu.matmul %111, %113, %cst_62 {dimension_numbers = #tpu.dot_dimension_numbers<[1], [0], [0], [1], [0, 0, 1, 1], [], []>} : vector<64x128xf32>, vector<128x128xf32>, vector<64x128xf32> -> vector<64x128xf32>
    %115 = arith.addf %109, %114 : vector<64x128xf32>
    %116 = vector.extract_strided_slice %10 {offsets = [1, 2, 2, 0], sizes = [4, 4, 4, 128], strides = [1, 1, 1, 1]} : vector<6x6x6x128xf32> to vector<4x4x4x128xf32>
    %117 = vector.shape_cast %116 : vector<4x4x4x128xf32> to vector<64x128xf32>
    %c17 = arith.constant 17 : index
    %c0_63 = arith.constant 0 : index
    %c0_64 = arith.constant 0 : index
    %118 = vector.load %arg4[%c17, %c0_63, %c0_64] : memref<27x128x128xf32, #tpu.memory_space<vmem>>, vector<1x128x128xf32>
    %119 = vector.shape_cast %118 : vector<1x128x128xf32> to vector<128x128xf32>
    %cst_65 = arith.constant dense<0.000000e+00> : vector<64x128xf32>
    %120 = tpu.matmul %117, %119, %cst_65 {dimension_numbers = #tpu.dot_dimension_numbers<[1], [0], [0], [1], [0, 0, 1, 1], [], []>} : vector<64x128xf32>, vector<128x128xf32>, vector<64x128xf32> -> vector<64x128xf32>
    %121 = arith.addf %115, %120 : vector<64x128xf32>
    %122 = vector.extract_strided_slice %10 {offsets = [2, 0, 0, 0], sizes = [4, 4, 4, 128], strides = [1, 1, 1, 1]} : vector<6x6x6x128xf32> to vector<4x4x4x128xf32>
    %123 = vector.shape_cast %122 : vector<4x4x4x128xf32> to vector<64x128xf32>
    %c18 = arith.constant 18 : index
    %c0_66 = arith.constant 0 : index
    %c0_67 = arith.constant 0 : index
    %124 = vector.load %arg4[%c18, %c0_66, %c0_67] : memref<27x128x128xf32, #tpu.memory_space<vmem>>, vector<1x128x128xf32>
    %125 = vector.shape_cast %124 : vector<1x128x128xf32> to vector<128x128xf32>
    %cst_68 = arith.constant dense<0.000000e+00> : vector<64x128xf32>
    %126 = tpu.matmul %123, %125, %cst_68 {dimension_numbers = #tpu.dot_dimension_numbers<[1], [0], [0], [1], [0, 0, 1, 1], [], []>} : vector<64x128xf32>, vector<128x128xf32>, vector<64x128xf32> -> vector<64x128xf32>
    %127 = arith.addf %121, %126 : vector<64x128xf32>
    %128 = vector.extract_strided_slice %10 {offsets = [2, 0, 1, 0], sizes = [4, 4, 4, 128], strides = [1, 1, 1, 1]} : vector<6x6x6x128xf32> to vector<4x4x4x128xf32>
    %129 = vector.shape_cast %128 : vector<4x4x4x128xf32> to vector<64x128xf32>
    %c19 = arith.constant 19 : index
    %c0_69 = arith.constant 0 : index
    %c0_70 = arith.constant 0 : index
    %130 = vector.load %arg4[%c19, %c0_69, %c0_70] : memref<27x128x128xf32, #tpu.memory_space<vmem>>, vector<1x128x128xf32>
    %131 = vector.shape_cast %130 : vector<1x128x128xf32> to vector<128x128xf32>
    %cst_71 = arith.constant dense<0.000000e+00> : vector<64x128xf32>
    %132 = tpu.matmul %129, %131, %cst_71 {dimension_numbers = #tpu.dot_dimension_numbers<[1], [0], [0], [1], [0, 0, 1, 1], [], []>} : vector<64x128xf32>, vector<128x128xf32>, vector<64x128xf32> -> vector<64x128xf32>
    %133 = arith.addf %127, %132 : vector<64x128xf32>
    %134 = vector.extract_strided_slice %10 {offsets = [2, 0, 2, 0], sizes = [4, 4, 4, 128], strides = [1, 1, 1, 1]} : vector<6x6x6x128xf32> to vector<4x4x4x128xf32>
    %135 = vector.shape_cast %134 : vector<4x4x4x128xf32> to vector<64x128xf32>
    %c20 = arith.constant 20 : index
    %c0_72 = arith.constant 0 : index
    %c0_73 = arith.constant 0 : index
    %136 = vector.load %arg4[%c20, %c0_72, %c0_73] : memref<27x128x128xf32, #tpu.memory_space<vmem>>, vector<1x128x128xf32>
    %137 = vector.shape_cast %136 : vector<1x128x128xf32> to vector<128x128xf32>
    %cst_74 = arith.constant dense<0.000000e+00> : vector<64x128xf32>
    %138 = tpu.matmul %135, %137, %cst_74 {dimension_numbers = #tpu.dot_dimension_numbers<[1], [0], [0], [1], [0, 0, 1, 1], [], []>} : vector<64x128xf32>, vector<128x128xf32>, vector<64x128xf32> -> vector<64x128xf32>
    %139 = arith.addf %133, %138 : vector<64x128xf32>
    %140 = vector.extract_strided_slice %10 {offsets = [2, 1, 0, 0], sizes = [4, 4, 4, 128], strides = [1, 1, 1, 1]} : vector<6x6x6x128xf32> to vector<4x4x4x128xf32>
    %141 = vector.shape_cast %140 : vector<4x4x4x128xf32> to vector<64x128xf32>
    %c21 = arith.constant 21 : index
    %c0_75 = arith.constant 0 : index
    %c0_76 = arith.constant 0 : index
    %142 = vector.load %arg4[%c21, %c0_75, %c0_76] : memref<27x128x128xf32, #tpu.memory_space<vmem>>, vector<1x128x128xf32>
    %143 = vector.shape_cast %142 : vector<1x128x128xf32> to vector<128x128xf32>
    %cst_77 = arith.constant dense<0.000000e+00> : vector<64x128xf32>
    %144 = tpu.matmul %141, %143, %cst_77 {dimension_numbers = #tpu.dot_dimension_numbers<[1], [0], [0], [1], [0, 0, 1, 1], [], []>} : vector<64x128xf32>, vector<128x128xf32>, vector<64x128xf32> -> vector<64x128xf32>
    %145 = arith.addf %139, %144 : vector<64x128xf32>
    %146 = vector.extract_strided_slice %10 {offsets = [2, 1, 1, 0], sizes = [4, 4, 4, 128], strides = [1, 1, 1, 1]} : vector<6x6x6x128xf32> to vector<4x4x4x128xf32>
    %147 = vector.shape_cast %146 : vector<4x4x4x128xf32> to vector<64x128xf32>
    %c22 = arith.constant 22 : index
    %c0_78 = arith.constant 0 : index
    %c0_79 = arith.constant 0 : index
    %148 = vector.load %arg4[%c22, %c0_78, %c0_79] : memref<27x128x128xf32, #tpu.memory_space<vmem>>, vector<1x128x128xf32>
    %149 = vector.shape_cast %148 : vector<1x128x128xf32> to vector<128x128xf32>
    %cst_80 = arith.constant dense<0.000000e+00> : vector<64x128xf32>
    %150 = tpu.matmul %147, %149, %cst_80 {dimension_numbers = #tpu.dot_dimension_numbers<[1], [0], [0], [1], [0, 0, 1, 1], [], []>} : vector<64x128xf32>, vector<128x128xf32>, vector<64x128xf32> -> vector<64x128xf32>
    %151 = arith.addf %145, %150 : vector<64x128xf32>
    %152 = vector.extract_strided_slice %10 {offsets = [2, 1, 2, 0], sizes = [4, 4, 4, 128], strides = [1, 1, 1, 1]} : vector<6x6x6x128xf32> to vector<4x4x4x128xf32>
    %153 = vector.shape_cast %152 : vector<4x4x4x128xf32> to vector<64x128xf32>
    %c23 = arith.constant 23 : index
    %c0_81 = arith.constant 0 : index
    %c0_82 = arith.constant 0 : index
    %154 = vector.load %arg4[%c23, %c0_81, %c0_82] : memref<27x128x128xf32, #tpu.memory_space<vmem>>, vector<1x128x128xf32>
    %155 = vector.shape_cast %154 : vector<1x128x128xf32> to vector<128x128xf32>
    %cst_83 = arith.constant dense<0.000000e+00> : vector<64x128xf32>
    %156 = tpu.matmul %153, %155, %cst_83 {dimension_numbers = #tpu.dot_dimension_numbers<[1], [0], [0], [1], [0, 0, 1, 1], [], []>} : vector<64x128xf32>, vector<128x128xf32>, vector<64x128xf32> -> vector<64x128xf32>
    %157 = arith.addf %151, %156 : vector<64x128xf32>
    %158 = vector.extract_strided_slice %10 {offsets = [2, 2, 0, 0], sizes = [4, 4, 4, 128], strides = [1, 1, 1, 1]} : vector<6x6x6x128xf32> to vector<4x4x4x128xf32>
    %159 = vector.shape_cast %158 : vector<4x4x4x128xf32> to vector<64x128xf32>
    %c24 = arith.constant 24 : index
    %c0_84 = arith.constant 0 : index
    %c0_85 = arith.constant 0 : index
    %160 = vector.load %arg4[%c24, %c0_84, %c0_85] : memref<27x128x128xf32, #tpu.memory_space<vmem>>, vector<1x128x128xf32>
    %161 = vector.shape_cast %160 : vector<1x128x128xf32> to vector<128x128xf32>
    %cst_86 = arith.constant dense<0.000000e+00> : vector<64x128xf32>
    %162 = tpu.matmul %159, %161, %cst_86 {dimension_numbers = #tpu.dot_dimension_numbers<[1], [0], [0], [1], [0, 0, 1, 1], [], []>} : vector<64x128xf32>, vector<128x128xf32>, vector<64x128xf32> -> vector<64x128xf32>
    %163 = arith.addf %157, %162 : vector<64x128xf32>
    %164 = vector.extract_strided_slice %10 {offsets = [2, 2, 1, 0], sizes = [4, 4, 4, 128], strides = [1, 1, 1, 1]} : vector<6x6x6x128xf32> to vector<4x4x4x128xf32>
    %165 = vector.shape_cast %164 : vector<4x4x4x128xf32> to vector<64x128xf32>
    %c25 = arith.constant 25 : index
    %c0_87 = arith.constant 0 : index
    %c0_88 = arith.constant 0 : index
    %166 = vector.load %arg4[%c25, %c0_87, %c0_88] : memref<27x128x128xf32, #tpu.memory_space<vmem>>, vector<1x128x128xf32>
    %167 = vector.shape_cast %166 : vector<1x128x128xf32> to vector<128x128xf32>
    %cst_89 = arith.constant dense<0.000000e+00> : vector<64x128xf32>
    %168 = tpu.matmul %165, %167, %cst_89 {dimension_numbers = #tpu.dot_dimension_numbers<[1], [0], [0], [1], [0, 0, 1, 1], [], []>} : vector<64x128xf32>, vector<128x128xf32>, vector<64x128xf32> -> vector<64x128xf32>
    %169 = arith.addf %163, %168 : vector<64x128xf32>
    %170 = vector.extract_strided_slice %10 {offsets = [2, 2, 2, 0], sizes = [4, 4, 4, 128], strides = [1, 1, 1, 1]} : vector<6x6x6x128xf32> to vector<4x4x4x128xf32>
    %171 = vector.shape_cast %170 : vector<4x4x4x128xf32> to vector<64x128xf32>
    %c26 = arith.constant 26 : index
    %c0_90 = arith.constant 0 : index
    %c0_91 = arith.constant 0 : index
    %172 = vector.load %arg4[%c26, %c0_90, %c0_91] : memref<27x128x128xf32, #tpu.memory_space<vmem>>, vector<1x128x128xf32>
    %173 = vector.shape_cast %172 : vector<1x128x128xf32> to vector<128x128xf32>
    %cst_92 = arith.constant dense<0.000000e+00> : vector<64x128xf32>
    %174 = tpu.matmul %171, %173, %cst_92 {dimension_numbers = #tpu.dot_dimension_numbers<[1], [0], [0], [1], [0, 0, 1, 1], [], []>} : vector<64x128xf32>, vector<128x128xf32>, vector<64x128xf32> -> vector<64x128xf32>
    %175 = arith.addf %169, %174 : vector<64x128xf32>
    %176 = vector.shape_cast %175 : vector<64x128xf32> to vector<4x4x4x128xf32>
    %c0_93 = arith.constant 0 : index
    %c0_94 = arith.constant 0 : index
    %177 = vector.load %arg7[%c0_93, %c0_94] : memref<1x128xf32, #tpu.memory_space<vmem>>, vector<1x128xf32>
    %178 = vector.shape_cast %177 : vector<1x128xf32> to vector<1x128xf32>
    %179 = vector.broadcast %178 : vector<1x128xf32> to vector<8x128xf32>
    %180 = vector.extract_strided_slice %176 {offsets = [0, 0, 0, 0], sizes = [2, 2, 2, 128], strides = [1, 1, 1, 1]} : vector<4x4x4x128xf32> to vector<2x2x2x128xf32>
    %181 = vector.shape_cast %180 : vector<2x2x2x128xf32> to vector<8x128xf32>
    %c0_95 = arith.constant 0 : index
    %c0_96 = arith.constant 0 : index
    %c0_97 = arith.constant 0 : index
    %182 = vector.load %arg6[%c0_95, %c0_96, %c0_97] : memref<27x128x128xf32, #tpu.memory_space<vmem>>, vector<1x128x128xf32>
    %183 = vector.shape_cast %182 : vector<1x128x128xf32> to vector<128x128xf32>
    %cst_98 = arith.constant dense<0.000000e+00> : vector<8x128xf32>
    %184 = tpu.matmul %181, %183, %cst_98 {dimension_numbers = #tpu.dot_dimension_numbers<[1], [0], [0], [1], [0, 0, 1, 1], [], []>} : vector<8x128xf32>, vector<128x128xf32>, vector<8x128xf32> -> vector<8x128xf32>
    %185 = arith.addf %179, %184 : vector<8x128xf32>
    %186 = vector.extract_strided_slice %176 {offsets = [0, 0, 1, 0], sizes = [2, 2, 2, 128], strides = [1, 1, 1, 1]} : vector<4x4x4x128xf32> to vector<2x2x2x128xf32>
    %187 = vector.shape_cast %186 : vector<2x2x2x128xf32> to vector<8x128xf32>
    %c1_99 = arith.constant 1 : index
    %c0_100 = arith.constant 0 : index
    %c0_101 = arith.constant 0 : index
    %188 = vector.load %arg6[%c1_99, %c0_100, %c0_101] : memref<27x128x128xf32, #tpu.memory_space<vmem>>, vector<1x128x128xf32>
    %189 = vector.shape_cast %188 : vector<1x128x128xf32> to vector<128x128xf32>
    %cst_102 = arith.constant dense<0.000000e+00> : vector<8x128xf32>
    %190 = tpu.matmul %187, %189, %cst_102 {dimension_numbers = #tpu.dot_dimension_numbers<[1], [0], [0], [1], [0, 0, 1, 1], [], []>} : vector<8x128xf32>, vector<128x128xf32>, vector<8x128xf32> -> vector<8x128xf32>
    %191 = arith.addf %185, %190 : vector<8x128xf32>
    %192 = vector.extract_strided_slice %176 {offsets = [0, 0, 2, 0], sizes = [2, 2, 2, 128], strides = [1, 1, 1, 1]} : vector<4x4x4x128xf32> to vector<2x2x2x128xf32>
    %193 = vector.shape_cast %192 : vector<2x2x2x128xf32> to vector<8x128xf32>
    %c2_103 = arith.constant 2 : index
    %c0_104 = arith.constant 0 : index
    %c0_105 = arith.constant 0 : index
    %194 = vector.load %arg6[%c2_103, %c0_104, %c0_105] : memref<27x128x128xf32, #tpu.memory_space<vmem>>, vector<1x128x128xf32>
    %195 = vector.shape_cast %194 : vector<1x128x128xf32> to vector<128x128xf32>
    %cst_106 = arith.constant dense<0.000000e+00> : vector<8x128xf32>
    %196 = tpu.matmul %193, %195, %cst_106 {dimension_numbers = #tpu.dot_dimension_numbers<[1], [0], [0], [1], [0, 0, 1, 1], [], []>} : vector<8x128xf32>, vector<128x128xf32>, vector<8x128xf32> -> vector<8x128xf32>
    %197 = arith.addf %191, %196 : vector<8x128xf32>
    %198 = vector.extract_strided_slice %176 {offsets = [0, 1, 0, 0], sizes = [2, 2, 2, 128], strides = [1, 1, 1, 1]} : vector<4x4x4x128xf32> to vector<2x2x2x128xf32>
    %199 = vector.shape_cast %198 : vector<2x2x2x128xf32> to vector<8x128xf32>
    %c3_107 = arith.constant 3 : index
    %c0_108 = arith.constant 0 : index
    %c0_109 = arith.constant 0 : index
    %200 = vector.load %arg6[%c3_107, %c0_108, %c0_109] : memref<27x128x128xf32, #tpu.memory_space<vmem>>, vector<1x128x128xf32>
    %201 = vector.shape_cast %200 : vector<1x128x128xf32> to vector<128x128xf32>
    %cst_110 = arith.constant dense<0.000000e+00> : vector<8x128xf32>
    %202 = tpu.matmul %199, %201, %cst_110 {dimension_numbers = #tpu.dot_dimension_numbers<[1], [0], [0], [1], [0, 0, 1, 1], [], []>} : vector<8x128xf32>, vector<128x128xf32>, vector<8x128xf32> -> vector<8x128xf32>
    %203 = arith.addf %197, %202 : vector<8x128xf32>
    %204 = vector.extract_strided_slice %176 {offsets = [0, 1, 1, 0], sizes = [2, 2, 2, 128], strides = [1, 1, 1, 1]} : vector<4x4x4x128xf32> to vector<2x2x2x128xf32>
    %205 = vector.shape_cast %204 : vector<2x2x2x128xf32> to vector<8x128xf32>
    %c4_111 = arith.constant 4 : index
    %c0_112 = arith.constant 0 : index
    %c0_113 = arith.constant 0 : index
    %206 = vector.load %arg6[%c4_111, %c0_112, %c0_113] : memref<27x128x128xf32, #tpu.memory_space<vmem>>, vector<1x128x128xf32>
    %207 = vector.shape_cast %206 : vector<1x128x128xf32> to vector<128x128xf32>
    %cst_114 = arith.constant dense<0.000000e+00> : vector<8x128xf32>
    %208 = tpu.matmul %205, %207, %cst_114 {dimension_numbers = #tpu.dot_dimension_numbers<[1], [0], [0], [1], [0, 0, 1, 1], [], []>} : vector<8x128xf32>, vector<128x128xf32>, vector<8x128xf32> -> vector<8x128xf32>
    %209 = arith.addf %203, %208 : vector<8x128xf32>
    %210 = vector.extract_strided_slice %176 {offsets = [0, 1, 2, 0], sizes = [2, 2, 2, 128], strides = [1, 1, 1, 1]} : vector<4x4x4x128xf32> to vector<2x2x2x128xf32>
    %211 = vector.shape_cast %210 : vector<2x2x2x128xf32> to vector<8x128xf32>
    %c5_115 = arith.constant 5 : index
    %c0_116 = arith.constant 0 : index
    %c0_117 = arith.constant 0 : index
    %212 = vector.load %arg6[%c5_115, %c0_116, %c0_117] : memref<27x128x128xf32, #tpu.memory_space<vmem>>, vector<1x128x128xf32>
    %213 = vector.shape_cast %212 : vector<1x128x128xf32> to vector<128x128xf32>
    %cst_118 = arith.constant dense<0.000000e+00> : vector<8x128xf32>
    %214 = tpu.matmul %211, %213, %cst_118 {dimension_numbers = #tpu.dot_dimension_numbers<[1], [0], [0], [1], [0, 0, 1, 1], [], []>} : vector<8x128xf32>, vector<128x128xf32>, vector<8x128xf32> -> vector<8x128xf32>
    %215 = arith.addf %209, %214 : vector<8x128xf32>
    %216 = vector.extract_strided_slice %176 {offsets = [0, 2, 0, 0], sizes = [2, 2, 2, 128], strides = [1, 1, 1, 1]} : vector<4x4x4x128xf32> to vector<2x2x2x128xf32>
    %217 = vector.shape_cast %216 : vector<2x2x2x128xf32> to vector<8x128xf32>
    %c6_119 = arith.constant 6 : index
    %c0_120 = arith.constant 0 : index
    %c0_121 = arith.constant 0 : index
    %218 = vector.load %arg6[%c6_119, %c0_120, %c0_121] : memref<27x128x128xf32, #tpu.memory_space<vmem>>, vector<1x128x128xf32>
    %219 = vector.shape_cast %218 : vector<1x128x128xf32> to vector<128x128xf32>
    %cst_122 = arith.constant dense<0.000000e+00> : vector<8x128xf32>
    %220 = tpu.matmul %217, %219, %cst_122 {dimension_numbers = #tpu.dot_dimension_numbers<[1], [0], [0], [1], [0, 0, 1, 1], [], []>} : vector<8x128xf32>, vector<128x128xf32>, vector<8x128xf32> -> vector<8x128xf32>
    %221 = arith.addf %215, %220 : vector<8x128xf32>
    %222 = vector.extract_strided_slice %176 {offsets = [0, 2, 1, 0], sizes = [2, 2, 2, 128], strides = [1, 1, 1, 1]} : vector<4x4x4x128xf32> to vector<2x2x2x128xf32>
    %223 = vector.shape_cast %222 : vector<2x2x2x128xf32> to vector<8x128xf32>
    %c7_123 = arith.constant 7 : index
    %c0_124 = arith.constant 0 : index
    %c0_125 = arith.constant 0 : index
    %224 = vector.load %arg6[%c7_123, %c0_124, %c0_125] : memref<27x128x128xf32, #tpu.memory_space<vmem>>, vector<1x128x128xf32>
    %225 = vector.shape_cast %224 : vector<1x128x128xf32> to vector<128x128xf32>
    %cst_126 = arith.constant dense<0.000000e+00> : vector<8x128xf32>
    %226 = tpu.matmul %223, %225, %cst_126 {dimension_numbers = #tpu.dot_dimension_numbers<[1], [0], [0], [1], [0, 0, 1, 1], [], []>} : vector<8x128xf32>, vector<128x128xf32>, vector<8x128xf32> -> vector<8x128xf32>
    %227 = arith.addf %221, %226 : vector<8x128xf32>
    %228 = vector.extract_strided_slice %176 {offsets = [0, 2, 2, 0], sizes = [2, 2, 2, 128], strides = [1, 1, 1, 1]} : vector<4x4x4x128xf32> to vector<2x2x2x128xf32>
    %229 = vector.shape_cast %228 : vector<2x2x2x128xf32> to vector<8x128xf32>
    %c8_127 = arith.constant 8 : index
    %c0_128 = arith.constant 0 : index
    %c0_129 = arith.constant 0 : index
    %230 = vector.load %arg6[%c8_127, %c0_128, %c0_129] : memref<27x128x128xf32, #tpu.memory_space<vmem>>, vector<1x128x128xf32>
    %231 = vector.shape_cast %230 : vector<1x128x128xf32> to vector<128x128xf32>
    %cst_130 = arith.constant dense<0.000000e+00> : vector<8x128xf32>
    %232 = tpu.matmul %229, %231, %cst_130 {dimension_numbers = #tpu.dot_dimension_numbers<[1], [0], [0], [1], [0, 0, 1, 1], [], []>} : vector<8x128xf32>, vector<128x128xf32>, vector<8x128xf32> -> vector<8x128xf32>
    %233 = arith.addf %227, %232 : vector<8x128xf32>
    %234 = vector.extract_strided_slice %176 {offsets = [1, 0, 0, 0], sizes = [2, 2, 2, 128], strides = [1, 1, 1, 1]} : vector<4x4x4x128xf32> to vector<2x2x2x128xf32>
    %235 = vector.shape_cast %234 : vector<2x2x2x128xf32> to vector<8x128xf32>
    %c9_131 = arith.constant 9 : index
    %c0_132 = arith.constant 0 : index
    %c0_133 = arith.constant 0 : index
    %236 = vector.load %arg6[%c9_131, %c0_132, %c0_133] : memref<27x128x128xf32, #tpu.memory_space<vmem>>, vector<1x128x128xf32>
    %237 = vector.shape_cast %236 : vector<1x128x128xf32> to vector<128x128xf32>
    %cst_134 = arith.constant dense<0.000000e+00> : vector<8x128xf32>
    %238 = tpu.matmul %235, %237, %cst_134 {dimension_numbers = #tpu.dot_dimension_numbers<[1], [0], [0], [1], [0, 0, 1, 1], [], []>} : vector<8x128xf32>, vector<128x128xf32>, vector<8x128xf32> -> vector<8x128xf32>
    %239 = arith.addf %233, %238 : vector<8x128xf32>
    %240 = vector.extract_strided_slice %176 {offsets = [1, 0, 1, 0], sizes = [2, 2, 2, 128], strides = [1, 1, 1, 1]} : vector<4x4x4x128xf32> to vector<2x2x2x128xf32>
    %241 = vector.shape_cast %240 : vector<2x2x2x128xf32> to vector<8x128xf32>
    %c10_135 = arith.constant 10 : index
    %c0_136 = arith.constant 0 : index
    %c0_137 = arith.constant 0 : index
    %242 = vector.load %arg6[%c10_135, %c0_136, %c0_137] : memref<27x128x128xf32, #tpu.memory_space<vmem>>, vector<1x128x128xf32>
    %243 = vector.shape_cast %242 : vector<1x128x128xf32> to vector<128x128xf32>
    %cst_138 = arith.constant dense<0.000000e+00> : vector<8x128xf32>
    %244 = tpu.matmul %241, %243, %cst_138 {dimension_numbers = #tpu.dot_dimension_numbers<[1], [0], [0], [1], [0, 0, 1, 1], [], []>} : vector<8x128xf32>, vector<128x128xf32>, vector<8x128xf32> -> vector<8x128xf32>
    %245 = arith.addf %239, %244 : vector<8x128xf32>
    %246 = vector.extract_strided_slice %176 {offsets = [1, 0, 2, 0], sizes = [2, 2, 2, 128], strides = [1, 1, 1, 1]} : vector<4x4x4x128xf32> to vector<2x2x2x128xf32>
    %247 = vector.shape_cast %246 : vector<2x2x2x128xf32> to vector<8x128xf32>
    %c11_139 = arith.constant 11 : index
    %c0_140 = arith.constant 0 : index
    %c0_141 = arith.constant 0 : index
    %248 = vector.load %arg6[%c11_139, %c0_140, %c0_141] : memref<27x128x128xf32, #tpu.memory_space<vmem>>, vector<1x128x128xf32>
    %249 = vector.shape_cast %248 : vector<1x128x128xf32> to vector<128x128xf32>
    %cst_142 = arith.constant dense<0.000000e+00> : vector<8x128xf32>
    %250 = tpu.matmul %247, %249, %cst_142 {dimension_numbers = #tpu.dot_dimension_numbers<[1], [0], [0], [1], [0, 0, 1, 1], [], []>} : vector<8x128xf32>, vector<128x128xf32>, vector<8x128xf32> -> vector<8x128xf32>
    %251 = arith.addf %245, %250 : vector<8x128xf32>
    %252 = vector.extract_strided_slice %176 {offsets = [1, 1, 0, 0], sizes = [2, 2, 2, 128], strides = [1, 1, 1, 1]} : vector<4x4x4x128xf32> to vector<2x2x2x128xf32>
    %253 = vector.shape_cast %252 : vector<2x2x2x128xf32> to vector<8x128xf32>
    %c12_143 = arith.constant 12 : index
    %c0_144 = arith.constant 0 : index
    %c0_145 = arith.constant 0 : index
    %254 = vector.load %arg6[%c12_143, %c0_144, %c0_145] : memref<27x128x128xf32, #tpu.memory_space<vmem>>, vector<1x128x128xf32>
    %255 = vector.shape_cast %254 : vector<1x128x128xf32> to vector<128x128xf32>
    %cst_146 = arith.constant dense<0.000000e+00> : vector<8x128xf32>
    %256 = tpu.matmul %253, %255, %cst_146 {dimension_numbers = #tpu.dot_dimension_numbers<[1], [0], [0], [1], [0, 0, 1, 1], [], []>} : vector<8x128xf32>, vector<128x128xf32>, vector<8x128xf32> -> vector<8x128xf32>
    %257 = arith.addf %251, %256 : vector<8x128xf32>
    %258 = vector.extract_strided_slice %176 {offsets = [1, 1, 1, 0], sizes = [2, 2, 2, 128], strides = [1, 1, 1, 1]} : vector<4x4x4x128xf32> to vector<2x2x2x128xf32>
    %259 = vector.shape_cast %258 : vector<2x2x2x128xf32> to vector<8x128xf32>
    %c13_147 = arith.constant 13 : index
    %c0_148 = arith.constant 0 : index
    %c0_149 = arith.constant 0 : index
    %260 = vector.load %arg6[%c13_147, %c0_148, %c0_149] : memref<27x128x128xf32, #tpu.memory_space<vmem>>, vector<1x128x128xf32>
    %261 = vector.shape_cast %260 : vector<1x128x128xf32> to vector<128x128xf32>
    %cst_150 = arith.constant dense<0.000000e+00> : vector<8x128xf32>
    %262 = tpu.matmul %259, %261, %cst_150 {dimension_numbers = #tpu.dot_dimension_numbers<[1], [0], [0], [1], [0, 0, 1, 1], [], []>} : vector<8x128xf32>, vector<128x128xf32>, vector<8x128xf32> -> vector<8x128xf32>
    %263 = arith.addf %257, %262 : vector<8x128xf32>
    %264 = vector.extract_strided_slice %176 {offsets = [1, 1, 2, 0], sizes = [2, 2, 2, 128], strides = [1, 1, 1, 1]} : vector<4x4x4x128xf32> to vector<2x2x2x128xf32>
    %265 = vector.shape_cast %264 : vector<2x2x2x128xf32> to vector<8x128xf32>
    %c14_151 = arith.constant 14 : index
    %c0_152 = arith.constant 0 : index
    %c0_153 = arith.constant 0 : index
    %266 = vector.load %arg6[%c14_151, %c0_152, %c0_153] : memref<27x128x128xf32, #tpu.memory_space<vmem>>, vector<1x128x128xf32>
    %267 = vector.shape_cast %266 : vector<1x128x128xf32> to vector<128x128xf32>
    %cst_154 = arith.constant dense<0.000000e+00> : vector<8x128xf32>
    %268 = tpu.matmul %265, %267, %cst_154 {dimension_numbers = #tpu.dot_dimension_numbers<[1], [0], [0], [1], [0, 0, 1, 1], [], []>} : vector<8x128xf32>, vector<128x128xf32>, vector<8x128xf32> -> vector<8x128xf32>
    %269 = arith.addf %263, %268 : vector<8x128xf32>
    %270 = vector.extract_strided_slice %176 {offsets = [1, 2, 0, 0], sizes = [2, 2, 2, 128], strides = [1, 1, 1, 1]} : vector<4x4x4x128xf32> to vector<2x2x2x128xf32>
    %271 = vector.shape_cast %270 : vector<2x2x2x128xf32> to vector<8x128xf32>
    %c15_155 = arith.constant 15 : index
    %c0_156 = arith.constant 0 : index
    %c0_157 = arith.constant 0 : index
    %272 = vector.load %arg6[%c15_155, %c0_156, %c0_157] : memref<27x128x128xf32, #tpu.memory_space<vmem>>, vector<1x128x128xf32>
    %273 = vector.shape_cast %272 : vector<1x128x128xf32> to vector<128x128xf32>
    %cst_158 = arith.constant dense<0.000000e+00> : vector<8x128xf32>
    %274 = tpu.matmul %271, %273, %cst_158 {dimension_numbers = #tpu.dot_dimension_numbers<[1], [0], [0], [1], [0, 0, 1, 1], [], []>} : vector<8x128xf32>, vector<128x128xf32>, vector<8x128xf32> -> vector<8x128xf32>
    %275 = arith.addf %269, %274 : vector<8x128xf32>
    %276 = vector.extract_strided_slice %176 {offsets = [1, 2, 1, 0], sizes = [2, 2, 2, 128], strides = [1, 1, 1, 1]} : vector<4x4x4x128xf32> to vector<2x2x2x128xf32>
    %277 = vector.shape_cast %276 : vector<2x2x2x128xf32> to vector<8x128xf32>
    %c16_159 = arith.constant 16 : index
    %c0_160 = arith.constant 0 : index
    %c0_161 = arith.constant 0 : index
    %278 = vector.load %arg6[%c16_159, %c0_160, %c0_161] : memref<27x128x128xf32, #tpu.memory_space<vmem>>, vector<1x128x128xf32>
    %279 = vector.shape_cast %278 : vector<1x128x128xf32> to vector<128x128xf32>
    %cst_162 = arith.constant dense<0.000000e+00> : vector<8x128xf32>
    %280 = tpu.matmul %277, %279, %cst_162 {dimension_numbers = #tpu.dot_dimension_numbers<[1], [0], [0], [1], [0, 0, 1, 1], [], []>} : vector<8x128xf32>, vector<128x128xf32>, vector<8x128xf32> -> vector<8x128xf32>
    %281 = arith.addf %275, %280 : vector<8x128xf32>
    %282 = vector.extract_strided_slice %176 {offsets = [1, 2, 2, 0], sizes = [2, 2, 2, 128], strides = [1, 1, 1, 1]} : vector<4x4x4x128xf32> to vector<2x2x2x128xf32>
    %283 = vector.shape_cast %282 : vector<2x2x2x128xf32> to vector<8x128xf32>
    %c17_163 = arith.constant 17 : index
    %c0_164 = arith.constant 0 : index
    %c0_165 = arith.constant 0 : index
    %284 = vector.load %arg6[%c17_163, %c0_164, %c0_165] : memref<27x128x128xf32, #tpu.memory_space<vmem>>, vector<1x128x128xf32>
    %285 = vector.shape_cast %284 : vector<1x128x128xf32> to vector<128x128xf32>
    %cst_166 = arith.constant dense<0.000000e+00> : vector<8x128xf32>
    %286 = tpu.matmul %283, %285, %cst_166 {dimension_numbers = #tpu.dot_dimension_numbers<[1], [0], [0], [1], [0, 0, 1, 1], [], []>} : vector<8x128xf32>, vector<128x128xf32>, vector<8x128xf32> -> vector<8x128xf32>
    %287 = arith.addf %281, %286 : vector<8x128xf32>
    %288 = vector.extract_strided_slice %176 {offsets = [2, 0, 0, 0], sizes = [2, 2, 2, 128], strides = [1, 1, 1, 1]} : vector<4x4x4x128xf32> to vector<2x2x2x128xf32>
    %289 = vector.shape_cast %288 : vector<2x2x2x128xf32> to vector<8x128xf32>
    %c18_167 = arith.constant 18 : index
    %c0_168 = arith.constant 0 : index
    %c0_169 = arith.constant 0 : index
    %290 = vector.load %arg6[%c18_167, %c0_168, %c0_169] : memref<27x128x128xf32, #tpu.memory_space<vmem>>, vector<1x128x128xf32>
    %291 = vector.shape_cast %290 : vector<1x128x128xf32> to vector<128x128xf32>
    %cst_170 = arith.constant dense<0.000000e+00> : vector<8x128xf32>
    %292 = tpu.matmul %289, %291, %cst_170 {dimension_numbers = #tpu.dot_dimension_numbers<[1], [0], [0], [1], [0, 0, 1, 1], [], []>} : vector<8x128xf32>, vector<128x128xf32>, vector<8x128xf32> -> vector<8x128xf32>
    %293 = arith.addf %287, %292 : vector<8x128xf32>
    %294 = vector.extract_strided_slice %176 {offsets = [2, 0, 1, 0], sizes = [2, 2, 2, 128], strides = [1, 1, 1, 1]} : vector<4x4x4x128xf32> to vector<2x2x2x128xf32>
    %295 = vector.shape_cast %294 : vector<2x2x2x128xf32> to vector<8x128xf32>
    %c19_171 = arith.constant 19 : index
    %c0_172 = arith.constant 0 : index
    %c0_173 = arith.constant 0 : index
    %296 = vector.load %arg6[%c19_171, %c0_172, %c0_173] : memref<27x128x128xf32, #tpu.memory_space<vmem>>, vector<1x128x128xf32>
    %297 = vector.shape_cast %296 : vector<1x128x128xf32> to vector<128x128xf32>
    %cst_174 = arith.constant dense<0.000000e+00> : vector<8x128xf32>
    %298 = tpu.matmul %295, %297, %cst_174 {dimension_numbers = #tpu.dot_dimension_numbers<[1], [0], [0], [1], [0, 0, 1, 1], [], []>} : vector<8x128xf32>, vector<128x128xf32>, vector<8x128xf32> -> vector<8x128xf32>
    %299 = arith.addf %293, %298 : vector<8x128xf32>
    %300 = vector.extract_strided_slice %176 {offsets = [2, 0, 2, 0], sizes = [2, 2, 2, 128], strides = [1, 1, 1, 1]} : vector<4x4x4x128xf32> to vector<2x2x2x128xf32>
    %301 = vector.shape_cast %300 : vector<2x2x2x128xf32> to vector<8x128xf32>
    %c20_175 = arith.constant 20 : index
    %c0_176 = arith.constant 0 : index
    %c0_177 = arith.constant 0 : index
    %302 = vector.load %arg6[%c20_175, %c0_176, %c0_177] : memref<27x128x128xf32, #tpu.memory_space<vmem>>, vector<1x128x128xf32>
    %303 = vector.shape_cast %302 : vector<1x128x128xf32> to vector<128x128xf32>
    %cst_178 = arith.constant dense<0.000000e+00> : vector<8x128xf32>
    %304 = tpu.matmul %301, %303, %cst_178 {dimension_numbers = #tpu.dot_dimension_numbers<[1], [0], [0], [1], [0, 0, 1, 1], [], []>} : vector<8x128xf32>, vector<128x128xf32>, vector<8x128xf32> -> vector<8x128xf32>
    %305 = arith.addf %299, %304 : vector<8x128xf32>
    %306 = vector.extract_strided_slice %176 {offsets = [2, 1, 0, 0], sizes = [2, 2, 2, 128], strides = [1, 1, 1, 1]} : vector<4x4x4x128xf32> to vector<2x2x2x128xf32>
    %307 = vector.shape_cast %306 : vector<2x2x2x128xf32> to vector<8x128xf32>
    %c21_179 = arith.constant 21 : index
    %c0_180 = arith.constant 0 : index
    %c0_181 = arith.constant 0 : index
    %308 = vector.load %arg6[%c21_179, %c0_180, %c0_181] : memref<27x128x128xf32, #tpu.memory_space<vmem>>, vector<1x128x128xf32>
    %309 = vector.shape_cast %308 : vector<1x128x128xf32> to vector<128x128xf32>
    %cst_182 = arith.constant dense<0.000000e+00> : vector<8x128xf32>
    %310 = tpu.matmul %307, %309, %cst_182 {dimension_numbers = #tpu.dot_dimension_numbers<[1], [0], [0], [1], [0, 0, 1, 1], [], []>} : vector<8x128xf32>, vector<128x128xf32>, vector<8x128xf32> -> vector<8x128xf32>
    %311 = arith.addf %305, %310 : vector<8x128xf32>
    %312 = vector.extract_strided_slice %176 {offsets = [2, 1, 1, 0], sizes = [2, 2, 2, 128], strides = [1, 1, 1, 1]} : vector<4x4x4x128xf32> to vector<2x2x2x128xf32>
    %313 = vector.shape_cast %312 : vector<2x2x2x128xf32> to vector<8x128xf32>
    %c22_183 = arith.constant 22 : index
    %c0_184 = arith.constant 0 : index
    %c0_185 = arith.constant 0 : index
    %314 = vector.load %arg6[%c22_183, %c0_184, %c0_185] : memref<27x128x128xf32, #tpu.memory_space<vmem>>, vector<1x128x128xf32>
    %315 = vector.shape_cast %314 : vector<1x128x128xf32> to vector<128x128xf32>
    %cst_186 = arith.constant dense<0.000000e+00> : vector<8x128xf32>
    %316 = tpu.matmul %313, %315, %cst_186 {dimension_numbers = #tpu.dot_dimension_numbers<[1], [0], [0], [1], [0, 0, 1, 1], [], []>} : vector<8x128xf32>, vector<128x128xf32>, vector<8x128xf32> -> vector<8x128xf32>
    %317 = arith.addf %311, %316 : vector<8x128xf32>
    %318 = vector.extract_strided_slice %176 {offsets = [2, 1, 2, 0], sizes = [2, 2, 2, 128], strides = [1, 1, 1, 1]} : vector<4x4x4x128xf32> to vector<2x2x2x128xf32>
    %319 = vector.shape_cast %318 : vector<2x2x2x128xf32> to vector<8x128xf32>
    %c23_187 = arith.constant 23 : index
    %c0_188 = arith.constant 0 : index
    %c0_189 = arith.constant 0 : index
    %320 = vector.load %arg6[%c23_187, %c0_188, %c0_189] : memref<27x128x128xf32, #tpu.memory_space<vmem>>, vector<1x128x128xf32>
    %321 = vector.shape_cast %320 : vector<1x128x128xf32> to vector<128x128xf32>
    %cst_190 = arith.constant dense<0.000000e+00> : vector<8x128xf32>
    %322 = tpu.matmul %319, %321, %cst_190 {dimension_numbers = #tpu.dot_dimension_numbers<[1], [0], [0], [1], [0, 0, 1, 1], [], []>} : vector<8x128xf32>, vector<128x128xf32>, vector<8x128xf32> -> vector<8x128xf32>
    %323 = arith.addf %317, %322 : vector<8x128xf32>
    %324 = vector.extract_strided_slice %176 {offsets = [2, 2, 0, 0], sizes = [2, 2, 2, 128], strides = [1, 1, 1, 1]} : vector<4x4x4x128xf32> to vector<2x2x2x128xf32>
    %325 = vector.shape_cast %324 : vector<2x2x2x128xf32> to vector<8x128xf32>
    %c24_191 = arith.constant 24 : index
    %c0_192 = arith.constant 0 : index
    %c0_193 = arith.constant 0 : index
    %326 = vector.load %arg6[%c24_191, %c0_192, %c0_193] : memref<27x128x128xf32, #tpu.memory_space<vmem>>, vector<1x128x128xf32>
    %327 = vector.shape_cast %326 : vector<1x128x128xf32> to vector<128x128xf32>
    %cst_194 = arith.constant dense<0.000000e+00> : vector<8x128xf32>
    %328 = tpu.matmul %325, %327, %cst_194 {dimension_numbers = #tpu.dot_dimension_numbers<[1], [0], [0], [1], [0, 0, 1, 1], [], []>} : vector<8x128xf32>, vector<128x128xf32>, vector<8x128xf32> -> vector<8x128xf32>
    %329 = arith.addf %323, %328 : vector<8x128xf32>
    %330 = vector.extract_strided_slice %176 {offsets = [2, 2, 1, 0], sizes = [2, 2, 2, 128], strides = [1, 1, 1, 1]} : vector<4x4x4x128xf32> to vector<2x2x2x128xf32>
    %331 = vector.shape_cast %330 : vector<2x2x2x128xf32> to vector<8x128xf32>
    %c25_195 = arith.constant 25 : index
    %c0_196 = arith.constant 0 : index
    %c0_197 = arith.constant 0 : index
    %332 = vector.load %arg6[%c25_195, %c0_196, %c0_197] : memref<27x128x128xf32, #tpu.memory_space<vmem>>, vector<1x128x128xf32>
    %333 = vector.shape_cast %332 : vector<1x128x128xf32> to vector<128x128xf32>
    %cst_198 = arith.constant dense<0.000000e+00> : vector<8x128xf32>
    %334 = tpu.matmul %331, %333, %cst_198 {dimension_numbers = #tpu.dot_dimension_numbers<[1], [0], [0], [1], [0, 0, 1, 1], [], []>} : vector<8x128xf32>, vector<128x128xf32>, vector<8x128xf32> -> vector<8x128xf32>
    %335 = arith.addf %329, %334 : vector<8x128xf32>
    %336 = vector.extract_strided_slice %176 {offsets = [2, 2, 2, 0], sizes = [2, 2, 2, 128], strides = [1, 1, 1, 1]} : vector<4x4x4x128xf32> to vector<2x2x2x128xf32>
    %337 = vector.shape_cast %336 : vector<2x2x2x128xf32> to vector<8x128xf32>
    %c26_199 = arith.constant 26 : index
    %c0_200 = arith.constant 0 : index
    %c0_201 = arith.constant 0 : index
    %338 = vector.load %arg6[%c26_199, %c0_200, %c0_201] : memref<27x128x128xf32, #tpu.memory_space<vmem>>, vector<1x128x128xf32>
    %339 = vector.shape_cast %338 : vector<1x128x128xf32> to vector<128x128xf32>
    %cst_202 = arith.constant dense<0.000000e+00> : vector<8x128xf32>
    %340 = tpu.matmul %337, %339, %cst_202 {dimension_numbers = #tpu.dot_dimension_numbers<[1], [0], [0], [1], [0, 0, 1, 1], [], []>} : vector<8x128xf32>, vector<128x128xf32>, vector<8x128xf32> -> vector<8x128xf32>
    %341 = arith.addf %335, %340 : vector<8x128xf32>
    %cst_203 = arith.constant 0.000000e+00 : f32
    %342 = vector.broadcast %cst_203 : f32 to vector<8x128xf32>
    %343 = arith.maximumf %341, %342 : vector<8x128xf32>
    %344 = vector.shape_cast %343 : vector<8x128xf32> to vector<2x2x2x128xf32>
    %c0_204 = arith.constant 0 : index
    %c0_205 = arith.constant 0 : index
    %345 = vector.load %arg9[%c0_204, %c0_205] : memref<1x128xf32, #tpu.memory_space<vmem>>, vector<1x128xf32>
    %346 = vector.extract_strided_slice %344 {offsets = [0, 0, 0, 0], sizes = [1, 1, 1, 128], strides = [1, 1, 1, 1]} : vector<2x2x2x128xf32> to vector<1x1x1x128xf32>
    %347 = vector.shape_cast %346 : vector<1x1x1x128xf32> to vector<1x128xf32>
    %c0_206 = arith.constant 0 : index
    %c0_207 = arith.constant 0 : index
    %c0_208 = arith.constant 0 : index
    %348 = vector.load %arg8[%c0_206, %c0_207, %c0_208] : memref<8x128x128xf32, #tpu.memory_space<vmem>>, vector<1x128x128xf32>
    %349 = vector.shape_cast %348 : vector<1x128x128xf32> to vector<128x128xf32>
    %cst_209 = arith.constant dense<0.000000e+00> : vector<1x128xf32>
    %350 = tpu.matmul %347, %349, %cst_209 {dimension_numbers = #tpu.dot_dimension_numbers<[1], [0], [0], [1], [0, 0, 1, 1], [], []>} : vector<1x128xf32>, vector<128x128xf32>, vector<1x128xf32> -> vector<1x128xf32>
    %351 = arith.addf %345, %350 : vector<1x128xf32>
    %352 = vector.extract_strided_slice %344 {offsets = [0, 0, 1, 0], sizes = [1, 1, 1, 128], strides = [1, 1, 1, 1]} : vector<2x2x2x128xf32> to vector<1x1x1x128xf32>
    %353 = vector.shape_cast %352 : vector<1x1x1x128xf32> to vector<1x128xf32>
    %c1_210 = arith.constant 1 : index
    %c0_211 = arith.constant 0 : index
    %c0_212 = arith.constant 0 : index
    %354 = vector.load %arg8[%c1_210, %c0_211, %c0_212] : memref<8x128x128xf32, #tpu.memory_space<vmem>>, vector<1x128x128xf32>
    %355 = vector.shape_cast %354 : vector<1x128x128xf32> to vector<128x128xf32>
    %cst_213 = arith.constant dense<0.000000e+00> : vector<1x128xf32>
    %356 = tpu.matmul %353, %355, %cst_213 {dimension_numbers = #tpu.dot_dimension_numbers<[1], [0], [0], [1], [0, 0, 1, 1], [], []>} : vector<1x128xf32>, vector<128x128xf32>, vector<1x128xf32> -> vector<1x128xf32>
    %357 = arith.addf %351, %356 : vector<1x128xf32>
    %358 = vector.extract_strided_slice %344 {offsets = [0, 1, 0, 0], sizes = [1, 1, 1, 128], strides = [1, 1, 1, 1]} : vector<2x2x2x128xf32> to vector<1x1x1x128xf32>
    %359 = vector.shape_cast %358 : vector<1x1x1x128xf32> to vector<1x128xf32>
    %c2_214 = arith.constant 2 : index
    %c0_215 = arith.constant 0 : index
    %c0_216 = arith.constant 0 : index
    %360 = vector.load %arg8[%c2_214, %c0_215, %c0_216] : memref<8x128x128xf32, #tpu.memory_space<vmem>>, vector<1x128x128xf32>
    %361 = vector.shape_cast %360 : vector<1x128x128xf32> to vector<128x128xf32>
    %cst_217 = arith.constant dense<0.000000e+00> : vector<1x128xf32>
    %362 = tpu.matmul %359, %361, %cst_217 {dimension_numbers = #tpu.dot_dimension_numbers<[1], [0], [0], [1], [0, 0, 1, 1], [], []>} : vector<1x128xf32>, vector<128x128xf32>, vector<1x128xf32> -> vector<1x128xf32>
    %363 = arith.addf %357, %362 : vector<1x128xf32>
    %364 = vector.extract_strided_slice %344 {offsets = [0, 1, 1, 0], sizes = [1, 1, 1, 128], strides = [1, 1, 1, 1]} : vector<2x2x2x128xf32> to vector<1x1x1x128xf32>
    %365 = vector.shape_cast %364 : vector<1x1x1x128xf32> to vector<1x128xf32>
    %c3_218 = arith.constant 3 : index
    %c0_219 = arith.constant 0 : index
    %c0_220 = arith.constant 0 : index
    %366 = vector.load %arg8[%c3_218, %c0_219, %c0_220] : memref<8x128x128xf32, #tpu.memory_space<vmem>>, vector<1x128x128xf32>
    %367 = vector.shape_cast %366 : vector<1x128x128xf32> to vector<128x128xf32>
    %cst_221 = arith.constant dense<0.000000e+00> : vector<1x128xf32>
    %368 = tpu.matmul %365, %367, %cst_221 {dimension_numbers = #tpu.dot_dimension_numbers<[1], [0], [0], [1], [0, 0, 1, 1], [], []>} : vector<1x128xf32>, vector<128x128xf32>, vector<1x128xf32> -> vector<1x128xf32>
    %369 = arith.addf %363, %368 : vector<1x128xf32>
    %370 = vector.extract_strided_slice %344 {offsets = [1, 0, 0, 0], sizes = [1, 1, 1, 128], strides = [1, 1, 1, 1]} : vector<2x2x2x128xf32> to vector<1x1x1x128xf32>
    %371 = vector.shape_cast %370 : vector<1x1x1x128xf32> to vector<1x128xf32>
    %c4_222 = arith.constant 4 : index
    %c0_223 = arith.constant 0 : index
    %c0_224 = arith.constant 0 : index
    %372 = vector.load %arg8[%c4_222, %c0_223, %c0_224] : memref<8x128x128xf32, #tpu.memory_space<vmem>>, vector<1x128x128xf32>
    %373 = vector.shape_cast %372 : vector<1x128x128xf32> to vector<128x128xf32>
    %cst_225 = arith.constant dense<0.000000e+00> : vector<1x128xf32>
    %374 = tpu.matmul %371, %373, %cst_225 {dimension_numbers = #tpu.dot_dimension_numbers<[1], [0], [0], [1], [0, 0, 1, 1], [], []>} : vector<1x128xf32>, vector<128x128xf32>, vector<1x128xf32> -> vector<1x128xf32>
    %375 = arith.addf %369, %374 : vector<1x128xf32>
    %376 = vector.extract_strided_slice %344 {offsets = [1, 0, 1, 0], sizes = [1, 1, 1, 128], strides = [1, 1, 1, 1]} : vector<2x2x2x128xf32> to vector<1x1x1x128xf32>
    %377 = vector.shape_cast %376 : vector<1x1x1x128xf32> to vector<1x128xf32>
    %c5_226 = arith.constant 5 : index
    %c0_227 = arith.constant 0 : index
    %c0_228 = arith.constant 0 : index
    %378 = vector.load %arg8[%c5_226, %c0_227, %c0_228] : memref<8x128x128xf32, #tpu.memory_space<vmem>>, vector<1x128x128xf32>
    %379 = vector.shape_cast %378 : vector<1x128x128xf32> to vector<128x128xf32>
    %cst_229 = arith.constant dense<0.000000e+00> : vector<1x128xf32>
    %380 = tpu.matmul %377, %379, %cst_229 {dimension_numbers = #tpu.dot_dimension_numbers<[1], [0], [0], [1], [0, 0, 1, 1], [], []>} : vector<1x128xf32>, vector<128x128xf32>, vector<1x128xf32> -> vector<1x128xf32>
    %381 = arith.addf %375, %380 : vector<1x128xf32>
    %382 = vector.extract_strided_slice %344 {offsets = [1, 1, 0, 0], sizes = [1, 1, 1, 128], strides = [1, 1, 1, 1]} : vector<2x2x2x128xf32> to vector<1x1x1x128xf32>
    %383 = vector.shape_cast %382 : vector<1x1x1x128xf32> to vector<1x128xf32>
    %c6_230 = arith.constant 6 : index
    %c0_231 = arith.constant 0 : index
    %c0_232 = arith.constant 0 : index
    %384 = vector.load %arg8[%c6_230, %c0_231, %c0_232] : memref<8x128x128xf32, #tpu.memory_space<vmem>>, vector<1x128x128xf32>
    %385 = vector.shape_cast %384 : vector<1x128x128xf32> to vector<128x128xf32>
    %cst_233 = arith.constant dense<0.000000e+00> : vector<1x128xf32>
    %386 = tpu.matmul %383, %385, %cst_233 {dimension_numbers = #tpu.dot_dimension_numbers<[1], [0], [0], [1], [0, 0, 1, 1], [], []>} : vector<1x128xf32>, vector<128x128xf32>, vector<1x128xf32> -> vector<1x128xf32>
    %387 = arith.addf %381, %386 : vector<1x128xf32>
    %388 = vector.extract_strided_slice %344 {offsets = [1, 1, 1, 0], sizes = [1, 1, 1, 128], strides = [1, 1, 1, 1]} : vector<2x2x2x128xf32> to vector<1x1x1x128xf32>
    %389 = vector.shape_cast %388 : vector<1x1x1x128xf32> to vector<1x128xf32>
    %c7_234 = arith.constant 7 : index
    %c0_235 = arith.constant 0 : index
    %c0_236 = arith.constant 0 : index
    %390 = vector.load %arg8[%c7_234, %c0_235, %c0_236] : memref<8x128x128xf32, #tpu.memory_space<vmem>>, vector<1x128x128xf32>
    %391 = vector.shape_cast %390 : vector<1x128x128xf32> to vector<128x128xf32>
    %cst_237 = arith.constant dense<0.000000e+00> : vector<1x128xf32>
    %392 = tpu.matmul %389, %391, %cst_237 {dimension_numbers = #tpu.dot_dimension_numbers<[1], [0], [0], [1], [0, 0, 1, 1], [], []>} : vector<1x128xf32>, vector<128x128xf32>, vector<1x128xf32> -> vector<1x128xf32>
    %393 = arith.addf %387, %392 : vector<1x128xf32>
    %c0_238 = arith.constant 0 : index
    %c0_239 = arith.constant 0 : index
    %c0_240 = arith.constant 0 : index
    %394 = vector.load %arg10[%c0_238, %c0_239, %c0_240] : memref<1x1x128xf32, #tpu.memory_space<vmem>>, vector<1x1x128xf32>
    %395 = vector.shape_cast %394 : vector<1x1x128xf32> to vector<1x128xf32>
    %396 = vector.shape_cast %393 : vector<1x128xf32> to vector<1x1x128xf32>
    tpu.vector_store %arg10[%c0_238, %c0_239, %c0_240], %396 {strides = array<i32>} : memref<1x1x128xf32, #tpu.memory_space<vmem>>, vector<1x1x128xf32>,
    return
  }
  func.func @transform_0(%arg0: i32) -> (i32, i32, i32, i32, i32) {
    %c0_i32 = arith.constant 0 : i32
    %c0_i32_0 = arith.constant 0 : i32
    %c0_i32_1 = arith.constant 0 : i32
    %c0_i32_2 = arith.constant 0 : i32
    %c0_i32_3 = arith.constant 0 : i32
    return %arg0, %c0_i32, %c0_i32_0, %c0_i32_1, %c0_i32_2 : i32, i32, i32, i32, i32
  }
  func.func @transform_1(%arg0: i32) -> (i32, i32, i32) {
    %c0_i32 = arith.constant 0 : i32
    %c0_i32_0 = arith.constant 0 : i32
    %c0_i32_1 = arith.constant 0 : i32
    %c0_i32_2 = arith.constant 0 : i32
    return %c0_i32, %c0_i32_0, %c0_i32_1 : i32, i32, i32
  }
  func.func @transform_2(%arg0: i32) -> (i32, i32) {
    %c0_i32 = arith.constant 0 : i32
    %c0_i32_0 = arith.constant 0 : i32
    %c0_i32_1 = arith.constant 0 : i32
    return %c0_i32, %c0_i32_0 : i32, i32
  }
  func.func @transform_3(%arg0: i32) -> (i32, i32, i32) {
    %c0_i32 = arith.constant 0 : i32
    %c0_i32_0 = arith.constant 0 : i32
    %c0_i32_1 = arith.constant 0 : i32
    %c0_i32_2 = arith.constant 0 : i32
    return %c0_i32, %c0_i32_0, %c0_i32_1 : i32, i32, i32
  }
  func.func @transform_4(%arg0: i32) -> (i32, i32) {
    %c0_i32 = arith.constant 0 : i32
    %c0_i32_0 = arith.constant 0 : i32
    %c0_i32_1 = arith.constant 0 : i32
    return %c0_i32, %c0_i32_0 : i32, i32
  }
  func.func @transform_5(%arg0: i32) -> (i32, i32, i32) {
    %c0_i32 = arith.constant 0 : i32
    %c0_i32_0 = arith.constant 0 : i32
    %c0_i32_1 = arith.constant 0 : i32
    %c0_i32_2 = arith.constant 0 : i32
    return %c0_i32, %c0_i32_0, %c0_i32_1 : i32, i32, i32
  }
  func.func @transform_6(%arg0: i32) -> (i32, i32) {
    %c0_i32 = arith.constant 0 : i32
    %c0_i32_0 = arith.constant 0 : i32
    %c0_i32_1 = arith.constant 0 : i32
    return %c0_i32, %c0_i32_0 : i32, i32
  }
  func.func @transform_7(%arg0: i32) -> (i32, i32, i32) {
    %c0_i32 = arith.constant 0 : i32
    %c0_i32_0 = arith.constant 0 : i32
    %c0_i32_1 = arith.constant 0 : i32
    %c0_i32_2 = arith.constant 0 : i32
    return %c0_i32, %c0_i32_0, %c0_i32_1 : i32, i32, i32
  }
  func.func @transform_8(%arg0: i32) -> (i32, i32) {
    %c0_i32 = arith.constant 0 : i32
    %c0_i32_0 = arith.constant 0 : i32
    %c0_i32_1 = arith.constant 0 : i32
    return %c0_i32, %c0_i32_0 : i32, i32
  }
  func.func @transform_9(%arg0: i32) -> (i32, i32, i32) {
    %c0_i32 = arith.constant 0 : i32
    %c0_i32_0 = arith.constant 0 : i32
    %c0_i32_1 = arith.constant 0 : i32
    return %arg0, %c0_i32, %c0_i32_0 : i32, i32, i32
  }
}

</mosaic_0001>

<bundles_post_ra>
// kernel: _forward.1
= control target key start
LH: loop header
LB: loop body
LE: loop exit
PB: predicated region body
PF: predicated region fallthrough
CT: control target
= control target key end

     0   :  { %14 = vsyncpa [#allocation3], 0  ;;  %s13538_s0 = inlined_call_operand.vmem [shape: f32[2,6,6,6,128], index: 0, kind: input, shape index: {}]   ;;  %s13539_s1 = inlined_call_operand.vmem [shape: f32[1,128,128], index: 1, kind: input, shape index: {}]   ;;  %s13540_s2 = inlined_call_operand.vmem [shape: f32[1,128], index: 2, kind: input, shape index: {}]   ;;  %s13541_s3 = inlined_call_operand.vmem [shape: f32[27,128,128], index: 3, kind: input, shape index: {}]   ;;  %s13542_s4 = inlined_call_operand.vmem [shape: f32[1,128], index: 4, kind: input, shape index: {}]   ;;  %s13543_s5 = inlined_call_operand.vmem [shape: f32[27,128,128], index: 5, kind: input, shape index: {}]   ;;  %s13544_s6 = inlined_call_operand.vmem [shape: f32[1,128], index: 6, kind: input, shape index: {}]   ;;  %s13545_s7 = inlined_call_operand.vmem [shape: f32[8,128,128], index: 7, kind: input, shape index: {}]   ;;  %s13546_s8 = inlined_call_operand.vmem [shape: f32[1,128], index: 8, kind: input, shape index: {}]   ;;  %s13547_s9 = inlined_call_operand.hbm [shape: f32[2,1,128], index: 9, kind: output, shape index: {}]  }
   0x1   :  { %16 = vsyncpa [#allocation3 + $0x1], 0  ;;  %s7521_s30 = smov 0   ;;  %s7523_s10 = smov 0  }
   0x2   :  { %s7525_s11 = smov 0   ;;  %s7527_s12 = smov 0  }
   0x3 LB: > { %s7542_s13 = sadd.s32 4294967295, %s7469_s12   ;;  %s6340_s14 = sadd.s32 4294967294, %s7469_s12   ;;  %s7469_s12 = sphi %s7527_s12, %s14431_s12   ;;  %s7465_s11 = sphi %s7525_s11, %s14430_s11   ;;  %s7461_s10 = sphi %s7523_s10, %s14429_s10   ;;  %s7457_s30 = sphi %s7521_s30, %s14428_s30  }
   0x4   : > { %s7546_s15 = sadd.s32 1, %s7469_s12   ;;  %s223_s16 = sadd.s32 1, %s7465_s11 }
   0x5   : > { %s220_s17 = ssub.s32 %s7469_s12, %s7546_s15  ;;  %p233_p0 = scmp.ne.s32.totalorder %s7465_s11, %s7461_s10 }
   0x6   : > { %p221_p1 = scmp.eq.s32.totalorder %s220_s17, 0  ;;  %p234_p2 = scmp.eq.s32.totalorder %s7542_s13, 1 }
   0x7   : > { %p239_p3 = scmp.ne.s32.totalorder %s7461_s10, %s7457_s30  ;;  %p240_p4 = scmp.eq.s32.totalorder %s6340_s14, 1 }
   0x8   : > { %s7557_s18 = scalar_select %p221_p1, %s7465_s11, %s223_s16  }
   0x9   : > { %p7559_p5 = por %p234_p2, %p233_p0  ;;  %p7563_p6 = por %p240_p4, %p239_p3 }
   0xa   : > { %p6343_p7 = scmp.ge.s32.totalorder %s7469_s12, 1  ;;  %p290_p8 = scmp.lt.s32.totalorder %s7469_s12, 3 }
   0xc   : > { %p291_p9 = pnand %p6343_p7, %p290_p8 }
   0xe   : > { %294 = sbr.rel (%p291_p9) target bundleno = 2304 (0x900), region = 56 }
  0x13   : > { %v493_v0 = vld [vmem:[%s13539_s1 + $0x78] sm:$0xff]  ;;  %v492_v1 = vld [vmem:[%s13539_s1 + $0x70] sm:$0xff]  ;;  %p325_p10 = scmp.lt.s32.totalorder %s7542_s13, 1  ;;  %v491_v2 = vld [vmem:[%s13539_s1 + $0x68] sm:$0xff]  ;;  %vm1020_vm0 = vcmask 1040384   ;;  %vm1021_vm1 = vcmask 1042434  }
  0x14   : > { %663 = vmatpush.msra.mxu0 %v493_v0  ;;  %v490_v3 = vld [vmem:[%s13539_s1 + $0x60] sm:$0xff]  ;;  %v489_v4 = vld [vmem:[%s13539_s1 + $0x58] sm:$0xff]  ;;  %v488_v5 = vld [vmem:[%s13539_s1 + $0x50] sm:$0xff]  ;;  %vm1023_vm3 = vcmask 1044484   ;;  %vm1025_vm5 = vcmask 1046534   ;;  %vm4495_vm7 = vcmask 1041408  }
  0x15   : > { %s326_s27 = scalar_select %p325_p10, %s7542_s13, 1  ;;  %v487_v13 = vld [vmem:[%s13539_s1 + $0x48] sm:$0xff]  ;;  %v486_v15 = vld [vmem:[%s13539_s1 + $0x40] sm:$0xff]  ;;  %v485_v16 = vld [vmem:[%s13539_s1 + $0x38] sm:$0xff]  ;;  %vm4497_vm8 = vcmask 1043458  }
  0x16   : > { %664 = vmatpush.msra.mxu0 %v492_v1  ;;  %v484_v19 = vld [vmem:[%s13539_s1 + $0x30] sm:$0xff]  ;;  %v483_v22 = vld [vmem:[%s13539_s1 + $0x28] sm:$0xff]  ;;  %v482_v25 = vld [vmem:[%s13539_s1 + $0x20] sm:$0xff]  ;;  %s7427_s24 = scalar_lea.hbm %s13547_s9, 2 }
  0x17   : > { %s7359_s14 = smul.u32 288, %s326_s27  ;;  %v481_v28 = vld [vmem:[%s13539_s1 + $0x18] sm:$0xff]  ;;  %v480_v31 = vld [vmem:[%s13539_s1 + $0x10] sm:$0xff]  ;;  %v479_v32 = vld [vmem:[%s13539_s1 + $0x8] sm:$0xff]  ;;  %s6281_s27 = scalar_lea.hbm %s13547_s9, %s7542_s13 }
  0x18   : > { %665 = vmatpush.msra.mxu0 %v491_v2  ;;  %v478_v36 = vld [vmem:[%s13539_s1] sm:$0xff]  ;;  %vm1022_vm2 = vmor %vm1020_vm0, %vm1021_vm1 }
  0x19   : > { %s7589_s23 = scalar_lea.vmem %s13538_s0, %s7359_s14  ;;  %vm1024_vm4 = vmor %vm1022_vm2, %vm1023_vm3  ;;  %s6285_s14 = sshll.u32 %s6281_s27, 4  ;;  %s6286_s14 = int_to_ptr.hbm [resolvable:$true] %s6285_s14 }
  0x1a   : > { %666 = vmatpush.msra.mxu0 %v490_v3  ;;  %v330_v6 = vld [vmem:[%s7589_s23] sm:$0x3f]  ;;  %v331_v7 = vld [vmem:[%s7589_s23 + $0x8] sm:$0x3f]  ;;  %v332_v10 = vld [vmem:[%s7589_s23 + $0x10] sm:$0x3f] }
  0x1b   : > { %v406_v8 = vrot.slane %v330_v6, 2  ;;  %v407_v9 = vrot.slane %v330_v6, 4  ;;  %494 = vst [vmem:[#allocation1] ss:$4 sm:$0xff] %v330_v6  ;;  %v408_v11 = vrot.slane %v331_v7, 2  ;;  %v409_v12 = vrot.slane %v331_v7, 4  ;;  %vm7924_vm6 = vmor %vm1024_vm4, %vm1025_vm5 }
  0x1c   : > { %667 = vmatpush.msra.mxu0 %v489_v4  ;;  %500 = vst [vmem:[#allocation1 + $0x3] ss:$4 sm:$0xff] %v331_v7  ;;  %v410_v14 = vrot.slane %v332_v10, 2  ;;  %v333_v17 = vld [vmem:[%s7589_s23 + $0x18] sm:$0x3f]  ;;  %v411_v18 = vrot.slane %v332_v10, 4 }
  0x1d   : > { %496 = vst [vmem:[#allocation1 + $0x1] ss:$4 sm:$0xff] %v406_v8  ;;  %v412_v20 = vrot.slane %v333_v17, 2  ;;  %v334_v21 = vld [vmem:[%s7589_s23 + $0x20] sm:$0x3f]  ;;  %v413_v24 = vrot.slane %v333_v17, 4 }
  0x1e   : > { %668 = vmatpush.msra.mxu0 %v488_v5  ;;  %498 = vst [vmem:[#allocation1 + $0x2] ss:$4 sm:$0xff] %v407_v9  ;;  %v414_v26 = vrot.slane %v334_v21, 2  ;;  %v415_v27 = vrot.slane %v334_v21, 4  ;;  %v335_v30 = vld [vmem:[%s7589_s23 + $0x28] sm:$0x3f] }
  0x1f   : > { %502 = vst [vmem:[#allocation1 + $0x20] ss:$4 sm:$0xff] %v408_v11  ;;  %v336_v33 = vld [vmem:[%s7589_s23 + $0x30] sm:$0x3f]  ;;  %v416_v34 = vrot.slane %v335_v30, 2  ;;  %v417_v35 = vrot.slane %v335_v30, 4 }
  0x20   : > { %669 = vmatpush.msra.mxu0 %v487_v13  ;;  %504 = vst [vmem:[#allocation1 + $0x21] ss:$4 sm:$0xff] %v409_v12  ;;  %v418_v38 = vrot.slane %v336_v33, 2  ;;  %v337_v39 = vld [vmem:[%s7589_s23 + $0x38] sm:$0x3f]  ;;  %v419_v40 = vrot.slane %v336_v33, 4 }
  0x21   : > { %506 = vst [vmem:[#allocation1 + $0x22] ss:$4 sm:$0xff] %v332_v10  ;;  %v420_v41 = vrot.slane %v337_v39, 2  ;;  %v421_v43 = vrot.slane %v337_v39, 4  ;;  %v338_v44 = vld [vmem:[%s7589_s23 + $0x40] sm:$0x3f] }
  0x22   : > { %670 = vmatpush.msra.mxu0 %v486_v15  ;;  %508 = vst [vmem:[#allocation1 + $0x23] ss:$4 sm:$0xff] %v410_v14  ;;  %v422_v45 = vrot.slane %v338_v44, 2  ;;  %v423_v46 = vrot.slane %v338_v44, 4  ;;  %v339_v48 = vld [vmem:[%s7589_s23 + $0x48] sm:$0x3f] }
  0x23   : > { %v340_v50 = vld [vmem:[%s7589_s23 + $0x50] sm:$0x3f]  ;;  %v424_v51 = vrot.slane %v339_v48, 2  ;;  %v425_v52 = vrot.slane %v339_v48, 4  ;;  %v341_v54 = vld [vmem:[%s7589_s23 + $0x58] sm:$0x3f] }
  0x24   : > { %671 = vmatpush.msra.mxu0 %v485_v16  ;;  %v426_v53 = vrot.slane %v340_v50, 2  ;;  %v427_v55 = vrot.slane %v340_v50, 4  ;;  %v428_v56 = vrot.slane %v341_v54, 2  ;;  %v429_v58 = vrot.slane %v341_v54, 4  ;;  %v343_v60 = vld [vmem:[%s7589_s23 + $0x68] sm:$0x3f] }
  0x25   : > { %v509_v23 = vld.sshfl [vmem:[#allocation1] sm:$0xff pattern:$0x73625140]  ;;  %v344_v62 = vld [vmem:[%s7589_s23 + $0x70] sm:$0x3f]  ;;  %v432_v1 = vrot.slane %v343_v60, 2 }
  0x26   : > { %672 = vmatpush.msra.mxu0 %v484_v19  ;;  %511 = vst [vmem:[#allocation1] ss:$4 sm:$0xff] %v411_v18  ;;  %v342_v61 = vld [vmem:[%s7589_s23 + $0x60] sm:$0x3f]  ;;  %v433_v3 = vrot.slane %v343_v60, 4  ;;  %v434_v4 = vrot.slane %v344_v62, 2 }
  0x27   : > { %512 = vst [vmem:[#allocation1 + $0x1] ss:$4 sm:$0xff] %v333_v17  ;;  %v430_v63 = vrot.slane %v342_v61, 2  ;;  %v431_v0 = vrot.slane %v342_v61, 4  ;;  %v346_v5 = vld [vmem:[%s7589_s23 + $0x80] sm:$0x3f] }
  0x28   : > { %673 = vmatpush.msra.mxu0 %v483_v22  ;;  %513 = vst [vmem:[#allocation1 + $0x2] ss:$4 sm:$0xff] %v412_v20  ;;  %v345_v6 = vld [vmem:[%s7589_s23 + $0x78] sm:$0x3f]  ;;  %v435_v8 = vrot.slane %v344_v62, 4  ;;  %v438_v11 = vrot.slane %v346_v5, 2 }
  0x29   : > { %v510_v29 = vld.sshfl [vmem:[#allocation1 + $0x20] sm:$0xff pattern:$0x73625140]  ;;  %514 = vst [vmem:[#allocation1 + $0x3] ss:$4 sm:$0xff] %v413_v24  ;;  %v436_v9 = vrot.slane %v345_v6, 2 }
  0x2a   : > { %674 = vmatpush.msra.mxu0 %v482_v25  ;;  %515 = vst [vmem:[#allocation1 + $0x20] ss:$4 sm:$0xff] %v334_v21  ;;  %v437_v10 = vrot.slane %v345_v6, 4  ;;  %v439_v12 = vrot.slane %v346_v5, 4  ;;  %v347_v14 = vld [vmem:[%s7589_s23 + $0x88] sm:$0x3f] }
  0x2b   : > { %516 = vst [vmem:[#allocation1 + $0x21] ss:$4 sm:$0xff] %v414_v26  ;;  %v440_v15 = vrot.slane %v347_v14, 2  ;;  %v348_v16 = vld [vmem:[%s7589_s23 + $0x90] sm:$0x3f]  ;;  %v441_v17 = vrot.slane %v347_v14, 4 }
  0x2c   : > { %675 = vmatpush.msra.mxu0 %v481_v28  ;;  %517 = vst [vmem:[#allocation1 + $0x22] ss:$4 sm:$0xff] %v415_v27  ;;  %v349_v19 = vld [vmem:[%s7589_s23 + $0x98] sm:$0x3f]  ;;  %v442_v20 = vrot.slane %v348_v16, 2  ;;  %v443_v21 = vrot.slane %v348_v16, 4 }
  0x2d   : > { %518 = vst [vmem:[#allocation1 + $0x23] ss:$4 sm:$0xff] %v335_v30  ;;  %v444_v22 = vrot.slane %v349_v19, 2  ;;  %v445_v24 = vrot.slane %v349_v19, 4  ;;  %v350_v25 = vld [vmem:[%s7589_s23 + $0xa0] sm:$0x3f] }
  0x2e   : > { %676 = vmatpush.msra.mxu0 %v480_v31  ;;  %v351_v26 = vld [vmem:[%s7589_s23 + $0xa8] sm:$0x3f]  ;;  %v446_v27 = vrot.slane %v350_v25, 2  ;;  %v447_v28 = vrot.slane %v350_v25, 4  ;;  %v352_v30 = vld [vmem:[%s7589_s23 + $0xb0] sm:$0x3f] }
  0x2f   : > { %v448_v31 = vrot.slane %v351_v26, 2  ;;  %s7421_s17 = sshra.s32 %s6286_s14, 4  ;;  %s7422_s17 = int_to_ptr.hbm [resolvable:$true] %s7421_s17 }
  0x30   : > { %677 = vmatpush.msra.mxu0 %v479_v32  ;;  %v519_v37 = vld.sshfl [vmem:[#allocation1] sm:$0xff pattern:$0x73625140]  ;;  %v449_v32 = vrot.slane %v351_v26, 4  ;;  %s7423_s21 = scalar_lea.hbm %s7422_s17, 1  ;;  %p7428_p0 = scmp.lt.s32.totalorder %s7422_s17, %s13547_s9 }
  0x31   : > { %521 = vst [vmem:[#allocation1] ss:$4 sm:$0xff] %v416_v34  ;;  %v450_v34 = vrot.slane %v352_v30, 2  ;;  %p7424_p11 = scmp.ne.s32.totalorder %s7422_s17, %s7423_s21  ;;  %p7429_p1 = scmp.lt.s32.totalorder %s7427_s24, %s7423_s21 }
  0x32   : > { %678 = vmatpush.msra.mxu0 %v478_v36  ;;  %522 = vst [vmem:[#allocation1 + $0x1] ss:$4 sm:$0xff] %v417_v35  ;;  %v451_v35 = vrot.slane %v352_v30, 4  ;;  %v353_v36 = vld [vmem:[%s7589_s23 + $0xb8] sm:$0x3f] }
  0x33   : > { %679 = vmatmul.f32.vlgmr.msra.gmra.mxu0 %v509_v23  ;;  %523 = vst [vmem:[#allocation1 + $0x2] ss:$4 sm:$0xff] %v336_v33  ;;  %p7425_p12 = pnand %p7424_p11, %p7559_p5  ;;  %p7430_p2 = por %p7429_p1, %p7428_p0 }
  0x34   : > { %v520_v42 = vld.sshfl [vmem:[#allocation1 + $0x20] sm:$0xff pattern:$0x73625140]  ;;  %524 = vst [vmem:[#allocation1 + $0x3] ss:$4 sm:$0xff] %v418_v38  ;;  %v452_v38 = vrot.slane %v353_v36, 2 }
  0x35   : > { %525 = vst [vmem:[#allocation1 + $0x20] ss:$4 sm:$0xff] %v419_v40  ;;  %p7426_p13 = pneg %p7425_p12 }
  0x36   : > { %526 = vst [vmem:[#allocation1 + $0x21] ss:$4 sm:$0xff] %v337_v39 }
  0x37   : > { %527 = vst [vmem:[#allocation1 + $0x22] ss:$4 sm:$0xff] %v420_v41  ;;  %p7431_p3 = pnand %p7430_p2, %p7426_p13 }
  0x38   : > { %528 = vst [vmem:[#allocation1 + $0x23] ss:$4 sm:$0xff] %v421_v43  ;;  %v355_v43 = vld [vmem:[%s7589_s23 + $0xc8] sm:$0x3f] }
  0x3b   : > { %682 = vmatmul.f32.gmra.mxu0 %v510_v29  ;;  %v529_v47 = vld.sshfl [vmem:[#allocation1] sm:$0xff pattern:$0x73625140] }
  0x3c   : > { %531 = vst [vmem:[#allocation1] ss:$4 sm:$0xff] %v338_v44  ;;  %v453_v44 = vrot.slane %v353_v36, 4 }
  0x3d   : > { %532 = vst [vmem:[#allocation1 + $0x1] ss:$4 sm:$0xff] %v422_v45  ;;  %v915_v45 = vld [vmem:[%s13541_s3 + $0x78] sm:$0xff] }
  0x3e   : > { %533 = vst [vmem:[#allocation1 + $0x2] ss:$4 sm:$0xff] %v423_v46  ;;  %v914_v46 = vld [vmem:[%s13541_s3 + $0x70] sm:$0xff]  ;;  %971 = vmatpush.msra.mxu1 %v915_v45 }
  0x3f   : > { %534 = vst [vmem:[#allocation1 + $0x3] ss:$4 sm:$0xff] %v339_v48  ;;  %v530_v49 = vld.sshfl [vmem:[#allocation1 + $0x20] sm:$0xff pattern:$0x73625140] }
  0x40   : > { %537 = vst [vmem:[#allocation1 + $0x22] ss:$4 sm:$0xff] %v340_v50  ;;  %972 = vmatpush.msra.mxu1 %v914_v46  ;;  %v356_v48 = vld [vmem:[%s7589_s23 + $0xd0] sm:$0x3f]  ;;  %v357_v50 = vld [vmem:[%s7589_s23 + $0xd8] sm:$0x3f] }
  0x41   : > { %535 = vst [vmem:[#allocation1 + $0x20] ss:$4 sm:$0xff] %v424_v51  ;;  %v459_v51 = vrot.slane %v356_v48, 4 }
  0x42   : > { %536 = vst [vmem:[#allocation1 + $0x21] ss:$4 sm:$0xff] %v425_v52  ;;  %v911_v52 = vld [vmem:[%s13541_s3 + $0x58] sm:$0xff] }
  0x43   : > { %685 = vmatmul.f32.gmra.mxu0 %v519_v37  ;;  %538 = vst [vmem:[#allocation1 + $0x23] ss:$4 sm:$0xff] %v426_v53  ;;  %v354_v37 = vld [vmem:[%s7589_s23 + $0xc0] sm:$0x3f]  ;;  %v910_v53 = vld [vmem:[%s13541_s3 + $0x50] sm:$0xff] }
  0x44   : > { %v454_v40 = vrot.slane %v354_v37, 2  ;;  %v455_v41 = vrot.slane %v354_v37, 4 }
  0x46   : > { %v539_v57 = vld.sshfl [vmem:[#allocation1] sm:$0xff pattern:$0x73625140] }
  0x47   : > { %541 = vst [vmem:[#allocation1] ss:$4 sm:$0xff] %v427_v55  ;;  %v461_v55 = vrot.slane %v357_v50, 4 }
  0x48   : > { %542 = vst [vmem:[#allocation1 + $0x1] ss:$4 sm:$0xff] %v341_v54  ;;  %v460_v54 = vrot.slane %v357_v50, 2 }
  0x49   : > { %543 = vst [vmem:[#allocation1 + $0x2] ss:$4 sm:$0xff] %v428_v56 }
  0x4a   : > { %544 = vst [vmem:[#allocation1 + $0x3] ss:$4 sm:$0xff] %v429_v58  ;;  %v540_v59 = vld.sshfl [vmem:[#allocation1 + $0x20] sm:$0xff pattern:$0x73625140]  ;;  %v457_v58 = vrot.slane %v355_v43, 4 }
  0x4b   : > { %688 = vmatmul.f32.gmra.mxu0 %v520_v42  ;;  %548 = vst [vmem:[#allocation1 + $0x23] ss:$4 sm:$0xff] %v343_v60  ;;  %v458_v60 = vrot.slane %v356_v48, 2 }
  0x4c   : > { %545 = vst [vmem:[#allocation1 + $0x20] ss:$4 sm:$0xff] %v342_v61  ;;  %v359_v61 = vld [vmem:[%s7589_s23 + $0xe8] sm:$0x3f] }
  0x4d   : > { %546 = vst [vmem:[#allocation1 + $0x21] ss:$4 sm:$0xff] %v430_v63  ;;  %v464_v63 = vrot.slane %v359_v61, 2 }
  0x4e   : > { %547 = vst [vmem:[#allocation1 + $0x22] ss:$4 sm:$0xff] %v431_v0  ;;  %v465_v0 = vrot.slane %v359_v61, 4 }
  0x51   : > { %v549_v2 = vld.sshfl [vmem:[#allocation1] sm:$0xff pattern:$0x73625140] }
  0x52   : > { %551 = vst [vmem:[#allocation1] ss:$4 sm:$0xff] %v432_v1  ;;  %v909_v1 = vld [vmem:[%s13541_s3 + $0x48] sm:$0xff] }
  0x53   : > { %691 = vmatmul.f32.gmra.mxu0 %v529_v47  ;;  %552 = vst [vmem:[#allocation1 + $0x1] ss:$4 sm:$0xff] %v433_v3  ;;  %v913_v47 = vld [vmem:[%s13541_s3 + $0x68] sm:$0xff] }
  0x54   : > { %553 = vst [vmem:[#allocation1 + $0x2] ss:$4 sm:$0xff] %v344_v62  ;;  %973 = vmatpush.msra.mxu1 %v913_v47  ;;  %v360_v62 = vld [vmem:[%s7589_s23 + $0xf0] sm:$0x3f] }
  0x55   : > { %554 = vst [vmem:[#allocation1 + $0x3] ss:$4 sm:$0xff] %v434_v4  ;;  %v550_v7 = vld.sshfl [vmem:[#allocation1 + $0x20] sm:$0xff pattern:$0x73625140] }
  0x56   : > { %556 = vst [vmem:[#allocation1 + $0x21] ss:$4 sm:$0xff] %v345_v6  ;;  %v908_v4 = vld [vmem:[%s13541_s3 + $0x40] sm:$0xff]  ;;  %v907_v6 = vld [vmem:[%s13541_s3 + $0x38] sm:$0xff] }
  0x57   : > { %555 = vst [vmem:[#allocation1 + $0x20] ss:$4 sm:$0xff] %v435_v8  ;;  %v906_v8 = vld [vmem:[%s13541_s3 + $0x30] sm:$0xff] }
  0x58   : > { %557 = vst [vmem:[#allocation1 + $0x22] ss:$4 sm:$0xff] %v436_v9 }
  0x59   : > { %558 = vst [vmem:[#allocation1 + $0x23] ss:$4 sm:$0xff] %v437_v10 }
  0x5b   : > { %694 = vmatmul.f32.gmra.mxu0 %v530_v49  ;;  %v912_v49 = vld [vmem:[%s13541_s3 + $0x60] sm:$0xff] }
  0x5c   : > { %v559_v13 = vld.sshfl [vmem:[#allocation1] sm:$0xff pattern:$0x73625140]  ;;  %974 = vmatpush.msra.mxu1 %v912_v49 }
  0x5d   : > { %561 = vst [vmem:[#allocation1] ss:$4 sm:$0xff] %v346_v5  ;;  %v358_v5 = vld [vmem:[%s7589_s23 + $0xe0] sm:$0x3f] }
  0x5e   : > { %562 = vst [vmem:[#allocation1 + $0x1] ss:$4 sm:$0xff] %v438_v11  ;;  %975 = vmatpush.msra.mxu1 %v911_v52  ;;  %v463_v9 = vrot.slane %v358_v5, 4  ;;  %v362_v11 = vld [vmem:[%s7589_s23 + $0x100] sm:$0x3f] }
  0x5f   : > { %563 = vst [vmem:[#allocation1 + $0x2] ss:$4 sm:$0xff] %v439_v12  ;;  %v905_v12 = vld [vmem:[%s13541_s3 + $0x28] sm:$0xff] }
  0x60   : > { %564 = vst [vmem:[#allocation1 + $0x3] ss:$4 sm:$0xff] %v347_v14  ;;  %v7643_v18 = vld.sshfl [vmem:[#allocation1 + $0x20] sm:$0xff pattern:$0x73625140]  ;;  %976 = vmatpush.msra.mxu1 %v910_v53  ;;  %v470_v14 = vrot.slane %v362_v11, 2 }
  0x61   : > { %565 = vst [vmem:[#allocation1 + $0x20] ss:$4 sm:$0xff] %v440_v15  ;;  %v471_v15 = vrot.slane %v362_v11, 4 }
  0x62   : > { %566 = vst [vmem:[#allocation1 + $0x21] ss:$4 sm:$0xff] %v441_v17  ;;  %977 = vmatpush.msra.mxu1 %v909_v1  ;;  %v363_v17 = vld [vmem:[%s7589_s23 + $0x108] sm:$0x3f] }
  0x63   : > { %697 = vmatmul.f32.gmra.mxu0 %v539_v57  ;;  %567 = vst [vmem:[#allocation1 + $0x22] ss:$4 sm:$0xff] %v348_v16  ;;  %v456_v57 = vrot.slane %v355_v43, 2  ;;  %v903_v16 = vld [vmem:[%s13541_s3 + $0x18] sm:$0xff] }
  0x64   : > { %568 = vst [vmem:[#allocation1 + $0x23] ss:$4 sm:$0xff] %v442_v20  ;;  %978 = vmatpush.msra.mxu1 %v908_v4  ;;  %v902_v20 = vld [vmem:[%s13541_s3 + $0x10] sm:$0xff] }
  0x66   : > { %979 = vmatpush.msra.mxu1 %v907_v6 }
  0x67   : > { %v7646_v23 = vld.sshfl [vmem:[#allocation1] sm:$0xff pattern:$0x73625140] }
  0x68   : > { %571 = vst [vmem:[#allocation1] ss:$4 sm:$0xff] %v443_v21  ;;  %980 = vmatpush.msra.mxu1 %v906_v8  ;;  %v467_v21 = vrot.slane %v360_v62, 4 }
  0x69   : > { %572 = vst [vmem:[#allocation1 + $0x1] ss:$4 sm:$0xff] %v349_v19  ;;  %v361_v19 = vld [vmem:[%s7589_s23 + $0xf8] sm:$0x3f] }
  0x6a   : > { %573 = vst [vmem:[#allocation1 + $0x2] ss:$4 sm:$0xff] %v444_v22  ;;  %981 = vmatpush.msra.mxu1 %v905_v12  ;;  %v901_v22 = vld [vmem:[%s13541_s3 + $0x8] sm:$0xff] }
  0x6b   : > { %700 = vmatmul.f32.gmra.mxu0 %v540_v59  ;;  %574 = vst [vmem:[#allocation1 + $0x3] ss:$4 sm:$0xff] %v445_v24  ;;  %v7650_v29 = vld.sshfl [vmem:[#allocation1 + $0x20] sm:$0xff pattern:$0x73625140]  ;;  %v468_v24 = vrot.slane %v361_v19, 2 }
  0x6c   : > { %575 = vst [vmem:[#allocation1 + $0x20] ss:$4 sm:$0xff] %v350_v25  ;;  %v469_v25 = vrot.slane %v361_v19, 4 }
  0x6d   : > { %576 = vst [vmem:[#allocation1 + $0x21] ss:$4 sm:$0xff] %v446_v27  ;;  %v900_v27 = vld [vmem:[%s13541_s3] sm:$0xff] }
  0x6e   : > { %577 = vst [vmem:[#allocation1 + $0x22] ss:$4 sm:$0xff] %v447_v28  ;;  %v365_v28 = vld [vmem:[%s7589_s23 + $0x118] sm:$0x3f] }
  0x6f   : > { %578 = vst [vmem:[#allocation1 + $0x23] ss:$4 sm:$0xff] %v351_v26 }
  0x72   : > { %v7653_v33 = vld.sshfl [vmem:[#allocation1] sm:$0xff pattern:$0x73625140] }
  0x73   : > { %703 = vmatmul.f32.gmra.mxu0 %v549_v2  ;;  %581 = vst [vmem:[#allocation1] ss:$4 sm:$0xff] %v448_v31  ;;  %v466_v2 = vrot.slane %v360_v62, 2  ;;  %v477_v31 = vrot.slane %v365_v28, 4 }
  0x74   : > { %582 = vst [vmem:[#allocation1 + $0x1] ss:$4 sm:$0xff] %v449_v32 }
  0x75   : > { %583 = vst [vmem:[#allocation1 + $0x2] ss:$4 sm:$0xff] %v352_v30  ;;  %v476_v30 = vrot.slane %v365_v28, 2 }
  0x76   : > { %584 = vst [vmem:[#allocation1 + $0x3] ss:$4 sm:$0xff] %v450_v34  ;;  %v7657_v39 = vld.sshfl [vmem:[#allocation1 + $0x20] sm:$0xff pattern:$0x73625140]  ;;  %v472_v34 = vrot.slane %v363_v17, 2 }
  0x77   : > { %585 = vst [vmem:[#allocation1 + $0x20] ss:$4 sm:$0xff] %v451_v35 }
  0x78   : > { %586 = vst [vmem:[#allocation1 + $0x21] ss:$4 sm:$0xff] %v353_v36  ;;  %v473_v36 = vrot.slane %v363_v17, 4 }
  0x79   : > { %587 = vst [vmem:[#allocation1 + $0x22] ss:$4 sm:$0xff] %v452_v38 }
  0x7a   : > { %588 = vst [vmem:[#allocation1 + $0x23] ss:$4 sm:$0xff] %v453_v44 }
  0x7b   : > { %706 = vmatmul.f32.gmra.mxu0 %v550_v7  ;;  %v462_v7 = vrot.slane %v358_v5, 2 }
  0x7d   : > { %v7659_v42 = vld.sshfl [vmem:[#allocation1] sm:$0xff pattern:$0x73625140] }
  0x7e   : > { %591 = vst [vmem:[#allocation1] ss:$4 sm:$0xff] %v354_v37 }
  0x7f   : > { %592 = vst [vmem:[#allocation1 + $0x1] ss:$4 sm:$0xff] %v454_v40 }
  0x80   : > { %593 = vst [vmem:[#allocation1 + $0x2] ss:$4 sm:$0xff] %v455_v41 }
  0x81   : > { %594 = vst [vmem:[#allocation1 + $0x3] ss:$4 sm:$0xff] %v355_v43  ;;  %v7685_v59 = vld.sshfl [vmem:[#allocation1 + $0x20] sm:$0xff pattern:$0x73625140] }
  0x82   : > { %595 = vst [vmem:[#allocation1 + $0x20] ss:$4 sm:$0xff] %v456_v57 }
  0x83   : > { %709 = vmatmul.f32.gmra.mxu0 %v559_v13  ;;  %596 = vst [vmem:[#allocation1 + $0x21] ss:$4 sm:$0xff] %v457_v58  ;;  %v904_v13 = vld [vmem:[%s13541_s3 + $0x20] sm:$0xff] }
  0x84   : > { %597 = vst [vmem:[#allocation1 + $0x22] ss:$4 sm:$0xff] %v356_v48  ;;  %982 = vmatpush.msra.mxu1 %v904_v13  ;;  %v6375_v13 = vld [vmem:[%s13541_s3 + $0xf0] sm:$0xff] }
  0x85   : > { %598 = vst [vmem:[#allocation1 + $0x23] ss:$4 sm:$0xff] %v458_v60 }
  0x86   : > { %983 = vmatpush.msra.mxu1 %v903_v16 }
  0x88   : > { %v7683_v56 = vld.sshfl [vmem:[#allocation1] sm:$0xff pattern:$0x73625140]  ;;  %984 = vmatpush.msra.mxu1 %v902_v20 }
  0x89   : > { %601 = vst [vmem:[#allocation1] ss:$4 sm:$0xff] %v459_v51 }
  0x8a   : > { %602 = vst [vmem:[#allocation1 + $0x1] ss:$4 sm:$0xff] %v357_v50  ;;  %985 = vmatpush.msra.mxu1 %v901_v22 }
  0x8b   : > { %712 = vmatmul.f32.gmra.mxu0 %v7643_v18  ;;  %603 = vst [vmem:[#allocation1 + $0x2] ss:$4 sm:$0xff] %v460_v54 }
  0x8c   : > { %604 = vst [vmem:[#allocation1 + $0x3] ss:$4 sm:$0xff] %v461_v55  ;;  %v7706_v10 = vld.sshfl [vmem:[#allocation1 + $0x20] sm:$0xff pattern:$0x73625140]  ;;  %986 = vmatpush.msra.mxu1 %v900_v27 }
  0x8d   : > { %605 = vst [vmem:[#allocation1 + $0x20] ss:$4 sm:$0xff] %v358_v5 }
  0x8e   : > { %606 = vst [vmem:[#allocation1 + $0x21] ss:$4 sm:$0xff] %v462_v7 }
  0x8f   : > { %607 = vst [vmem:[#allocation1 + $0x22] ss:$4 sm:$0xff] %v463_v9 }
  0x90   : > { %608 = vst [vmem:[#allocation1 + $0x23] ss:$4 sm:$0xff] %v359_v61 }
  0x93   : > { %715 = vmatmul.f32.gmra.mxu0 %v7646_v23  ;;  %v7693_v3 = vld.sshfl [vmem:[#allocation1] sm:$0xff pattern:$0x73625140]  ;;  %v364_v23 = vld [vmem:[%s7589_s23 + $0x110] sm:$0x3f]  ;;  %s323_s23 = sand.u32 1, %s7461_s10  }
  0x94   : > { %611 = vst [vmem:[#allocation1] ss:$4 sm:$0xff] %v464_v63  ;;  %v474_v38 = vrot.slane %v364_v23, 2  ;;  %s324_s28 = scalar_lea.vmem [#allocation2], %s323_s23  ;;  %s6273_s16 = scalar_lea.sflag [#allocation3], %s323_s23 }
  0x95   : > { %612 = vst [vmem:[#allocation1 + $0x1] ss:$4 sm:$0xff] %v465_v0  ;;  %s6283_s29 = sshll.u32 %s324_s28, 4  ;;  %s6284_s29 = int_to_ptr.vmem [resolvable:$true] %s6283_s29 }
  0x96   : > { %613 = vst [vmem:[#allocation1 + $0x2] ss:$4 sm:$0xff] %v360_v62 }
  0x97   : > { %614 = vst [vmem:[#allocation1 + $0x3] ss:$4 sm:$0xff] %v466_v2  ;;  %v7730_v26 = vld.sshfl [vmem:[#allocation1 + $0x20] sm:$0xff pattern:$0x73625140] }
  0x98   : > { %615 = vst [vmem:[#allocation1 + $0x20] ss:$4 sm:$0xff] %v467_v21 }
  0x99   : > { %616 = vst [vmem:[#allocation1 + $0x21] ss:$4 sm:$0xff] %v361_v19 }
  0x9a   : > { %617 = vst [vmem:[#allocation1 + $0x22] ss:$4 sm:$0xff] %v468_v24 }
  0x9b   : > { %718 = vmatmul.f32.gmra.mxu0 %v7650_v29  ;;  %v475_v29 = vrot.slane %v364_v23, 4  ;;  %618 = vst [vmem:[#allocation1 + $0x23] ss:$4 sm:$0xff] %v469_v25 }
  0x9e   : > { %v7719_v18 = vld.sshfl [vmem:[#allocation1] sm:$0xff pattern:$0x73625140] }
  0x9f   : > { %621 = vst [vmem:[#allocation1] ss:$4 sm:$0xff] %v362_v11 }
  0xa0   : > { %622 = vst [vmem:[#allocation1 + $0x1] ss:$4 sm:$0xff] %v470_v14  ;;  %v6374_v14 = vld [vmem:[%s13541_s3 + $0xe8] sm:$0xff] }
  0xa1   : > { %623 = vst [vmem:[#allocation1 + $0x2] ss:$4 sm:$0xff] %v471_v15  ;;  %v6373_v15 = vld [vmem:[%s13541_s3 + $0xe0] sm:$0xff] }
  0xa2   : > { %624 = vst [vmem:[#allocation1 + $0x3] ss:$4 sm:$0xff] %v363_v17 }
  0xa3   : > { %721 = vmatmul.f32.gmra.mxu0 %v7653_v33  ;;  %v7742_v33 = vld [vmem:[%s13540_s2] ss:$0 sm:$0xff] }
  0xa9   : > { %v7737_v32 = vld.sshfl [vmem:[#allocation1] sm:$0xff pattern:$0x73625140] }
  0xaa   : > { %631 = vst [vmem:[#allocation1] ss:$4 sm:$0xff] %v475_v29 }
  0xab   : > { %724 = vmatmul.f32.gmra.mxu0 %v7657_v39  ;;  %632 = vst [vmem:[#allocation1 + $0x1] ss:$4 sm:$0xff] %v365_v28  ;;  %v620_v39 = vld.sshfl [vmem:[#allocation1 + $0x20] sm:$0xff pattern:$0x73625140] }
  0xac   : > { %633 = vst [vmem:[#allocation1 + $0x2] ss:$4 sm:$0xff] %v476_v30 }
  0xad   : > { %634 = vst [vmem:[#allocation1 + $0x3] ss:$4 sm:$0xff] %v477_v31 }
  0xae   : > { %625 = vst [vmem:[#allocation1 + $0x20] ss:$4 sm:$0xff] %v472_v34 }
  0xaf   : > { %626 = vst [vmem:[#allocation1 + $0x21] ss:$4 sm:$0xff] %v473_v36 }
  0xb0   : > { %v680_v35 = vpop.f32.mrf.mxu0  ;;  %627 = vst [vmem:[#allocation1 + $0x22] ss:$4 sm:$0xff] %v364_v23 }
  0xb1   : > { %v7745_v37 = vadd.f32 %v7742_v33, %v680_v35  ;;  %628 = vst [vmem:[#allocation1 + $0x23] ss:$4 sm:$0xff] %v474_v38  ;;  %v6371_v35 = vld [vmem:[%s13541_s3 + $0xd0] sm:$0xff] }
  0xb3   : > { %727 = vmatmul.f32.gmra.mxu0 %v7659_v42  ;;  %v7749_v40 = vrot.slane %v7745_v37, 2  ;;  %v7752_v41 = vrot.slane %v7745_v37, 6 }
  0xb4   : > { %v7754_v43 = vld.sshfl [vmem:[#allocation1] sm:$0xff pattern:$0x73625140] }
  0xb5   : > { %916 = vst [vmem:[#allocation1] ss:$4 sm:$0xff] %v7745_v37 }
  0xb6   : > { %918 = vst [vmem:[#allocation1 + $0x1] ss:$4 sm:$0xff] %v7749_v40 }
  0xb7   : > { %920 = vst [vmem:[#allocation1 + $0x2] ss:$4 sm:$0xff] %v7752_v41 }
  0xb8   : > { %v683_v44 = vpop.f32.mrf.mxu0  ;;  %v630_v47 = vld.sshfl [vmem:[#allocation1 + $0x20] sm:$0xff pattern:$0x73625140] }
  0xb9   : > { %v7758_v45 = vadd.f32 %v7742_v33, %v683_v44  ;;  %v6369_v44 = vld [vmem:[%s13541_s3 + $0xc0] sm:$0xff] }
  0xbb   : > { %v7763_v42 = vrot.slane %v7758_v45, 4  ;;  %v7766_v46 = vrot.slane %v7758_v45, 6  ;;  %730 = vmatmul.f32.gmra.mxu0 %v7685_v59  ;;  %922 = vst [vmem:[#allocation1 + $0x3] ss:$4 sm:$0xff] %v7758_v45 }
  0xbd   : > { %13806 = vst [vmem:[#allocation5_spill] sm:$0xff] %v7763_v42 }
  0xbe   : > { %924 = vst [vmem:[#allocation1 + $0x20] ss:$4 sm:$0xff] %v7763_v42 }
  0xbf   : > { %926 = vst [vmem:[#allocation1 + $0x21] ss:$4 sm:$0xff] %v7766_v46 }
  0xc0   : > { %v686_v48 = vpop.f32.mrf.mxu0 }
  0xc1   : > { %v7773_v49 = vadd.f32 %v7742_v33, %v686_v48  ;;  %v7918_v48 = vrot.slane %v7758_v45, 2 }
  0xc2   : > { %v931_v50 = vld.sshfl [vmem:[#allocation1] sm:$0xff pattern:$0x73625140] }
  0xc3   : > { %13807 = vst [vmem:[#allocation6_spill] sm:$0xff] %v7773_v49  ;;  %v7776_v51 = vrot.slane %v7773_v49, 2  ;;  %v7779_v52 = vrot.slane %v7773_v49, 4  ;;  %733 = vmatmul.f32.gmra.mxu0 %v7683_v56  ;;  %987 = vmatmul.f32.vlgmr.msra.gmra.mxu1 %v931_v50  ;;  %v1036_v50 = vrot.slane %v7758_v45, 7 }
  0xc4   : > { %13829 = vst [vmem:[#allocation28_spill] sm:$0xff] %v7918_v48 }
  0xc5   : > { %928 = vst [vmem:[#allocation1 + $0x22] ss:$4 sm:$0xff] %v7776_v51 }
  0xc6   : > { %930 = vst [vmem:[#allocation1 + $0x23] ss:$4 sm:$0xff] %v7779_v52 }
  0xc8   : > { %v7784_v53 = vpop.f32.mrf.mxu0 }
  0xcb   : > { %736 = vmatmul.f32.gmra.mxu0 %v7706_v10  ;;  %v6376_v10 = vld [vmem:[%s13541_s3 + $0xf8] sm:$0xff] }
  0xcc   : > { %1211 = vmatpush.msra.mxu2 %v6376_v10 }
  0xcd   : > { %v932_v54 = vld.sshfl [vmem:[#allocation1 + $0x20] sm:$0xff pattern:$0x73625140] }
  0xce   : > { %990 = vmatmul.f32.gmra.mxu1 %v932_v54  ;;  %1212 = vmatpush.msra.mxu2 %v6375_v13  ;;  %v6368_v54 = vld [vmem:[%s13541_s3 + $0xb8] sm:$0xff] }
  0xd0   : > { %v692_v55 = vpop.f32.mrf.mxu0  ;;  %1213 = vmatpush.msra.mxu2 %v6374_v14  ;;  %v6346_v14 = vrot.slane %v7752_v41, 9 }
  0xd1   : > { %v7788_v57 = vadd.f32 %v7742_v33, %v692_v55  ;;  %v13830_v55 = vmov 0 }
  0xd2   : > { %1214 = vmatpush.msra.mxu2 %v6373_v15  ;;  %v13831_v55 = vsel %vm7924_vm6, 4294967295, %v13830_v55 }
  0xd3   : > { %13808 = vst [vmem:[#allocation7_spill] sm:$0xff] %v7788_v57  ;;  %v7791_v58 = vrot.slane %v7788_v57, 4  ;;  %v7794_v56 = vrot.slane %v7788_v57, 6  ;;  %739 = vmatmul.f32.gmra.mxu0 %v7693_v3 }
  0xd4   : > { %13832 = vst [vmem:[#allocation29_spill] sm:$0xff] %v13831_v55 }
  0xd5   : > { %13809 = vst [vmem:[#allocation8_spill] sm:$0xff] %v7791_v58 }
  0xd6   : > { %13810 = vst [vmem:[#allocation9_spill] sm:$0xff] %v7794_v56 }
  0xd7   : > { %933 = vst [vmem:[#allocation1] ss:$4 sm:$0xff] %v7791_v58 }
  0xd8   : > { %934 = vst [vmem:[#allocation1 + $0x1] ss:$4 sm:$0xff] %v7794_v56  ;;  %v695_v59 = vpop.f32.mrf.mxu0 }
  0xd9   : > { %v7800_v60 = vadd.f32 %v7742_v33, %v695_v59 }
  0xdb   : > { %13811 = vst [vmem:[#allocation10_spill] sm:$0xff] %v7800_v60  ;;  %v7803_v61 = vrot.slane %v7800_v60, 2  ;;  %v7806_v62 = vrot.slane %v7800_v60, 4  ;;  %742 = vmatmul.f32.gmra.mxu0 %v7730_v26 }
  0xdd   : > { %13812 = vst [vmem:[#allocation11_spill] sm:$0xff] %v7803_v61 }
  0xde   : > { %13813 = vst [vmem:[#allocation12_spill] sm:$0xff] %v7806_v62 }
  0xdf   : > { %935 = vst [vmem:[#allocation1 + $0x2] ss:$4 sm:$0xff] %v7803_v61 }
  0xe0   : > { %936 = vst [vmem:[#allocation1 + $0x3] ss:$4 sm:$0xff] %v7806_v62  ;;  %v698_v63 = vpop.f32.mrf.mxu0 }
  0xe1   : > { %v7812_v0 = vadd.f32 %v7742_v33, %v698_v63  ;;  %v6345_v63 = vrot.slane %v7745_v37, 9 }
  0xe3   : > { %v7815_v1 = vrot.slane %v7812_v0, 2  ;;  %v7818_v2 = vrot.slane %v7812_v0, 6  ;;  %937 = vst [vmem:[#allocation1 + $0x20] ss:$4 sm:$0xff] %v7812_v0  ;;  %745 = vmatmul.f32.gmra.mxu0 %v7719_v18  ;;  %v6372_v18 = vld [vmem:[%s13541_s3 + $0xd8] sm:$0xff] }
  0xe4   : > { %1215 = vmatpush.msra.mxu2 %v6372_v18  ;;  %v7942_v18 = vsel %vm7924_vm6, %v6346_v14, %v1036_v50 }
  0xe5   : > { %938 = vst [vmem:[#allocation1 + $0x21] ss:$4 sm:$0xff] %v7815_v1 }
  0xe6   : > { %939 = vst [vmem:[#allocation1 + $0x22] ss:$4 sm:$0xff] %v7818_v2  ;;  %1216 = vmatpush.msra.mxu2 %v6371_v35  ;;  %v6349_v35 = vrot.slane %v7791_v58, 9  ;;  %v6367_v58 = vld [vmem:[%s13541_s3 + $0xb0] sm:$0xff] }
  0xe7   : > { %v941_v3 = vld.sshfl [vmem:[#allocation1] sm:$0xff pattern:$0x73625140] }
  0xe8   : > { %993 = vmatmul.f32.gmra.mxu1 %v941_v3  ;;  %v701_v4 = vpop.f32.mrf.mxu0 }
  0xe9   : > { %v7825_v5 = vadd.f32 %v7742_v33, %v701_v4 }
  0xeb   : > { %940 = vst [vmem:[#allocation1 + $0x23] ss:$4 sm:$0xff] %v7825_v5  ;;  %748 = vmatmul.f32.gmra.mxu0 %v620_v39  ;;  %v6370_v39 = vld [vmem:[%s13541_s3 + $0xc8] sm:$0xff] }
  0xec   : > { %1217 = vmatpush.msra.mxu2 %v6370_v39  ;;  %v7963_v39 = vrot.slane %v7800_v60, 6 }
  0xee   : > { %1218 = vmatpush.msra.mxu2 %v6369_v44  ;;  %13834 = vst [vmem:[#allocation31_spill] sm:$0xff] %v7963_v39  ;;  %v6350_v44 = vrot.slane %v7803_v61, 9 }
  0xf0   : > { %v7828_v6 = vpop.f32.mrf.mxu0  ;;  %1219 = vmatpush.msra.mxu2 %v6368_v54 }
  0xf1   : > { %13814 = vst [vmem:[#allocation13_spill] sm:$0xff] %v7828_v6 }
  0xf2   : > { %v942_v7 = vld.sshfl [vmem:[#allocation1 + $0x20] sm:$0xff pattern:$0x73625140]  ;;  %1220 = vmatpush.msra.mxu2 %v6367_v58  ;;  %v6364_v58 = vld [vmem:[%s13541_s3 + $0x98] sm:$0xff] }
  0xf3   : > { %996 = vmatmul.f32.gmra.mxu1 %v942_v7  ;;  %751 = vmatmul.f32.gmra.mxu0 %v7737_v32  ;;  %v1038_v7 = vrot.slane %v1036_v50, 2 }
  0xf8   : > { %v707_v8 = vpop.f32.mrf.mxu0 }
  0xf9   : > { %v7832_v9 = vadd.f32 %v7742_v33, %v707_v8  ;;  %v1039_v8 = vrot.slane %v7918_v48, 7 }
  0xfb   : > { %13815 = vst [vmem:[#allocation14_spill] sm:$0xff] %v7832_v9  ;;  %v7838_v11 = vrot.slane %v7832_v9, 2  ;;  %v7841_v12 = vrot.slane %v7832_v9, 6  ;;  %754 = vmatmul.f32.gmra.mxu0 %v630_v47  ;;  %v13548_v47 = vrot.slane %v7745_v37, 4  ;;  %v7992_v14 = vrot.slane %v7832_v9, 4 }
  0xfc   : > { %943 = vst [vmem:[#allocation1] ss:$4 sm:$0xff] %v7832_v9 }
  0xfd   : > { %13816 = vst [vmem:[#allocation15_spill] sm:$0xff] %v7838_v11  ;;  %v1032_v4 = vrot.slane %v13548_v47, 7 }
  0xfe   : > { %13817 = vst [vmem:[#allocation16_spill] sm:$0xff] %v7841_v12 }
  0xff   : > { %944 = vst [vmem:[#allocation1 + $0x1] ss:$4 sm:$0xff] %v7838_v11 }
 0x100   : > { %945 = vst [vmem:[#allocation1 + $0x2] ss:$4 sm:$0xff] %v7841_v12  ;;  %v710_v16 = vpop.f32.mrf.mxu0 }
 0x101   : > { %v7856_v17 = vadd.f32 %v7742_v33, %v710_v16  ;;  %13839 = vst [vmem:[#allocation36_spill] sm:$0xff] %v7992_v14 }
 0x103   : > { %13818 = vst [vmem:[#allocation17_spill] sm:$0xff] %v7856_v17  ;;  %v7862_v19 = vrot.slane %v7856_v17, 4  ;;  %v7865_v20 = vrot.slane %v7856_v17, 6  ;;  %757 = vmatmul.f32.gmra.mxu0 %v7754_v43  ;;  %v1029_v43 = vrot.slane %v7749_v40, 7 }
 0x104   : > { %946 = vst [vmem:[#allocation1 + $0x3] ss:$4 sm:$0xff] %v7856_v17 }
 0x105   : > { %13819 = vst [vmem:[#allocation18_spill] sm:$0xff] %v7865_v20  ;;  %v1031_v59 = vrot.slane %v1029_v43, 2  ;;  %v1030_v13 = vsel %vm7924_vm6, %v6345_v63, %v1029_v43  ;;  %v1060_v43 = vrot.slane %v7800_v60, 7 }
 0x106   : > { %947 = vst [vmem:[#allocation1 + $0x20] ss:$4 sm:$0xff] %v7862_v19 }
 0x107   : > { %948 = vst [vmem:[#allocation1 + $0x21] ss:$4 sm:$0xff] %v7865_v20  ;;  %v1033_v16 = vsel %vm7924_vm6, %v1031_v59, %v1032_v4  ;;  %v1067_v4 = vrot.slane %v7963_v39, 7 }
 0x108   : > { %v713_v21 = vpop.f32.mrf.mxu0 }
 0x109   : > { %v7872_v22 = vadd.f32 %v7742_v33, %v713_v21 }
 0x10b   : > { %13820 = vst [vmem:[#allocation19_spill] sm:$0xff] %v7872_v22  ;;  %v951_v23 = vld.sshfl [vmem:[#allocation1] sm:$0xff pattern:$0x73625140]  ;;  %v7875_v24 = vrot.slane %v7872_v22, 2  ;;  %v7878_v25 = vrot.slane %v7872_v22, 4 }
 0x10c   : > { %999 = vmatmul.f32.gmra.mxu1 %v951_v23  ;;  %v7949_v23 = vsel %vm7924_vm6, %v1038_v7, %v1039_v8 }
 0x10d   : > { %13821 = vst [vmem:[#allocation20_spill] sm:$0xff] %v7875_v24 }
 0x10e   : > { %13822 = vst [vmem:[#allocation21_spill] sm:$0xff] %v7878_v25 }
 0x10f   : > { %949 = vst [vmem:[#allocation1 + $0x22] ss:$4 sm:$0xff] %v7875_v24 }
 0x110   : > { %950 = vst [vmem:[#allocation1 + $0x23] ss:$4 sm:$0xff] %v7878_v25  ;;  %v7882_v26 = vpop.f32.mrf.mxu0 }
 0x117   : > { %v952_v27 = vld.sshfl [vmem:[#allocation1 + $0x20] sm:$0xff pattern:$0x73625140] }
 0x118   : > { %1002 = vmatmul.f32.gmra.mxu1 %v952_v27  ;;  %v719_v28 = vpop.f32.mrf.mxu0 }
 0x119   : > { %v7885_v29 = vadd.f32 %v7742_v33, %v719_v28  ;;  %v1057_v28 = vrot.slane %v7794_v56, 7 }
 0x11b   : > { %13823 = vst [vmem:[#allocation22_spill] sm:$0xff] %v7885_v29  ;;  %v7888_v30 = vrot.slane %v7885_v29, 4  ;;  %v7891_v31 = vrot.slane %v7885_v29, 6  ;;  %v1059_v50 = vrot.slane %v1057_v28, 2  ;;  %v7969_v59 = vsel %vm7924_vm6, %v6349_v35, %v1057_v28 }
 0x11c   : > { %13835 = vst [vmem:[#allocation32_spill] sm:$0xff] %v7969_v59  ;;  %v1088_v35 = vrot.slane %v7992_v14, 7 }
 0x11d   : > { %13824 = vst [vmem:[#allocation23_spill] sm:$0xff] %v7888_v30 }
 0x11e   : > { %13825 = vst [vmem:[#allocation24_spill] sm:$0xff] %v7891_v31 }
 0x11f   : > { %953 = vst [vmem:[#allocation1] ss:$4 sm:$0xff] %v7888_v30 }
 0x120   : > { %954 = vst [vmem:[#allocation1 + $0x1] ss:$4 sm:$0xff] %v7891_v31  ;;  %v722_v32 = vpop.f32.mrf.mxu0 }
 0x121   : > { %v7896_v34 = vadd.f32 %v7742_v33, %v722_v32  ;;  %v1064_v32 = vrot.slane %v7806_v62, 7 }
 0x123   : > { %13826 = vst [vmem:[#allocation25_spill] sm:$0xff] %v7896_v34  ;;  %v7902_v36 = vrot.slane %v7896_v34, 2  ;;  %v7905_v38 = vrot.slane %v7896_v34, 4  ;;  %v1066_v54 = vrot.slane %v1064_v32, 2  ;;  %v7981_v7 = vsel %vm7924_vm6, %v6350_v44, %v1064_v32 }
 0x124   : > { %13837 = vst [vmem:[#allocation34_spill] sm:$0xff] %v7981_v7  ;;  %v6353_v32 = vrot.slane %v7832_v9, 9 }
 0x125   : > { %13827 = vst [vmem:[#allocation26_spill] sm:$0xff] %v7902_v36  ;;  %v7986_v8 = vsel %vm7924_vm6, %v1066_v54, %v1067_v4  ;;  %v6354_v54 = vrot.slane %v7841_v12, 9 }
 0x126   : > { %13828 = vst [vmem:[#allocation27_spill] sm:$0xff] %v7905_v38 }
 0x127   : > { %955 = vst [vmem:[#allocation1 + $0x2] ss:$4 sm:$0xff] %v7902_v36 }
 0x128   : > { %956 = vst [vmem:[#allocation1 + $0x3] ss:$4 sm:$0xff] %v7905_v38  ;;  %v725_v3 = vpop.f32.mrf.mxu0 }
 0x129   : > { %v7933_v10 = vadd.f32 %v7742_v33, %v725_v3  ;;  %v7975_v3 = vsel %vm7924_vm6, %v1059_v50, %v1060_v43  ;;  %13838 = vst [vmem:[#allocation35_spill] sm:$0xff] %v7986_v8 }
 0x12a   : > { %13836 = vst [vmem:[#allocation33_spill] sm:$0xff] %v7975_v3 }
 0x12b   : > { %v7945_v21 = vrot.slane %v7933_v10, 2  ;;  %v7953_v27 = vrot.slane %v7933_v10, 6  ;;  %957 = vst [vmem:[#allocation1 + $0x20] ss:$4 sm:$0xff] %v7933_v10 }
 0x12d   : > { %13833 = vst [vmem:[#allocation30_spill] sm:$0xff] %v7953_v27 }
 0x12e   : > { %958 = vst [vmem:[#allocation1 + $0x21] ss:$4 sm:$0xff] %v7945_v21 }
 0x12f   : > { %v961_v15 = vld.sshfl [vmem:[#allocation1] sm:$0xff pattern:$0x73625140]  ;;  %959 = vst [vmem:[#allocation1 + $0x22] ss:$4 sm:$0xff] %v7953_v27 }
 0x130   : > { %1156 = vst [vmem:[#allocation1] ss:$4 sm:$0xff] %v1030_v13  ;;  %1005 = vmatmul.f32.gmra.mxu1 %v961_v15  ;;  %v1085_v13 = vrot.slane %v7838_v11, 7  ;;  %v7995_v15 = vrot.slane %v7856_v17, 2 }
 0x131   : > { %1158 = vst [vmem:[#allocation1 + $0x1] ss:$4 sm:$0xff] %v1033_v16  ;;  %v1092_v16 = vrot.slane %v7856_v17, 7 }
 0x132   : > { %1160 = vst [vmem:[#allocation1 + $0x2] ss:$4 sm:$0xff] %v7942_v18  ;;  %v1087_v28 = vrot.slane %v1085_v13, 2  ;;  %v1095_v44 = vrot.slane %v7995_v15, 7  ;;  %v8003_v50 = vsel %vm7924_vm6, %v6353_v32, %v1085_v13  ;;  %v1113_v32 = vrot.slane %v7891_v31, 7 }
 0x133   : > { %1162 = vst [vmem:[#allocation1 + $0x3] ss:$4 sm:$0xff] %v7949_v23  ;;  %v1094_v43 = vrot.slane %v1092_v16, 2 }
 0x134   : > { %13840 = vst [vmem:[#allocation37_spill] sm:$0xff] %v7995_v15  ;;  %v8010_v47 = vsel %vm7924_vm6, %v1087_v28, %v1088_v35  ;;  %v1120_v28 = vrot.slane %v7905_v38, 7  ;;  %v6357_v35 = vrot.slane %v7888_v30, 9 }
 0x135   : > { %13841 = vst [vmem:[#allocation38_spill] sm:$0xff] %v8003_v50  ;;  %v8020_v13 = vsel %vm7924_vm6, %v1094_v43, %v1095_v44 }
 0x136   : > { %13842 = vst [vmem:[#allocation39_spill] sm:$0xff] %v8010_v47  ;;  %v1122_v43 = vrot.slane %v1120_v28, 2  ;;  %v8034_v44 = vsel %vm7924_vm6, %v6357_v35, %v1113_v32 }
 0x137   : > { %13844 = vst [vmem:[#allocation41_spill] sm:$0xff] %v8020_v13 }
 0x138   : > { %13846 = vst [vmem:[#allocation43_spill] sm:$0xff] %v8034_v44 }
 0x13a   : > { %v7971_v63 = vld.sshfl [vmem:[#allocation1] sm:$0xff pattern:$0x73625140] }
 0x13b   : > { %1173 = vst [vmem:[#allocation1] ss:$4 sm:$0xff] %v7969_v59 }
 0x13c   : > { %1174 = vst [vmem:[#allocation1 + $0x1] ss:$4 sm:$0xff] %v7975_v3  ;;  %v8015_v3 = vsel %vm7924_vm6, %v6354_v54, %v1092_v16  ;;  %v1116_v16 = vrot.slane %v7896_v34, 7  ;;  %v6358_v54 = vrot.slane %v7902_v36, 9 }
 0x13d   : > { %1175 = vst [vmem:[#allocation1 + $0x2] ss:$4 sm:$0xff] %v7981_v7 }
 0x13e   : > { %1176 = vst [vmem:[#allocation1 + $0x3] ss:$4 sm:$0xff] %v7986_v8  ;;  %v8049_v29 = vsel %vm7924_vm6, %v6358_v54, %v1120_v28  ;;  %v6365_v28 = vld [vmem:[%s13541_s3 + $0xa0] sm:$0xff]  ;;  %v13850_v54 = vrot.slane %v7745_v37, 4  ;;  %v1046_v37 = vrot.slane %v7773_v49, 7 }
 0x13f   : > { %13843 = vst [vmem:[#allocation40_spill] sm:$0xff] %v8015_v3 }
 0x140   : > { %13848 = vst [vmem:[#allocation45_spill] sm:$0xff] %v8049_v29 }
 0x145   : > { %v8006_v4 = vld.sshfl [vmem:[#allocation1] sm:$0xff pattern:$0x73625140] }
 0x146   : > { %1183 = vst [vmem:[#allocation1] ss:$4 sm:$0xff] %v8003_v50  ;;  %v8028_v50 = vrot.slane %v7896_v34, 6 }
 0x147   : > { %1184 = vst [vmem:[#allocation1 + $0x1] ss:$4 sm:$0xff] %v8010_v47  ;;  %v1115_v47 = vrot.slane %v1113_v32, 2 }
 0x148   : > { %1185 = vst [vmem:[#allocation1 + $0x2] ss:$4 sm:$0xff] %v8015_v3  ;;  %v1123_v30 = vrot.slane %v8028_v50, 7 }
 0x149   : > { %1186 = vst [vmem:[#allocation1 + $0x3] ss:$4 sm:$0xff] %v8020_v13  ;;  %v8040_v9 = vsel %vm7924_vm6, %v1115_v47, %v1116_v16  ;;  %v6366_v47 = vld [vmem:[%s13541_s3 + $0xa8] sm:$0xff] }
 0x14a   : > { %13845 = vst [vmem:[#allocation42_spill] sm:$0xff] %v8028_v50  ;;  %v8054_v32 = vsel %vm7924_vm6, %v1122_v43, %v1123_v30  ;;  %1221 = vmatpush.msra.mxu2 %v6366_v47  ;;  %v728_v30 = vpop.f32.mrf.mxu0  ;;  %v1043_v43 = vrot.slane %v7766_v46, 7  ;;  %v1050_v47 = vrot.slane %v7779_v52, 7 }
 0x14b   : > { %13847 = vst [vmem:[#allocation44_spill] sm:$0xff] %v8040_v9  ;;  %v8071_v16 = vadd.f32 %v7742_v33, %v728_v30 }
 0x14c   : > { %13849 = vst [vmem:[#allocation46_spill] sm:$0xff] %v8054_v32  ;;  %1222 = vmatpush.msra.mxu2 %v6365_v28  ;;  %v6347_v28 = vrot.slane %v7763_v42, 9 }
 0x14d   : > { %960 = vst [vmem:[#allocation1 + $0x23] ss:$4 sm:$0xff] %v8071_v16 }
 0x14e   : > { %1223 = vmatpush.msra.mxu2 %v6364_v58  ;;  %v8093_v57 = vsel %vm7924_vm6, %v6347_v28, %v1043_v43  ;;  %v1071_v28 = vrot.slane %v7815_v1, 7 }
 0x150   : > { %v8036_v59 = vld.sshfl [vmem:[#allocation1] sm:$0xff pattern:$0x73625140] }
 0x151   : > { %1193 = vst [vmem:[#allocation1] ss:$4 sm:$0xff] %v8034_v44  ;;  %v1052_v44 = vrot.slane %v1050_v47, 2 }
 0x152   : > { %1194 = vst [vmem:[#allocation1 + $0x1] ss:$4 sm:$0xff] %v8040_v9  ;;  %v1045_v9 = vrot.slane %v1043_v43, 2 }
 0x153   : > { %1195 = vst [vmem:[#allocation1 + $0x2] ss:$4 sm:$0xff] %v8049_v29 }
 0x154   : > { %1196 = vst [vmem:[#allocation1 + $0x3] ss:$4 sm:$0xff] %v8054_v32  ;;  %v962_v30 = vld.sshfl [vmem:[#allocation1 + $0x20] sm:$0xff pattern:$0x73625140]  ;;  %v8098_v6 = vsel %vm7924_vm6, %v1045_v9, %v1046_v37  ;;  %v8115_v9 = vrot.slane %v7812_v0, 4 }
 0x155   : > { %1008 = vmatmul.f32.gmra.mxu1 %v962_v30  ;;  %1164 = vst [vmem:[#allocation1 + $0x20] ss:$4 sm:$0xff] %v8093_v57  ;;  %v8118_v37 = vrot.slane %v7825_v5, 2 }
 0x156   : > { %1166 = vst [vmem:[#allocation1 + $0x21] ss:$4 sm:$0xff] %v8098_v6 }
 0x157   : > { %13853 = vst [vmem:[#allocation49_spill] sm:$0xff] %v8115_v9 }
 0x15b   : > { %v8067_v35 = vld.sshfl [vmem:[#allocation1] sm:$0xff pattern:$0x73625140] }
 0x15c   : > { %1277 = vst [vmem:[#allocation1] ss:$4 sm:$0xff] %v7749_v40  ;;  %v8082_v40 = vrot.slane %v7773_v49, 6 }
 0x15d   : > { %1279 = vst [vmem:[#allocation1 + $0x1] ss:$4 sm:$0xff] %v13850_v54  ;;  %v6348_v54 = vrot.slane %v7776_v51, 9 }
 0x15e   : > { %1281 = vst [vmem:[#allocation1 + $0x2] ss:$4 sm:$0xff] %v7758_v45 }
 0x15f   : > { %1283 = vst [vmem:[#allocation1 + $0x3] ss:$4 sm:$0xff] %v7918_v48  ;;  %v8104_v30 = vsel %vm7924_vm6, %v6348_v54, %v1050_v47  ;;  %v1078_v47 = vrot.slane %v7825_v5, 7  ;;  %v6352_v48 = vrot.slane %v7818_v2, 9 }
 0x160   : > { %13851 = vst [vmem:[#allocation47_spill] sm:$0xff] %v8104_v30 }
 0x161   : > { %1168 = vst [vmem:[#allocation1 + $0x22] ss:$4 sm:$0xff] %v8104_v30  ;;  %v1081_v30 = vrot.slane %v8118_v37, 7 }
 0x166   : > { %v8084_v58 = vld.sshfl [vmem:[#allocation1] sm:$0xff pattern:$0x73625140] }
 0x167   : > { %1294 = vst [vmem:[#allocation1] ss:$4 sm:$0xff] %v7794_v56  ;;  %v1053_v56 = vrot.slane %v8082_v40, 7 }
 0x168   : > { %1295 = vst [vmem:[#allocation1 + $0x1] ss:$4 sm:$0xff] %v7800_v60  ;;  %v1073_v60 = vrot.slane %v1071_v28, 2 }
 0x169   : > { %1296 = vst [vmem:[#allocation1 + $0x2] ss:$4 sm:$0xff] %v7806_v62  ;;  %v8109_v43 = vsel %vm7924_vm6, %v1052_v44, %v1053_v56  ;;  %v6351_v56 = vrot.slane %v7812_v0, 9  ;;  %v1074_v44 = vrot.slane %v8115_v9, 7 }
 0x16a   : > { %1297 = vst [vmem:[#allocation1 + $0x3] ss:$4 sm:$0xff] %v7963_v39 }
 0x16b   : > { %13852 = vst [vmem:[#allocation48_spill] sm:$0xff] %v8109_v43  ;;  %v8131_v39 = vsel %vm7924_vm6, %v6351_v56, %v1071_v28  ;;  %v1099_v56 = vrot.slane %v7865_v20, 7 }
 0x16c   : > { %1170 = vst [vmem:[#allocation1 + $0x23] ss:$4 sm:$0xff] %v8109_v43  ;;  %v1080_v43 = vrot.slane %v1078_v47, 2 }
 0x16e   : > { %v8147_v28 = vsel %vm7924_vm6, %v1080_v43, %v1081_v30  ;;  %v8160_v30 = vrot.slane %v7872_v22, 6  ;;  %v1102_v43 = vrot.slane %v7872_v22, 7 }
 0x16f   : > { %13856 = vst [vmem:[#allocation52_spill] sm:$0xff] %v8147_v28 }
 0x170   : > { %13858 = vst [vmem:[#allocation54_spill] sm:$0xff] %v8160_v30 }
 0x171   : > { %v8121_v54 = vld.sshfl [vmem:[#allocation1] sm:$0xff pattern:$0x73625140] }
 0x172   : > { %13854 = vst [vmem:[#allocation50_spill] sm:$0xff] %v8121_v54  ;;  %v8137_v54 = vsel %vm7924_vm6, %v1073_v60, %v1074_v44  ;;  %v1106_v60 = vrot.slane %v7878_v25, 7  ;;  %v6363_v44 = vld [vmem:[%s13541_s3 + $0x90] sm:$0xff] }
 0x173   : > { %1304 = vst [vmem:[#allocation1] ss:$4 sm:$0xff] %v7838_v11  ;;  %v1172_v11 = vld.sshfl [vmem:[#allocation1 + $0x20] sm:$0xff pattern:$0x73625140]  ;;  %1224 = vmatpush.msra.mxu2 %v6363_v44 }
 0x174   : > { %1305 = vst [vmem:[#allocation1 + $0x1] ss:$4 sm:$0xff] %v7992_v14  ;;  %v8142_v14 = vsel %vm7924_vm6, %v6352_v48, %v1078_v47  ;;  %v6355_v48 = vrot.slane %v7862_v19, 9  ;;  %v1108_v32 = vrot.slane %v1106_v60, 2  ;;  %v6361_v44 = vld [vmem:[%s13541_s3 + $0x80] sm:$0xff] }
 0x175   : > { %1306 = vst [vmem:[#allocation1 + $0x2] ss:$4 sm:$0xff] %v7856_v17 }
 0x176   : > { %1307 = vst [vmem:[#allocation1 + $0x3] ss:$4 sm:$0xff] %v7995_v15  ;;  %v1101_v15 = vrot.slane %v1099_v56, 2 }
 0x177   : > { %1177 = vst [vmem:[#allocation1 + $0x20] ss:$4 sm:$0xff] %v8131_v39 }
 0x178   : > { %13855 = vst [vmem:[#allocation51_spill] sm:$0xff] %v8142_v14 }
 0x179   : > { %1178 = vst [vmem:[#allocation1 + $0x21] ss:$4 sm:$0xff] %v8137_v54 }
 0x17a   : > { %1179 = vst [vmem:[#allocation1 + $0x22] ss:$4 sm:$0xff] %v8142_v14  ;;  %v6356_v14 = vrot.slane %v7875_v24, 9  ;;  %v6392_v24 = vld [vmem:[%s13541_s3 + $0x178] sm:$0xff] }
 0x17b   : > { %1180 = vst [vmem:[#allocation1 + $0x23] ss:$4 sm:$0xff] %v8147_v28  ;;  %v6362_v28 = vld [vmem:[%s13541_s3 + $0x88] sm:$0xff]  ;;  %1332 = vmatpush.msra.mxu3 %v6392_v24 }
 0x17c   : > { %1225 = vmatpush.msra.mxu2 %v6362_v28  ;;  %v1109_v28 = vrot.slane %v8160_v30, 7 }
 0x17d   : > { %v8157_v47 = vld.sshfl [vmem:[#allocation1] sm:$0xff pattern:$0x73625140] }
 0x17e   : > { %13857 = vst [vmem:[#allocation53_spill] sm:$0xff] %v8157_v47  ;;  %1226 = vmatpush.msra.mxu2 %v6361_v44 }
 0x17f   : > { %1314 = vst [vmem:[#allocation1] ss:$4 sm:$0xff] %v7891_v31  ;;  %v8175_v31 = vsel %vm7924_vm6, %v6355_v48, %v1099_v56  ;;  %1227 = vmatmul.f32.vlgmr.msra.gmra.mxu2 %v7971_v63  ;;  %v8190_v56 = vsel %vm7924_vm6, %v6356_v14, %v1106_v60  ;;  %v1127_v48 = vrot.slane %v7945_v21, 7  ;;  %v8201_v63 = vrot.slane %v7933_v10, 4 }
 0x180   : > { %1315 = vst [vmem:[#allocation1 + $0x1] ss:$4 sm:$0xff] %v7896_v34  ;;  %v8180_v34 = vsel %vm7924_vm6, %v1101_v15, %v1102_v43  ;;  %v8195_v15 = vsel %vm7924_vm6, %v1108_v32, %v1109_v28  ;;  %v8204_v43 = vrot.slane %v8071_v16, 2  ;;  %v1134_v14 = vrot.slane %v8071_v16, 7 }
 0x181   : > { %1316 = vst [vmem:[#allocation1 + $0x2] ss:$4 sm:$0xff] %v7905_v38  ;;  %v1129_v24 = vrot.slane %v1127_v48, 2  ;;  %v6359_v32 = vrot.slane %v7933_v10, 9  ;;  %v1130_v44 = vrot.slane %v8201_v63, 7 }
 0x182   : > { %13859 = vst [vmem:[#allocation55_spill] sm:$0xff] %v8175_v31  ;;  %v1182_v47 = vld.sshfl [vmem:[#allocation1 + $0x20] sm:$0xff pattern:$0x73625140]  ;;  %v1136_v28 = vrot.slane %v1134_v14, 2 }
 0x183   : > { %1317 = vst [vmem:[#allocation1 + $0x3] ss:$4 sm:$0xff] %v8028_v50 }
 0x184   : > { %13860 = vst [vmem:[#allocation56_spill] sm:$0xff] %v8180_v34 }
 0x185   : > { %1187 = vst [vmem:[#allocation1 + $0x20] ss:$4 sm:$0xff] %v8175_v31 }
 0x186   : > { %13861 = vst [vmem:[#allocation57_spill] sm:$0xff] %v8190_v56 }
 0x187   : > { %1188 = vst [vmem:[#allocation1 + $0x21] ss:$4 sm:$0xff] %v8180_v34  ;;  %1230 = vmatmul.f32.gmra.mxu2 %v1172_v11 }
 0x188   : > { %13862 = vst [vmem:[#allocation58_spill] sm:$0xff] %v8195_v15 }
 0x189   : > { %1189 = vst [vmem:[#allocation1 + $0x22] ss:$4 sm:$0xff] %v8190_v56  ;;  %v8218_v56 = vsel %vm7924_vm6, %v6359_v32, %v1127_v48 }
 0x18a   : > { %1190 = vst [vmem:[#allocation1 + $0x23] ss:$4 sm:$0xff] %v8195_v15  ;;  %v8207_v60 = vld.sshfl [vmem:[#allocation1] sm:$0xff pattern:$0x73625140]  ;;  %v1137_v15 = vrot.slane %v8204_v43, 7 }
 0x18b   : > { %13863 = vst [vmem:[#allocation59_spill] sm:$0xff] %v8201_v63 }
 0x18c   : > { %13864 = vst [vmem:[#allocation60_spill] sm:$0xff] %v8207_v60  ;;  %v8223_v60 = vsel %vm7924_vm6, %v1129_v24, %v1130_v44  ;;  %v6390_v24 = vld [vmem:[%s13541_s3 + $0x168] sm:$0xff]  ;;  %v6389_v44 = vld [vmem:[%s13541_s3 + $0x160] sm:$0xff] }
 0x18d   : > { %1398 = vst [vmem:[#allocation1] ss:$4 sm:$0xff] %v7752_v41  ;;  %v6360_v41 = vrot.slane %v7953_v27, 9 }
 0x18e   : > { %1400 = vst [vmem:[#allocation1 + $0x1] ss:$4 sm:$0xff] %v7758_v45 }
 0x18f   : > { %1402 = vst [vmem:[#allocation1 + $0x2] ss:$4 sm:$0xff] %v7763_v42  ;;  %v8228_v11 = vsel %vm7924_vm6, %v6360_v41, %v1134_v14  ;;  %v8233_v42 = vsel %vm7924_vm6, %v1136_v28, %v1137_v15  ;;  %1233 = vmatmul.f32.gmra.mxu2 %v8006_v4  ;;  %v6385_v41 = vld [vmem:[%s13541_s3 + $0x140] sm:$0xff] }
 0x190   : > { %1404 = vst [vmem:[#allocation1 + $0x3] ss:$4 sm:$0xff] %v7766_v46 }
 0x191   : > { %13865 = vst [vmem:[#allocation61_spill] sm:$0xff] %v8218_v56  ;;  %v1192_v50 = vld.sshfl [vmem:[#allocation1 + $0x20] sm:$0xff pattern:$0x73625140] }
 0x192   : > { %13866 = vst [vmem:[#allocation62_spill] sm:$0xff] %v8223_v60 }
 0x193   : > { %1197 = vst [vmem:[#allocation1 + $0x20] ss:$4 sm:$0xff] %v8218_v56 }
 0x194   : > { %13867 = vst [vmem:[#allocation63_spill] sm:$0xff] %v8228_v11 }
 0x195   : > { %1198 = vst [vmem:[#allocation1 + $0x21] ss:$4 sm:$0xff] %v8223_v60 }
 0x196   : > { %13868 = vst [vmem:[#allocation64_spill] sm:$0xff] %v8233_v42 }
 0x197   : > { %1199 = vst [vmem:[#allocation1 + $0x22] ss:$4 sm:$0xff] %v8228_v11  ;;  %v8238_v48 = vld.sshfl [vmem:[#allocation1] sm:$0xff pattern:$0x73625140]  ;;  %1236 = vmatmul.f32.gmra.mxu2 %v1182_v47 }
 0x198   : > { %1200 = vst [vmem:[#allocation1 + $0x23] ss:$4 sm:$0xff] %v8233_v42 }
 0x199   : > { %1415 = vst [vmem:[#allocation1] ss:$4 sm:$0xff] %v7803_v61 }
 0x19a   : > { %1416 = vst [vmem:[#allocation1 + $0x1] ss:$4 sm:$0xff] %v7806_v62 }
 0x19b   : > { %1417 = vst [vmem:[#allocation1 + $0x2] ss:$4 sm:$0xff] %v7812_v0 }
 0x19c   : > { %1418 = vst [vmem:[#allocation1 + $0x3] ss:$4 sm:$0xff] %v7815_v1 }
 0x19f   : > { %v1202_v14 = vld.sshfl [vmem:[#allocation1 + $0x20] sm:$0xff pattern:$0x73625140]  ;;  %1239 = vmatmul.f32.gmra.mxu2 %v8036_v59 }
 0x1a0   : > { %1285 = vst [vmem:[#allocation1 + $0x20] ss:$4 sm:$0xff] %v7766_v46 }
 0x1a1   : > { %1287 = vst [vmem:[#allocation1 + $0x21] ss:$4 sm:$0xff] %v7773_v49 }
 0x1a2   : > { %1289 = vst [vmem:[#allocation1 + $0x22] ss:$4 sm:$0xff] %v7779_v52 }
 0x1a3   : > { %1291 = vst [vmem:[#allocation1 + $0x23] ss:$4 sm:$0xff] %v8082_v40  ;;  %v8248_v4 = vld.sshfl [vmem:[#allocation1] sm:$0xff pattern:$0x73625140] }
 0x1a4   : > { %1425 = vst [vmem:[#allocation1] ss:$4 sm:$0xff] %v7841_v12 }
 0x1a5   : > { %1426 = vst [vmem:[#allocation1 + $0x1] ss:$4 sm:$0xff] %v7856_v17 }
 0x1a6   : > { %1427 = vst [vmem:[#allocation1 + $0x2] ss:$4 sm:$0xff] %v7862_v19 }
 0x1a7   : > { %1428 = vst [vmem:[#allocation1 + $0x3] ss:$4 sm:$0xff] %v7865_v20  ;;  %1242 = vmatmul.f32.gmra.mxu2 %v1192_v50  ;;  %v6391_v50 = vld [vmem:[%s13541_s3 + $0x170] sm:$0xff] }
 0x1a8   : > { %1333 = vmatpush.msra.mxu3 %v6391_v50 }
 0x1aa   : > { %v8254_v15 = vld.sshfl [vmem:[#allocation1 + $0x20] sm:$0xff pattern:$0x73625140]  ;;  %1334 = vmatpush.msra.mxu3 %v6390_v24  ;;  %v8315_v24 = vadd.f32 %v7742_v33, %v7784_v53 }
 0x1ab   : > { %1298 = vst [vmem:[#allocation1 + $0x20] ss:$4 sm:$0xff] %v7815_v1 }
 0x1ac   : > { %1299 = vst [vmem:[#allocation1 + $0x21] ss:$4 sm:$0xff] %v8115_v9  ;;  %1335 = vmatpush.msra.mxu3 %v6389_v44  ;;  %v6383_v44 = vld [vmem:[%s13541_s3 + $0x130] sm:$0xff]  ;;  %v8330_v53 = vrot.slane %v8315_v24, 2 }
 0x1ad   : > { %1300 = vst [vmem:[#allocation1 + $0x22] ss:$4 sm:$0xff] %v7825_v5 }
 0x1ae   : > { %1301 = vst [vmem:[#allocation1 + $0x23] ss:$4 sm:$0xff] %v8118_v37  ;;  %v8261_v47 = vld.sshfl [vmem:[#allocation1] sm:$0xff pattern:$0x73625140]  ;;  %v1504_v12 = vrot.slane %v8330_v53, 7 }
 0x1af   : > { %1435 = vst [vmem:[#allocation1] ss:$4 sm:$0xff] %v7902_v36  ;;  %1245 = vmatmul.f32.gmra.mxu2 %v8067_v35  ;;  %v6388_v35 = vld [vmem:[%s13541_s3 + $0x158] sm:$0xff]  ;;  %v13875_v36 = vld [vmem:[#allocation28_spill] sm:$0xff] }
 0x1b0   : > { %1436 = vst [vmem:[#allocation1 + $0x1] ss:$4 sm:$0xff] %v7905_v38  ;;  %1336 = vmatpush.msra.mxu3 %v6388_v35 }
 0x1b1   : > { %1437 = vst [vmem:[#allocation1 + $0x2] ss:$4 sm:$0xff] %v7933_v10 }
 0x1b2   : > { %1438 = vst [vmem:[#allocation1 + $0x3] ss:$4 sm:$0xff] %v7945_v21 }
 0x1b5   : > { %v8267_v59 = vld.sshfl [vmem:[#allocation1 + $0x20] sm:$0xff pattern:$0x73625140] }
 0x1b6   : > { %1308 = vst [vmem:[#allocation1 + $0x20] ss:$4 sm:$0xff] %v7865_v20 }
 0x1b7   : > { %1309 = vst [vmem:[#allocation1 + $0x21] ss:$4 sm:$0xff] %v7872_v22  ;;  %1248 = vmatmul.f32.gmra.mxu2 %v1202_v14  ;;  %v6384_v14 = vld [vmem:[%s13541_s3 + $0x138] sm:$0xff] }
 0x1b8   : > { %1310 = vst [vmem:[#allocation1 + $0x22] ss:$4 sm:$0xff] %v7878_v25 }
 0x1b9   : > { %1311 = vst [vmem:[#allocation1 + $0x23] ss:$4 sm:$0xff] %v8160_v30  ;;  %v8280_v32 = vld.sshfl [vmem:[#allocation1] sm:$0xff pattern:$0x73625140] }
 0x1ba   : > { %1547 = vst [vmem:[#allocation1] ss:$4 sm:$0xff] %v7942_v18  ;;  %v6387_v18 = vld [vmem:[%s13541_s3 + $0x150] sm:$0xff] }
 0x1bb   : > { %1549 = vst [vmem:[#allocation1 + $0x1] ss:$4 sm:$0xff] %v7949_v23  ;;  %1337 = vmatpush.msra.mxu3 %v6387_v18  ;;  %v6386_v23 = vld [vmem:[%s13541_s3 + $0x148] sm:$0xff] }
 0x1bc   : > { %1551 = vst [vmem:[#allocation1 + $0x2] ss:$4 sm:$0xff] %v8093_v57  ;;  %v6382_v18 = vld [vmem:[%s13541_s3 + $0x128] sm:$0xff] }
 0x1bd   : > { %1553 = vst [vmem:[#allocation1 + $0x3] ss:$4 sm:$0xff] %v8098_v6  ;;  %1338 = vmatpush.msra.mxu3 %v6386_v23  ;;  %v6381_v23 = vld [vmem:[%s13541_s3 + $0x120] sm:$0xff] }
 0x1bf   : > { %1339 = vmatpush.msra.mxu3 %v6385_v41  ;;  %v6380_v41 = vld [vmem:[%s13541_s3 + $0x118] sm:$0xff] }
 0x1c0   : > { %v8292_v28 = vld.sshfl [vmem:[#allocation1 + $0x20] sm:$0xff pattern:$0x73625140] }
 0x1c1   : > { %1318 = vst [vmem:[#allocation1 + $0x20] ss:$4 sm:$0xff] %v7945_v21  ;;  %1340 = vmatpush.msra.mxu3 %v6384_v14  ;;  %v6379_v14 = vld [vmem:[%s13541_s3 + $0x110] sm:$0xff] }
 0x1c2   : > { %1319 = vst [vmem:[#allocation1 + $0x21] ss:$4 sm:$0xff] %v8201_v63 }
 0x1c3   : > { %1320 = vst [vmem:[#allocation1 + $0x22] ss:$4 sm:$0xff] %v8071_v16  ;;  %1341 = vmatpush.msra.mxu3 %v6383_v44 }
 0x1c4   : > { %1321 = vst [vmem:[#allocation1 + $0x23] ss:$4 sm:$0xff] %v8204_v43  ;;  %v8307_v50 = vld.sshfl [vmem:[#allocation1] sm:$0xff pattern:$0x73625140] }
 0x1c5   : > { %1564 = vst [vmem:[#allocation1] ss:$4 sm:$0xff] %v7981_v7  ;;  %1342 = vmatpush.msra.mxu3 %v6382_v18  ;;  %v6378_v18 = vld [vmem:[%s13541_s3 + $0x108] sm:$0xff]  ;;  %v13871_v7 = vld [vmem:[#allocation46_spill] sm:$0xff] }
 0x1c6   : > { %1565 = vst [vmem:[#allocation1 + $0x1] ss:$4 sm:$0xff] %v7986_v8  ;;  %v8386_v8 = vadd.f32 %v7742_v33, %v7882_v26  ;;  %v6403_v33 = vld [vmem:[%s13541_s3 + $0x1d0] sm:$0xff]  ;;  %v13872_v26 = vld [vmem:[#allocation20_spill] sm:$0xff] }
 0x1c7   : > { %1566 = vst [vmem:[#allocation1 + $0x2] ss:$4 sm:$0xff] %v8131_v39  ;;  %1343 = vmatpush.msra.mxu3 %v6381_v23  ;;  %v6377_v23 = vld [vmem:[%s13541_s3 + $0x100] sm:$0xff] }
 0x1c8   : > { %1567 = vst [vmem:[#allocation1 + $0x3] ss:$4 sm:$0xff] %v8137_v54 }
 0x1c9   : > { %1344 = vmatpush.msra.mxu3 %v6380_v41  ;;  %13870 = vst [vmem:[#allocation66_spill] sm:$0xff] %v8386_v8 }
 0x1cb   : > { %v8323_v35 = vld.sshfl [vmem:[#allocation1 + $0x20] sm:$0xff pattern:$0x73625140]  ;;  %1345 = vmatpush.msra.mxu3 %v6379_v14  ;;  %v8359_v14 = vrot.slane %v7825_v5, 4 }
 0x1cc   : > { %1406 = vst [vmem:[#allocation1 + $0x20] ss:$4 sm:$0xff] %v7776_v51 }
 0x1cd   : > { %1408 = vst [vmem:[#allocation1 + $0x21] ss:$4 sm:$0xff] %v7779_v52  ;;  %1346 = vmatpush.msra.mxu3 %v6378_v18  ;;  %v6408_v18 = vld [vmem:[%s13541_s3 + $0x1f8] sm:$0xff] }
 0x1ce   : > { %1410 = vst [vmem:[#allocation1 + $0x22] ss:$4 sm:$0xff] %v8315_v24  ;;  %1453 = vmatpush.msrb.mxu1 %v6408_v18  ;;  %v6405_v18 = vld [vmem:[%s13541_s3 + $0x1e0] sm:$0xff] }
 0x1cf   : > { %1412 = vst [vmem:[#allocation1 + $0x23] ss:$4 sm:$0xff] %v8330_v53  ;;  %v8344_v44 = vld.sshfl [vmem:[#allocation1] sm:$0xff pattern:$0x73625140]  ;;  %1347 = vmatpush.msra.mxu3 %v6377_v23  ;;  %v6407_v23 = vld [vmem:[%s13541_s3 + $0x1f0] sm:$0xff] }
 0x1d0   : > { %1574 = vst [vmem:[#allocation1] ss:$4 sm:$0xff] %v8015_v3  ;;  %1348 = vmatmul.f32.vlgmr.msra.gmra.mxu3 %v8084_v58  ;;  %1454 = vmatpush.msrb.mxu1 %v6407_v23  ;;  %v6406_v58 = vld [vmem:[%s13541_s3 + $0x1e8] sm:$0xff]  ;;  %v6404_v23 = vld [vmem:[%s13541_s3 + $0x1d8] sm:$0xff] }
 0x1d1   : > { %1575 = vst [vmem:[#allocation1 + $0x1] ss:$4 sm:$0xff] %v8020_v13  ;;  %v8367_v13 = vrot.slane %v7825_v5, 6 }
 0x1d2   : > { %1576 = vst [vmem:[#allocation1 + $0x2] ss:$4 sm:$0xff] %v8175_v31  ;;  %1455 = vmatpush.msrb.mxu1 %v6406_v58 }
 0x1d3   : > { %1577 = vst [vmem:[#allocation1 + $0x3] ss:$4 sm:$0xff] %v8180_v34  ;;  %v13880_v34 = vld [vmem:[#allocation47_spill] sm:$0xff] }
 0x1d4   : > { %13869 = vst [vmem:[#allocation65_spill] sm:$0xff] %v8359_v14  ;;  %1456 = vmatpush.msrb.mxu1 %v6405_v18  ;;  %v8402_v18 = vrot.slane %v8386_v8, 2 }
 0x1d6   : > { %v8356_v41 = vld.sshfl [vmem:[#allocation1 + $0x20] sm:$0xff pattern:$0x73625140]  ;;  %1457 = vmatpush.msrb.mxu1 %v6404_v23  ;;  %13873 = vst [vmem:[#allocation67_spill] sm:$0xff] %v8402_v18 }
 0x1d7   : > { %1419 = vst [vmem:[#allocation1 + $0x20] ss:$4 sm:$0xff] %v7818_v2  ;;  %v6401_v23 = vld [vmem:[%s13541_s3 + $0x1c0] sm:$0xff] }
 0x1d8   : > { %1420 = vst [vmem:[#allocation1 + $0x21] ss:$4 sm:$0xff] %v7825_v5  ;;  %1351 = vmatmul.f32.gmra.mxu3 %v8254_v15  ;;  %1458 = vmatpush.msrb.mxu1 %v6403_v33  ;;  %v6402_v15 = vld [vmem:[%s13541_s3 + $0x1c8] sm:$0xff]  ;;  %v6400_v33 = vld [vmem:[%s13541_s3 + $0x1b8] sm:$0xff] }
 0x1d9   : > { %1421 = vst [vmem:[#allocation1 + $0x22] ss:$4 sm:$0xff] %v8359_v14 }
 0x1da   : > { %1422 = vst [vmem:[#allocation1 + $0x23] ss:$4 sm:$0xff] %v8367_v13  ;;  %v8378_v3 = vld.sshfl [vmem:[#allocation1] sm:$0xff pattern:$0x73625140]  ;;  %1459 = vmatpush.msrb.mxu1 %v6402_v15  ;;  %v6399_v15 = vld [vmem:[%s13541_s3 + $0x1b0] sm:$0xff] }
 0x1db   : > { %1584 = vst [vmem:[#allocation1] ss:$4 sm:$0xff] %v8049_v29 }
 0x1dc   : > { %1585 = vst [vmem:[#allocation1 + $0x1] ss:$4 sm:$0xff] %v13871_v7  ;;  %1460 = vmatpush.msrb.mxu1 %v6401_v23  ;;  %v13874_v7 = vld [vmem:[#allocation50_spill] sm:$0xff]  ;;  %v6398_v23 = vld [vmem:[%s13541_s3 + $0x1a8] sm:$0xff] }
 0x1dd   : > { %1586 = vst [vmem:[#allocation1 + $0x2] ss:$4 sm:$0xff] %v8218_v56 }
 0x1de   : > { %1587 = vst [vmem:[#allocation1 + $0x3] ss:$4 sm:$0xff] %v8223_v60  ;;  %1461 = vmatpush.msrb.mxu1 %v6400_v33  ;;  %v8439_v33 = vrot.slane %v8071_v16, 6  ;;  %v1506_v60 = vrot.slane %v1504_v12, 2 }
 0x1e0   : > { %1354 = vmatmul.f32.gmra.mxu3 %v13874_v7  ;;  %1462 = vmatpush.msrb.mxu1 %v6399_v15  ;;  %13877 = vst [vmem:[#allocation28_spill] sm:$0xff] %v8439_v33  ;;  %v6396_v15 = vld [vmem:[%s13541_s3 + $0x198] sm:$0xff] }
 0x1e1   : > { %v8395_v58 = vld.sshfl [vmem:[#allocation1 + $0x20] sm:$0xff pattern:$0x73625140] }
 0x1e2   : > { %1429 = vst [vmem:[#allocation1 + $0x20] ss:$4 sm:$0xff] %v13872_v26  ;;  %1463 = vmatpush.msrb.mxu1 %v6398_v23  ;;  %v6395_v23 = vld [vmem:[%s13541_s3 + $0x190] sm:$0xff] }
 0x1e3   : > { %1430 = vst [vmem:[#allocation1 + $0x21] ss:$4 sm:$0xff] %v7878_v25 }
 0x1e4   : > { %1431 = vst [vmem:[#allocation1 + $0x22] ss:$4 sm:$0xff] %v8386_v8 }
 0x1e5   : > { %1432 = vst [vmem:[#allocation1 + $0x23] ss:$4 sm:$0xff] %v8402_v18  ;;  %v8417_v29 = vld.sshfl [vmem:[#allocation1] sm:$0xff pattern:$0x73625140] }
 0x1e6   : > { %1668 = vst [vmem:[#allocation1] ss:$4 sm:$0xff] %v7758_v45  ;;  %v8432_v45 = vrot.slane %v8071_v16, 4 }
 0x1e7   : > { %1670 = vst [vmem:[#allocation1 + $0x1] ss:$4 sm:$0xff] %v13875_v36  ;;  %v6397_v36 = vld [vmem:[%s13541_s3 + $0x1a0] sm:$0xff] }
 0x1e8   : > { %1672 = vst [vmem:[#allocation1 + $0x2] ss:$4 sm:$0xff] %v7766_v46  ;;  %1464 = vmatpush.msrb.mxu1 %v6397_v36  ;;  %1357 = vmatmul.f32.gmra.mxu3 %v8267_v59  ;;  %v6394_v36 = vld [vmem:[%s13541_s3 + $0x188] sm:$0xff]  ;;  %v13878_v59 = vld [vmem:[#allocation31_spill] sm:$0xff] }
 0x1e9   : > { %1674 = vst [vmem:[#allocation1 + $0x3] ss:$4 sm:$0xff] %v7773_v49  ;;  %v8458_v49 = vrot.slane %v8315_v24, 4 }
 0x1ea   : > { %13876 = vst [vmem:[#allocation50_spill] sm:$0xff] %v8432_v45  ;;  %1465 = vmatpush.msrb.mxu1 %v6396_v15  ;;  %v6393_v15 = vld [vmem:[%s13541_s3 + $0x180] sm:$0xff] }
 0x1ec   : > { %v8429_v7 = vld.sshfl [vmem:[#allocation1 + $0x20] sm:$0xff pattern:$0x73625140]  ;;  %1466 = vmatpush.msrb.mxu1 %v6395_v23  ;;  %v6409_v23 = vrot.slane %v8315_v24, 9 }
 0x1ed   : > { %1439 = vst [vmem:[#allocation1 + $0x20] ss:$4 sm:$0xff] %v7953_v27 }
 0x1ee   : > { %1440 = vst [vmem:[#allocation1 + $0x21] ss:$4 sm:$0xff] %v8071_v16  ;;  %1467 = vmatpush.msrb.mxu1 %v6394_v36  ;;  %v6428_v36 = vld [vmem:[%s13541_s3 + $0x278] sm:$0xff] }
 0x1ef   : > { %1441 = vst [vmem:[#allocation1 + $0x22] ss:$4 sm:$0xff] %v8432_v45  ;;  %1602 = vmatpush.msrb.mxu2 %v6428_v36 }
 0x1f0   : > { %1442 = vst [vmem:[#allocation1 + $0x23] ss:$4 sm:$0xff] %v8439_v33  ;;  %v8452_v61 = vld.sshfl [vmem:[#allocation1] sm:$0xff pattern:$0x73625140]  ;;  %1468 = vmatpush.msrb.mxu1 %v6393_v15  ;;  %v8479_v15 = vsel %vm7924_vm6, %v6409_v23, %v1504_v12  ;;  %v6426_v12 = vld [vmem:[%s13541_s3 + $0x268] sm:$0xff] }
 0x1f1   : > { %1685 = vst [vmem:[#allocation1] ss:$4 sm:$0xff] %v7806_v62  ;;  %1469 = vmatmul.f32.vlgmr.msrb.gmra.mxu1 %v8238_v48  ;;  %v1507_v62 = vrot.slane %v8458_v49, 7  ;;  %v6427_v48 = vld [vmem:[%s13541_s3 + $0x270] sm:$0xff] }
 0x1f2   : > { %1686 = vst [vmem:[#allocation1 + $0x1] ss:$4 sm:$0xff] %v13878_v59  ;;  %v13879_v59 = vld [vmem:[#allocation53_spill] sm:$0xff]  ;;  %1603 = vmatpush.msrb.mxu2 %v6427_v48  ;;  %v1511_v48 = vrot.slane %v8367_v13, 7 }
 0x1f3   : > { %1687 = vst [vmem:[#allocation1 + $0x2] ss:$4 sm:$0xff] %v7815_v1  ;;  %1360 = vmatmul.f32.gmra.mxu3 %v13879_v59  ;;  %v8487_v31 = vsel %vm7924_vm6, %v1506_v60, %v1507_v62  ;;  %v8497_v59 = vld [vmem:[%s13540_s2] ss:$0 sm:$0xff]  ;;  %v13885_v23 = vld [vmem:[#allocation13_spill] sm:$0xff] }
 0x1f4   : > { %1688 = vst [vmem:[#allocation1 + $0x3] ss:$4 sm:$0xff] %v8115_v9  ;;  %v13882_v9 = vld [vmem:[#allocation48_spill] sm:$0xff]  ;;  %1604 = vmatpush.msrb.mxu2 %v6426_v12  ;;  %v8501_v36 = vadd.f32 %v8497_v59, %v13885_v23  ;;  %v6424_v12 = vld [vmem:[%s13541_s3 + $0x258] sm:$0xff]  ;;  %v6410_v23 = vrot.slane %v8359_v14, 9 }
 0x1f5   : > { %13881 = vst [vmem:[#allocation53_spill] sm:$0xff] %v8479_v15  ;;  %v6425_v62 = vld [vmem:[%s13541_s3 + $0x260] sm:$0xff] }
 0x1f6   : > { %13883 = vst [vmem:[#allocation47_spill] sm:$0xff] %v8487_v31  ;;  %1605 = vmatpush.msrb.mxu2 %v6425_v62  ;;  %v6423_v62 = vld [vmem:[%s13541_s3 + $0x250] sm:$0xff]  ;;  %v13890_v14 = vld [vmem:[#allocation52_spill] sm:$0xff] }
 0x1f7   : > { %v8468_v56 = vld.sshfl [vmem:[#allocation1 + $0x20] sm:$0xff pattern:$0x73625140]  ;;  %13884 = vst [vmem:[#allocation48_spill] sm:$0xff] %v8497_v59 }
 0x1f8   : > { %1555 = vst [vmem:[#allocation1 + $0x20] ss:$4 sm:$0xff] %v13880_v34  ;;  %1606 = vmatpush.msrb.mxu2 %v6424_v12  ;;  %v6422_v12 = vld [vmem:[%s13541_s3 + $0x248] sm:$0xff] }
 0x1f9   : > { %1557 = vst [vmem:[#allocation1 + $0x21] ss:$4 sm:$0xff] %v13882_v9  ;;  %1472 = vmatmul.f32.gmra.mxu1 %v8356_v41  ;;  %v13888_v41 = vld [vmem:[#allocation51_spill] sm:$0xff] }
 0x1fa   : > { %1559 = vst [vmem:[#allocation1 + $0x22] ss:$4 sm:$0xff] %v8479_v15  ;;  %v1514_v15 = vrot.slane %v8501_v36, 7  ;;  %1607 = vmatpush.msrb.mxu2 %v6423_v62  ;;  %v6421_v62 = vld [vmem:[%s13541_s3 + $0x240] sm:$0xff] }
 0x1fb   : > { %1561 = vst [vmem:[#allocation1 + $0x23] ss:$4 sm:$0xff] %v8487_v31  ;;  %v8506_v60 = vld.sshfl [vmem:[#allocation1] sm:$0xff pattern:$0x73625140]  ;;  %1363 = vmatmul.f32.gmra.mxu3 %v8292_v28  ;;  %v13887_v31 = vld [vmem:[#allocation37_spill] sm:$0xff] }
 0x1fc   : > { %13886 = vst [vmem:[#allocation13_spill] sm:$0xff] %v8501_v36  ;;  %v1513_v28 = vrot.slane %v1511_v48, 2  ;;  %1608 = vmatpush.msrb.mxu2 %v6422_v12  ;;  %v6419_v12 = vld [vmem:[%s13541_s3 + $0x230] sm:$0xff] }
 0x1fd   : > { %1695 = vst [vmem:[#allocation1] ss:$4 sm:$0xff] %v7856_v17 }
 0x1fe   : > { %1696 = vst [vmem:[#allocation1 + $0x1] ss:$4 sm:$0xff] %v13887_v31  ;;  %v8531_v31 = vsel %vm7924_vm6, %v6410_v23, %v1511_v48  ;;  %1609 = vmatpush.msrb.mxu2 %v6421_v62  ;;  %v6420_v48 = vld [vmem:[%s13541_s3 + $0x238] sm:$0xff]  ;;  %v13892_v23 = vld [vmem:[#allocation60_spill] sm:$0xff] }
 0x1ff   : > { %1697 = vst [vmem:[#allocation1 + $0x2] ss:$4 sm:$0xff] %v7865_v20  ;;  %v13895_v62 = vld [vmem:[#allocation42_spill] sm:$0xff] }
 0x200   : > { %1698 = vst [vmem:[#allocation1 + $0x3] ss:$4 sm:$0xff] %v7872_v22  ;;  %v8536_v22 = vsel %vm7924_vm6, %v1513_v28, %v1514_v15  ;;  %v1518_v15 = vrot.slane %v8402_v18, 7  ;;  %1610 = vmatpush.msrb.mxu2 %v6420_v48  ;;  %v6411_v48 = vrot.slane %v8386_v8, 9 }
 0x201   : > { %13889 = vst [vmem:[#allocation68_spill] sm:$0xff] %v8531_v31  ;;  %1475 = vmatmul.f32.gmra.mxu1 %v8248_v4  ;;  %v6418_v4 = vld [vmem:[%s13541_s3 + $0x228] sm:$0xff] }
 0x202   : > { %v8523_v17 = vld.sshfl [vmem:[#allocation1 + $0x20] sm:$0xff pattern:$0x73625140]  ;;  %13891 = vst [vmem:[#allocation69_spill] sm:$0xff] %v8536_v22  ;;  %1611 = vmatpush.msrb.mxu2 %v6419_v12 }
 0x203   : > { %1568 = vst [vmem:[#allocation1 + $0x20] ss:$4 sm:$0xff] %v13888_v41  ;;  %1366 = vmatmul.f32.gmra.mxu3 %v13892_v23  ;;  %v1520_v23 = vrot.slane %v1518_v15, 2  ;;  %v6417_v12 = vld [vmem:[%s13541_s3 + $0x220] sm:$0xff] }
 0x204   : > { %1569 = vst [vmem:[#allocation1 + $0x21] ss:$4 sm:$0xff] %v13890_v14  ;;  %1612 = vmatpush.msrb.mxu2 %v6418_v4  ;;  %v6416_v4 = vld [vmem:[%s13541_s3 + $0x218] sm:$0xff] }
 0x205   : > { %1570 = vst [vmem:[#allocation1 + $0x22] ss:$4 sm:$0xff] %v8531_v31 }
 0x206   : > { %1571 = vst [vmem:[#allocation1 + $0x23] ss:$4 sm:$0xff] %v8536_v22  ;;  %v8555_v22 = vrot.slane %v8386_v8, 4  ;;  %1613 = vmatpush.msrb.mxu2 %v6417_v12  ;;  %v8574_v8 = vsel %vm7924_vm6, %v6411_v48, %v1518_v15  ;;  %v731_v12 = vpop.f32.mrf.mxu0  ;;  %v6415_v15 = vld [vmem:[%s13541_s3 + $0x210] sm:$0xff] }
 0x207   : > { %v8549_v28 = vld.sshfl [vmem:[#allocation1] sm:$0xff pattern:$0x73625140]  ;;  %13897 = vst [vmem:[#allocation71_spill] sm:$0xff] %v8574_v8  ;;  %v8592_v48 = vadd.f32 %v8497_v59, %v731_v12  ;;  %v6412_v12 = vrot.slane %v8432_v45, 9 }
 0x208   : > { %13893 = vst [vmem:[#allocation60_spill] sm:$0xff] %v8549_v28  ;;  %v13898_v28 = vld [vmem:[#allocation58_spill] sm:$0xff]  ;;  %1614 = vmatpush.msrb.mxu2 %v6416_v4  ;;  %v6413_v4 = vld [vmem:[%s13541_s3 + $0x200] sm:$0xff] }
 0x209   : > { %13894 = vst [vmem:[#allocation70_spill] sm:$0xff] %v8555_v22  ;;  %1478 = vmatmul.f32.gmra.mxu1 %v8395_v58  ;;  %v6441_v59 = vld [vmem:[%s13541_s3 + $0x2e0] sm:$0xff] }
 0x20a   : > { %1705 = vst [vmem:[#allocation1] ss:$4 sm:$0xff] %v7905_v38  ;;  %v13896_v38 = vld [vmem:[#allocation57_spill] sm:$0xff]  ;;  %1615 = vmatpush.msrb.mxu2 %v6415_v15  ;;  %v1528_v15 = vrot.slane %v8592_v48, 7 }
 0x20b   : > { %1706 = vst [vmem:[#allocation1 + $0x1] ss:$4 sm:$0xff] %v13895_v62  ;;  %v1521_v62 = vrot.slane %v8555_v22, 7  ;;  %1369 = vmatmul.f32.gmra.mxu3 %v8323_v35  ;;  %v6414_v35 = vld [vmem:[%s13541_s3 + $0x208] sm:$0xff] }
 0x20c   : > { %1707 = vst [vmem:[#allocation1 + $0x2] ss:$4 sm:$0xff] %v7945_v21  ;;  %1616 = vmatpush.msrb.mxu2 %v6414_v35  ;;  %v6444_v35 = vld [vmem:[%s13541_s3 + $0x2f8] sm:$0xff] }
 0x20d   : > { %1708 = vst [vmem:[#allocation1 + $0x3] ss:$4 sm:$0xff] %v8201_v63  ;;  %v8565_v31 = vld.sshfl [vmem:[#allocation1 + $0x20] sm:$0xff pattern:$0x73625140]  ;;  %v8584_v63 = vsel %vm7924_vm6, %v1520_v23, %v1521_v62  ;;  %v13901_v62 = vld [vmem:[#allocation5_spill] sm:$0xff]  ;;  %1723 = vmatpush.msrb.mxu3 %v6444_v35 }
 0x20e   : > { %1578 = vst [vmem:[#allocation1 + $0x20] ss:$4 sm:$0xff] %v13896_v38  ;;  %v1525_v23 = vrot.slane %v8439_v33, 7  ;;  %1617 = vmatpush.msrb.mxu2 %v6413_v4  ;;  %v6442_v35 = vld [vmem:[%s13541_s3 + $0x2e8] sm:$0xff] }
 0x20f   : > { %1579 = vst [vmem:[#allocation1 + $0x21] ss:$4 sm:$0xff] %v13898_v28  ;;  %1618 = vmatmul.f32.vlgmr.msrb.gmra.mxu2 %v8307_v50 }
 0x210   : > { %13899 = vst [vmem:[#allocation72_spill] sm:$0xff] %v8584_v63  ;;  %v1527_v4 = vrot.slane %v1525_v23, 2  ;;  %v8623_v50 = vsel %vm7924_vm6, %v6412_v12, %v1525_v23  ;;  %v6440_v12 = vld [vmem:[%s13541_s3 + $0x2d8] sm:$0xff] }
 0x211   : > { %1580 = vst [vmem:[#allocation1 + $0x22] ss:$4 sm:$0xff] %v8574_v8  ;;  %1481 = vmatmul.f32.gmra.mxu1 %v8261_v47 }
 0x212   : > { %1581 = vst [vmem:[#allocation1 + $0x23] ss:$4 sm:$0xff] %v8584_v63  ;;  %v8627_v47 = vsel %vm7924_vm6, %v1527_v4, %v1528_v15  ;;  %v6439_v15 = vld [vmem:[%s13541_s3 + $0x2d0] sm:$0xff]  ;;  %v6436_v4 = vld [vmem:[%s13541_s3 + $0x2b8] sm:$0xff] }
 0x213   : > { %13900 = vst [vmem:[#allocation73_spill] sm:$0xff] %v8592_v48 }
 0x214   : > { %v8597_v58 = vld.sshfl [vmem:[#allocation1] sm:$0xff pattern:$0x73625140]  ;;  %13902 = vst [vmem:[#allocation5_spill] sm:$0xff] %v8623_v50 }
 0x215   : > { %1789 = vst [vmem:[#allocation1] ss:$4 sm:$0xff] %v13901_v62 }
 0x216   : > { %1791 = vst [vmem:[#allocation1 + $0x1] ss:$4 sm:$0xff] %v7766_v46 }
 0x217   : > { %1793 = vst [vmem:[#allocation1 + $0x2] ss:$4 sm:$0xff] %v7776_v51  ;;  %v6443_v51 = vld [vmem:[%s13541_s3 + $0x2f0] sm:$0xff]  ;;  %1621 = vmatmul.f32.gmra.mxu2 %v8523_v17  ;;  %v6438_v17 = vld [vmem:[%s13541_s3 + $0x2c8] sm:$0xff] }
 0x218   : > { %1795 = vst [vmem:[#allocation1 + $0x3] ss:$4 sm:$0xff] %v7779_v52  ;;  %1724 = vmatpush.msrb.mxu3 %v6443_v51  ;;  %v6435_v51 = vld [vmem:[%s13541_s3 + $0x2b0] sm:$0xff] }
 0x219   : > { %v8614_v62 = vld.sshfl [vmem:[#allocation1 + $0x20] sm:$0xff pattern:$0x73625140]  ;;  %13903 = vst [vmem:[#allocation74_spill] sm:$0xff] %v8627_v47  ;;  %1484 = vmatmul.f32.gmra.mxu1 %v8429_v7 }
 0x21a   : > { %1588 = vst [vmem:[#allocation1 + $0x20] ss:$4 sm:$0xff] %v8228_v11  ;;  %1725 = vmatpush.msrb.mxu3 %v6442_v35  ;;  %v6437_v7 = vld [vmem:[%s13541_s3 + $0x2c0] sm:$0xff] }
 0x21b   : > { %1589 = vst [vmem:[#allocation1 + $0x21] ss:$4 sm:$0xff] %v8233_v42 }
 0x21c   : > { %1590 = vst [vmem:[#allocation1 + $0x22] ss:$4 sm:$0xff] %v8623_v50  ;;  %1726 = vmatpush.msrb.mxu3 %v6441_v59 }
 0x21d   : > { %1591 = vst [vmem:[#allocation1 + $0x23] ss:$4 sm:$0xff] %v8627_v47 }
 0x21e   : > { %1727 = vmatpush.msrb.mxu3 %v6440_v12  ;;  %v6434_v12 = vld [vmem:[%s13541_s3 + $0x2a8] sm:$0xff] }
 0x21f   : > { %v8637_v23 = vld.sshfl [vmem:[#allocation1] sm:$0xff pattern:$0x73625140]  ;;  %1624 = vmatmul.f32.gmra.mxu2 %v8344_v44 }
 0x220   : > { %1806 = vst [vmem:[#allocation1] ss:$4 sm:$0xff] %v7812_v0  ;;  %1728 = vmatpush.msrb.mxu3 %v6439_v15  ;;  %v6432_v15 = vld [vmem:[%s13541_s3 + $0x298] sm:$0xff] }
 0x221   : > { %1807 = vst [vmem:[#allocation1 + $0x1] ss:$4 sm:$0xff] %v7815_v1  ;;  %1487 = vmatmul.f32.gmra.mxu1 %v8280_v32  ;;  %v6433_v32 = vld [vmem:[%s13541_s3 + $0x2a0] sm:$0xff] }
 0x222   : > { %1808 = vst [vmem:[#allocation1 + $0x2] ss:$4 sm:$0xff] %v7818_v2  ;;  %1729 = vmatpush.msrb.mxu3 %v6438_v17  ;;  %v6431_v17 = vld [vmem:[%s13541_s3 + $0x290] sm:$0xff] }
 0x223   : > { %1809 = vst [vmem:[#allocation1 + $0x3] ss:$4 sm:$0xff] %v7825_v5 }
 0x224   : > { %v8651_v59 = vld.sshfl [vmem:[#allocation1 + $0x20] sm:$0xff pattern:$0x73625140]  ;;  %1730 = vmatpush.msrb.mxu3 %v6437_v7  ;;  %v6430_v7 = vld [vmem:[%s13541_s3 + $0x288] sm:$0xff] }
 0x225   : > { %1676 = vst [vmem:[#allocation1 + $0x20] ss:$4 sm:$0xff] %v7779_v52 }
 0x226   : > { %1678 = vst [vmem:[#allocation1 + $0x21] ss:$4 sm:$0xff] %v8082_v40  ;;  %1731 = vmatpush.msrb.mxu3 %v6436_v4  ;;  %v6460_v4 = vld [vmem:[%s13541_s3 + $0x378] sm:$0xff] }
 0x227   : > { %1680 = vst [vmem:[#allocation1 + $0x22] ss:$4 sm:$0xff] %v8330_v53  ;;  %1627 = vmatmul.f32.gmra.mxu2 %v8565_v31  ;;  %v6429_v31 = vld [vmem:[%s13541_s3 + $0x280] sm:$0xff]  ;;  %1844 = vmatpush.msra.mxu1 %v6460_v4  ;;  %v13652_v4 = vrot.slane %v8315_v24, 6 }
 0x228   : > { %1682 = vst [vmem:[#allocation1 + $0x23] ss:$4 sm:$0xff] %v8458_v49  ;;  %1732 = vmatpush.msrb.mxu3 %v6435_v51 }
 0x229   : > { %1490 = vmatmul.f32.gmra.mxu1 %v8468_v56 }
 0x22a   : > { %v8671_v35 = vld.sshfl [vmem:[#allocation1] sm:$0xff pattern:$0x73625140]  ;;  %1733 = vmatpush.msrb.mxu3 %v6434_v12  ;;  %v6459_v12 = vld [vmem:[%s13541_s3 + $0x370] sm:$0xff] }
 0x22b   : > { %1816 = vst [vmem:[#allocation1] ss:$4 sm:$0xff] %v7862_v19  ;;  %1845 = vmatpush.msra.mxu1 %v6459_v12  ;;  %v6447_v12 = vld [vmem:[%s13541_s3 + $0x310] sm:$0xff] }
 0x22c   : > { %1817 = vst [vmem:[#allocation1 + $0x1] ss:$4 sm:$0xff] %v7865_v20  ;;  %1734 = vmatpush.msrb.mxu3 %v6433_v32  ;;  %v6456_v32 = vld [vmem:[%s13541_s3 + $0x358] sm:$0xff] }
 0x22d   : > { %1818 = vst [vmem:[#allocation1 + $0x2] ss:$4 sm:$0xff] %v13872_v26 }
 0x22e   : > { %1819 = vst [vmem:[#allocation1 + $0x3] ss:$4 sm:$0xff] %v7878_v25  ;;  %1735 = vmatpush.msrb.mxu3 %v6432_v15 }
 0x22f   : > { %v1684_v44 = vld.sshfl [vmem:[#allocation1 + $0x20] sm:$0xff pattern:$0x73625140]  ;;  %1630 = vmatmul.f32.gmra.mxu2 %v8378_v3 }
 0x230   : > { %1689 = vst [vmem:[#allocation1 + $0x20] ss:$4 sm:$0xff] %v7825_v5  ;;  %1736 = vmatpush.msrb.mxu3 %v6431_v17  ;;  %v6457_v3 = vld [vmem:[%s13541_s3 + $0x360] sm:$0xff]  ;;  %v6455_v17 = vld [vmem:[%s13541_s3 + $0x350] sm:$0xff] }
 0x231   : > { %1690 = vst [vmem:[#allocation1 + $0x21] ss:$4 sm:$0xff] %v8118_v37 }
 0x232   : > { %1691 = vst [vmem:[#allocation1 + $0x22] ss:$4 sm:$0xff] %v8367_v13  ;;  %1737 = vmatpush.msrb.mxu3 %v6430_v7  ;;  %v6454_v7 = vld [vmem:[%s13541_s3 + $0x348] sm:$0xff] }
 0x233   : > { %1692 = vst [vmem:[#allocation1 + $0x23] ss:$4 sm:$0xff] %v8501_v36 }
 0x234   : > { %1738 = vmatpush.msrb.mxu3 %v6429_v31  ;;  %v6448_v31 = vld [vmem:[%s13541_s3 + $0x318] sm:$0xff] }
 0x235   : > { %v8698_v56 = vld.sshfl [vmem:[#allocation1] sm:$0xff pattern:$0x73625140]  ;;  %1739 = vmatmul.f32.vlgmr.msrb.gmra.mxu3 %v8452_v61  ;;  %v6458_v61 = vld [vmem:[%s13541_s3 + $0x368] sm:$0xff] }
 0x236   : > { %1826 = vst [vmem:[#allocation1] ss:$4 sm:$0xff] %v7933_v10  ;;  %1846 = vmatpush.msra.mxu1 %v6458_v61  ;;  %v13904_v61 = vld [vmem:[#allocation7_spill] sm:$0xff] }
 0x237   : > { %1827 = vst [vmem:[#allocation1 + $0x1] ss:$4 sm:$0xff] %v7945_v21  ;;  %1633 = vmatmul.f32.gmra.mxu2 %v8614_v62 }
 0x238   : > { %1828 = vst [vmem:[#allocation1 + $0x2] ss:$4 sm:$0xff] %v7953_v27  ;;  %1847 = vmatpush.msra.mxu1 %v6457_v3 }
 0x239   : > { %1829 = vst [vmem:[#allocation1 + $0x3] ss:$4 sm:$0xff] %v8071_v16 }
 0x23a   : > { %v1694_v51 = vld.sshfl [vmem:[#allocation1 + $0x20] sm:$0xff pattern:$0x73625140]  ;;  %1848 = vmatpush.msra.mxu1 %v6456_v32 }
 0x23b   : > { %1699 = vst [vmem:[#allocation1 + $0x20] ss:$4 sm:$0xff] %v7878_v25  ;;  %v13905_v32 = vld [vmem:[#allocation55_spill] sm:$0xff] }
 0x23c   : > { %1700 = vst [vmem:[#allocation1 + $0x21] ss:$4 sm:$0xff] %v8160_v30  ;;  %1849 = vmatpush.msra.mxu1 %v6455_v17  ;;  %v6480_v17 = vld [vmem:[%s13541_s3 + $0x3f8] sm:$0xff] }
 0x23d   : > { %1701 = vst [vmem:[#allocation1 + $0x22] ss:$4 sm:$0xff] %v8402_v18  ;;  %1742 = vmatmul.f32.gmra.mxu3 %v1684_v44  ;;  %v6450_v44 = vld [vmem:[%s13541_s3 + $0x328] sm:$0xff]  ;;  %1993 = vmatpush.msra.mxu2 %v6480_v17  ;;  %v6475_v17 = vld [vmem:[%s13541_s3 + $0x3d0] sm:$0xff] }
 0x23e   : > { %1702 = vst [vmem:[#allocation1 + $0x23] ss:$4 sm:$0xff] %v8555_v22  ;;  %1850 = vmatpush.msra.mxu1 %v6454_v7  ;;  %v13906_v7 = vld [vmem:[#allocation60_spill] sm:$0xff] }
 0x23f   : > { %1636 = vmatmul.f32.gmra.mxu2 %v8417_v29  ;;  %v6449_v29 = vld [vmem:[%s13541_s3 + $0x320] sm:$0xff] }
 0x240   : > { %v8729_v15 = vld.sshfl [vmem:[#allocation1] sm:$0xff pattern:$0x73625140] }
 0x241   : > { %1938 = vst [vmem:[#allocation1] ss:$4 sm:$0xff] %v8093_v57  ;;  %v6453_v57 = vld [vmem:[%s13541_s3 + $0x340] sm:$0xff] }
 0x242   : > { %1940 = vst [vmem:[#allocation1 + $0x1] ss:$4 sm:$0xff] %v8098_v6  ;;  %1851 = vmatpush.msra.mxu1 %v6453_v57  ;;  %v6452_v6 = vld [vmem:[%s13541_s3 + $0x338] sm:$0xff]  ;;  %v13907_v57 = vld [vmem:[#allocation56_spill] sm:$0xff] }
 0x243   : > { %1942 = vst [vmem:[#allocation1 + $0x2] ss:$4 sm:$0xff] %v13880_v34  ;;  %v6451_v34 = vld [vmem:[%s13541_s3 + $0x330] sm:$0xff] }
 0x244   : > { %1944 = vst [vmem:[#allocation1 + $0x3] ss:$4 sm:$0xff] %v13882_v9  ;;  %1852 = vmatpush.msra.mxu1 %v6452_v6  ;;  %v6479_v6 = vld [vmem:[%s13541_s3 + $0x3f0] sm:$0xff] }
 0x245   : > { %v1704_v62 = vld.sshfl [vmem:[#allocation1 + $0x20] sm:$0xff pattern:$0x73625140]  ;;  %1745 = vmatmul.f32.gmra.mxu3 %v8506_v60  ;;  %1994 = vmatpush.msra.mxu2 %v6479_v6  ;;  %v13912_v6 = vld [vmem:[#allocation62_spill] sm:$0xff] }
 0x246   : > { %1709 = vst [vmem:[#allocation1 + $0x20] ss:$4 sm:$0xff] %v8071_v16  ;;  %1853 = vmatpush.msra.mxu1 %v6451_v34 }
 0x247   : > { %1710 = vst [vmem:[#allocation1 + $0x21] ss:$4 sm:$0xff] %v8204_v43  ;;  %1639 = vmatmul.f32.gmra.mxu2 %v8651_v59  ;;  %v6446_v59 = vld [vmem:[%s13541_s3 + $0x308] sm:$0xff] }
 0x248   : > { %1711 = vst [vmem:[#allocation1 + $0x22] ss:$4 sm:$0xff] %v8439_v33  ;;  %1854 = vmatpush.msra.mxu1 %v6450_v44  ;;  %v13909_v44 = vld [vmem:[#allocation65_spill] sm:$0xff] }
 0x249   : > { %1712 = vst [vmem:[#allocation1 + $0x23] ss:$4 sm:$0xff] %v8592_v48 }
 0x24a   : > { %1855 = vmatpush.msra.mxu1 %v6449_v29  ;;  %v6478_v29 = vld [vmem:[%s13541_s3 + $0x3e8] sm:$0xff] }
 0x24b   : > { %v8756_v9 = vld.sshfl [vmem:[#allocation1] sm:$0xff pattern:$0x73625140]  ;;  %1995 = vmatpush.msra.mxu2 %v6478_v29  ;;  %v6474_v29 = vld [vmem:[%s13541_s3 + $0x3c8] sm:$0xff] }
 0x24c   : > { %1955 = vst [vmem:[#allocation1] ss:$4 sm:$0xff] %v8131_v39  ;;  %1856 = vmatpush.msra.mxu1 %v6448_v31  ;;  %v8811_v31 = vrot.slane %v8501_v36, 4 }
 0x24d   : > { %1956 = vst [vmem:[#allocation1 + $0x1] ss:$4 sm:$0xff] %v8137_v54  ;;  %1748 = vmatmul.f32.gmra.mxu3 %v1694_v51  ;;  %v6445_v51 = vld [vmem:[%s13541_s3 + $0x300] sm:$0xff] }
 0x24e   : > { %1957 = vst [vmem:[#allocation1 + $0x2] ss:$4 sm:$0xff] %v13888_v41  ;;  %1857 = vmatpush.msra.mxu1 %v6447_v12  ;;  %v6477_v12 = vld [vmem:[%s13541_s3 + $0x3e0] sm:$0xff] }
 0x24f   : > { %1958 = vst [vmem:[#allocation1 + $0x3] ss:$4 sm:$0xff] %v13890_v14  ;;  %1996 = vmatpush.msra.mxu2 %v6477_v12  ;;  %v13913_v12 = vld [vmem:[#allocation66_spill] sm:$0xff] }
 0x250   : > { %v8768_v60 = vld.sshfl [vmem:[#allocation1 + $0x20] sm:$0xff pattern:$0x73625140]  ;;  %1858 = vmatpush.msra.mxu1 %v6446_v59  ;;  %13910 = vst [vmem:[#allocation60_spill] sm:$0xff] %v8811_v31  ;;  %v6476_v59 = vld [vmem:[%s13541_s3 + $0x3d8] sm:$0xff] }
 0x251   : > { %1797 = vst [vmem:[#allocation1 + $0x20] ss:$4 sm:$0xff] %v8315_v24  ;;  %1997 = vmatpush.msra.mxu2 %v6476_v59  ;;  %v8838_v59 = vrot.slane %v13913_v12, 6 }
 0x252   : > { %1799 = vst [vmem:[#allocation1 + $0x21] ss:$4 sm:$0xff] %v8330_v53  ;;  %1859 = vmatpush.msra.mxu1 %v6445_v51 }
 0x253   : > { %1801 = vst [vmem:[#allocation1 + $0x22] ss:$4 sm:$0xff] %v13652_v4  ;;  %1860 = vmatmul.f32.vlgmr.msra.gmra.mxu1 %v8637_v23  ;;  %v8804_v23 = vrot.slane %v8501_v36, 2  ;;  %1998 = vmatpush.msra.mxu2 %v6475_v17  ;;  %v6472_v17 = vld [vmem:[%s13541_s3 + $0x3b8] sm:$0xff]  ;;  %v6471_v4 = vld [vmem:[%s13541_s3 + $0x3b0] sm:$0xff] }
 0x254   : > { %1803 = vst [vmem:[#allocation1 + $0x23] ss:$4 sm:$0xff] %v13904_v61 }
 0x255   : > { %1751 = vmatmul.f32.gmra.mxu3 %v13906_v7  ;;  %13908 = vst [vmem:[#allocation7_spill] sm:$0xff] %v8804_v23  ;;  %v13911_v7 = vld [vmem:[#allocation61_spill] sm:$0xff]  ;;  %1999 = vmatpush.msra.mxu2 %v6474_v29  ;;  %v13915_v29 = vld [vmem:[#allocation22_spill] sm:$0xff] }
 0x256   : > { %v8789_v3 = vld.sshfl [vmem:[#allocation1] sm:$0xff pattern:$0x73625140]  ;;  %13914 = vst [vmem:[#allocation75_spill] sm:$0xff] %v8838_v59 }
 0x257   : > { %1965 = vst [vmem:[#allocation1] ss:$4 sm:$0xff] %v13905_v32 }
 0x258   : > { %1966 = vst [vmem:[#allocation1 + $0x1] ss:$4 sm:$0xff] %v13907_v57 }
 0x259   : > { %1967 = vst [vmem:[#allocation1 + $0x2] ss:$4 sm:$0xff] %v13896_v38 }
 0x25a   : > { %1968 = vst [vmem:[#allocation1 + $0x3] ss:$4 sm:$0xff] %v13898_v28 }
 0x25b   : > { %v1805_v34 = vld.sshfl [vmem:[#allocation1 + $0x20] sm:$0xff pattern:$0x73625140] }
 0x25c   : > { %1810 = vst [vmem:[#allocation1 + $0x20] ss:$4 sm:$0xff] %v13909_v44  ;;  %1863 = vmatmul.f32.gmra.mxu1 %v1805_v34  ;;  %v6473_v34 = vld [vmem:[%s13541_s3 + $0x3c0] sm:$0xff] }
 0x25d   : > { %1811 = vst [vmem:[#allocation1 + $0x21] ss:$4 sm:$0xff] %v8367_v13  ;;  %1754 = vmatmul.f32.gmra.mxu3 %v1704_v62  ;;  %2000 = vmatpush.msra.mxu2 %v6473_v34  ;;  %v6470_v34 = vld [vmem:[%s13541_s3 + $0x3a8] sm:$0xff] }
 0x25e   : > { %1812 = vst [vmem:[#allocation1 + $0x22] ss:$4 sm:$0xff] %v8804_v23 }
 0x25f   : > { %1813 = vst [vmem:[#allocation1 + $0x23] ss:$4 sm:$0xff] %v8811_v31  ;;  %2001 = vmatpush.msra.mxu2 %v6472_v17 }
 0x261   : > { %v8822_v51 = vld.sshfl [vmem:[#allocation1] sm:$0xff pattern:$0x73625140]  ;;  %2002 = vmatpush.msra.mxu2 %v6471_v4  ;;  %v6468_v4 = vld [vmem:[%s13541_s3 + $0x398] sm:$0xff] }
 0x262   : > { %1975 = vst [vmem:[#allocation1] ss:$4 sm:$0xff] %v13911_v7 }
 0x263   : > { %1976 = vst [vmem:[#allocation1 + $0x1] ss:$4 sm:$0xff] %v13912_v6  ;;  %2003 = vmatpush.msra.mxu2 %v6470_v34  ;;  %v8876_v34 = vrot.slane %v8592_v48, 4 }
 0x264   : > { %1977 = vst [vmem:[#allocation1 + $0x2] ss:$4 sm:$0xff] %v8228_v11  ;;  %1866 = vmatmul.f32.gmra.mxu1 %v8671_v35  ;;  %v13916_v35 = vld [vmem:[#allocation6_spill] sm:$0xff] }
 0x265   : > { %1978 = vst [vmem:[#allocation1 + $0x3] ss:$4 sm:$0xff] %v8233_v42  ;;  %1757 = vmatmul.f32.gmra.mxu3 %v8597_v58  ;;  %v6469_v58 = vld [vmem:[%s13541_s3 + $0x3a0] sm:$0xff] }
 0x266   : > { %v1815_v62 = vld.sshfl [vmem:[#allocation1 + $0x20] sm:$0xff pattern:$0x73625140]  ;;  %2004 = vmatpush.msra.mxu2 %v6469_v58  ;;  %13918 = vst [vmem:[#allocation76_spill] sm:$0xff] %v8876_v34  ;;  %v1895_v58 = vrot.slane %v13904_v61, 7 }
 0x267   : > { %1820 = vst [vmem:[#allocation1 + $0x20] ss:$4 sm:$0xff] %v13913_v12 }
 0x268   : > { %1821 = vst [vmem:[#allocation1 + $0x21] ss:$4 sm:$0xff] %v8402_v18  ;;  %2005 = vmatpush.msra.mxu2 %v6468_v4  ;;  %v6496_v4 = vld [vmem:[%s13541_s3 + $0x478] sm:$0xff] }
 0x269   : > { %1822 = vst [vmem:[#allocation1 + $0x22] ss:$4 sm:$0xff] %v8838_v59  ;;  %2114 = vmatpush.msra.mxu3 %v6496_v4  ;;  %v6494_v4 = vld [vmem:[%s13541_s3 + $0x468] sm:$0xff] }
 0x26a   : > { %1823 = vst [vmem:[#allocation1 + $0x23] ss:$4 sm:$0xff] %v13915_v29 }
 0x26c   : > { %v8855_v12 = vld.sshfl [vmem:[#allocation1] sm:$0xff pattern:$0x73625140]  ;;  %1869 = vmatmul.f32.gmra.mxu1 %v1815_v62 }
 0x26d   : > { %2059 = vst [vmem:[#allocation1] ss:$4 sm:$0xff] %v7766_v46  ;;  %1760 = vmatmul.f32.gmra.mxu3 %v8768_v60  ;;  %v8869_v46 = vrot.slane %v8592_v48, 2  ;;  %v6465_v60 = vld [vmem:[%s13541_s3 + $0x380] sm:$0xff] }
 0x26e   : > { %2061 = vst [vmem:[#allocation1 + $0x1] ss:$4 sm:$0xff] %v13916_v35 }
 0x26f   : > { %2063 = vst [vmem:[#allocation1 + $0x2] ss:$4 sm:$0xff] %v7779_v52  ;;  %v6467_v52 = vld [vmem:[%s13541_s3 + $0x390] sm:$0xff] }
 0x270   : > { %2065 = vst [vmem:[#allocation1 + $0x3] ss:$4 sm:$0xff] %v8082_v40  ;;  %2006 = vmatpush.msra.mxu2 %v6467_v52  ;;  %v6466_v40 = vld [vmem:[%s13541_s3 + $0x388] sm:$0xff] }
 0x271   : > { %v1825_v17 = vld.sshfl [vmem:[#allocation1 + $0x20] sm:$0xff pattern:$0x73625140]  ;;  %13917 = vst [vmem:[#allocation6_spill] sm:$0xff] %v8869_v46  ;;  %v13919_v52 = vld [vmem:[#allocation49_spill] sm:$0xff] }
 0x272   : > { %1830 = vst [vmem:[#allocation1 + $0x20] ss:$4 sm:$0xff] %v8432_v45  ;;  %2007 = vmatpush.msra.mxu2 %v6466_v40  ;;  %v6495_v40 = vld [vmem:[%s13541_s3 + $0x470] sm:$0xff]  ;;  %v1897_v45 = vrot.slane %v1895_v58, 2 }
 0x273   : > { %1831 = vst [vmem:[#allocation1 + $0x21] ss:$4 sm:$0xff] %v8439_v33  ;;  %2115 = vmatpush.msra.mxu3 %v6495_v40 }
 0x274   : > { %1832 = vst [vmem:[#allocation1 + $0x22] ss:$4 sm:$0xff] %v8869_v46  ;;  %2008 = vmatpush.msra.mxu2 %v6465_v60  ;;  %1872 = vmatmul.f32.gmra.mxu1 %v8698_v56  ;;  %v13920_v60 = vrot.slane %v8315_v24, 6 }
 0x275   : > { %1833 = vst [vmem:[#allocation1 + $0x23] ss:$4 sm:$0xff] %v8876_v34  ;;  %2009 = vmatmul.f32.vlgmr.msra.gmra.mxu2 %v8756_v9  ;;  %v13921_v9 = vrot.slane %v13904_v61, 2  ;;  %2116 = vmatpush.msra.mxu3 %v6494_v4 }
 0x276   : > { %v6461_v62 = vrot.slane %v13920_v60, 9  ;;  %v13923_v60 = vld [vmem:[#allocation47_spill] sm:$0xff] }
 0x277   : > { %v8889_v35 = vld.sshfl [vmem:[#allocation1] sm:$0xff pattern:$0x73625140]  ;;  %v1898_v44 = vrot.slane %v13921_v9, 7 }
 0x278   : > { %2076 = vst [vmem:[#allocation1] ss:$4 sm:$0xff] %v7815_v1  ;;  %v1896_v24 = vsel %vm7924_vm6, %v6461_v62, %v1895_v58  ;;  %v6493_v9 = vld [vmem:[%s13541_s3 + $0x460] sm:$0xff]  ;;  %v1902_v62 = vrot.slane %v8811_v31, 7  ;;  %v6491_v58 = vld [vmem:[%s13541_s3 + $0x450] sm:$0xff] }
 0x279   : > { %2077 = vst [vmem:[#allocation1 + $0x1] ss:$4 sm:$0xff] %v13919_v52  ;;  %v13922_v52 = vld [vmem:[#allocation53_spill] sm:$0xff]  ;;  %v1899_v40 = vsel %vm7924_vm6, %v1897_v45, %v1898_v44  ;;  %2117 = vmatpush.msra.mxu3 %v6493_v9  ;;  %v8929_v45 = vrot.slane %v8501_v36, 6  ;;  %v6489_v9 = vld [vmem:[%s13541_s3 + $0x440] sm:$0xff] }
 0x27a   : > { %2078 = vst [vmem:[#allocation1 + $0x2] ss:$4 sm:$0xff] %v7825_v5  ;;  %v6490_v44 = vld [vmem:[%s13541_s3 + $0x448] sm:$0xff] }
 0x27b   : > { %2079 = vst [vmem:[#allocation1 + $0x3] ss:$4 sm:$0xff] %v8118_v37 }
 0x27c   : > { %v1835_v56 = vld.sshfl [vmem:[#allocation1 + $0x20] sm:$0xff pattern:$0x73625140]  ;;  %1875 = vmatmul.f32.gmra.mxu1 %v1825_v17  ;;  %13924 = vst [vmem:[#allocation53_spill] sm:$0xff] %v8929_v45  ;;  %v6462_v17 = vrot.slane %v8804_v23, 9 }
 0x27d   : > { %1946 = vst [vmem:[#allocation1 + $0x20] ss:$4 sm:$0xff] %v13922_v52  ;;  %v6492_v52 = vld [vmem:[%s13541_s3 + $0x458] sm:$0xff] }
 0x27e   : > { %1948 = vst [vmem:[#allocation1 + $0x21] ss:$4 sm:$0xff] %v13923_v60  ;;  %2118 = vmatpush.msra.mxu3 %v6492_v52  ;;  %v1904_v60 = vrot.slane %v1902_v62, 2  ;;  %v1905_v52 = vrot.slane %v8929_v45, 7  ;;  %v8950_v23 = vsel %vm7924_vm6, %v6462_v17, %v1902_v62  ;;  %v8966_v62 = vrot.slane %v13915_v29, 2 }
 0x27f   : > { %1950 = vst [vmem:[#allocation1 + $0x22] ss:$4 sm:$0xff] %v1896_v24  ;;  %v13925_v24 = vld [vmem:[#allocation19_spill] sm:$0xff]  ;;  %v1909_v17 = vrot.slane %v13915_v29, 7 }
 0x280   : > { %1952 = vst [vmem:[#allocation1 + $0x23] ss:$4 sm:$0xff] %v1899_v40  ;;  %2119 = vmatpush.msra.mxu3 %v6491_v58  ;;  %v13926_v58 = vld [vmem:[#allocation68_spill] sm:$0xff] }
 0x281   : > { %13927 = vst [vmem:[#allocation47_spill] sm:$0xff] %v8950_v23 }
 0x282   : > { %v8926_v4 = vld.sshfl [vmem:[#allocation1] sm:$0xff pattern:$0x73625140]  ;;  %2120 = vmatpush.msra.mxu3 %v6490_v44  ;;  %v6488_v44 = vld [vmem:[%s13541_s3 + $0x438] sm:$0xff]  ;;  %13930 = vst [vmem:[#allocation78_spill] sm:$0xff] %v8966_v62 }
 0x283   : > { %2086 = vst [vmem:[#allocation1] ss:$4 sm:$0xff] %v7865_v20 }
 0x284   : > { %2087 = vst [vmem:[#allocation1 + $0x1] ss:$4 sm:$0xff] %v13925_v24  ;;  %2121 = vmatpush.msra.mxu3 %v6489_v9  ;;  %1878 = vmatmul.f32.gmra.mxu1 %v8729_v15  ;;  %v13928_v24 = vld [vmem:[#allocation69_spill] sm:$0xff]  ;;  %v8955_v9 = vsel %vm7924_vm6, %v1904_v60, %v1905_v52  ;;  %v6485_v52 = vld [vmem:[%s13541_s3 + $0x420] sm:$0xff] }
 0x285   : > { %2088 = vst [vmem:[#allocation1 + $0x2] ss:$4 sm:$0xff] %v7878_v25  ;;  %v6486_v15 = vld [vmem:[%s13541_s3 + $0x428] sm:$0xff] }
 0x286   : > { %2089 = vst [vmem:[#allocation1 + $0x3] ss:$4 sm:$0xff] %v8160_v30  ;;  %2122 = vmatpush.msra.mxu3 %v6488_v44  ;;  %v13931_v44 = vld [vmem:[#allocation59_spill] sm:$0xff] }
 0x287   : > { %v1954_v40 = vld.sshfl [vmem:[#allocation1 + $0x20] sm:$0xff pattern:$0x73625140]  ;;  %13929 = vst [vmem:[#allocation77_spill] sm:$0xff] %v8955_v9 }
 0x288   : > { %1959 = vst [vmem:[#allocation1 + $0x20] ss:$4 sm:$0xff] %v13926_v58  ;;  %2012 = vmatmul.f32.gmra.mxu2 %v1954_v40  ;;  %v6487_v40 = vld [vmem:[%s13541_s3 + $0x430] sm:$0xff] }
 0x289   : > { %1960 = vst [vmem:[#allocation1 + $0x21] ss:$4 sm:$0xff] %v13928_v24  ;;  %2123 = vmatpush.msra.mxu3 %v6487_v40  ;;  %v6484_v40 = vld [vmem:[%s13541_s3 + $0x418] sm:$0xff] }
 0x28a   : > { %1961 = vst [vmem:[#allocation1 + $0x22] ss:$4 sm:$0xff] %v8950_v23  ;;  %v1912_v23 = vrot.slane %v8966_v62, 7 }
 0x28b   : > { %1962 = vst [vmem:[#allocation1 + $0x23] ss:$4 sm:$0xff] %v8955_v9  ;;  %2124 = vmatpush.msra.mxu3 %v6486_v15  ;;  %v6463_v15 = vrot.slane %v8838_v59, 9  ;;  %v1911_v9 = vrot.slane %v1909_v17, 2 }
 0x28c   : > { %1881 = vmatmul.f32.gmra.mxu1 %v1835_v56 }
 0x28d   : > { %v8969_v60 = vld.sshfl [vmem:[#allocation1] sm:$0xff pattern:$0x73625140]  ;;  %2125 = vmatpush.msra.mxu3 %v6485_v52  ;;  %v8990_v56 = vsel %vm7924_vm6, %v6463_v15, %v1909_v17  ;;  %v8998_v59 = vsel %vm7924_vm6, %v1911_v9, %v1912_v23  ;;  %v9006_v15 = vrot.slane %v8592_v48, 6  ;;  %v6512_v23 = vld [vmem:[%s13541_s3 + $0x4f8] sm:$0xff] }
 0x28e   : > { %2096 = vst [vmem:[#allocation1] ss:$4 sm:$0xff] %v7945_v21  ;;  %v6481_v17 = vld [vmem:[%s13541_s3 + $0x400] sm:$0xff]  ;;  %2235 = vmatpush.msrb.mxu1 %v6512_v23  ;;  %v6510_v23 = vld [vmem:[%s13541_s3 + $0x4e8] sm:$0xff] }
 0x28f   : > { %2097 = vst [vmem:[#allocation1 + $0x1] ss:$4 sm:$0xff] %v13931_v44  ;;  %2126 = vmatpush.msra.mxu3 %v6484_v40  ;;  %v6482_v40 = vld [vmem:[%s13541_s3 + $0x408] sm:$0xff] }
 0x290   : > { %2015 = vmatmul.f32.gmra.mxu2 %v8789_v3  ;;  %2098 = vst [vmem:[#allocation1 + $0x2] ss:$4 sm:$0xff] %v8071_v16  ;;  %v6483_v3 = vld [vmem:[%s13541_s3 + $0x410] sm:$0xff] }
 0x291   : > { %2099 = vst [vmem:[#allocation1 + $0x3] ss:$4 sm:$0xff] %v8204_v43  ;;  %2127 = vmatpush.msra.mxu3 %v6483_v3  ;;  %v1916_v3 = vrot.slane %v8876_v34, 7 }
 0x292   : > { %v1964_v52 = vld.sshfl [vmem:[#allocation1 + $0x20] sm:$0xff pattern:$0x73625140]  ;;  %13932 = vst [vmem:[#allocation79_spill] sm:$0xff] %v8990_v56 }
 0x293   : > { %1969 = vst [vmem:[#allocation1 + $0x20] ss:$4 sm:$0xff] %v8574_v8  ;;  %2128 = vmatpush.msra.mxu3 %v6482_v40  ;;  %v13935_v40 = vld [vmem:[#allocation8_spill] sm:$0xff] }
 0x294   : > { %1970 = vst [vmem:[#allocation1 + $0x21] ss:$4 sm:$0xff] %v8584_v63  ;;  %v1919_v63 = vrot.slane %v9006_v15, 7  ;;  %v13938_v8 = vld [vmem:[#allocation12_spill] sm:$0xff] }
 0x295   : > { %13933 = vst [vmem:[#allocation80_spill] sm:$0xff] %v8998_v59  ;;  %2129 = vmatpush.msra.mxu3 %v6481_v17  ;;  %v6511_v17 = vld [vmem:[%s13541_s3 + $0x4f0] sm:$0xff] }
 0x296   : > { %1971 = vst [vmem:[#allocation1 + $0x22] ss:$4 sm:$0xff] %v8990_v56  ;;  %2130 = vmatmul.f32.vlgmr.msra.gmra.mxu3 %v8889_v35  ;;  %v6464_v56 = vrot.slane %v8869_v46, 9  ;;  %2236 = vmatpush.msrb.mxu1 %v6511_v17  ;;  %v1918_v35 = vrot.slane %v1916_v3, 2  ;;  %v6509_v46 = vld [vmem:[%s13541_s3 + $0x4e0] sm:$0xff] }
 0x297   : > { %1972 = vst [vmem:[#allocation1 + $0x23] ss:$4 sm:$0xff] %v8998_v59  ;;  %v13936_v59 = vld [vmem:[#allocation9_spill] sm:$0xff] }
 0x298   : > { %13934 = vst [vmem:[#allocation81_spill] sm:$0xff] %v9006_v15  ;;  %2018 = vmatmul.f32.gmra.mxu2 %v1964_v52  ;;  %v9013_v9 = vld.sshfl [vmem:[#allocation1] sm:$0xff pattern:$0x73625140]  ;;  %2237 = vmatpush.msrb.mxu1 %v6510_v23  ;;  %v9033_v17 = vsel %vm7924_vm6, %v6464_v56, %v1916_v3  ;;  %v9038_v24 = vsel %vm7924_vm6, %v1918_v35, %v1919_v63  ;;  %v6508_v23 = vld [vmem:[%s13541_s3 + $0x4d8] sm:$0xff]  ;;  %v6507_v56 = vld [vmem:[%s13541_s3 + $0x4d0] sm:$0xff] }
 0x299   : > { %2180 = vst [vmem:[#allocation1] ss:$4 sm:$0xff] %v13935_v40  ;;  %v13937_v52 = vld [vmem:[#allocation11_spill] sm:$0xff]  ;;  %v6506_v63 = vld [vmem:[%s13541_s3 + $0x4c8] sm:$0xff]  ;;  %v13941_v3 = vld [vmem:[#allocation14_spill] sm:$0xff] }
 0x29a   : > { %2182 = vst [vmem:[#allocation1 + $0x1] ss:$4 sm:$0xff] %v13936_v59  ;;  %2238 = vmatpush.msrb.mxu1 %v6509_v46  ;;  %v6505_v35 = vld [vmem:[%s13541_s3 + $0x4c0] sm:$0xff] }
 0x29b   : > { %2184 = vst [vmem:[#allocation1 + $0x2] ss:$4 sm:$0xff] %v13937_v52 }
 0x29c   : > { %2186 = vst [vmem:[#allocation1 + $0x3] ss:$4 sm:$0xff] %v13938_v8  ;;  %2239 = vmatpush.msrb.mxu1 %v6508_v23  ;;  %v13943_v23 = vld [vmem:[#allocation16_spill] sm:$0xff] }
 0x29d   : > { %13939 = vst [vmem:[#allocation8_spill] sm:$0xff] %v9033_v17 }
 0x29e   : > { %v1974_v40 = vld.sshfl [vmem:[#allocation1 + $0x20] sm:$0xff pattern:$0x73625140]  ;;  %13940 = vst [vmem:[#allocation9_spill] sm:$0xff] %v9038_v24  ;;  %2240 = vmatpush.msrb.mxu1 %v6507_v56 }
 0x29f   : > { %1979 = vst [vmem:[#allocation1 + $0x20] ss:$4 sm:$0xff] %v8623_v50  ;;  %v9204_v50 = vld [vmem:[%s13540_s2] ss:$0 sm:$0xff] }
 0x2a0   : > { %1980 = vst [vmem:[#allocation1 + $0x21] ss:$4 sm:$0xff] %v8627_v47  ;;  %2021 = vmatmul.f32.gmra.mxu2 %v8822_v51  ;;  %2241 = vmatpush.msrb.mxu1 %v6506_v63  ;;  %v13942_v51 = vld [vmem:[#allocation15_spill] sm:$0xff]  ;;  %v6503_v63 = vld [vmem:[%s13541_s3 + $0x4b0] sm:$0xff] }
 0x2a1   : > { %1981 = vst [vmem:[#allocation1 + $0x22] ss:$4 sm:$0xff] %v9033_v17  ;;  %v6504_v17 = vld [vmem:[%s13541_s3 + $0x4b8] sm:$0xff] }
 0x2a2   : > { %1982 = vst [vmem:[#allocation1 + $0x23] ss:$4 sm:$0xff] %v9038_v24  ;;  %2242 = vmatpush.msrb.mxu1 %v6505_v35  ;;  %v13944_v24 = vld [vmem:[#allocation17_spill] sm:$0xff]  ;;  %v13945_v35 = vrot.slane %v13904_v61, 2  ;;  %v13971_v47 = vld [vmem:[#allocation46_spill] sm:$0xff] }
 0x2a3   : > { %v2195_v46 = vld.sshfl [vmem:[#allocation1] sm:$0xff pattern:$0x73625140]  ;;  %13972 = vst [vmem:[#allocation86_spill] sm:$0xff] %v9204_v50 }
 0x2a4   : > { %2197 = vst [vmem:[#allocation1] ss:$4 sm:$0xff] %v13941_v3  ;;  %2243 = vmatpush.msrb.mxu1 %v6504_v17  ;;  %v13946_v17 = vld [vmem:[#allocation23_spill] sm:$0xff] }
 0x2a5   : > { %2198 = vst [vmem:[#allocation1 + $0x1] ss:$4 sm:$0xff] %v13942_v51  ;;  %v13949_v3 = vld [vmem:[#allocation27_spill] sm:$0xff] }
 0x2a6   : > { %2199 = vst [vmem:[#allocation1 + $0x2] ss:$4 sm:$0xff] %v13943_v23  ;;  %2244 = vmatpush.msrb.mxu1 %v6503_v63  ;;  %v13947_v63 = vld [vmem:[#allocation24_spill] sm:$0xff] }
 0x2a7   : > { %2200 = vst [vmem:[#allocation1 + $0x3] ss:$4 sm:$0xff] %v13944_v24 }
 0x2a8   : > { %2024 = vmatmul.f32.gmra.mxu2 %v1974_v40  ;;  %v6502_v40 = vld [vmem:[%s13541_s3 + $0x4a8] sm:$0xff] }
 0x2a9   : > { %v1984_v56 = vld.sshfl [vmem:[#allocation1 + $0x20] sm:$0xff pattern:$0x73625140]  ;;  %2245 = vmatpush.msrb.mxu1 %v6502_v40  ;;  %v6499_v40 = vld [vmem:[%s13541_s3 + $0x490] sm:$0xff] }
 0x2aa   : > { %2067 = vst [vmem:[#allocation1 + $0x20] ss:$4 sm:$0xff] %v8330_v53  ;;  %v6501_v53 = vld [vmem:[%s13541_s3 + $0x4a0] sm:$0xff] }
 0x2ab   : > { %2069 = vst [vmem:[#allocation1 + $0x21] ss:$4 sm:$0xff] %v8458_v49  ;;  %2246 = vmatpush.msrb.mxu1 %v6501_v53 }
 0x2ac   : > { %2071 = vst [vmem:[#allocation1 + $0x22] ss:$4 sm:$0xff] %v13904_v61  ;;  %v6500_v61 = vld [vmem:[%s13541_s3 + $0x498] sm:$0xff] }
 0x2ad   : > { %2073 = vst [vmem:[#allocation1 + $0x23] ss:$4 sm:$0xff] %v13945_v35  ;;  %2247 = vmatpush.msrb.mxu1 %v6500_v61  ;;  %v13948_v35 = vld [vmem:[#allocation26_spill] sm:$0xff]  ;;  %v6497_v61 = vld [vmem:[%s13541_s3 + $0x480] sm:$0xff] }
 0x2ae   : > { %v9076_v49 = vld.sshfl [vmem:[#allocation1] sm:$0xff pattern:$0x73625140] }
 0x2af   : > { %2207 = vst [vmem:[#allocation1] ss:$4 sm:$0xff] %v13946_v17  ;;  %2248 = vmatpush.msrb.mxu1 %v6499_v40  ;;  %v9099_v40 = vpop.f32.mrf.mxu1 }
 0x2b0   : > { %2027 = vmatmul.f32.gmra.mxu2 %v8855_v12  ;;  %2208 = vst [vmem:[#allocation1 + $0x1] ss:$4 sm:$0xff] %v13947_v63  ;;  %v6498_v12 = vld [vmem:[%s13541_s3 + $0x488] sm:$0xff] }
 0x2b1   : > { %2209 = vst [vmem:[#allocation1 + $0x2] ss:$4 sm:$0xff] %v13948_v35  ;;  %2249 = vmatpush.msrb.mxu1 %v6498_v12  ;;  %v6531_v12 = vld [vmem:[%s13541_s3 + $0x570] sm:$0xff] }
 0x2b2   : > { %2210 = vst [vmem:[#allocation1 + $0x3] ss:$4 sm:$0xff] %v13949_v3 }
 0x2b3   : > { %2250 = vmatpush.msrb.mxu1 %v6497_v61  ;;  %13950 = vst [vmem:[#allocation11_spill] sm:$0xff] %v9099_v40  ;;  %v6530_v61 = vld [vmem:[%s13541_s3 + $0x568] sm:$0xff] }
 0x2b4   : > { %v2075_v53 = vld.sshfl [vmem:[#allocation1 + $0x20] sm:$0xff pattern:$0x73625140]  ;;  %2251 = vmatmul.f32.vlgmr.msrb.gmra.mxu1 %v2195_v46 }
 0x2b5   : > { %2080 = vst [vmem:[#allocation1 + $0x20] ss:$4 sm:$0xff] %v8367_v13  ;;  %2133 = vmatmul.f32.gmra.mxu3 %v2075_v53  ;;  %v6532_v53 = vld [vmem:[%s13541_s3 + $0x578] sm:$0xff]  ;;  %v6529_v46 = vld [vmem:[%s13541_s3 + $0x560] sm:$0xff] }
 0x2b6   : > { %2081 = vst [vmem:[#allocation1 + $0x21] ss:$4 sm:$0xff] %v8501_v36  ;;  %2384 = vmatpush.msrb.mxu2 %v6532_v53  ;;  %v13951_v53 = vld [vmem:[#allocation48_spill] sm:$0xff] }
 0x2b7   : > { %2082 = vst [vmem:[#allocation1 + $0x22] ss:$4 sm:$0xff] %v8811_v31  ;;  %v13962_v31 = vld [vmem:[#allocation39_spill] sm:$0xff] }
 0x2b8   : > { %2083 = vst [vmem:[#allocation1 + $0x23] ss:$4 sm:$0xff] %v8929_v45  ;;  %2030 = vmatmul.f32.gmra.mxu2 %v1984_v56  ;;  %v734_v56 = vpop.f32.mrf.mxu0 }
 0x2b9   : > { %2385 = vmatpush.msrb.mxu2 %v6531_v12  ;;  %v9122_v12 = vadd.f32 %v13951_v53, %v734_v56 }
 0x2bb   : > { %2386 = vmatpush.msrb.mxu2 %v6530_v61  ;;  %13952 = vst [vmem:[#allocation12_spill] sm:$0xff] %v9122_v12  ;;  %v9125_v61 = vrot.slane %v9122_v12, 2  ;;  %v9135_v56 = vrot.slane %v9122_v12, 6  ;;  %v6513_v58 = vrot.slane %v9122_v12, 9 }
 0x2bd   : > { %2136 = vmatmul.f32.gmra.mxu3 %v8926_v4  ;;  %2387 = vmatpush.msrb.mxu2 %v6529_v46  ;;  %v6528_v4 = vld [vmem:[%s13541_s3 + $0x558] sm:$0xff]  ;;  %13953 = vst [vmem:[#allocation48_spill] sm:$0xff] %v9125_v61  ;;  %v9127_v46 = vld.sshfl [vmem:[#allocation1] sm:$0xff pattern:$0x73625140]  ;;  %v2286_v36 = vrot.slane %v9125_v61, 7 }
 0x2be   : > { %2217 = vst [vmem:[#allocation1] ss:$4 sm:$0xff] %v9122_v12 }
 0x2bf   : > { %v2085_v40 = vld.sshfl [vmem:[#allocation1 + $0x20] sm:$0xff pattern:$0x73625140]  ;;  %2388 = vmatpush.msrb.mxu2 %v6528_v4  ;;  %2218 = vst [vmem:[#allocation1 + $0x1] ss:$4 sm:$0xff] %v9125_v61 }
 0x2c0   : > { %2090 = vst [vmem:[#allocation1 + $0x20] ss:$4 sm:$0xff] %v8402_v18  ;;  %v737_v45 = vpop.f32.mrf.mxu0 }
 0x2c1   : > { %2091 = vst [vmem:[#allocation1 + $0x21] ss:$4 sm:$0xff] %v8555_v22  ;;  %v13968_v22 = vld [vmem:[#allocation44_spill] sm:$0xff] }
 0x2c2   : > { %2092 = vst [vmem:[#allocation1 + $0x22] ss:$4 sm:$0xff] %v13915_v29 }
 0x2c3   : > { %2093 = vst [vmem:[#allocation1 + $0x23] ss:$4 sm:$0xff] %v8966_v62 }
 0x2c4   : > { %13954 = vst [vmem:[#allocation82_spill] sm:$0xff] %v9135_v56 }
 0x2c5   : > { %2139 = vmatmul.f32.gmra.mxu3 %v2085_v40  ;;  %v9140_v40 = vadd.f32 %v13951_v53, %v737_v45  ;;  %2219 = vst [vmem:[#allocation1 + $0x2] ss:$4 sm:$0xff] %v9135_v56  ;;  %v6527_v45 = vld [vmem:[%s13541_s3 + $0x550] sm:$0xff] }
 0x2c6   : > { %v13957_v53 = vld [vmem:[#allocation33_spill] sm:$0xff]  ;;  %2389 = vmatpush.msrb.mxu2 %v6527_v45  ;;  %v6524_v45 = vld [vmem:[%s13541_s3 + $0x538] sm:$0xff] }
 0x2c7   : > { %13955 = vst [vmem:[#allocation83_spill] sm:$0xff] %v9140_v40 }
 0x2c8   : > { %2220 = vst [vmem:[#allocation1 + $0x3] ss:$4 sm:$0xff] %v9140_v40 }
 0x2ca   : > { %v2095_v17 = vld.sshfl [vmem:[#allocation1 + $0x20] sm:$0xff pattern:$0x73625140] }
 0x2cb   : > { %2100 = vst [vmem:[#allocation1 + $0x20] ss:$4 sm:$0xff] %v8439_v33  ;;  %v2288_v33 = vrot.slane %v2286_v36, 2 }
 0x2cc   : > { %2101 = vst [vmem:[#allocation1 + $0x21] ss:$4 sm:$0xff] %v8592_v48 }
 0x2cd   : > { %2102 = vst [vmem:[#allocation1 + $0x22] ss:$4 sm:$0xff] %v8876_v34  ;;  %2142 = vmatmul.f32.gmra.mxu3 %v8969_v60  ;;  %v13956_v60 = vld [vmem:[#allocation32_spill] sm:$0xff]  ;;  %v13959_v34 = vld [vmem:[#allocation35_spill] sm:$0xff] }
 0x2ce   : > { %2103 = vst [vmem:[#allocation1 + $0x23] ss:$4 sm:$0xff] %v9006_v15  ;;  %v6526_v15 = vld [vmem:[%s13541_s3 + $0x548] sm:$0xff] }
 0x2cf   : > { %v9146_v62 = vld.sshfl [vmem:[#allocation1] sm:$0xff pattern:$0x73625140]  ;;  %2390 = vmatpush.msrb.mxu2 %v6526_v15  ;;  %v6523_v15 = vld [vmem:[%s13541_s3 + $0x530] sm:$0xff] }
 0x2d0   : > { %2329 = vst [vmem:[#allocation1] ss:$4 sm:$0xff] %v13956_v60  ;;  %v6525_v60 = vld [vmem:[%s13541_s3 + $0x540] sm:$0xff] }
 0x2d1   : > { %2331 = vst [vmem:[#allocation1 + $0x1] ss:$4 sm:$0xff] %v13957_v53  ;;  %2391 = vmatpush.msrb.mxu2 %v6525_v60  ;;  %v9168_v53 = vpop.f32.mrf.mxu1  ;;  %v13961_v60 = vld [vmem:[#allocation38_spill] sm:$0xff] }
 0x2d2   : > { %2335 = vst [vmem:[#allocation1 + $0x3] ss:$4 sm:$0xff] %v13959_v34 }
 0x2d3   : > { %13960 = vst [vmem:[#allocation32_spill] sm:$0xff] %v9168_v53  ;;  %2392 = vmatpush.msrb.mxu2 %v6524_v45  ;;  %v13964_v45 = vld [vmem:[#allocation41_spill] sm:$0xff] }
 0x2d5   : > { %v2105_v4 = vld.sshfl [vmem:[#allocation1 + $0x20] sm:$0xff pattern:$0x73625140]  ;;  %2145 = vmatmul.f32.gmra.mxu3 %v2095_v17  ;;  %v13958_v17 = vld [vmem:[#allocation34_spill] sm:$0xff]  ;;  %2393 = vmatpush.msrb.mxu2 %v6523_v15 }
 0x2d6   : > { %2188 = vst [vmem:[#allocation1 + $0x20] ss:$4 sm:$0xff] %v7812_v0  ;;  %v13966_v15 = vld [vmem:[#allocation43_spill] sm:$0xff] }
 0x2d7   : > { %2190 = vst [vmem:[#allocation1 + $0x21] ss:$4 sm:$0xff] %v7815_v1 }
 0x2d8   : > { %2192 = vst [vmem:[#allocation1 + $0x22] ss:$4 sm:$0xff] %v7818_v2 }
 0x2d9   : > { %2194 = vst [vmem:[#allocation1 + $0x23] ss:$4 sm:$0xff] %v7825_v5  ;;  %v9182_v53 = vpop.f32.mrf.mxu1 }
 0x2da   : > { %2333 = vst [vmem:[#allocation1 + $0x2] ss:$4 sm:$0xff] %v13958_v17 }
 0x2db   : > { %13965 = vst [vmem:[#allocation33_spill] sm:$0xff] %v9182_v53  ;;  %v9197_v53 = vrot.slane %v9122_v12, 4 }
 0x2dd   : > { %2148 = vmatmul.f32.gmra.mxu3 %v9013_v9  ;;  %13970 = vst [vmem:[#allocation85_spill] sm:$0xff] %v9197_v53 }
 0x2e0   : > { %v2196_v29 = vld.sshfl [vmem:[#allocation1 + $0x20] sm:$0xff pattern:$0x73625140] }
 0x2e1   : > { %2201 = vst [vmem:[#allocation1 + $0x20] ss:$4 sm:$0xff] %v7862_v19  ;;  %2254 = vmatmul.f32.gmra.mxu1 %v2196_v29  ;;  %v9176_v9 = vld.sshfl [vmem:[#allocation1] sm:$0xff pattern:$0x73625140] }
 0x2e2   : > { %2202 = vst [vmem:[#allocation1 + $0x21] ss:$4 sm:$0xff] %v7865_v20  ;;  %v13963_v29 = vld [vmem:[#allocation40_spill] sm:$0xff] }
 0x2e3   : > { %2203 = vst [vmem:[#allocation1 + $0x22] ss:$4 sm:$0xff] %v13872_v26  ;;  %v9237_v26 = vsel %vm7924_vm6, %v6513_v58, %v2286_v36 }
 0x2e4   : > { %2204 = vst [vmem:[#allocation1 + $0x23] ss:$4 sm:$0xff] %v7878_v25 }
 0x2e5   : > { %2346 = vst [vmem:[#allocation1] ss:$4 sm:$0xff] %v13961_v60  ;;  %2151 = vmatmul.f32.gmra.mxu3 %v2105_v4  ;;  %v9192_v60 = vpop.f32.mrf.mxu1 }
 0x2e6   : > { %2347 = vst [vmem:[#allocation1 + $0x1] ss:$4 sm:$0xff] %v13962_v31  ;;  %v740_v31 = vpop.f32.mrf.mxu0 }
 0x2e7   : > { %2348 = vst [vmem:[#allocation1 + $0x2] ss:$4 sm:$0xff] %v13963_v29 }
 0x2e8   : > { %2349 = vst [vmem:[#allocation1 + $0x3] ss:$4 sm:$0xff] %v13964_v45 }
 0x2e9   : > { %2257 = vmatmul.f32.gmra.mxu1 %v9076_v49  ;;  %13967 = vst [vmem:[#allocation84_spill] sm:$0xff] %v9192_v60  ;;  %v13969_v49 = vld [vmem:[#allocation45_spill] sm:$0xff]  ;;  %v9210_v60 = vrot.slane %v9140_v40, 2 }
 0x2ea   : > { %13977 = vst [vmem:[#allocation91_spill] sm:$0xff] %v9237_v26 }
 0x2eb   : > { %v2206_v48 = vld.sshfl [vmem:[#allocation1 + $0x20] sm:$0xff pattern:$0x73625140]  ;;  %13974 = vst [vmem:[#allocation88_spill] sm:$0xff] %v9210_v60  ;;  %v2296_v18 = vrot.slane %v9210_v60, 7 }
 0x2ec   : > { %2211 = vst [vmem:[#allocation1 + $0x20] ss:$4 sm:$0xff] %v7933_v10 }
 0x2ed   : > { %2212 = vst [vmem:[#allocation1 + $0x21] ss:$4 sm:$0xff] %v7945_v21  ;;  %v9230_v29 = vpop.f32.mrf.mxu1 }
 0x2ee   : > { %2213 = vst [vmem:[#allocation1 + $0x22] ss:$4 sm:$0xff] %v7953_v27  ;;  %v2289_v27 = vrot.slane %v9197_v53, 7 }
 0x2ef   : > { %2214 = vst [vmem:[#allocation1 + $0x23] ss:$4 sm:$0xff] %v8071_v16  ;;  %v9189_v4 = vld.sshfl [vmem:[#allocation1] sm:$0xff pattern:$0x73625140] }
 0x2f0   : > { %2356 = vst [vmem:[#allocation1] ss:$4 sm:$0xff] %v13966_v15  ;;  %v9207_v15 = vadd.f32 %v9204_v50, %v740_v31  ;;  %v2293_v31 = vrot.slane %v9140_v40, 7  ;;  %v6514_v50 = vrot.slane %v9135_v56, 9  ;;  %v9244_v17 = vsel %vm7924_vm6, %v2288_v33, %v2289_v27 }
 0x2f1   : > { %2357 = vst [vmem:[#allocation1 + $0x1] ss:$4 sm:$0xff] %v13968_v22  ;;  %2260 = vmatmul.f32.gmra.mxu1 %v2206_v48  ;;  %v9213_v48 = vrot.slane %v9140_v40, 4 }
 0x2f2   : > { %2358 = vst [vmem:[#allocation1 + $0x2] ss:$4 sm:$0xff] %v13969_v49  ;;  %v9216_v22 = vrot.slane %v9207_v15, 2  ;;  %v9228_v45 = vrot.slane %v9207_v15, 4  ;;  %v2295_v12 = vrot.slane %v2293_v31, 2 }
 0x2f3   : > { %2359 = vst [vmem:[#allocation1 + $0x3] ss:$4 sm:$0xff] %v13971_v47  ;;  %v9220_v47 = vrot.slane %v9140_v40, 6 }
 0x2f4   : > { %13973 = vst [vmem:[#allocation87_spill] sm:$0xff] %v9207_v15  ;;  %v9254_v36 = vsel %vm7924_vm6, %v2295_v12, %v2296_v18  ;;  %v13982_v18 = vld [vmem:[#allocation10_spill] sm:$0xff]  ;;  %v13984_v12 = vld [vmem:[#allocation31_spill] sm:$0xff] }
 0x2f5   : > { %13975 = vst [vmem:[#allocation89_spill] sm:$0xff] %v9213_v48  ;;  %v9258_v58 = vpop.f32.mrf.mxu1 }
 0x2f6   : > { %v2216_v49 = vld.sshfl [vmem:[#allocation1 + $0x20] sm:$0xff pattern:$0x73625140]  ;;  %13976 = vst [vmem:[#allocation90_spill] sm:$0xff] %v9230_v29  ;;  %v9249_v29 = vsel %vm7924_vm6, %v6514_v50, %v2293_v31 }
 0x2f7   : > { %2221 = vst [vmem:[#allocation1 + $0x20] ss:$4 sm:$0xff] %v9213_v48  ;;  %v13986_v31 = vld [vmem:[#allocation36_spill] sm:$0xff] }
 0x2f8   : > { %2222 = vst [vmem:[#allocation1 + $0x21] ss:$4 sm:$0xff] %v9220_v47 }
 0x2f9   : > { %2223 = vst [vmem:[#allocation1 + $0x22] ss:$4 sm:$0xff] %v9216_v22  ;;  %2263 = vmatmul.f32.gmra.mxu1 %v9127_v46 }
 0x2fa   : > { %v9239_v34 = vld.sshfl [vmem:[#allocation1] sm:$0xff pattern:$0x73625140]  ;;  %2224 = vst [vmem:[#allocation1 + $0x23] ss:$4 sm:$0xff] %v9228_v45 }
 0x2fb   : > { %13978 = vst [vmem:[#allocation92_spill] sm:$0xff] %v9244_v17 }
 0x2fc   : > { %2366 = vst [vmem:[#allocation1] ss:$4 sm:$0xff] %v9237_v26  ;;  %v9304_v26 = vpop.f32.mrf.mxu2 }
 0x2fd   : > { %13979 = vst [vmem:[#allocation93_spill] sm:$0xff] %v9249_v29  ;;  %v9269_v50 = vpop.f32.mrf.mxu1 }
 0x2fe   : > { %2367 = vst [vmem:[#allocation1 + $0x1] ss:$4 sm:$0xff] %v9244_v17  ;;  %v6515_v17 = vrot.slane %v9213_v48, 9 }
 0x2ff   : > { %13980 = vst [vmem:[#allocation94_spill] sm:$0xff] %v9254_v36 }
 0x300   : > { %2368 = vst [vmem:[#allocation1 + $0x2] ss:$4 sm:$0xff] %v9249_v29 }
 0x301   : > { %2369 = vst [vmem:[#allocation1 + $0x3] ss:$4 sm:$0xff] %v9254_v36  ;;  %v2226_v27 = vld.sshfl [vmem:[#allocation1 + $0x20] sm:$0xff pattern:$0x73625140]  ;;  %2266 = vmatmul.f32.gmra.mxu1 %v2216_v49 }
 0x302   : > { %13981 = vst [vmem:[#allocation95_spill] sm:$0xff] %v9258_v58  ;;  %v9299_v58 = vrot.slane %v9207_v15, 6 }
 0x303   : > { %2337 = vst [vmem:[#allocation1 + $0x20] ss:$4 sm:$0xff] %v8131_v39 }
 0x304   : > { %2339 = vst [vmem:[#allocation1 + $0x21] ss:$4 sm:$0xff] %v8137_v54 }
 0x305   : > { %2341 = vst [vmem:[#allocation1 + $0x22] ss:$4 sm:$0xff] %v13888_v41 }
 0x306   : > { %2343 = vst [vmem:[#allocation1 + $0x23] ss:$4 sm:$0xff] %v13890_v14 }
 0x307   : > { %13983 = vst [vmem:[#allocation10_spill] sm:$0xff] %v9269_v50 }
 0x308   : > { %v9263_v33 = vld.sshfl [vmem:[#allocation1] sm:$0xff pattern:$0x73625140]  ;;  %13989 = vst [vmem:[#allocation96_spill] sm:$0xff] %v9304_v26 }
 0x309   : > { %2450 = vst [vmem:[#allocation1] ss:$4 sm:$0xff] %v13936_v59  ;;  %2269 = vmatmul.f32.gmra.mxu1 %v9146_v62  ;;  %v9281_v59 = vpop.f32.mrf.mxu1  ;;  %v13987_v62 = vld [vmem:[#allocation37_spill] sm:$0xff] }
 0x30a   : > { %2452 = vst [vmem:[#allocation1 + $0x1] ss:$4 sm:$0xff] %v13982_v18 }
 0x30b   : > { %2454 = vst [vmem:[#allocation1 + $0x2] ss:$4 sm:$0xff] %v13938_v8 }
 0x30c   : > { %2456 = vst [vmem:[#allocation1 + $0x3] ss:$4 sm:$0xff] %v13984_v12 }
 0x30d   : > { %v9273_v46 = vld.sshfl [vmem:[#allocation1 + $0x20] sm:$0xff pattern:$0x73625140]  ;;  %13985 = vst [vmem:[#allocation31_spill] sm:$0xff] %v9281_v59  ;;  %v2300_v59 = vrot.slane %v9220_v47, 7 }
 0x30e   : > { %2350 = vst [vmem:[#allocation1 + $0x20] ss:$4 sm:$0xff] %v13905_v32 }
 0x30f   : > { %2351 = vst [vmem:[#allocation1 + $0x21] ss:$4 sm:$0xff] %v13907_v57  ;;  %v9318_v26 = vsel %vm7924_vm6, %v6515_v17, %v2300_v59 }
 0x310   : > { %2352 = vst [vmem:[#allocation1 + $0x22] ss:$4 sm:$0xff] %v13896_v38  ;;  %v2310_v38 = vrot.slane %v9299_v58, 7 }
 0x311   : > { %2353 = vst [vmem:[#allocation1 + $0x23] ss:$4 sm:$0xff] %v13898_v28  ;;  %2272 = vmatmul.f32.gmra.mxu1 %v2226_v27  ;;  %v13988_v27 = vld [vmem:[#allocation25_spill] sm:$0xff] }
 0x312   : > { %13991 = vst [vmem:[#allocation97_spill] sm:$0xff] %v9318_v26 }
 0x313   : > { %v9278_v49 = vld.sshfl [vmem:[#allocation1] sm:$0xff pattern:$0x73625140] }
 0x314   : > { %2467 = vst [vmem:[#allocation1] ss:$4 sm:$0xff] %v13942_v51  ;;  %v13990_v51 = vld [vmem:[#allocation42_spill] sm:$0xff] }
 0x315   : > { %2468 = vst [vmem:[#allocation1 + $0x1] ss:$4 sm:$0xff] %v13986_v31  ;;  %v2307_v31 = vrot.slane %v9228_v45, 7 }
 0x316   : > { %2469 = vst [vmem:[#allocation1 + $0x2] ss:$4 sm:$0xff] %v13944_v24 }
 0x317   : > { %2470 = vst [vmem:[#allocation1 + $0x3] ss:$4 sm:$0xff] %v13987_v62  ;;  %v2309_v28 = vrot.slane %v2307_v31, 2  ;;  %v6521_v62 = vld [vmem:[%s13541_s3 + $0x520] sm:$0xff] }
 0x318   : > { %v9287_v18 = vld.sshfl [vmem:[#allocation1 + $0x20] sm:$0xff pattern:$0x73625140] }
 0x319   : > { %2360 = vst [vmem:[#allocation1 + $0x20] ss:$4 sm:$0xff] %v13911_v7  ;;  %v9337_v17 = vsel %vm7924_vm6, %v2309_v28, %v2310_v38  ;;  %v6518_v38 = vld [vmem:[%s13541_s3 + $0x508] sm:$0xff]  ;;  %v6517_v28 = vld [vmem:[%s13541_s3 + $0x500] sm:$0xff] }
 0x31a   : > { %2361 = vst [vmem:[#allocation1 + $0x21] ss:$4 sm:$0xff] %v13912_v6 }
 0x31b   : > { %2362 = vst [vmem:[#allocation1 + $0x22] ss:$4 sm:$0xff] %v8228_v11  ;;  %v2302_v11 = vrot.slane %v2300_v59, 2  ;;  %v6548_v59 = vld [vmem:[%s13541_s3 + $0x5f8] sm:$0xff] }
 0x31c   : > { %2363 = vst [vmem:[#allocation1 + $0x23] ss:$4 sm:$0xff] %v8233_v42  ;;  %v2303_v42 = vrot.slane %v9207_v15, 7  ;;  %2505 = vmatpush.msrb.mxu3 %v6548_v59  ;;  %v6544_v59 = vld [vmem:[%s13541_s3 + $0x5d8] sm:$0xff] }
 0x31d   : > { %13994 = vst [vmem:[#allocation100_spill] sm:$0xff] %v9337_v17 }
 0x31e   : > { %v9292_v50 = vld.sshfl [vmem:[#allocation1] sm:$0xff pattern:$0x73625140]  ;;  %v9324_v14 = vsel %vm7924_vm6, %v2302_v11, %v2303_v42  ;;  %v6519_v42 = vld [vmem:[%s13541_s3 + $0x510] sm:$0xff] }
 0x31f   : > { %2477 = vst [vmem:[#allocation1] ss:$4 sm:$0xff] %v13947_v63  ;;  %v6516_v63 = vrot.slane %v9216_v22, 9 }
 0x320   : > { %2478 = vst [vmem:[#allocation1 + $0x1] ss:$4 sm:$0xff] %v13988_v27  ;;  %v6522_v27 = vld [vmem:[%s13541_s3 + $0x528] sm:$0xff] }
 0x321   : > { %2479 = vst [vmem:[#allocation1 + $0x2] ss:$4 sm:$0xff] %v13949_v3  ;;  %2394 = vmatpush.msrb.mxu2 %v6522_v27  ;;  %v6520_v27 = vld [vmem:[%s13541_s3 + $0x518] sm:$0xff]  ;;  %v9332_v41 = vsel %vm7924_vm6, %v6516_v63, %v2307_v31  ;;  %v9346_v63 = vpop.f32.mrf.mxu2 }
 0x322   : > { %2480 = vst [vmem:[#allocation1 + $0x3] ss:$4 sm:$0xff] %v13990_v51 }
 0x323   : > { %v9320_v51 = vld.sshfl [vmem:[#allocation1 + $0x20] sm:$0xff pattern:$0x73625140]  ;;  %2395 = vmatpush.msrb.mxu2 %v6521_v62  ;;  %13992 = vst [vmem:[#allocation98_spill] sm:$0xff] %v9324_v14  ;;  %v6547_v62 = vld [vmem:[%s13541_s3 + $0x5f0] sm:$0xff] }
 0x324   : > { %2370 = vst [vmem:[#allocation1 + $0x20] ss:$4 sm:$0xff] %v9318_v26  ;;  %2506 = vmatpush.msrb.mxu3 %v6547_v62  ;;  %v6543_v62 = vld [vmem:[%s13541_s3 + $0x5d0] sm:$0xff] }
 0x325   : > { %13993 = vst [vmem:[#allocation99_spill] sm:$0xff] %v9332_v41  ;;  %2396 = vmatpush.msrb.mxu2 %v6520_v27  ;;  %v13996_v27 = vld [vmem:[#allocation49_spill] sm:$0xff] }
 0x326   : > { %2371 = vst [vmem:[#allocation1 + $0x21] ss:$4 sm:$0xff] %v9324_v14 }
 0x327   : > { %2372 = vst [vmem:[#allocation1 + $0x22] ss:$4 sm:$0xff] %v9332_v41  ;;  %2397 = vmatpush.msrb.mxu2 %v6519_v42 }
 0x328   : > { %2373 = vst [vmem:[#allocation1 + $0x23] ss:$4 sm:$0xff] %v9337_v17 }
 0x329   : > { %v9343_v11 = vld.sshfl [vmem:[#allocation1] sm:$0xff pattern:$0x73625140]  ;;  %13995 = vst [vmem:[#allocation101_spill] sm:$0xff] %v9346_v63  ;;  %2398 = vmatpush.msrb.mxu2 %v6518_v38  ;;  %v9373_v42 = vpop.f32.mrf.mxu2  ;;  %v9417_v63 = vpop.f32.mrf.mxu3 }
 0x32a   : > { %2487 = vst [vmem:[#allocation1] ss:$4 sm:$0xff] %v9125_v61  ;;  %v6577_v61 = vld [vmem:[%s13541_s3 + $0x6d8] sm:$0xff] }
 0x32b   : > { %2488 = vst [vmem:[#allocation1 + $0x1] ss:$4 sm:$0xff] %v9197_v53  ;;  %2399 = vmatpush.msrb.mxu2 %v6517_v28  ;;  %v6545_v28 = vld [vmem:[%s13541_s3 + $0x5e0] sm:$0xff] }
 0x32c   : > { %2489 = vst [vmem:[#allocation1 + $0x2] ss:$4 sm:$0xff] %v9140_v40  ;;  %2400 = vmatmul.f32.vlgmr.msrb.gmra.mxu2 %v9176_v9  ;;  %v6546_v9 = vld [vmem:[%s13541_s3 + $0x5e8] sm:$0xff]  ;;  %v6549_v53 = vld [vmem:[%s13541_s3 + $0x600] sm:$0xff] }
 0x32d   : > { %2490 = vst [vmem:[#allocation1 + $0x3] ss:$4 sm:$0xff] %v9210_v60  ;;  %2507 = vmatpush.msrb.mxu3 %v6546_v9 }
 0x32e   : > { %13997 = vst [vmem:[#allocation102_spill] sm:$0xff] %v9373_v42 }
 0x32f   : > { %v9362_v31 = vld.sshfl [vmem:[#allocation1 + $0x20] sm:$0xff pattern:$0x73625140]  ;;  %2508 = vmatpush.msrb.mxu3 %v6545_v28  ;;  %14000 = vst [vmem:[#allocation104_spill] sm:$0xff] %v9417_v63 }
 0x330   : > { %2458 = vst [vmem:[#allocation1 + $0x20] ss:$4 sm:$0xff] %v7815_v1  ;;  %v13998_v28 = vld [vmem:[#allocation19_spill] sm:$0xff] }
 0x331   : > { %2460 = vst [vmem:[#allocation1 + $0x21] ss:$4 sm:$0xff] %v13996_v27  ;;  %2509 = vmatpush.msrb.mxu3 %v6544_v59  ;;  %v9402_v59 = vpop.f32.mrf.mxu2 }
 0x332   : > { %2462 = vst [vmem:[#allocation1 + $0x22] ss:$4 sm:$0xff] %v7825_v5 }
 0x333   : > { %2464 = vst [vmem:[#allocation1 + $0x23] ss:$4 sm:$0xff] %v8118_v37  ;;  %2510 = vmatpush.msrb.mxu3 %v6543_v62  ;;  %v6540_v62 = vld [vmem:[%s13541_s3 + $0x5b8] sm:$0xff] }
 0x334   : > { %v9375_v38 = vld.sshfl [vmem:[#allocation1] sm:$0xff pattern:$0x73625140]  ;;  %2403 = vmatmul.f32.gmra.mxu2 %v9273_v46  ;;  %13999 = vst [vmem:[#allocation103_spill] sm:$0xff] %v9402_v59 }
 0x335   : > { %2571 = vst [vmem:[#allocation1] ss:$4 sm:$0xff] %v13937_v52  ;;  %v6542_v52 = vld [vmem:[%s13541_s3 + $0x5c8] sm:$0xff]  ;;  %v6541_v46 = vld [vmem:[%s13541_s3 + $0x5c0] sm:$0xff] }
 0x336   : > { %2573 = vst [vmem:[#allocation1 + $0x1] ss:$4 sm:$0xff] %v13938_v8  ;;  %2511 = vmatpush.msrb.mxu3 %v6542_v52 }
 0x337   : > { %2575 = vst [vmem:[#allocation1 + $0x2] ss:$4 sm:$0xff] %v7812_v0 }
 0x338   : > { %2577 = vst [vmem:[#allocation1 + $0x3] ss:$4 sm:$0xff] %v7815_v1  ;;  %2512 = vmatpush.msrb.mxu3 %v6541_v46  ;;  %v6539_v46 = vld [vmem:[%s13541_s3 + $0x5b0] sm:$0xff] }
 0x339   : > { %v9434_v63 = vpop.f32.mrf.mxu2 }
 0x33a   : > { %v9395_v9 = vld.sshfl [vmem:[#allocation1 + $0x20] sm:$0xff pattern:$0x73625140]  ;;  %2513 = vmatpush.msrb.mxu3 %v6540_v62  ;;  %14001 = vst [vmem:[#allocation105_spill] sm:$0xff] %v9434_v63 }
 0x33b   : > { %2471 = vst [vmem:[#allocation1 + $0x20] ss:$4 sm:$0xff] %v7865_v20  ;;  %v6537_v62 = vld [vmem:[%s13541_s3 + $0x5a0] sm:$0xff] }
 0x33c   : > { %2472 = vst [vmem:[#allocation1 + $0x21] ss:$4 sm:$0xff] %v13998_v28  ;;  %2406 = vmatmul.f32.gmra.mxu2 %v9189_v4  ;;  %2514 = vmatpush.msrb.mxu3 %v6539_v46  ;;  %v6538_v4 = vld [vmem:[%s13541_s3 + $0x5a8] sm:$0xff]  ;;  %v6536_v46 = vld [vmem:[%s13541_s3 + $0x598] sm:$0xff] }
 0x33d   : > { %2473 = vst [vmem:[#allocation1 + $0x22] ss:$4 sm:$0xff] %v7878_v25 }
 0x33e   : > { %2474 = vst [vmem:[#allocation1 + $0x23] ss:$4 sm:$0xff] %v8160_v30  ;;  %2515 = vmatpush.msrb.mxu3 %v6538_v4  ;;  %v6535_v4 = vld [vmem:[%s13541_s3 + $0x590] sm:$0xff] }
 0x33f   : > { %v9409_v52 = vld.sshfl [vmem:[#allocation1] sm:$0xff pattern:$0x73625140] }
 0x340   : > { %2588 = vst [vmem:[#allocation1] ss:$4 sm:$0xff] %v13943_v23  ;;  %2516 = vmatpush.msrb.mxu3 %v6537_v62  ;;  %v9441_v62 = vpop.f32.mrf.mxu3  ;;  %v6575_v23 = vld [vmem:[%s13541_s3 + $0x6c8] sm:$0xff] }
 0x341   : > { %2589 = vst [vmem:[#allocation1 + $0x1] ss:$4 sm:$0xff] %v13944_v24  ;;  %v9466_v63 = vpop.f32.mrf.mxu2 }
 0x342   : > { %2590 = vst [vmem:[#allocation1 + $0x2] ss:$4 sm:$0xff] %v7862_v19  ;;  %2517 = vmatpush.msrb.mxu3 %v6536_v46  ;;  %v6533_v46 = vld [vmem:[%s13541_s3 + $0x580] sm:$0xff] }
 0x343   : > { %2591 = vst [vmem:[#allocation1 + $0x3] ss:$4 sm:$0xff] %v7865_v20 }
 0x344   : > { %2409 = vmatmul.f32.gmra.mxu2 %v9287_v18  ;;  %2518 = vmatpush.msrb.mxu3 %v6535_v4  ;;  %14002 = vst [vmem:[#allocation106_spill] sm:$0xff] %v9441_v62  ;;  %v6534_v18 = vld [vmem:[%s13541_s3 + $0x588] sm:$0xff]  ;;  %v6564_v4 = vld [vmem:[%s13541_s3 + $0x678] sm:$0xff] }
 0x345   : > { %v9427_v59 = vld.sshfl [vmem:[#allocation1 + $0x20] sm:$0xff pattern:$0x73625140]  ;;  %2626 = vmatpush.msrb.mxu0 %v6564_v4  ;;  %14003 = vst [vmem:[#allocation107_spill] sm:$0xff] %v9466_v63 }
 0x346   : > { %2481 = vst [vmem:[#allocation1 + $0x20] ss:$4 sm:$0xff] %v7945_v21  ;;  %2519 = vmatpush.msrb.mxu3 %v6534_v18  ;;  %v6563_v18 = vld [vmem:[%s13541_s3 + $0x670] sm:$0xff] }
 0x347   : > { %2482 = vst [vmem:[#allocation1 + $0x21] ss:$4 sm:$0xff] %v13931_v44  ;;  %2627 = vmatpush.msrb.mxu0 %v6563_v18  ;;  %v6560_v18 = vld [vmem:[%s13541_s3 + $0x658] sm:$0xff] }
 0x348   : > { %2483 = vst [vmem:[#allocation1 + $0x22] ss:$4 sm:$0xff] %v8071_v16  ;;  %2520 = vmatpush.msrb.mxu3 %v6533_v46  ;;  %v6561_v46 = vld [vmem:[%s13541_s3 + $0x660] sm:$0xff] }
 0x349   : > { %2484 = vst [vmem:[#allocation1 + $0x23] ss:$4 sm:$0xff] %v8204_v43  ;;  %2521 = vmatmul.f32.vlgmr.msrb.gmra.mxu3 %v9278_v49  ;;  %v6562_v49 = vld [vmem:[%s13541_s3 + $0x668] sm:$0xff] }
 0x34a   : > { %v9443_v42 = vld.sshfl [vmem:[#allocation1] sm:$0xff pattern:$0x73625140]  ;;  %2628 = vmatpush.msrb.mxu0 %v6562_v49  ;;  %v6559_v49 = vld [vmem:[%s13541_s3 + $0x650] sm:$0xff] }
 0x34b   : > { %2598 = vst [vmem:[#allocation1] ss:$4 sm:$0xff] %v13948_v35  ;;  %v14022_v35 = vld [vmem:[#allocation46_spill] sm:$0xff] }
 0x34c   : > { %2599 = vst [vmem:[#allocation1 + $0x1] ss:$4 sm:$0xff] %v13949_v3  ;;  %2412 = vmatmul.f32.gmra.mxu2 %v9239_v34  ;;  %v9473_v34 = vpop.f32.mrf.mxu3  ;;  %2629 = vmatpush.msrb.mxu0 %v6561_v46  ;;  %v6558_v46 = vld [vmem:[%s13541_s3 + $0x648] sm:$0xff] }
 0x34d   : > { %2600 = vst [vmem:[#allocation1 + $0x2] ss:$4 sm:$0xff] %v7933_v10 }
 0x34e   : > { %2601 = vst [vmem:[#allocation1 + $0x3] ss:$4 sm:$0xff] %v7945_v21  ;;  %2630 = vmatpush.msrb.mxu0 %v6560_v18  ;;  %v6557_v18 = vld [vmem:[%s13541_s3 + $0x640] sm:$0xff] }
 0x34f   : > { %14004 = vst [vmem:[#allocation108_spill] sm:$0xff] %v9473_v34  ;;  %v14009_v34 = vld [vmem:[#allocation35_spill] sm:$0xff] }
 0x350   : > { %v9464_v62 = vld.sshfl [vmem:[#allocation1 + $0x20] sm:$0xff pattern:$0x73625140]  ;;  %2631 = vmatpush.msrb.mxu0 %v6559_v49  ;;  %v6556_v49 = vld [vmem:[%s13541_s3 + $0x638] sm:$0xff] }
 0x351   : > { %2491 = vst [vmem:[#allocation1 + $0x20] ss:$4 sm:$0xff] %v9220_v47  ;;  %2524 = vmatmul.f32.gmra.mxu3 %v9395_v9 }
 0x352   : > { %2492 = vst [vmem:[#allocation1 + $0x21] ss:$4 sm:$0xff] %v9207_v15  ;;  %2632 = vmatpush.msrb.mxu0 %v6558_v46  ;;  %v14007_v46 = vld [vmem:[#allocation65_spill] sm:$0xff] }
 0x353   : > { %2493 = vst [vmem:[#allocation1 + $0x22] ss:$4 sm:$0xff] %v9228_v45 }
 0x354   : > { %2494 = vst [vmem:[#allocation1 + $0x23] ss:$4 sm:$0xff] %v9299_v58  ;;  %2415 = vmatmul.f32.gmra.mxu2 %v9320_v51  ;;  %v9497_v51 = vpop.f32.mrf.mxu2  ;;  %2633 = vmatpush.msrb.mxu0 %v6557_v18  ;;  %v9505_v63 = vpop.f32.mrf.mxu3  ;;  %v6555_v18 = vld [vmem:[%s13541_s3 + $0x630] sm:$0xff] }
 0x355   : > { %v9479_v4 = vld.sshfl [vmem:[#allocation1] sm:$0xff pattern:$0x73625140]  ;;  %14005 = vst [vmem:[#allocation109_spill] sm:$0xff] %v9497_v51 }
 0x356   : > { %2608 = vst [vmem:[#allocation1] ss:$4 sm:$0xff] %v9135_v56  ;;  %2634 = vmatpush.msrb.mxu0 %v6556_v49  ;;  %v14016_v56 = vld [vmem:[#allocation41_spill] sm:$0xff] }
 0x357   : > { %2609 = vst [vmem:[#allocation1 + $0x1] ss:$4 sm:$0xff] %v9140_v40 }
 0x358   : > { %2610 = vst [vmem:[#allocation1 + $0x2] ss:$4 sm:$0xff] %v9213_v48  ;;  %2635 = vmatpush.msrb.mxu0 %v6555_v18 }
 0x359   : > { %2611 = vst [vmem:[#allocation1 + $0x3] ss:$4 sm:$0xff] %v9220_v47  ;;  %2527 = vmatmul.f32.gmra.mxu3 %v9292_v50  ;;  %v6553_v50 = vld [vmem:[%s13541_s3 + $0x620] sm:$0xff] }
 0x35a   : > { %14006 = vst [vmem:[#allocation110_spill] sm:$0xff] %v9505_v63  ;;  %v14008_v63 = vld [vmem:[#allocation34_spill] sm:$0xff] }
 0x35b   : > { %v9499_v9 = vld.sshfl [vmem:[#allocation1 + $0x20] sm:$0xff pattern:$0x73625140] }
 0x35c   : > { %2579 = vst [vmem:[#allocation1 + $0x20] ss:$4 sm:$0xff] %v7818_v2  ;;  %2418 = vmatmul.f32.gmra.mxu2 %v9263_v33  ;;  %v6554_v33 = vld [vmem:[%s13541_s3 + $0x628] sm:$0xff]  ;;  %v9530_v49 = vpop.f32.mrf.mxu2  ;;  %v9537_v18 = vpop.f32.mrf.mxu3 }
 0x35d   : > { %2581 = vst [vmem:[#allocation1 + $0x21] ss:$4 sm:$0xff] %v7825_v5  ;;  %2636 = vmatpush.msrb.mxu0 %v6554_v33  ;;  %v14012_v33 = vld [vmem:[#allocation20_spill] sm:$0xff] }
 0x35e   : > { %2583 = vst [vmem:[#allocation1 + $0x22] ss:$4 sm:$0xff] %v14007_v46 }
 0x35f   : > { %2585 = vst [vmem:[#allocation1 + $0x23] ss:$4 sm:$0xff] %v8367_v13  ;;  %2637 = vmatpush.msrb.mxu0 %v6553_v50  ;;  %v6551_v50 = vld [vmem:[%s13541_s3 + $0x610] sm:$0xff] }
 0x360   : > { %v9514_v51 = vld.sshfl [vmem:[#allocation1] sm:$0xff pattern:$0x73625140]  ;;  %14010 = vst [vmem:[#allocation65_spill] sm:$0xff] %v9530_v49  ;;  %v14013_v49 = vld [vmem:[#allocation66_spill] sm:$0xff] }
 0x361   : > { %2699 = vst [vmem:[#allocation1] ss:$4 sm:$0xff] %v14008_v63  ;;  %v6552_v63 = vld [vmem:[%s13541_s3 + $0x618] sm:$0xff]  ;;  %2530 = vmatmul.f32.gmra.mxu3 %v9427_v59 }
 0x362   : > { %2701 = vst [vmem:[#allocation1 + $0x1] ss:$4 sm:$0xff] %v14009_v34  ;;  %2638 = vmatpush.msrb.mxu0 %v6552_v63  ;;  %v14014_v63 = vld [vmem:[#allocation67_spill] sm:$0xff] }
 0x363   : > { %2703 = vst [vmem:[#allocation1 + $0x2] ss:$4 sm:$0xff] %v8131_v39 }
 0x364   : > { %2705 = vst [vmem:[#allocation1 + $0x3] ss:$4 sm:$0xff] %v8137_v54  ;;  %2421 = vmatmul.f32.gmra.mxu2 %v9362_v31  ;;  %2639 = vmatpush.msrb.mxu0 %v6551_v50  ;;  %v6550_v31 = vld [vmem:[%s13541_s3 + $0x608] sm:$0xff]  ;;  %v6581_v50 = vld [vmem:[%s13541_s3 + $0x6f8] sm:$0xff] }
 0x365   : > { %14011 = vst [vmem:[#allocation34_spill] sm:$0xff] %v9537_v18  ;;  %v14015_v18 = vld [vmem:[#allocation40_spill] sm:$0xff]  ;;  %2754 = vmatpush.msra.mxu1 %v6581_v50  ;;  %v14019_v50 = vld [vmem:[#allocation50_spill] sm:$0xff] }
 0x366   : > { %v2587_v34 = vld.sshfl [vmem:[#allocation1 + $0x20] sm:$0xff pattern:$0x73625140]  ;;  %2640 = vmatpush.msrb.mxu0 %v6550_v31  ;;  %v6580_v31 = vld [vmem:[%s13541_s3 + $0x6f0] sm:$0xff] }
 0x367   : > { %2592 = vst [vmem:[#allocation1 + $0x20] ss:$4 sm:$0xff] %v14012_v33  ;;  %2755 = vmatpush.msra.mxu1 %v6580_v31 }
 0x368   : > { %2593 = vst [vmem:[#allocation1 + $0x21] ss:$4 sm:$0xff] %v7878_v25  ;;  %2641 = vmatpush.msrb.mxu0 %v6549_v53 }
 0x369   : > { %2594 = vst [vmem:[#allocation1 + $0x22] ss:$4 sm:$0xff] %v14013_v49  ;;  %2642 = vmatmul.f32.vlgmr.msrb.gmra.mxu0 %v9409_v52  ;;  %2533 = vmatmul.f32.gmra.mxu3 %v9343_v11  ;;  %v6579_v52 = vld [vmem:[%s13541_s3 + $0x6e8] sm:$0xff]  ;;  %v6578_v11 = vld [vmem:[%s13541_s3 + $0x6e0] sm:$0xff] }
 0x36a   : > { %2595 = vst [vmem:[#allocation1 + $0x23] ss:$4 sm:$0xff] %v14014_v63  ;;  %2756 = vmatpush.msra.mxu1 %v6579_v52  ;;  %v14021_v52 = vld [vmem:[#allocation45_spill] sm:$0xff] }
 0x36b   : > { %v9548_v59 = vld.sshfl [vmem:[#allocation1] sm:$0xff pattern:$0x73625140] }
 0x36c   : > { %2716 = vst [vmem:[#allocation1] ss:$4 sm:$0xff] %v14015_v18  ;;  %v14018_v18 = vld [vmem:[#allocation30_spill] sm:$0xff]  ;;  %2757 = vmatpush.msra.mxu1 %v6578_v11 }
 0x36d   : > { %2717 = vst [vmem:[#allocation1 + $0x1] ss:$4 sm:$0xff] %v14016_v56  ;;  %v9566_v56 = vpop.f32.mrf.mxu3  ;;  %v6576_v11 = vld [vmem:[%s13541_s3 + $0x6d0] sm:$0xff] }
 0x36e   : > { %2718 = vst [vmem:[#allocation1 + $0x2] ss:$4 sm:$0xff] %v13905_v32  ;;  %2758 = vmatpush.msra.mxu1 %v6577_v61  ;;  %v6574_v61 = vld [vmem:[%s13541_s3 + $0x6c0] sm:$0xff] }
 0x36f   : > { %2719 = vst [vmem:[#allocation1 + $0x3] ss:$4 sm:$0xff] %v13907_v57 }
 0x370   : > { %14017 = vst [vmem:[#allocation35_spill] sm:$0xff] %v9566_v56  ;;  %v14020_v56 = vld [vmem:[#allocation28_spill] sm:$0xff]  ;;  %2759 = vmatpush.msra.mxu1 %v6576_v11  ;;  %v6573_v11 = vld [vmem:[%s13541_s3 + $0x6b8] sm:$0xff] }
 0x371   : > { %v2597_v53 = vld.sshfl [vmem:[#allocation1 + $0x20] sm:$0xff pattern:$0x73625140]  ;;  %2536 = vmatmul.f32.gmra.mxu3 %v9464_v62  ;;  %2645 = vmatmul.f32.gmra.mxu0 %v2587_v34 }
 0x372   : > { %2602 = vst [vmem:[#allocation1 + $0x20] ss:$4 sm:$0xff] %v14018_v18  ;;  %2760 = vmatpush.msra.mxu1 %v6575_v23 }
 0x373   : > { %2603 = vst [vmem:[#allocation1 + $0x21] ss:$4 sm:$0xff] %v8071_v16 }
 0x374   : > { %2604 = vst [vmem:[#allocation1 + $0x22] ss:$4 sm:$0xff] %v14019_v50  ;;  %2761 = vmatpush.msra.mxu1 %v6574_v61  ;;  %v6572_v61 = vld [vmem:[%s13541_s3 + $0x6b0] sm:$0xff] }
 0x375   : > { %2605 = vst [vmem:[#allocation1 + $0x23] ss:$4 sm:$0xff] %v14020_v56  ;;  %v9594_v62 = vpop.f32.mrf.mxu3 }
 0x376   : > { %v9577_v31 = vld.sshfl [vmem:[#allocation1] sm:$0xff pattern:$0x73625140]  ;;  %14023 = vst [vmem:[#allocation20_spill] sm:$0xff] %v9594_v62  ;;  %2762 = vmatpush.msra.mxu1 %v6573_v11  ;;  %v14025_v62 = vld [vmem:[#allocation86_spill] sm:$0xff] }
 0x377   : > { %2726 = vst [vmem:[#allocation1] ss:$4 sm:$0xff] %v14021_v52  ;;  %v14035_v52 = vld [vmem:[#allocation71_spill] sm:$0xff] }
 0x378   : > { %2727 = vst [vmem:[#allocation1 + $0x1] ss:$4 sm:$0xff] %v14022_v35  ;;  %2763 = vmatpush.msra.mxu1 %v6572_v61  ;;  %v14034_v35 = vld [vmem:[#allocation58_spill] sm:$0xff] }
 0x379   : > { %2728 = vst [vmem:[#allocation1 + $0x2] ss:$4 sm:$0xff] %v13911_v7  ;;  %2539 = vmatmul.f32.gmra.mxu3 %v9375_v38  ;;  %2648 = vmatmul.f32.gmra.mxu0 %v9443_v42  ;;  %v743_v38 = vpop.f32.mrf.mxu0  ;;  %v6571_v42 = vld [vmem:[%s13541_s3 + $0x6a8] sm:$0xff] }
 0x37a   : > { %2729 = vst [vmem:[#allocation1 + $0x3] ss:$4 sm:$0xff] %v13912_v6  ;;  %2764 = vmatpush.msra.mxu1 %v6571_v42 }
 0x37c   : > { %v2607_v34 = vld.sshfl [vmem:[#allocation1 + $0x20] sm:$0xff pattern:$0x73625140] }
 0x37d   : > { %2612 = vst [vmem:[#allocation1 + $0x20] ss:$4 sm:$0xff] %v9216_v22  ;;  %v9618_v11 = vpop.f32.mrf.mxu3 }
 0x37e   : > { %2613 = vst [vmem:[#allocation1 + $0x21] ss:$4 sm:$0xff] %v9228_v45 }
 0x37f   : > { %14024 = vst [vmem:[#allocation111_spill] sm:$0xff] %v9618_v11  ;;  %v6569_v11 = vld [vmem:[%s13541_s3 + $0x698] sm:$0xff] }
 0x381   : > { %v9606_v23 = vld.sshfl [vmem:[#allocation1] sm:$0xff pattern:$0x73625140]  ;;  %2542 = vmatmul.f32.gmra.mxu3 %v9499_v9  ;;  %2651 = vmatmul.f32.gmra.mxu0 %v2597_v53 }
 0x382   : > { %2736 = vst [vmem:[#allocation1] ss:$4 sm:$0xff] %v9249_v29  ;;  %v9621_v29 = vadd.f32 %v14025_v62, %v743_v38  ;;  %v14028_v9 = vld [vmem:[#allocation51_spill] sm:$0xff]  ;;  %v14029_v53 = vld [vmem:[#allocation52_spill] sm:$0xff] }
 0x383   : > { %2737 = vst [vmem:[#allocation1 + $0x1] ss:$4 sm:$0xff] %v9254_v36  ;;  %v6570_v36 = vld [vmem:[%s13541_s3 + $0x6a0] sm:$0xff] }
 0x384   : > { %2738 = vst [vmem:[#allocation1 + $0x2] ss:$4 sm:$0xff] %v9318_v26  ;;  %v9628_v61 = vrot.slane %v9621_v29, 2  ;;  %2765 = vmatpush.msra.mxu1 %v6570_v36  ;;  %v14030_v38 = vld [vmem:[#allocation68_spill] sm:$0xff] }
 0x385   : > { %2739 = vst [vmem:[#allocation1 + $0x3] ss:$4 sm:$0xff] %v9324_v14 }
 0x386   : > { %14026 = vst [vmem:[#allocation86_spill] sm:$0xff] %v9621_v29  ;;  %2766 = vmatpush.msra.mxu1 %v6569_v11  ;;  %v14031_v11 = vld [vmem:[#allocation69_spill] sm:$0xff] }
 0x387   : > { %14027 = vst [vmem:[#allocation112_spill] sm:$0xff] %v9628_v61 }
 0x388   : > { %2614 = vst [vmem:[#allocation1 + $0x22] ss:$4 sm:$0xff] %v9621_v29 }
 0x389   : > { %2615 = vst [vmem:[#allocation1 + $0x23] ss:$4 sm:$0xff] %v9628_v61  ;;  %2654 = vmatmul.f32.gmra.mxu0 %v9479_v4  ;;  %v14033_v4 = vld [vmem:[#allocation57_spill] sm:$0xff] }
 0x38c   : > { %v9635_v62 = vld.sshfl [vmem:[#allocation1] sm:$0xff pattern:$0x73625140] }
 0x38d   : > { %2820 = vst [vmem:[#allocation1] ss:$4 sm:$0xff] %v13938_v8  ;;  %v14032_v8 = vld [vmem:[#allocation37_spill] sm:$0xff] }
 0x38e   : > { %2822 = vst [vmem:[#allocation1 + $0x1] ss:$4 sm:$0xff] %v13984_v12 }
 0x38f   : > { %2824 = vst [vmem:[#allocation1 + $0x2] ss:$4 sm:$0xff] %v7815_v1 }
 0x390   : > { %2826 = vst [vmem:[#allocation1 + $0x3] ss:$4 sm:$0xff] %v13996_v27  ;;  %v2617_v36 = vld.sshfl [vmem:[#allocation1 + $0x20] sm:$0xff pattern:$0x73625140] }
 0x391   : > { %2707 = vst [vmem:[#allocation1 + $0x20] ss:$4 sm:$0xff] %v14028_v9  ;;  %2657 = vmatmul.f32.gmra.mxu0 %v2607_v34  ;;  %v14036_v34 = vld [vmem:[#allocation72_spill] sm:$0xff] }
 0x392   : > { %2709 = vst [vmem:[#allocation1 + $0x21] ss:$4 sm:$0xff] %v14029_v53 }
 0x393   : > { %2711 = vst [vmem:[#allocation1 + $0x22] ss:$4 sm:$0xff] %v14030_v38 }
 0x394   : > { %2713 = vst [vmem:[#allocation1 + $0x23] ss:$4 sm:$0xff] %v14031_v11  ;;  %v6566_v11 = vld [vmem:[%s13541_s3 + $0x680] sm:$0xff] }
 0x397   : > { %v9645_v42 = vld.sshfl [vmem:[#allocation1] sm:$0xff pattern:$0x73625140] }
 0x398   : > { %2837 = vst [vmem:[#allocation1] ss:$4 sm:$0xff] %v13944_v24  ;;  %v14038_v24 = vld [vmem:[#allocation42_spill] sm:$0xff] }
 0x399   : > { %2838 = vst [vmem:[#allocation1 + $0x1] ss:$4 sm:$0xff] %v14032_v8  ;;  %2660 = vmatmul.f32.gmra.mxu0 %v9514_v51  ;;  %v9660_v8 = vpop.f32.mrf.mxu1 }
 0x39a   : > { %2839 = vst [vmem:[#allocation1 + $0x2] ss:$4 sm:$0xff] %v7865_v20 }
 0x39b   : > { %2840 = vst [vmem:[#allocation1 + $0x3] ss:$4 sm:$0xff] %v13998_v28  ;;  %v2715_v12 = vld.sshfl [vmem:[#allocation1 + $0x20] sm:$0xff pattern:$0x73625140] }
 0x39c   : > { %2720 = vst [vmem:[#allocation1 + $0x20] ss:$4 sm:$0xff] %v14033_v4  ;;  %v14039_v28 = vld [vmem:[#allocation63_spill] sm:$0xff] }
 0x39d   : > { %2721 = vst [vmem:[#allocation1 + $0x21] ss:$4 sm:$0xff] %v14034_v35 }
 0x39e   : > { %2722 = vst [vmem:[#allocation1 + $0x22] ss:$4 sm:$0xff] %v14035_v52  ;;  %v6568_v52 = vld [vmem:[%s13541_s3 + $0x690] sm:$0xff] }
 0x39f   : > { %2723 = vst [vmem:[#allocation1 + $0x23] ss:$4 sm:$0xff] %v14036_v34  ;;  %v14040_v34 = vld [vmem:[#allocation64_spill] sm:$0xff]  ;;  %2767 = vmatpush.msra.mxu1 %v6568_v52  ;;  %v9687_v52 = vrot.slane %v9621_v29, 4 }
 0x3a0   : > { %14037 = vst [vmem:[#allocation51_spill] sm:$0xff] %v9660_v8  ;;  %v14042_v8 = vld [vmem:[#allocation5_spill] sm:$0xff] }
 0x3a1   : > { %2663 = vmatmul.f32.gmra.mxu0 %v2617_v36  ;;  %14044 = vst [vmem:[#allocation113_spill] sm:$0xff] %v9687_v52 }
 0x3a2   : > { %v9656_v38 = vld.sshfl [vmem:[#allocation1] sm:$0xff pattern:$0x73625140] }
 0x3a3   : > { %2847 = vst [vmem:[#allocation1] ss:$4 sm:$0xff] %v13949_v3  ;;  %v9672_v3 = vpop.f32.mrf.mxu1 }
 0x3a4   : > { %2848 = vst [vmem:[#allocation1 + $0x1] ss:$4 sm:$0xff] %v14038_v24  ;;  %v6567_v24 = vld [vmem:[%s13541_s3 + $0x688] sm:$0xff] }
 0x3a5   : > { %2849 = vst [vmem:[#allocation1 + $0x2] ss:$4 sm:$0xff] %v7945_v21  ;;  %2768 = vmatpush.msra.mxu1 %v6567_v24  ;;  %v6597_v24 = vld [vmem:[%s13541_s3 + $0x778] sm:$0xff] }
 0x3a6   : > { %2850 = vst [vmem:[#allocation1 + $0x3] ss:$4 sm:$0xff] %v13931_v44  ;;  %v9665_v51 = vld.sshfl [vmem:[#allocation1 + $0x20] sm:$0xff pattern:$0x73625140]  ;;  %v14043_v44 = vld [vmem:[#allocation74_spill] sm:$0xff]  ;;  %2875 = vmatpush.msra.mxu2 %v6597_v24 }
 0x3a7   : > { %2730 = vst [vmem:[#allocation1 + $0x20] ss:$4 sm:$0xff] %v14039_v28  ;;  %2769 = vmatpush.msra.mxu1 %v6566_v11  ;;  %v2680_v11 = vrot.slane %v9687_v52, 7 }
 0x3a8   : > { %2731 = vst [vmem:[#allocation1 + $0x21] ss:$4 sm:$0xff] %v14040_v34  ;;  %2770 = vmatmul.f32.vlgmr.msra.gmra.mxu1 %v9548_v59  ;;  %v6595_v59 = vld [vmem:[%s13541_s3 + $0x768] sm:$0xff] }
 0x3a9   : > { %14041 = vst [vmem:[#allocation52_spill] sm:$0xff] %v9672_v3  ;;  %v2677_v3 = vrot.slane %v9628_v61, 7 }
 0x3aa   : > { %2732 = vst [vmem:[#allocation1 + $0x22] ss:$4 sm:$0xff] %v14042_v8 }
 0x3ab   : > { %2733 = vst [vmem:[#allocation1 + $0x23] ss:$4 sm:$0xff] %v14043_v44  ;;  %v2679_v44 = vrot.slane %v2677_v3, 2  ;;  %v9707_v24 = vpop.f32.mrf.mxu1 }
 0x3ac   : > { %14045 = vst [vmem:[#allocation114_spill] sm:$0xff] %v9707_v24 }
 0x3ad   : > { %v9678_v36 = vld.sshfl [vmem:[#allocation1] sm:$0xff pattern:$0x73625140]  ;;  %v9719_v27 = vsel %vm7924_vm6, %v2679_v44, %v2680_v11  ;;  %v6592_v44 = vld [vmem:[%s13541_s3 + $0x750] sm:$0xff] }
 0x3ae   : > { %2857 = vst [vmem:[#allocation1] ss:$4 sm:$0xff] %v9140_v40  ;;  %v6565_v40 = vrot.slane %v9621_v29, 9 }
 0x3af   : > { %2858 = vst [vmem:[#allocation1 + $0x1] ss:$4 sm:$0xff] %v9210_v60  ;;  %v6596_v60 = vld [vmem:[%s13541_s3 + $0x770] sm:$0xff] }
 0x3b0   : > { %2859 = vst [vmem:[#allocation1 + $0x2] ss:$4 sm:$0xff] %v9220_v47  ;;  %2876 = vmatpush.msra.mxu2 %v6596_v60  ;;  %v6594_v60 = vld [vmem:[%s13541_s3 + $0x760] sm:$0xff]  ;;  %2773 = vmatmul.f32.gmra.mxu1 %v2715_v12 }
 0x3b1   : > { %2860 = vst [vmem:[#allocation1 + $0x3] ss:$4 sm:$0xff] %v9207_v15  ;;  %v9711_v15 = vsel %vm7924_vm6, %v6565_v40, %v2677_v3  ;;  %v6593_v3 = vld [vmem:[%s13541_s3 + $0x758] sm:$0xff]  ;;  %v6591_v40 = vld [vmem:[%s13541_s3 + $0x748] sm:$0xff] }
 0x3b2   : > { %v9701_v8 = vld.sshfl [vmem:[#allocation1 + $0x20] sm:$0xff pattern:$0x73625140]  ;;  %2877 = vmatpush.msra.mxu2 %v6595_v59  ;;  %14046 = vst [vmem:[#allocation115_spill] sm:$0xff] %v9711_v15 }
 0x3b3   : > { %2740 = vst [vmem:[#allocation1 + $0x20] ss:$4 sm:$0xff] %v9332_v41  ;;  %v9743_v11 = vpop.f32.mrf.mxu1 }
 0x3b4   : > { %2741 = vst [vmem:[#allocation1 + $0x21] ss:$4 sm:$0xff] %v9337_v17  ;;  %2878 = vmatpush.msra.mxu2 %v6594_v60  ;;  %v6588_v60 = vld [vmem:[%s13541_s3 + $0x730] sm:$0xff] }
 0x3b5   : > { %14047 = vst [vmem:[#allocation116_spill] sm:$0xff] %v9719_v27 }
 0x3b6   : > { %2742 = vst [vmem:[#allocation1 + $0x22] ss:$4 sm:$0xff] %v9711_v15  ;;  %2879 = vmatpush.msra.mxu2 %v6593_v3 }
 0x3b7   : > { %2743 = vst [vmem:[#allocation1 + $0x23] ss:$4 sm:$0xff] %v9719_v27 }
 0x3b8   : > { %v9722_v59 = vld.sshfl [vmem:[#allocation1] sm:$0xff pattern:$0x73625140]  ;;  %2880 = vmatpush.msra.mxu2 %v6592_v44  ;;  %14048 = vst [vmem:[#allocation117_spill] sm:$0xff] %v9743_v11  ;;  %2776 = vmatmul.f32.gmra.mxu1 %v9577_v31  ;;  %v14049_v44 = vld [vmem:[#allocation13_spill] sm:$0xff] }
 0x3b9   : > { %2941 = vst [vmem:[#allocation1] ss:$4 sm:$0xff] %v7812_v0  ;;  %v6590_v0 = vld [vmem:[%s13541_s3 + $0x740] sm:$0xff]  ;;  %v6587_v31 = vld [vmem:[%s13541_s3 + $0x728] sm:$0xff] }
 0x3ba   : > { %2943 = vst [vmem:[#allocation1 + $0x1] ss:$4 sm:$0xff] %v7815_v1  ;;  %2881 = vmatpush.msra.mxu2 %v6591_v40  ;;  %v9758_v40 = vpop.f32.mrf.mxu2 }
 0x3bb   : > { %2945 = vst [vmem:[#allocation1 + $0x2] ss:$4 sm:$0xff] %v7818_v2  ;;  %v6589_v2 = vld [vmem:[%s13541_s3 + $0x738] sm:$0xff] }
 0x3bc   : > { %2947 = vst [vmem:[#allocation1 + $0x3] ss:$4 sm:$0xff] %v7825_v5  ;;  %2882 = vmatpush.msra.mxu2 %v6590_v0  ;;  %v6586_v0 = vld [vmem:[%s13541_s3 + $0x720] sm:$0xff] }
 0x3bd   : > { %14050 = vst [vmem:[#allocation13_spill] sm:$0xff] %v9758_v40 }
 0x3be   : > { %v9741_v12 = vld.sshfl [vmem:[#allocation1 + $0x20] sm:$0xff pattern:$0x73625140]  ;;  %2883 = vmatpush.msra.mxu2 %v6589_v2  ;;  %v6585_v2 = vld [vmem:[%s13541_s3 + $0x718] sm:$0xff] }
 0x3bf   : > { %2828 = vst [vmem:[#allocation1 + $0x20] ss:$4 sm:$0xff] %v7825_v5 }
 0x3c0   : > { %2830 = vst [vmem:[#allocation1 + $0x21] ss:$4 sm:$0xff] %v8118_v37  ;;  %2884 = vmatpush.msra.mxu2 %v6588_v60  ;;  %2779 = vmatmul.f32.gmra.mxu1 %v9665_v51  ;;  %v9774_v60 = vpop.f32.mrf.mxu1 }
 0x3c1   : > { %2832 = vst [vmem:[#allocation1 + $0x22] ss:$4 sm:$0xff] %v8367_v13 }
 0x3c2   : > { %2834 = vst [vmem:[#allocation1 + $0x23] ss:$4 sm:$0xff] %v14049_v44  ;;  %2885 = vmatpush.msra.mxu2 %v6587_v31  ;;  %v6584_v31 = vld [vmem:[%s13541_s3 + $0x710] sm:$0xff]  ;;  %v9780_v11 = vpop.f32.mrf.mxu2 }
 0x3c3   : > { %v9755_v3 = vld.sshfl [vmem:[#allocation1] sm:$0xff pattern:$0x73625140]  ;;  %14051 = vst [vmem:[#allocation118_spill] sm:$0xff] %v9774_v60 }
 0x3c4   : > { %2958 = vst [vmem:[#allocation1] ss:$4 sm:$0xff] %v7862_v19  ;;  %2886 = vmatpush.msra.mxu2 %v6586_v0  ;;  %v6583_v0 = vld [vmem:[%s13541_s3 + $0x708] sm:$0xff]  ;;  %v6582_v60 = vld [vmem:[%s13541_s3 + $0x700] sm:$0xff] }
 0x3c5   : > { %2959 = vst [vmem:[#allocation1 + $0x1] ss:$4 sm:$0xff] %v7865_v20 }
 0x3c6   : > { %2960 = vst [vmem:[#allocation1 + $0x2] ss:$4 sm:$0xff] %v14012_v33  ;;  %2887 = vmatpush.msra.mxu2 %v6585_v2  ;;  %v14053_v2 = vld [vmem:[#allocation70_spill] sm:$0xff] }
 0x3c7   : > { %2961 = vst [vmem:[#allocation1 + $0x3] ss:$4 sm:$0xff] %v7878_v25 }
 0x3c8   : > { %2888 = vmatpush.msra.mxu2 %v6584_v31  ;;  %14052 = vst [vmem:[#allocation119_spill] sm:$0xff] %v9780_v11  ;;  %v6613_v31 = vld [vmem:[%s13541_s3 + $0x7f8] sm:$0xff]  ;;  %2782 = vmatmul.f32.gmra.mxu1 %v9606_v23  ;;  %v6610_v23 = vld [vmem:[%s13541_s3 + $0x7e0] sm:$0xff] }
 0x3c9   : > { %v2836_v40 = vld.sshfl [vmem:[#allocation1 + $0x20] sm:$0xff pattern:$0x73625140]  ;;  %2996 = vmatpush.msra.mxu3 %v6613_v31  ;;  %v6609_v31 = vld [vmem:[%s13541_s3 + $0x7d8] sm:$0xff] }
 0x3ca   : > { %2841 = vst [vmem:[#allocation1 + $0x20] ss:$4 sm:$0xff] %v7878_v25  ;;  %2889 = vmatpush.msra.mxu2 %v6583_v0  ;;  %v6612_v0 = vld [vmem:[%s13541_s3 + $0x7f0] sm:$0xff]  ;;  %v9810_v24 = vpop.f32.mrf.mxu2 }
 0x3cb   : > { %2842 = vst [vmem:[#allocation1 + $0x21] ss:$4 sm:$0xff] %v8160_v30  ;;  %2997 = vmatpush.msra.mxu3 %v6612_v0 }
 0x3cc   : > { %2843 = vst [vmem:[#allocation1 + $0x22] ss:$4 sm:$0xff] %v14014_v63  ;;  %2890 = vmatpush.msra.mxu2 %v6582_v60  ;;  %v9805_v60 = vpop.f32.mrf.mxu1 }
 0x3cd   : > { %2844 = vst [vmem:[#allocation1 + $0x23] ss:$4 sm:$0xff] %v14053_v2  ;;  %2891 = vmatmul.f32.vlgmr.msra.gmra.mxu2 %v9645_v42  ;;  %v6611_v42 = vld [vmem:[%s13541_s3 + $0x7e8] sm:$0xff] }
 0x3ce   : > { %v9787_v51 = vld.sshfl [vmem:[#allocation1] sm:$0xff pattern:$0x73625140]  ;;  %14054 = vst [vmem:[#allocation120_spill] sm:$0xff] %v9805_v60  ;;  %2998 = vmatpush.msra.mxu3 %v6611_v42  ;;  %v14056_v42 = vld [vmem:[#allocation73_spill] sm:$0xff] }
 0x3cf   : > { %2968 = vst [vmem:[#allocation1] ss:$4 sm:$0xff] %v7933_v10 }
 0x3d0   : > { %2969 = vst [vmem:[#allocation1 + $0x1] ss:$4 sm:$0xff] %v7945_v21  ;;  %2999 = vmatpush.msra.mxu3 %v6610_v23  ;;  %2785 = vmatmul.f32.gmra.mxu1 %v9701_v8  ;;  %v6608_v23 = vld [vmem:[%s13541_s3 + $0x7d0] sm:$0xff]  ;;  %v6607_v8 = vld [vmem:[%s13541_s3 + $0x7c8] sm:$0xff] }
 0x3d1   : > { %2970 = vst [vmem:[#allocation1 + $0x2] ss:$4 sm:$0xff] %v14018_v18 }
 0x3d2   : > { %2971 = vst [vmem:[#allocation1 + $0x3] ss:$4 sm:$0xff] %v8071_v16  ;;  %3000 = vmatpush.msra.mxu3 %v6609_v31  ;;  %v6606_v31 = vld [vmem:[%s13541_s3 + $0x7c0] sm:$0xff]  ;;  %v9840_v60 = vpop.f32.mrf.mxu2 }
 0x3d3   : > { %14055 = vst [vmem:[#allocation121_spill] sm:$0xff] %v9810_v24 }
 0x3d4   : > { %v2846_v11 = vld.sshfl [vmem:[#allocation1 + $0x20] sm:$0xff pattern:$0x73625140]  ;;  %3001 = vmatpush.msra.mxu3 %v6608_v23  ;;  %14058 = vst [vmem:[#allocation123_spill] sm:$0xff] %v9840_v60  ;;  %v6605_v23 = vld [vmem:[%s13541_s3 + $0x7b8] sm:$0xff]  ;;  %v6645_v60 = vld [vmem:[%s13541_s3 + $0x8f0] sm:$0xff] }
 0x3d5   : > { %2851 = vst [vmem:[#allocation1 + $0x20] ss:$4 sm:$0xff] %v8071_v16  ;;  %2894 = vmatmul.f32.gmra.mxu2 %v2836_v40  ;;  %v9835_v40 = vpop.f32.mrf.mxu1 }
 0x3d6   : > { %2852 = vst [vmem:[#allocation1 + $0x21] ss:$4 sm:$0xff] %v8204_v43  ;;  %3002 = vmatpush.msra.mxu3 %v6607_v8  ;;  %v6604_v8 = vld [vmem:[%s13541_s3 + $0x7b0] sm:$0xff] }
 0x3d7   : > { %2853 = vst [vmem:[#allocation1 + $0x22] ss:$4 sm:$0xff] %v14020_v56 }
 0x3d8   : > { %2854 = vst [vmem:[#allocation1 + $0x23] ss:$4 sm:$0xff] %v14056_v42  ;;  %3003 = vmatpush.msra.mxu3 %v6606_v31  ;;  %2788 = vmatmul.f32.gmra.mxu1 %v9635_v62  ;;  %v6603_v62 = vld [vmem:[%s13541_s3 + $0x7a8] sm:$0xff] }
 0x3d9   : > { %v9822_v0 = vld.sshfl [vmem:[#allocation1] sm:$0xff pattern:$0x73625140]  ;;  %14057 = vst [vmem:[#allocation122_spill] sm:$0xff] %v9835_v40  ;;  %v14071_v40 = vld [vmem:[#allocation6_spill] sm:$0xff] }
 0x3da   : > { %2978 = vst [vmem:[#allocation1] ss:$4 sm:$0xff] %v9213_v48  ;;  %3004 = vmatpush.msra.mxu3 %v6605_v23  ;;  %v6602_v23 = vld [vmem:[%s13541_s3 + $0x7a0] sm:$0xff] }
 0x3db   : > { %2979 = vst [vmem:[#allocation1 + $0x1] ss:$4 sm:$0xff] %v9220_v47 }
 0x3dc   : > { %2980 = vst [vmem:[#allocation1 + $0x2] ss:$4 sm:$0xff] %v9216_v22  ;;  %3005 = vmatpush.msra.mxu3 %v6604_v8 }
 0x3dd   : > { %2981 = vst [vmem:[#allocation1 + $0x3] ss:$4 sm:$0xff] %v9228_v45  ;;  %2897 = vmatmul.f32.gmra.mxu2 %v9656_v38  ;;  %v9859_v38 = vpop.f32.mrf.mxu3  ;;  %v9867_v8 = vpop.f32.mrf.mxu1 }
 0x3de   : > { %14059 = vst [vmem:[#allocation124_spill] sm:$0xff] %v9859_v38  ;;  %3006 = vmatpush.msra.mxu3 %v6603_v62  ;;  %v6601_v38 = vld [vmem:[%s13541_s3 + $0x798] sm:$0xff] }
 0x3df   : > { %v2856_v24 = vld.sshfl [vmem:[#allocation1 + $0x20] sm:$0xff pattern:$0x73625140]  ;;  %14060 = vst [vmem:[#allocation125_spill] sm:$0xff] %v9867_v8 }
 0x3e0   : > { %2861 = vst [vmem:[#allocation1 + $0x20] ss:$4 sm:$0xff] %v9228_v45  ;;  %3007 = vmatpush.msra.mxu3 %v6602_v23  ;;  %2791 = vmatmul.f32.gmra.mxu1 %v9741_v12  ;;  %v14063_v12 = vld [vmem:[#allocation7_spill] sm:$0xff]  ;;  %v14064_v23 = vld [vmem:[#allocation60_spill] sm:$0xff] }
 0x3e1   : > { %2862 = vst [vmem:[#allocation1 + $0x21] ss:$4 sm:$0xff] %v9299_v58  ;;  %v6627_v8 = vld [vmem:[%s13541_s3 + $0x860] sm:$0xff] }
 0x3e2   : > { %2863 = vst [vmem:[#allocation1 + $0x22] ss:$4 sm:$0xff] %v9628_v61  ;;  %3008 = vmatpush.msra.mxu3 %v6601_v38 }
 0x3e3   : > { %2864 = vst [vmem:[#allocation1 + $0x23] ss:$4 sm:$0xff] %v9687_v52 }
 0x3e4   : > { %v9853_v31 = vld.sshfl [vmem:[#allocation1] sm:$0xff pattern:$0x73625140] }
 0x3e5   : > { %3069 = vst [vmem:[#allocation1] ss:$4 sm:$0xff] %v8131_v39  ;;  %2900 = vmatmul.f32.gmra.mxu2 %v2846_v11  ;;  %v9874_v39 = vpop.f32.mrf.mxu2  ;;  %v9883_v62 = vpop.f32.mrf.mxu3  ;;  %v6598_v11 = vld [vmem:[%s13541_s3 + $0x780] sm:$0xff] }
 0x3e6   : > { %3071 = vst [vmem:[#allocation1 + $0x1] ss:$4 sm:$0xff] %v8137_v54  ;;  %v6600_v54 = vld [vmem:[%s13541_s3 + $0x790] sm:$0xff] }
 0x3e7   : > { %3073 = vst [vmem:[#allocation1 + $0x2] ss:$4 sm:$0xff] %v14028_v9  ;;  %3009 = vmatpush.msra.mxu3 %v6600_v54  ;;  %v6629_v54 = vld [vmem:[%s13541_s3 + $0x870] sm:$0xff] }
 0x3e8   : > { %3075 = vst [vmem:[#allocation1 + $0x3] ss:$4 sm:$0xff] %v14029_v53  ;;  %v6599_v53 = vld [vmem:[%s13541_s3 + $0x788] sm:$0xff] }
 0x3e9   : > { %14061 = vst [vmem:[#allocation126_spill] sm:$0xff] %v9874_v39  ;;  %3010 = vmatpush.msra.mxu3 %v6599_v53 }
 0x3ea   : > { %v2866_v9 = vld.sshfl [vmem:[#allocation1 + $0x20] sm:$0xff pattern:$0x73625140]  ;;  %14062 = vst [vmem:[#allocation127_spill] sm:$0xff] %v9883_v62 }
 0x3eb   : > { %2949 = vst [vmem:[#allocation1 + $0x20] ss:$4 sm:$0xff] %v14007_v46  ;;  %3011 = vmatpush.msra.mxu3 %v6598_v11  ;;  %v6630_v46 = vld [vmem:[%s13541_s3 + $0x878] sm:$0xff]  ;;  %v6628_v11 = vld [vmem:[%s13541_s3 + $0x868] sm:$0xff]  ;;  %v9959_v62 = vld [vmem:[%s13540_s2] ss:$0 sm:$0xff] }
 0x3ec   : > { %2951 = vst [vmem:[#allocation1 + $0x21] ss:$4 sm:$0xff] %v8367_v13  ;;  %3012 = vmatmul.f32.vlgmr.msra.gmra.mxu3 %v9755_v3  ;;  %3124 = vmatpush.msra.mxu0 %v6630_v46 }
 0x3ed   : > { %2953 = vst [vmem:[#allocation1 + $0x22] ss:$4 sm:$0xff] %v14063_v12  ;;  %2903 = vmatmul.f32.gmra.mxu2 %v9678_v36  ;;  %v9905_v53 = vpop.f32.mrf.mxu2  ;;  %v9907_v12 = vpop.f32.mrf.mxu3  ;;  %v14067_v36 = vld [vmem:[#allocation75_spill] sm:$0xff] }
 0x3ee   : > { %2955 = vst [vmem:[#allocation1 + $0x23] ss:$4 sm:$0xff] %v14064_v23  ;;  %3125 = vmatpush.msra.mxu0 %v6629_v54  ;;  %v14068_v54 = vld [vmem:[#allocation22_spill] sm:$0xff] }
 0x3ef   : > { %v9890_v38 = vld.sshfl [vmem:[#allocation1] sm:$0xff pattern:$0x73625140]  ;;  %14065 = vst [vmem:[#allocation7_spill] sm:$0xff] %v9905_v53  ;;  %v9952_v53 = vrot.slane %v9621_v29, 6 }
 0x3f0   : > { %3086 = vst [vmem:[#allocation1] ss:$4 sm:$0xff] %v13905_v32  ;;  %3126 = vmatpush.msra.mxu0 %v6628_v11  ;;  %v6625_v11 = vld [vmem:[%s13541_s3 + $0x850] sm:$0xff] }
 0x3f1   : > { %3087 = vst [vmem:[#allocation1 + $0x1] ss:$4 sm:$0xff] %v13907_v57 }
 0x3f2   : > { %3088 = vst [vmem:[#allocation1 + $0x2] ss:$4 sm:$0xff] %v14033_v4  ;;  %3127 = vmatpush.msra.mxu0 %v6627_v8 }
 0x3f3   : > { %3089 = vst [vmem:[#allocation1 + $0x3] ss:$4 sm:$0xff] %v14034_v35 }
 0x3f4   : > { %14066 = vst [vmem:[#allocation60_spill] sm:$0xff] %v9907_v12  ;;  %v14092_v12 = vld [vmem:[#allocation74_spill] sm:$0xff] }
 0x3f5   : > { %v2957_v3 = vld.sshfl [vmem:[#allocation1 + $0x20] sm:$0xff pattern:$0x73625140]  ;;  %2906 = vmatmul.f32.gmra.mxu2 %v2856_v24  ;;  %v6626_v24 = vld [vmem:[%s13541_s3 + $0x858] sm:$0xff]  ;;  %14075 = vst [vmem:[#allocation132_spill] sm:$0xff] %v9952_v53 }
 0x3f6   : > { %2962 = vst [vmem:[#allocation1 + $0x20] ss:$4 sm:$0xff] %v14013_v49  ;;  %3015 = vmatmul.f32.gmra.mxu3 %v2957_v3  ;;  %v9928_v3 = vpop.f32.mrf.mxu2  ;;  %3128 = vmatpush.msra.mxu0 %v6626_v24  ;;  %v14072_v24 = vld [vmem:[#allocation76_spill] sm:$0xff] }
 0x3f7   : > { %2963 = vst [vmem:[#allocation1 + $0x21] ss:$4 sm:$0xff] %v14014_v63 }
 0x3f8   : > { %2964 = vst [vmem:[#allocation1 + $0x22] ss:$4 sm:$0xff] %v14067_v36  ;;  %3129 = vmatpush.msra.mxu0 %v6625_v11  ;;  %v9934_v36 = vpop.f32.mrf.mxu3  ;;  %v746_v11 = vpop.f32.mrf.mxu0 }
 0x3f9   : > { %2965 = vst [vmem:[#allocation1 + $0x23] ss:$4 sm:$0xff] %v14068_v54 }
 0x3fa   : > { %v9915_v46 = vld.sshfl [vmem:[#allocation1] sm:$0xff pattern:$0x73625140]  ;;  %14069 = vst [vmem:[#allocation128_spill] sm:$0xff] %v9928_v3 }
 0x3fb   : > { %3096 = vst [vmem:[#allocation1] ss:$4 sm:$0xff] %v13911_v7 }
 0x3fc   : > { %3097 = vst [vmem:[#allocation1 + $0x1] ss:$4 sm:$0xff] %v13912_v6 }
 0x3fd   : > { %3098 = vst [vmem:[#allocation1 + $0x2] ss:$4 sm:$0xff] %v14039_v28  ;;  %2909 = vmatmul.f32.gmra.mxu2 %v9722_v59 }
 0x3fe   : > { %3099 = vst [vmem:[#allocation1 + $0x3] ss:$4 sm:$0xff] %v14040_v34  ;;  %3018 = vmatmul.f32.gmra.mxu3 %v9787_v51  ;;  %v9946_v59 = vpop.f32.mrf.mxu2 }
 0x3ff   : > { %14070 = vst [vmem:[#allocation129_spill] sm:$0xff] %v9934_v36  ;;  %v6619_v36 = vld [vmem:[%s13541_s3 + $0x820] sm:$0xff] }
 0x400   : > { %v2967_v8 = vld.sshfl [vmem:[#allocation1 + $0x20] sm:$0xff pattern:$0x73625140]  ;;  %14073 = vst [vmem:[#allocation130_spill] sm:$0xff] %v9946_v59  ;;  %v9949_v51 = vpop.f32.mrf.mxu3  ;;  %v6624_v59 = vld [vmem:[%s13541_s3 + $0x848] sm:$0xff] }
 0x401   : > { %2972 = vst [vmem:[#allocation1 + $0x20] ss:$4 sm:$0xff] %v14019_v50  ;;  %3130 = vmatpush.msra.mxu0 %v6624_v59  ;;  %v6621_v59 = vld [vmem:[%s13541_s3 + $0x830] sm:$0xff]  ;;  %v6636_v50 = vld [vmem:[%s13541_s3 + $0x8a8] sm:$0xff] }
 0x402   : > { %2973 = vst [vmem:[#allocation1 + $0x21] ss:$4 sm:$0xff] %v14020_v56 }
 0x403   : > { %2974 = vst [vmem:[#allocation1 + $0x22] ss:$4 sm:$0xff] %v14071_v40 }
 0x404   : > { %2975 = vst [vmem:[#allocation1 + $0x23] ss:$4 sm:$0xff] %v14072_v24 }
 0x405   : > { %v9940_v3 = vld.sshfl [vmem:[#allocation1] sm:$0xff pattern:$0x73625140]  ;;  %2912 = vmatmul.f32.gmra.mxu2 %v2866_v9  ;;  %14074 = vst [vmem:[#allocation131_spill] sm:$0xff] %v9949_v51  ;;  %v9962_v9 = vadd.f32 %v9959_v62, %v746_v11  ;;  %v14077_v51 = vld [vmem:[#allocation49_spill] sm:$0xff] }
 0x406   : > { %3106 = vst [vmem:[#allocation1] ss:$4 sm:$0xff] %v9318_v26  ;;  %3021 = vmatmul.f32.gmra.mxu3 %v2967_v8  ;;  %v6623_v11 = vld [vmem:[%s13541_s3 + $0x840] sm:$0xff] }
 0x407   : > { %3107 = vst [vmem:[#allocation1 + $0x1] ss:$4 sm:$0xff] %v9324_v14  ;;  %3131 = vmatpush.msra.mxu0 %v6623_v11  ;;  %v14081_v11 = vld [vmem:[#allocation47_spill] sm:$0xff] }
 0x408   : > { %3108 = vst [vmem:[#allocation1 + $0x2] ss:$4 sm:$0xff] %v9332_v41  ;;  %v9979_v39 = vpop.f32.mrf.mxu3 }
 0x409   : > { %3109 = vst [vmem:[#allocation1 + $0x3] ss:$4 sm:$0xff] %v9337_v17 }
 0x40a   : > { %14076 = vst [vmem:[#allocation133_spill] sm:$0xff] %v9962_v9 }
 0x40b   : > { %v2977_v40 = vld.sshfl [vmem:[#allocation1 + $0x20] sm:$0xff pattern:$0x73625140]  ;;  %14078 = vst [vmem:[#allocation49_spill] sm:$0xff] %v9979_v39 }
 0x40c   : > { %2982 = vst [vmem:[#allocation1 + $0x20] ss:$4 sm:$0xff] %v9621_v29 }
 0x40d   : > { %2983 = vst [vmem:[#allocation1 + $0x21] ss:$4 sm:$0xff] %v9628_v61 }
 0x40e   : > { %2984 = vst [vmem:[#allocation1 + $0x22] ss:$4 sm:$0xff] %v9952_v53  ;;  %3024 = vmatmul.f32.gmra.mxu3 %v9822_v0 }
 0x40f   : > { %2985 = vst [vmem:[#allocation1 + $0x23] ss:$4 sm:$0xff] %v9962_v9 }
 0x410   : > { %v9965_v8 = vld.sshfl [vmem:[#allocation1] sm:$0xff pattern:$0x73625140] }
 0x411   : > { %3190 = vst [vmem:[#allocation1] ss:$4 sm:$0xff] %v7815_v1  ;;  %v6622_v1 = vld [vmem:[%s13541_s3 + $0x838] sm:$0xff] }
 0x412   : > { %3192 = vst [vmem:[#allocation1 + $0x1] ss:$4 sm:$0xff] %v14077_v51  ;;  %3132 = vmatpush.msra.mxu0 %v6622_v1  ;;  %v14080_v51 = vld [vmem:[#allocation69_spill] sm:$0xff] }
 0x413   : > { %3194 = vst [vmem:[#allocation1 + $0x2] ss:$4 sm:$0xff] %v7825_v5  ;;  %v14079_v5 = vld [vmem:[#allocation68_spill] sm:$0xff]  ;;  %v14082_v1 = vld [vmem:[#allocation77_spill] sm:$0xff] }
 0x414   : > { %3196 = vst [vmem:[#allocation1 + $0x3] ss:$4 sm:$0xff] %v8118_v37  ;;  %3133 = vmatpush.msra.mxu0 %v6621_v59  ;;  %v6620_v37 = vld [vmem:[%s13541_s3 + $0x828] sm:$0xff]  ;;  %v14083_v59 = vld [vmem:[#allocation19_spill] sm:$0xff] }
 0x416   : > { %v2987_v0 = vld.sshfl [vmem:[#allocation1 + $0x20] sm:$0xff pattern:$0x73625140]  ;;  %3027 = vmatmul.f32.gmra.mxu3 %v2977_v40  ;;  %3134 = vmatpush.msra.mxu0 %v6620_v37  ;;  %v6618_v40 = vld [vmem:[%s13541_s3 + $0x818] sm:$0xff] }
 0x417   : > { %3077 = vst [vmem:[#allocation1 + $0x20] ss:$4 sm:$0xff] %v14079_v5  ;;  %v10006_v5 = vpop.f32.mrf.mxu3 }
 0x418   : > { %3079 = vst [vmem:[#allocation1 + $0x21] ss:$4 sm:$0xff] %v14080_v51  ;;  %3135 = vmatpush.msra.mxu0 %v6619_v36  ;;  %v6617_v51 = vld [vmem:[%s13541_s3 + $0x810] sm:$0xff]  ;;  %v6616_v36 = vld [vmem:[%s13541_s3 + $0x808] sm:$0xff] }
 0x419   : > { %3081 = vst [vmem:[#allocation1 + $0x22] ss:$4 sm:$0xff] %v14081_v11  ;;  %v14085_v11 = vld [vmem:[#allocation71_spill] sm:$0xff] }
 0x41a   : > { %3083 = vst [vmem:[#allocation1 + $0x23] ss:$4 sm:$0xff] %v14082_v1  ;;  %3136 = vmatpush.msra.mxu0 %v6618_v40  ;;  %v6615_v1 = vld [vmem:[%s13541_s3 + $0x800] sm:$0xff] }
 0x41b   : > { %v9993_v39 = vld.sshfl [vmem:[#allocation1] sm:$0xff pattern:$0x73625140]  ;;  %14084 = vst [vmem:[#allocation68_spill] sm:$0xff] %v10006_v5 }
 0x41c   : > { %3207 = vst [vmem:[#allocation1] ss:$4 sm:$0xff] %v7865_v20  ;;  %3137 = vmatpush.msra.mxu0 %v6617_v51  ;;  %v14086_v40 = vld [vmem:[#allocation72_spill] sm:$0xff]  ;;  %v14087_v5 = vld [vmem:[#allocation79_spill] sm:$0xff] }
 0x41d   : > { %3208 = vst [vmem:[#allocation1 + $0x1] ss:$4 sm:$0xff] %v14083_v59  ;;  %v6646_v51 = vld [vmem:[%s13541_s3 + $0x8f8] sm:$0xff] }
 0x41e   : > { %3209 = vst [vmem:[#allocation1 + $0x2] ss:$4 sm:$0xff] %v7878_v25  ;;  %3030 = vmatmul.f32.gmra.mxu3 %v9853_v31  ;;  %3138 = vmatpush.msra.mxu0 %v6616_v36  ;;  %v14088_v36 = vld [vmem:[#allocation80_spill] sm:$0xff] }
 0x41f   : > { %3210 = vst [vmem:[#allocation1 + $0x3] ss:$4 sm:$0xff] %v8160_v30  ;;  %3245 = vmatpush.msrb.mxu1 %v6646_v51  ;;  %v6643_v51 = vld [vmem:[%s13541_s3 + $0x8e0] sm:$0xff] }
 0x420   : > { %3139 = vmatpush.msra.mxu0 %v6615_v1  ;;  %v14089_v1 = vld [vmem:[#allocation59_spill] sm:$0xff] }
 0x421   : > { %v3085_v37 = vld.sshfl [vmem:[#allocation1 + $0x20] sm:$0xff pattern:$0x73625140]  ;;  %3140 = vmatmul.f32.vlgmr.msra.gmra.mxu0 %v9890_v38  ;;  %3246 = vmatpush.msrb.mxu1 %v6645_v60  ;;  %v10034_v38 = vpop.f32.mrf.mxu3  ;;  %v6642_v60 = vld [vmem:[%s13541_s3 + $0x8d8] sm:$0xff] }
 0x422   : > { %3090 = vst [vmem:[#allocation1 + $0x20] ss:$4 sm:$0xff] %v14085_v11 }
 0x423   : > { %3091 = vst [vmem:[#allocation1 + $0x21] ss:$4 sm:$0xff] %v14086_v40 }
 0x424   : > { %3092 = vst [vmem:[#allocation1 + $0x22] ss:$4 sm:$0xff] %v14087_v5  ;;  %v6644_v5 = vld [vmem:[%s13541_s3 + $0x8e8] sm:$0xff] }
 0x425   : > { %3093 = vst [vmem:[#allocation1 + $0x23] ss:$4 sm:$0xff] %v14088_v36  ;;  %3247 = vmatpush.msrb.mxu1 %v6644_v5  ;;  %v14093_v5 = vld [vmem:[#allocation8_spill] sm:$0xff] }
 0x426   : > { %v10025_v31 = vld.sshfl [vmem:[#allocation1] sm:$0xff pattern:$0x73625140]  ;;  %14090 = vst [vmem:[#allocation69_spill] sm:$0xff] %v10034_v38  ;;  %3033 = vmatmul.f32.gmra.mxu3 %v2987_v0  ;;  %v14091_v38 = vld [vmem:[#allocation5_spill] sm:$0xff] }
 0x427   : > { %3217 = vst [vmem:[#allocation1] ss:$4 sm:$0xff] %v7945_v21  ;;  %3248 = vmatpush.msrb.mxu1 %v6643_v51  ;;  %v6641_v0 = vld [vmem:[%s13541_s3 + $0x8d0] sm:$0xff] }
 0x428   : > { %3218 = vst [vmem:[#allocation1 + $0x1] ss:$4 sm:$0xff] %v14089_v1  ;;  %v14094_v51 = vld [vmem:[#allocation9_spill] sm:$0xff] }
 0x429   : > { %3219 = vst [vmem:[#allocation1 + $0x2] ss:$4 sm:$0xff] %v8071_v16  ;;  %3143 = vmatmul.f32.gmra.mxu0 %v3085_v37  ;;  %3249 = vmatpush.msrb.mxu1 %v6642_v60  ;;  %v6640_v37 = vld [vmem:[%s13541_s3 + $0x8c8] sm:$0xff]  ;;  %v14095_v60 = vld [vmem:[#allocation87_spill] sm:$0xff] }
 0x42a   : > { %3220 = vst [vmem:[#allocation1 + $0x3] ss:$4 sm:$0xff] %v8204_v43 }
 0x42b   : > { %3250 = vmatpush.msrb.mxu1 %v6641_v0  ;;  %v6639_v0 = vld [vmem:[%s13541_s3 + $0x8c0] sm:$0xff] }
 0x42c   : > { %v3095_v36 = vld.sshfl [vmem:[#allocation1 + $0x20] sm:$0xff pattern:$0x73625140] }
 0x42d   : > { %3100 = vst [vmem:[#allocation1 + $0x20] ss:$4 sm:$0xff] %v14091_v38  ;;  %3251 = vmatpush.msrb.mxu1 %v6640_v37  ;;  %v6638_v37 = vld [vmem:[%s13541_s3 + $0x8b8] sm:$0xff] }
 0x42e   : > { %3101 = vst [vmem:[#allocation1 + $0x21] ss:$4 sm:$0xff] %v14092_v12  ;;  %v10061_v12 = vrot.slane %v9962_v9, 2 }
 0x42f   : > { %3102 = vst [vmem:[#allocation1 + $0x22] ss:$4 sm:$0xff] %v14093_v5  ;;  %3252 = vmatpush.msrb.mxu1 %v6639_v0  ;;  %v6614_v5 = vrot.slane %v9952_v53, 9  ;;  %v6637_v0 = vld [vmem:[%s13541_s3 + $0x8b0] sm:$0xff] }
 0x430   : > { %3103 = vst [vmem:[#allocation1 + $0x23] ss:$4 sm:$0xff] %v14094_v51  ;;  %v3047_v51 = vrot.slane %v9962_v9, 7  ;;  %v3050_v11 = vrot.slane %v10061_v12, 7 }
 0x431   : > { %v10052_v40 = vld.sshfl [vmem:[#allocation1] sm:$0xff pattern:$0x73625140]  ;;  %14096 = vst [vmem:[#allocation47_spill] sm:$0xff] %v10061_v12  ;;  %3146 = vmatmul.f32.gmra.mxu0 %v9915_v46  ;;  %3253 = vmatpush.msrb.mxu1 %v6638_v37  ;;  %v10087_v37 = vpop.f32.mrf.mxu1 }
 0x432   : > { %3227 = vst [vmem:[#allocation1] ss:$4 sm:$0xff] %v9220_v47  ;;  %v3049_v38 = vrot.slane %v3047_v51, 2  ;;  %v10084_v46 = vsel %vm7924_vm6, %v6614_v5, %v3047_v51  ;;  %v14100_v5 = vld [vmem:[#allocation14_spill] sm:$0xff] }
 0x433   : > { %3228 = vst [vmem:[#allocation1 + $0x1] ss:$4 sm:$0xff] %v14095_v60  ;;  %3254 = vmatpush.msrb.mxu1 %v6637_v0  ;;  %v6635_v0 = vld [vmem:[%s13541_s3 + $0x8a0] sm:$0xff]  ;;  %v6633_v51 = vld [vmem:[%s13541_s3 + $0x890] sm:$0xff] }
 0x434   : > { %3229 = vst [vmem:[#allocation1 + $0x2] ss:$4 sm:$0xff] %v9228_v45  ;;  %v10091_v53 = vsel %vm7924_vm6, %v3049_v38, %v3050_v11  ;;  %v14101_v11 = vld [vmem:[#allocation15_spill] sm:$0xff]  ;;  %v14102_v38 = vld [vmem:[#allocation16_spill] sm:$0xff] }
 0x435   : > { %3230 = vst [vmem:[#allocation1 + $0x3] ss:$4 sm:$0xff] %v9299_v58  ;;  %3255 = vmatpush.msrb.mxu1 %v6636_v50  ;;  %v6634_v50 = vld [vmem:[%s13541_s3 + $0x898] sm:$0xff] }
 0x436   : > { %14097 = vst [vmem:[#allocation77_spill] sm:$0xff] %v10084_v46 }
 0x437   : > { %v3105_v29 = vld.sshfl [vmem:[#allocation1 + $0x20] sm:$0xff pattern:$0x73625140]  ;;  %14098 = vst [vmem:[#allocation134_spill] sm:$0xff] %v10087_v37  ;;  %3256 = vmatpush.msrb.mxu1 %v6635_v0  ;;  %v14103_v37 = vld [vmem:[#allocation17_spill] sm:$0xff] }
 0x438   : > { %3110 = vst [vmem:[#allocation1 + $0x20] ss:$4 sm:$0xff] %v9711_v15  ;;  %v6632_v0 = vld [vmem:[%s13541_s3 + $0x888] sm:$0xff] }
 0x439   : > { %3111 = vst [vmem:[#allocation1 + $0x21] ss:$4 sm:$0xff] %v9719_v27  ;;  %3149 = vmatmul.f32.gmra.mxu0 %v3095_v36  ;;  %3257 = vmatpush.msrb.mxu1 %v6634_v50  ;;  %v6631_v50 = vld [vmem:[%s13541_s3 + $0x880] sm:$0xff] }
 0x43a   : > { %14099 = vst [vmem:[#allocation135_spill] sm:$0xff] %v10091_v53 }
 0x43b   : > { %3112 = vst [vmem:[#allocation1 + $0x22] ss:$4 sm:$0xff] %v10084_v46  ;;  %3258 = vmatpush.msrb.mxu1 %v6633_v51  ;;  %v6662_v51 = vld [vmem:[%s13541_s3 + $0x978] sm:$0xff] }
 0x43c   : > { %v10097_v15 = vld.sshfl [vmem:[#allocation1] sm:$0xff pattern:$0x73625140]  ;;  %3113 = vst [vmem:[#allocation1 + $0x23] ss:$4 sm:$0xff] %v10091_v53  ;;  %3366 = vmatpush.msrb.mxu2 %v6662_v51  ;;  %v14105_v53 = vld [vmem:[#allocation53_spill] sm:$0xff] }
 0x43d   : > { %3311 = vst [vmem:[#allocation1] ss:$4 sm:$0xff] %v14100_v5  ;;  %3259 = vmatpush.msrb.mxu1 %v6632_v0  ;;  %v10113_v5 = vpop.f32.mrf.mxu1 }
 0x43e   : > { %3313 = vst [vmem:[#allocation1 + $0x1] ss:$4 sm:$0xff] %v14101_v11 }
 0x43f   : > { %3315 = vst [vmem:[#allocation1 + $0x2] ss:$4 sm:$0xff] %v14102_v38  ;;  %3260 = vmatpush.msrb.mxu1 %v6631_v50  ;;  %v14108_v50 = vld [vmem:[#allocation26_spill] sm:$0xff] }
 0x440   : > { %3317 = vst [vmem:[#allocation1 + $0x3] ss:$4 sm:$0xff] %v14103_v37  ;;  %3261 = vmatmul.f32.vlgmr.msrb.gmra.mxu1 %v9993_v39  ;;  %v14107_v39 = vld [vmem:[#allocation24_spill] sm:$0xff] }
 0x441   : > { %14104 = vst [vmem:[#allocation14_spill] sm:$0xff] %v10113_v5  ;;  %3152 = vmatmul.f32.gmra.mxu0 %v9940_v3  ;;  %v6660_v3 = vld [vmem:[%s13541_s3 + $0x968] sm:$0xff] }
 0x442   : > { %v14113_v5 = vld [vmem:[#allocation48_spill] sm:$0xff] }
 0x443   : > { %v10115_v36 = vld.sshfl [vmem:[#allocation1 + $0x20] sm:$0xff pattern:$0x73625140] }
 0x444   : > { %3198 = vst [vmem:[#allocation1 + $0x20] ss:$4 sm:$0xff] %v8367_v13  ;;  %v6661_v13 = vld [vmem:[%s13541_s3 + $0x970] sm:$0xff] }
 0x445   : > { %3200 = vst [vmem:[#allocation1 + $0x21] ss:$4 sm:$0xff] %v14049_v44  ;;  %v14106_v44 = vld [vmem:[#allocation23_spill] sm:$0xff]  ;;  %3367 = vmatpush.msrb.mxu2 %v6661_v13  ;;  %v10144_v51 = vpop.f32.mrf.mxu1 }
 0x446   : > { %3202 = vst [vmem:[#allocation1 + $0x22] ss:$4 sm:$0xff] %v14064_v23  ;;  %v14109_v23 = vld [vmem:[#allocation27_spill] sm:$0xff] }
 0x447   : > { %v10128_v0 = vld.sshfl [vmem:[#allocation1] sm:$0xff pattern:$0x73625140]  ;;  %3204 = vst [vmem:[#allocation1 + $0x23] ss:$4 sm:$0xff] %v14105_v53  ;;  %3368 = vmatpush.msrb.mxu2 %v6660_v3  ;;  %v6658_v13 = vld [vmem:[%s13541_s3 + $0x958] sm:$0xff] }
 0x448   : > { %3328 = vst [vmem:[#allocation1] ss:$4 sm:$0xff] %v14106_v44  ;;  %v6659_v53 = vld [vmem:[%s13541_s3 + $0x960] sm:$0xff]  ;;  %v6657_v3 = vld [vmem:[%s13541_s3 + $0x950] sm:$0xff] }
 0x449   : > { %3329 = vst [vmem:[#allocation1 + $0x1] ss:$4 sm:$0xff] %v14107_v39  ;;  %3369 = vmatpush.msrb.mxu2 %v6659_v53  ;;  %3155 = vmatmul.f32.gmra.mxu0 %v3105_v29  ;;  %v6656_v53 = vld [vmem:[%s13541_s3 + $0x948] sm:$0xff]  ;;  %v14111_v29 = vld [vmem:[#allocation78_spill] sm:$0xff] }
 0x44a   : > { %3330 = vst [vmem:[#allocation1 + $0x2] ss:$4 sm:$0xff] %v14108_v50 }
 0x44b   : > { %3331 = vst [vmem:[#allocation1 + $0x3] ss:$4 sm:$0xff] %v14109_v23  ;;  %3370 = vmatpush.msrb.mxu2 %v6658_v13  ;;  %v14112_v13 = vld [vmem:[#allocation12_spill] sm:$0xff] }
 0x44c   : > { %14110 = vst [vmem:[#allocation15_spill] sm:$0xff] %v10144_v51  ;;  %v14117_v51 = vld [vmem:[#allocation81_spill] sm:$0xff] }
 0x44d   : > { %3371 = vmatpush.msrb.mxu2 %v6657_v3  ;;  %v14114_v3 = vld [vmem:[#allocation82_spill] sm:$0xff] }
 0x44e   : > { %v3206_v44 = vld.sshfl [vmem:[#allocation1 + $0x20] sm:$0xff pattern:$0x73625140] }
 0x44f   : > { %3211 = vst [vmem:[#allocation1 + $0x20] ss:$4 sm:$0xff] %v14014_v63  ;;  %3264 = vmatmul.f32.gmra.mxu1 %v3206_v44  ;;  %3372 = vmatpush.msrb.mxu2 %v6656_v53  ;;  %v6655_v44 = vld [vmem:[%s13541_s3 + $0x940] sm:$0xff]  ;;  %v10172_v53 = vpop.f32.mrf.mxu1 }
 0x450   : > { %3212 = vst [vmem:[#allocation1 + $0x21] ss:$4 sm:$0xff] %v14053_v2  ;;  %v14115_v2 = vld [vmem:[#allocation83_spill] sm:$0xff] }
 0x451   : > { %3213 = vst [vmem:[#allocation1 + $0x22] ss:$4 sm:$0xff] %v14068_v54  ;;  %3373 = vmatpush.msrb.mxu2 %v6655_v44  ;;  %v6654_v54 = vld [vmem:[%s13541_s3 + $0x938] sm:$0xff]  ;;  %3158 = vmatmul.f32.gmra.mxu0 %v9965_v8  ;;  %v6651_v8 = vld [vmem:[%s13541_s3 + $0x920] sm:$0xff] }
 0x452   : > { %v10158_v46 = vld.sshfl [vmem:[#allocation1] sm:$0xff pattern:$0x73625140]  ;;  %3214 = vst [vmem:[#allocation1 + $0x23] ss:$4 sm:$0xff] %v14111_v29  ;;  %v6652_v29 = vld [vmem:[%s13541_s3 + $0x928] sm:$0xff] }
 0x453   : > { %3338 = vst [vmem:[#allocation1] ss:$4 sm:$0xff] %v14112_v13  ;;  %3374 = vmatpush.msrb.mxu2 %v6654_v54  ;;  %v6653_v13 = vld [vmem:[%s13541_s3 + $0x930] sm:$0xff]  ;;  %v749_v54 = vpop.f32.mrf.mxu0  ;;  %v14253_v55 = vld [vmem:[#allocation15_spill] sm:$0xff] }
 0x454   : > { %3339 = vst [vmem:[#allocation1 + $0x1] ss:$4 sm:$0xff] %v14113_v5 }
 0x455   : > { %3340 = vst [vmem:[#allocation1 + $0x2] ss:$4 sm:$0xff] %v14114_v3  ;;  %3375 = vmatpush.msrb.mxu2 %v6653_v13  ;;  %v10192_v13 = vrot.slane %v9962_v9, 6 }
 0x456   : > { %3341 = vst [vmem:[#allocation1 + $0x3] ss:$4 sm:$0xff] %v14115_v2 }
 0x457   : > { %14116 = vst [vmem:[#allocation16_spill] sm:$0xff] %v10172_v53  ;;  %3267 = vmatmul.f32.gmra.mxu1 %v10025_v31  ;;  %3376 = vmatpush.msrb.mxu2 %v6652_v29  ;;  %v13750_v53 = vrot.slane %v9962_v9, 4  ;;  %v10189_v31 = vadd.f32 %v9959_v62, %v749_v54 }
 0x459   : > { %v3216_v44 = vld.sshfl [vmem:[#allocation1 + $0x20] sm:$0xff pattern:$0x73625140]  ;;  %3377 = vmatpush.msrb.mxu2 %v6651_v8  ;;  %3161 = vmatmul.f32.gmra.mxu0 %v10115_v36  ;;  %v10204_v54 = vrot.slane %v10189_v31, 2  ;;  %v6649_v8 = vld [vmem:[%s13541_s3 + $0x910] sm:$0xff]  ;;  %v10214_v36 = vpop.f32.mrf.mxu1 }
 0x45a   : > { %3221 = vst [vmem:[#allocation1 + $0x20] ss:$4 sm:$0xff] %v14020_v56  ;;  %v14133_v56 = vld [vmem:[#allocation46_spill] sm:$0xff] }
 0x45b   : > { %3222 = vst [vmem:[#allocation1 + $0x21] ss:$4 sm:$0xff] %v14056_v42  ;;  %v6650_v42 = vld [vmem:[%s13541_s3 + $0x918] sm:$0xff] }
 0x45c   : > { %3223 = vst [vmem:[#allocation1 + $0x22] ss:$4 sm:$0xff] %v14072_v24  ;;  %3378 = vmatpush.msrb.mxu2 %v6650_v42  ;;  %v10207_v24 = vrot.slane %v10189_v31, 4  ;;  %v6648_v42 = vld [vmem:[%s13541_s3 + $0x908] sm:$0xff] }
 0x45d   : > { %3224 = vst [vmem:[#allocation1 + $0x23] ss:$4 sm:$0xff] %v14117_v51  ;;  %v10195_v29 = vld.sshfl [vmem:[#allocation1] sm:$0xff pattern:$0x73625140]  ;;  %v10223_v51 = vpop.f32.mrf.mxu2 }
 0x45e   : > { %3348 = vst [vmem:[#allocation1] ss:$4 sm:$0xff] %v13750_v53  ;;  %3379 = vmatpush.msrb.mxu2 %v6649_v8  ;;  %v6647_v53 = vld [vmem:[%s13541_s3 + $0x900] sm:$0xff]  ;;  %v10230_v8 = vpop.f32.mrf.mxu3 }
 0x45f   : > { %3349 = vst [vmem:[#allocation1 + $0x1] ss:$4 sm:$0xff] %v10192_v13  ;;  %3270 = vmatmul.f32.gmra.mxu1 %v3216_v44  ;;  %v6682_v44 = vld [vmem:[%s13541_s3 + $0x9f8] sm:$0xff] }
 0x460   : > { %3350 = vst [vmem:[#allocation1 + $0x2] ss:$4 sm:$0xff] %v10204_v54  ;;  %3380 = vmatpush.msrb.mxu2 %v6648_v42  ;;  %3515 = vmatpush.msrb.mxu3 %v6682_v44  ;;  %v6681_v42 = vld [vmem:[%s13541_s3 + $0x9f0] sm:$0xff]  ;;  %v14122_v44 = vld [vmem:[#allocation39_spill] sm:$0xff] }
 0x461   : > { %14118 = vst [vmem:[#allocation17_spill] sm:$0xff] %v10214_v36 }
 0x462   : > { %3351 = vst [vmem:[#allocation1 + $0x3] ss:$4 sm:$0xff] %v10207_v24  ;;  %3381 = vmatpush.msrb.mxu2 %v6647_v53  ;;  %3516 = vmatpush.msrb.mxu3 %v6681_v42  ;;  %v14121_v53 = vld [vmem:[#allocation38_spill] sm:$0xff]  ;;  %v14126_v42 = vld [vmem:[#allocation41_spill] sm:$0xff] }
 0x463   : > { %14119 = vst [vmem:[#allocation53_spill] sm:$0xff] %v10223_v51  ;;  %3382 = vmatmul.f32.vlgmr.msrb.gmra.mxu2 %v10128_v0  ;;  %v10246_v51 = vpop.f32.mrf.mxu1 }
 0x464   : > { %v3226_v27 = vld.sshfl [vmem:[#allocation1 + $0x20] sm:$0xff pattern:$0x73625140]  ;;  %14120 = vst [vmem:[#allocation23_spill] sm:$0xff] %v10230_v8  ;;  %v6680_v8 = vld [vmem:[%s13541_s3 + $0x9e8] sm:$0xff] }
 0x465   : > { %3231 = vst [vmem:[#allocation1 + $0x20] ss:$4 sm:$0xff] %v9628_v61  ;;  %3517 = vmatpush.msrb.mxu3 %v6680_v8 }
 0x466   : > { %3232 = vst [vmem:[#allocation1 + $0x21] ss:$4 sm:$0xff] %v9687_v52  ;;  %v14124_v52 = vld [vmem:[#allocation40_spill] sm:$0xff]  ;;  %v10258_v36 = vpop.f32.mrf.mxu3 }
 0x467   : > { %3233 = vst [vmem:[#allocation1 + $0x22] ss:$4 sm:$0xff] %v9962_v9  ;;  %3273 = vmatmul.f32.gmra.mxu1 %v10052_v40  ;;  %v6679_v40 = vld [vmem:[%s13541_s3 + $0x9e0] sm:$0xff] }
 0x468   : > { %3234 = vst [vmem:[#allocation1 + $0x23] ss:$4 sm:$0xff] %v10061_v12  ;;  %v10252_v12 = vpop.f32.mrf.mxu2  ;;  %3518 = vmatpush.msrb.mxu3 %v6679_v40  ;;  %v6676_v40 = vld [vmem:[%s13541_s3 + $0x9c8] sm:$0xff] }
 0x469   : > { %v10239_v0 = vld.sshfl [vmem:[#allocation1] sm:$0xff pattern:$0x73625140]  ;;  %14123 = vst [vmem:[#allocation24_spill] sm:$0xff] %v10246_v51 }
 0x46a   : > { %3460 = vst [vmem:[#allocation1] ss:$4 sm:$0xff] %v14121_v53  ;;  %v6678_v53 = vld [vmem:[%s13541_s3 + $0x9d8] sm:$0xff] }
 0x46b   : > { %3462 = vst [vmem:[#allocation1 + $0x1] ss:$4 sm:$0xff] %v14122_v44  ;;  %3519 = vmatpush.msrb.mxu3 %v6678_v53  ;;  %v6677_v44 = vld [vmem:[%s13541_s3 + $0x9d0] sm:$0xff]  ;;  %v10274_v51 = vpop.f32.mrf.mxu1 }
 0x46c   : > { %3464 = vst [vmem:[#allocation1 + $0x2] ss:$4 sm:$0xff] %v14124_v52 }
 0x46d   : > { %14125 = vst [vmem:[#allocation26_spill] sm:$0xff] %v10252_v12  ;;  %3520 = vmatpush.msrb.mxu3 %v6677_v44  ;;  %v14130_v44 = vld [vmem:[#allocation44_spill] sm:$0xff]  ;;  %v6674_v12 = vld [vmem:[%s13541_s3 + $0x9b8] sm:$0xff] }
 0x46e   : > { %3466 = vst [vmem:[#allocation1 + $0x3] ss:$4 sm:$0xff] %v14126_v42  ;;  %v752_v42 = vpop.f32.mrf.mxu0 }
 0x46f   : > { %14127 = vst [vmem:[#allocation27_spill] sm:$0xff] %v10258_v36  ;;  %v3236_v8 = vld.sshfl [vmem:[#allocation1 + $0x20] sm:$0xff pattern:$0x73625140]  ;;  %3276 = vmatmul.f32.gmra.mxu1 %v3226_v27  ;;  %3521 = vmatpush.msrb.mxu3 %v6676_v40  ;;  %v14132_v40 = vld [vmem:[#allocation45_spill] sm:$0xff] }
 0x470   : > { %3319 = vst [vmem:[#allocation1 + $0x20] ss:$4 sm:$0xff] %v7862_v19  ;;  %v14128_v36 = vld [vmem:[#allocation43_spill] sm:$0xff]  ;;  %v10280_v61 = vpop.f32.mrf.mxu2 }
 0x471   : > { %3321 = vst [vmem:[#allocation1 + $0x21] ss:$4 sm:$0xff] %v7865_v20  ;;  %v6675_v27 = vld [vmem:[%s13541_s3 + $0x9c0] sm:$0xff] }
 0x472   : > { %3323 = vst [vmem:[#allocation1 + $0x22] ss:$4 sm:$0xff] %v14012_v33  ;;  %3522 = vmatpush.msrb.mxu3 %v6675_v27  ;;  %v6672_v27 = vld [vmem:[%s13541_s3 + $0x9a8] sm:$0xff] }
 0x473   : > { %3325 = vst [vmem:[#allocation1 + $0x23] ss:$4 sm:$0xff] %v7878_v25 }
 0x474   : > { %14129 = vst [vmem:[#allocation12_spill] sm:$0xff] %v10274_v51  ;;  %3523 = vmatpush.msrb.mxu3 %v6674_v12  ;;  %v10288_v51 = vpop.f32.mrf.mxu3  ;;  %v6671_v12 = vld [vmem:[%s13541_s3 + $0x9a0] sm:$0xff] }
 0x475   : > { %v3475_v53 = vld.sshfl [vmem:[#allocation1] sm:$0xff pattern:$0x73625140]  ;;  %14131 = vst [vmem:[#allocation48_spill] sm:$0xff] %v10280_v61 }
 0x476   : > { %3477 = vst [vmem:[#allocation1] ss:$4 sm:$0xff] %v14128_v36  ;;  %v6673_v36 = vld [vmem:[%s13541_s3 + $0x9b0] sm:$0xff] }
 0x477   : > { %3478 = vst [vmem:[#allocation1 + $0x1] ss:$4 sm:$0xff] %v14130_v44  ;;  %3279 = vmatmul.f32.gmra.mxu1 %v10097_v15  ;;  %3524 = vmatpush.msrb.mxu3 %v6673_v36  ;;  %v6670_v15 = vld [vmem:[%s13541_s3 + $0x998] sm:$0xff] }
 0x478   : > { %3479 = vst [vmem:[#allocation1 + $0x2] ss:$4 sm:$0xff] %v14132_v40  ;;  %v10311_v61 = vpop.f32.mrf.mxu2  ;;  %v6668_v40 = vld [vmem:[%s13541_s3 + $0x988] sm:$0xff] }
 0x479   : > { %3480 = vst [vmem:[#allocation1 + $0x3] ss:$4 sm:$0xff] %v14133_v56  ;;  %3525 = vmatpush.msrb.mxu3 %v6672_v27  ;;  %v14136_v27 = vld [vmem:[#allocation91_spill] sm:$0xff]  ;;  %v14139_v56 = vld [vmem:[#allocation93_spill] sm:$0xff] }
 0x47a   : > { %14134 = vst [vmem:[#allocation82_spill] sm:$0xff] %v10288_v51  ;;  %v3327_v44 = vld.sshfl [vmem:[#allocation1 + $0x20] sm:$0xff pattern:$0x73625140]  ;;  %v10305_v51 = vpop.f32.mrf.mxu1 }
 0x47b   : > { %3334 = vst [vmem:[#allocation1 + $0x22] ss:$4 sm:$0xff] %v14018_v18  ;;  %3385 = vmatmul.f32.gmra.mxu2 %v3327_v44  ;;  %3526 = vmatpush.msrb.mxu3 %v6671_v12  ;;  %v6669_v44 = vld [vmem:[%s13541_s3 + $0x990] sm:$0xff]  ;;  %v14138_v12 = vld [vmem:[#allocation92_spill] sm:$0xff]  ;;  %v6664_v18 = vrot.slane %v10204_v54, 9 }
 0x47c   : > { %3335 = vst [vmem:[#allocation1 + $0x23] ss:$4 sm:$0xff] %v8071_v16 }
 0x47d   : > { %3332 = vst [vmem:[#allocation1 + $0x20] ss:$4 sm:$0xff] %v7933_v10  ;;  %3527 = vmatpush.msrb.mxu3 %v6670_v15  ;;  %v3417_v15 = vrot.slane %v10192_v13, 7 }
 0x47e   : > { %3333 = vst [vmem:[#allocation1 + $0x21] ss:$4 sm:$0xff] %v7945_v21 }
 0x47f   : > { %14135 = vst [vmem:[#allocation83_spill] sm:$0xff] %v10305_v51  ;;  %3282 = vmatmul.f32.gmra.mxu1 %v3236_v8  ;;  %3528 = vmatpush.msrb.mxu3 %v6669_v44  ;;  %v10318_v51 = vpop.f32.mrf.mxu3  ;;  %v6667_v8 = vld [vmem:[%s13541_s3 + $0x980] sm:$0xff]  ;;  %v3424_v44 = vrot.slane %v10207_v24, 7 }
 0x480   : > { %v10303_v36 = vld.sshfl [vmem:[#allocation1] sm:$0xff pattern:$0x73625140]  ;;  %14137 = vst [vmem:[#allocation38_spill] sm:$0xff] %v10311_v61  ;;  %v14142_v61 = vrot.slane %v9962_v9, 4  ;;  %v10352_v63 = vpop.f32.mrf.mxu2 }
 0x481   : > { %3487 = vst [vmem:[#allocation1] ss:$4 sm:$0xff] %v14136_v27  ;;  %v14141_v27 = vld [vmem:[#allocation94_spill] sm:$0xff]  ;;  %3529 = vmatpush.msrb.mxu3 %v6668_v40  ;;  %v3420_v40 = vrot.slane %v10189_v31, 7 }
 0x482   : > { %3488 = vst [vmem:[#allocation1 + $0x1] ss:$4 sm:$0xff] %v14138_v12  ;;  %v10327_v12 = vrot.slane %v10189_v31, 6 }
 0x483   : > { %3489 = vst [vmem:[#allocation1 + $0x2] ss:$4 sm:$0xff] %v14139_v56  ;;  %3388 = vmatmul.f32.gmra.mxu2 %v10158_v46  ;;  %v6663_v56 = vrot.slane %v14142_v61, 9  ;;  %3530 = vmatpush.msrb.mxu3 %v6667_v8  ;;  %v3419_v46 = vrot.slane %v3417_v15, 2  ;;  %v6697_v61 = vld [vmem:[%s13541_s3 + $0xa70] sm:$0xff]  ;;  %v3426_v8 = vrot.slane %v3424_v44, 2 }
 0x484   : > { %14140 = vst [vmem:[#allocation39_spill] sm:$0xff] %v10318_v51  ;;  %3531 = vmatmul.f32.vlgmr.msrb.gmra.mxu3 %v3475_v53  ;;  %v3427_v9 = vrot.slane %v10327_v12, 7 }
 0x485   : > { %3490 = vst [vmem:[#allocation1 + $0x3] ss:$4 sm:$0xff] %v14141_v27  ;;  %v3337_v51 = vld.sshfl [vmem:[#allocation1 + $0x20] sm:$0xff pattern:$0x73625140]  ;;  %v6698_v27 = vld [vmem:[%s13541_s3 + $0xa78] sm:$0xff]  ;;  %v3418_v52 = vsel %vm7924_vm6, %v6663_v56, %v3417_v15  ;;  %v3421_v49 = vsel %vm7924_vm6, %v3419_v46, %v3420_v40  ;;  %v755_v46 = vpop.f32.mrf.mxu0 }
 0x486   : > { %3342 = vst [vmem:[#allocation1 + $0x20] ss:$4 sm:$0xff] %v9213_v48  ;;  %3636 = vmatpush.msrb.mxu0 %v6698_v27  ;;  %v6696_v27 = vld [vmem:[%s13541_s3 + $0xa68] sm:$0xff]  ;;  %v6695_v56 = vld [vmem:[%s13541_s3 + $0xa60] sm:$0xff] }
 0x487   : > { %3343 = vst [vmem:[#allocation1 + $0x21] ss:$4 sm:$0xff] %v9220_v47  ;;  %v10363_v15 = vpop.f32.mrf.mxu3  ;;  %v6692_v40 = vld [vmem:[%s13541_s3 + $0xa48] sm:$0xff] }
 0x488   : > { %3344 = vst [vmem:[#allocation1 + $0x22] ss:$4 sm:$0xff] %v9216_v22  ;;  %3637 = vmatpush.msrb.mxu0 %v6697_v61  ;;  %v10358_v61 = vsel %vm7924_vm6, %v6664_v18, %v3424_v44  ;;  %v6693_v18 = vld [vmem:[%s13541_s3 + $0xa50] sm:$0xff] }
 0x489   : > { %3345 = vst [vmem:[#allocation1 + $0x23] ss:$4 sm:$0xff] %v9228_v45 }
 0x48a   : > { %14143 = vst [vmem:[#allocation43_spill] sm:$0xff] %v10352_v63  ;;  %3638 = vmatpush.msrb.mxu0 %v6696_v27  ;;  %v10367_v63 = vsel %vm7924_vm6, %v3426_v8, %v3427_v9  ;;  %v10394_v8 = vadd.f32 %v9959_v62, %v755_v46  ;;  %v6691_v27 = vld [vmem:[%s13541_s3 + $0xa40] sm:$0xff]  ;;  %v6689_v46 = vld [vmem:[%s13541_s3 + $0xa30] sm:$0xff] }
 0x48b   : > { %3391 = vmatmul.f32.gmra.mxu2 %v3337_v51  ;;  %14144 = vst [vmem:[#allocation44_spill] sm:$0xff] %v10363_v15  ;;  %v10380_v51 = vpop.f32.mrf.mxu1  ;;  %v14168_v15 = vld [vmem:[#allocation85_spill] sm:$0xff] }
 0x48c   : > { %v10346_v53 = vld.sshfl [vmem:[#allocation1] sm:$0xff pattern:$0x73625140]  ;;  %3639 = vmatpush.msrb.mxu0 %v6695_v56  ;;  %14146 = vst [vmem:[#allocation92_spill] sm:$0xff] %v10380_v51  ;;  %v10401_v56 = vpop.f32.mrf.mxu2 }
 0x48d   : > { %3497 = vst [vmem:[#allocation1] ss:$4 sm:$0xff] %v3418_v52  ;;  %v10371_v52 = vadd.f32 %v9959_v62, %v752_v42  ;;  %v6690_v62 = vld [vmem:[%s13541_s3 + $0xa38] sm:$0xff] }
 0x48e   : > { %3498 = vst [vmem:[#allocation1 + $0x1] ss:$4 sm:$0xff] %v3421_v49  ;;  %v6694_v49 = vld [vmem:[%s13541_s3 + $0xa58] sm:$0xff] }
 0x48f   : > { %3499 = vst [vmem:[#allocation1 + $0x2] ss:$4 sm:$0xff] %v10358_v61  ;;  %3640 = vmatpush.msrb.mxu0 %v6694_v49  ;;  %v10383_v9 = vrot.slane %v10371_v52, 2  ;;  %v10386_v42 = vrot.slane %v10371_v52, 6 }
 0x490   : > { %14145 = vst [vmem:[#allocation91_spill] sm:$0xff] %v10371_v52  ;;  %v3347_v44 = vld.sshfl [vmem:[#allocation1 + $0x20] sm:$0xff pattern:$0x73625140] }
 0x491   : > { %3500 = vst [vmem:[#allocation1 + $0x3] ss:$4 sm:$0xff] %v10367_v63  ;;  %3641 = vmatpush.msrb.mxu0 %v6693_v18  ;;  %v10410_v18 = vpop.f32.mrf.mxu3 }
 0x492   : > { %14147 = vst [vmem:[#allocation136_spill] sm:$0xff] %v10386_v42 }
 0x493   : > { %3352 = vst [vmem:[#allocation1 + $0x20] ss:$4 sm:$0xff] %v10371_v52  ;;  %3642 = vmatpush.msrb.mxu0 %v6692_v40  ;;  %3394 = vmatmul.f32.gmra.mxu2 %v10195_v29  ;;  %v14151_v29 = vld [vmem:[#allocation36_spill] sm:$0xff]  ;;  %v10417_v40 = vpop.f32.mrf.mxu1 }
 0x494   : > { %3353 = vst [vmem:[#allocation1 + $0x21] ss:$4 sm:$0xff] %v10383_v9 }
 0x495   : > { %14148 = vst [vmem:[#allocation137_spill] sm:$0xff] %v10394_v8  ;;  %3643 = vmatpush.msrb.mxu0 %v6691_v27  ;;  %v14153_v27 = vld [vmem:[#allocation37_spill] sm:$0xff] }
 0x496   : > { %3354 = vst [vmem:[#allocation1 + $0x22] ss:$4 sm:$0xff] %v10386_v42 }
 0x497   : > { %14149 = vst [vmem:[#allocation138_spill] sm:$0xff] %v10401_v56  ;;  %3644 = vmatpush.msrb.mxu0 %v6690_v62  ;;  %v6687_v62 = vld [vmem:[%s13541_s3 + $0xa20] sm:$0xff]  ;;  %v10511_v56 = vrot.slane %v10394_v8, 2 }
 0x498   : > { %v10403_v49 = vld.sshfl [vmem:[#allocation1] sm:$0xff pattern:$0x73625140]  ;;  %3355 = vst [vmem:[#allocation1 + $0x23] ss:$4 sm:$0xff] %v10394_v8 }
 0x499   : > { %3581 = vst [vmem:[#allocation1] ss:$4 sm:$0xff] %v14101_v11  ;;  %3645 = vmatpush.msrb.mxu0 %v6689_v46  ;;  %v6688_v11 = vld [vmem:[%s13541_s3 + $0xa28] sm:$0xff]  ;;  %v10431_v46 = vpop.f32.mrf.mxu2 }
 0x49a   : > { %14150 = vst [vmem:[#allocation139_spill] sm:$0xff] %v10410_v18 }
 0x49b   : > { %3583 = vst [vmem:[#allocation1 + $0x1] ss:$4 sm:$0xff] %v14151_v29  ;;  %3646 = vmatpush.msrb.mxu0 %v6688_v11  ;;  %3397 = vmatmul.f32.gmra.mxu2 %v3347_v44  ;;  %v6686_v29 = vld [vmem:[%s13541_s3 + $0xa18] sm:$0xff]  ;;  %v6685_v44 = vld [vmem:[%s13541_s3 + $0xa10] sm:$0xff]  ;;  %v10438_v11 = vpop.f32.mrf.mxu3  ;;  %v10443_v18 = vpop.f32.mrf.mxu1 }
 0x49c   : > { %3585 = vst [vmem:[#allocation1 + $0x2] ss:$4 sm:$0xff] %v14103_v37 }
 0x49d   : > { %14152 = vst [vmem:[#allocation36_spill] sm:$0xff] %v10417_v40  ;;  %3647 = vmatpush.msrb.mxu0 %v6687_v62  ;;  %v6684_v62 = vld [vmem:[%s13541_s3 + $0xa08] sm:$0xff] }
 0x49e   : > { %3587 = vst [vmem:[#allocation1 + $0x3] ss:$4 sm:$0xff] %v14153_v27  ;;  %v14157_v40 = vld [vmem:[#allocation25_spill] sm:$0xff] }
 0x49f   : > { %v3357_v51 = vld.sshfl [vmem:[#allocation1 + $0x20] sm:$0xff pattern:$0x73625140]  ;;  %14154 = vst [vmem:[#allocation37_spill] sm:$0xff] %v10431_v46  ;;  %3648 = vmatpush.msrb.mxu0 %v6686_v29 }
 0x4a0   : > { %3468 = vst [vmem:[#allocation1 + $0x20] ss:$4 sm:$0xff] %v13905_v32  ;;  %v6683_v29 = vld [vmem:[%s13541_s3 + $0xa00] sm:$0xff] }
 0x4a1   : > { %3470 = vst [vmem:[#allocation1 + $0x21] ss:$4 sm:$0xff] %v13907_v57  ;;  %3649 = vmatpush.msrb.mxu0 %v6685_v44  ;;  %v6714_v44 = vld [vmem:[%s13541_s3 + $0xaf8] sm:$0xff] }
 0x4a2   : > { %3472 = vst [vmem:[#allocation1 + $0x22] ss:$4 sm:$0xff] %v14033_v4  ;;  %3757 = vmatpush.msra.mxu1 %v6714_v44  ;;  %v6710_v44 = vld [vmem:[%s13541_s3 + $0xad8] sm:$0xff] }
 0x4a3   : > { %3474 = vst [vmem:[#allocation1 + $0x23] ss:$4 sm:$0xff] %v14034_v35  ;;  %3650 = vmatpush.msrb.mxu0 %v6684_v62  ;;  %3400 = vmatmul.f32.gmra.mxu2 %v10239_v0  ;;  %v6713_v0 = vld [vmem:[%s13541_s3 + $0xaf0] sm:$0xff]  ;;  %v10458_v62 = vpop.f32.mrf.mxu2 }
 0x4a4   : > { %14155 = vst [vmem:[#allocation140_spill] sm:$0xff] %v10438_v11  ;;  %3758 = vmatpush.msra.mxu1 %v6713_v0  ;;  %v6709_v0 = vld [vmem:[%s13541_s3 + $0xad0] sm:$0xff] }
 0x4a5   : > { %14156 = vst [vmem:[#allocation141_spill] sm:$0xff] %v10443_v18  ;;  %3651 = vmatpush.msrb.mxu0 %v6683_v29  ;;  %v3596_v46 = vld.sshfl [vmem:[#allocation1] sm:$0xff pattern:$0x73625140]  ;;  %v14161_v29 = vld [vmem:[#allocation42_spill] sm:$0xff] }
 0x4a6   : > { %3652 = vmatmul.f32.vlgmr.msrb.gmra.mxu0 %v3596_v46  ;;  %3598 = vst [vmem:[#allocation1] ss:$4 sm:$0xff] %v14107_v39  ;;  %v6712_v39 = vld [vmem:[%s13541_s3 + $0xae8] sm:$0xff]  ;;  %v6711_v46 = vld [vmem:[%s13541_s3 + $0xae0] sm:$0xff]  ;;  %v6705_v18 = vld [vmem:[%s13541_s3 + $0xab0] sm:$0xff] }
 0x4a7   : > { %3599 = vst [vmem:[#allocation1 + $0x1] ss:$4 sm:$0xff] %v14157_v40  ;;  %v10465_v40 = vpop.f32.mrf.mxu3  ;;  %3759 = vmatpush.msra.mxu1 %v6712_v39 }
 0x4a8   : > { %14158 = vst [vmem:[#allocation25_spill] sm:$0xff] %v10458_v62  ;;  %v10490_v62 = vpop.f32.mrf.mxu0 }
 0x4a9   : > { %14159 = vst [vmem:[#allocation142_spill] sm:$0xff] %v10465_v40  ;;  %3760 = vmatpush.msra.mxu1 %v6711_v46 }
 0x4aa   : > { %v3476_v11 = vld.sshfl [vmem:[#allocation1 + $0x20] sm:$0xff pattern:$0x73625140]  ;;  %3600 = vst [vmem:[#allocation1 + $0x2] ss:$4 sm:$0xff] %v14109_v23 }
 0x4ab   : > { %3481 = vst [vmem:[#allocation1 + $0x20] ss:$4 sm:$0xff] %v13911_v7  ;;  %3534 = vmatmul.f32.gmra.mxu3 %v3476_v11  ;;  %3403 = vmatmul.f32.gmra.mxu2 %v3357_v51  ;;  %v10472_v11 = vpop.f32.mrf.mxu1  ;;  %v6708_v51 = vld [vmem:[%s13541_s3 + $0xac8] sm:$0xff]  ;;  %v10485_v39 = vpop.f32.mrf.mxu2 }
 0x4ac   : > { %3482 = vst [vmem:[#allocation1 + $0x21] ss:$4 sm:$0xff] %v13912_v6  ;;  %3761 = vmatpush.msra.mxu1 %v6710_v44 }
 0x4ad   : > { %3483 = vst [vmem:[#allocation1 + $0x22] ss:$4 sm:$0xff] %v14039_v28 }
 0x4ae   : > { %3484 = vst [vmem:[#allocation1 + $0x23] ss:$4 sm:$0xff] %v14040_v34  ;;  %3762 = vmatpush.msra.mxu1 %v6709_v0 }
 0x4af   : > { %14160 = vst [vmem:[#allocation143_spill] sm:$0xff] %v10472_v11  ;;  %v10487_v46 = vpop.f32.mrf.mxu3 }
 0x4b0   : > { %3601 = vst [vmem:[#allocation1 + $0x3] ss:$4 sm:$0xff] %v14161_v29  ;;  %3763 = vmatpush.msra.mxu1 %v6708_v51  ;;  %v6706_v51 = vld [vmem:[%s13541_s3 + $0xab8] sm:$0xff]  ;;  %v3441_v29 = vrot.slane %v10511_v56, 7 }
 0x4b1   : > { %14162 = vst [vmem:[#allocation144_spill] sm:$0xff] %v10485_v39  ;;  %v3431_v39 = vrot.slane %v10383_v9, 7 }
 0x4b2   : > { %14163 = vst [vmem:[#allocation145_spill] sm:$0xff] %v10487_v46  ;;  %v6707_v46 = vld [vmem:[%s13541_s3 + $0xac0] sm:$0xff] }
 0x4b3   : > { %3537 = vmatmul.f32.gmra.mxu3 %v10303_v36  ;;  %14164 = vst [vmem:[#allocation146_spill] sm:$0xff] %v10490_v62  ;;  %v10497_v36 = vrot.slane %v10371_v52, 4  ;;  %v10501_v0 = vpop.f32.mrf.mxu1  ;;  %3764 = vmatpush.msra.mxu1 %v6707_v46  ;;  %v10514_v11 = vpop.f32.mrf.mxu2  ;;  %v3433_v62 = vrot.slane %v3431_v39, 2 }
 0x4b4   : > { %14166 = vst [vmem:[#allocation148_spill] sm:$0xff] %v10501_v0  ;;  %v6665_v0 = vrot.slane %v10371_v52, 9 }
 0x4b5   : > { %v3486_v40 = vld.sshfl [vmem:[#allocation1 + $0x20] sm:$0xff pattern:$0x73625140]  ;;  %14165 = vst [vmem:[#allocation147_spill] sm:$0xff] %v10497_v36  ;;  %3765 = vmatpush.msra.mxu1 %v6706_v51  ;;  %v10535_v51 = vpop.f32.mrf.mxu0 }
 0x4b6   : > { %3491 = vst [vmem:[#allocation1 + $0x20] ss:$4 sm:$0xff] %v9318_v26  ;;  %v10533_v34 = vsel %vm7924_vm6, %v6665_v0, %v3431_v39  ;;  %v6702_v39 = vld [vmem:[%s13541_s3 + $0xa98] sm:$0xff] }
 0x4b7   : > { %3492 = vst [vmem:[#allocation1 + $0x21] ss:$4 sm:$0xff] %v9324_v14  ;;  %v10493_v44 = vld.sshfl [vmem:[#allocation1] sm:$0xff pattern:$0x73625140]  ;;  %v10525_v46 = vpop.f32.mrf.mxu3  ;;  %3766 = vmatpush.msra.mxu1 %v6705_v18 }
 0x4b8   : > { %3493 = vst [vmem:[#allocation1 + $0x22] ss:$4 sm:$0xff] %v9332_v41 }
 0x4b9   : > { %3494 = vst [vmem:[#allocation1 + $0x23] ss:$4 sm:$0xff] %v9337_v17  ;;  %v3438_v17 = vrot.slane %v10394_v8, 7 }
 0x4ba   : > { %3608 = vst [vmem:[#allocation1] ss:$4 sm:$0xff] %v14113_v5  ;;  %v3434_v5 = vrot.slane %v10497_v36, 7 }
 0x4bb   : > { %14167 = vst [vmem:[#allocation149_spill] sm:$0xff] %v10511_v56  ;;  %3540 = vmatmul.f32.gmra.mxu3 %v3486_v40  ;;  %v14170_v40 = vld [vmem:[#allocation88_spill] sm:$0xff]  ;;  %v3440_v41 = vrot.slane %v3438_v17, 2 }
 0x4bc   : > { %3609 = vst [vmem:[#allocation1 + $0x1] ss:$4 sm:$0xff] %v14168_v15  ;;  %v6666_v15 = vrot.slane %v10386_v42, 9 }
 0x4bd   : > { %14169 = vst [vmem:[#allocation85_spill] sm:$0xff] %v10514_v11  ;;  %v6704_v11 = vld [vmem:[%s13541_s3 + $0xaa8] sm:$0xff]  ;;  %v10555_v0 = vsel %vm7924_vm6, %v3440_v41, %v3441_v29  ;;  %v10568_v41 = vpop.f32.mrf.mxu2  ;;  %v6731_v29 = vld [vmem:[%s13541_s3 + $0xb78] sm:$0xff] }
 0x4be   : > { %3610 = vst [vmem:[#allocation1 + $0x2] ss:$4 sm:$0xff] %v14115_v2  ;;  %3767 = vmatpush.msra.mxu1 %v6704_v11  ;;  %v10547_v18 = vsel %vm7924_vm6, %v6666_v15, %v3438_v17  ;;  %v6701_v17 = vld [vmem:[%s13541_s3 + $0xa90] sm:$0xff]  ;;  %v6699_v15 = vld [vmem:[%s13541_s3 + $0xa80] sm:$0xff]  ;;  %3885 = vmatpush.msra.mxu2 %v6731_v29 }
 0x4bf   : > { %3611 = vst [vmem:[#allocation1 + $0x3] ss:$4 sm:$0xff] %v14170_v40  ;;  %v6703_v40 = vld [vmem:[%s13541_s3 + $0xaa0] sm:$0xff] }
 0x4c0   : > { %14171 = vst [vmem:[#allocation150_spill] sm:$0xff] %v10525_v46  ;;  %v3496_v28 = vld.sshfl [vmem:[#allocation1 + $0x20] sm:$0xff pattern:$0x73625140]  ;;  %v10542_v46 = vsel %vm7924_vm6, %v3433_v62, %v3434_v5  ;;  %3768 = vmatpush.msra.mxu1 %v6703_v40  ;;  %v10559_v62 = vpop.f32.mrf.mxu1  ;;  %v6730_v5 = vld [vmem:[%s13541_s3 + $0xb70] sm:$0xff]  ;;  %v10583_v40 = vpop.f32.mrf.mxu0 }
 0x4c1   : > { %14172 = vst [vmem:[#allocation151_spill] sm:$0xff] %v10533_v34  ;;  %3886 = vmatpush.msra.mxu2 %v6730_v5  ;;  %v6728_v29 = vld [vmem:[%s13541_s3 + $0xb60] sm:$0xff] }
 0x4c2   : > { %14173 = vst [vmem:[#allocation152_spill] sm:$0xff] %v10535_v51  ;;  %3769 = vmatpush.msra.mxu1 %v6702_v39 }
 0x4c3   : > { %14174 = vst [vmem:[#allocation153_spill] sm:$0xff] %v10542_v46  ;;  %3543 = vmatmul.f32.gmra.mxu3 %v10346_v53  ;;  %v6700_v53 = vld [vmem:[%s13541_s3 + $0xa88] sm:$0xff] }
 0x4c4   : > { %3501 = vst [vmem:[#allocation1 + $0x20] ss:$4 sm:$0xff] %v10533_v34  ;;  %3770 = vmatpush.msra.mxu1 %v6701_v17 }
 0x4c5   : > { %3502 = vst [vmem:[#allocation1 + $0x21] ss:$4 sm:$0xff] %v10542_v46  ;;  %v10603_v5 = vpop.f32.mrf.mxu2 }
 0x4c6   : > { %14175 = vst [vmem:[#allocation154_spill] sm:$0xff] %v10555_v0  ;;  %v10565_v11 = vld.sshfl [vmem:[#allocation1] sm:$0xff pattern:$0x73625140]  ;;  %3771 = vmatpush.msra.mxu1 %v6700_v53 }
 0x4c7   : > { %3503 = vst [vmem:[#allocation1 + $0x22] ss:$4 sm:$0xff] %v10547_v18 }
 0x4c8   : > { %14176 = vst [vmem:[#allocation155_spill] sm:$0xff] %v10559_v62  ;;  %3772 = vmatpush.msra.mxu1 %v6699_v15  ;;  %v10594_v17 = vpop.f32.mrf.mxu1  ;;  %v6726_v15 = vld [vmem:[%s13541_s3 + $0xb50] sm:$0xff]  ;;  %v10615_v51 = vpop.f32.mrf.mxu0  ;;  %v6721_v62 = vld [vmem:[%s13541_s3 + $0xb28] sm:$0xff] }
 0x4c9   : > { %3504 = vst [vmem:[#allocation1 + $0x23] ss:$4 sm:$0xff] %v10555_v0 }
 0x4ca   : > { %3618 = vst [vmem:[#allocation1] ss:$4 sm:$0xff] %v10192_v13  ;;  %v10581_v13 = vpop.f32.mrf.mxu3 }
 0x4cb   : > { %3619 = vst [vmem:[#allocation1 + $0x1] ss:$4 sm:$0xff] %v10189_v31  ;;  %v6729_v31 = vld [vmem:[%s13541_s3 + $0xb68] sm:$0xff]  ;;  %3546 = vmatmul.f32.gmra.mxu3 %v3496_v28  ;;  %v6727_v28 = vld [vmem:[%s13541_s3 + $0xb58] sm:$0xff] }
 0x4cc   : > { %3620 = vst [vmem:[#allocation1 + $0x2] ss:$4 sm:$0xff] %v10207_v24  ;;  %3887 = vmatpush.msra.mxu2 %v6729_v31 }
 0x4cd   : > { %14177 = vst [vmem:[#allocation156_spill] sm:$0xff] %v10583_v40 }
 0x4ce   : > { %3621 = vst [vmem:[#allocation1 + $0x3] ss:$4 sm:$0xff] %v10327_v12  ;;  %3888 = vmatpush.msra.mxu2 %v6728_v29 }
 0x4cf   : > { %14178 = vst [vmem:[#allocation157_spill] sm:$0xff] %v10594_v17 }
 0x4d0   : > { %v3506_v39 = vld.sshfl [vmem:[#allocation1 + $0x20] sm:$0xff pattern:$0x73625140]  ;;  %3889 = vmatpush.msra.mxu2 %v6727_v28  ;;  %v10624_v17 = vpop.f32.mrf.mxu1  ;;  %v10628_v28 = vpop.f32.mrf.mxu2 }
 0x4d1   : > { %3589 = vst [vmem:[#allocation1 + $0x20] ss:$4 sm:$0xff] %v7865_v20 }
 0x4d2   : > { %3591 = vst [vmem:[#allocation1 + $0x21] ss:$4 sm:$0xff] %v14083_v59  ;;  %v10613_v31 = vpop.f32.mrf.mxu3  ;;  %3890 = vmatpush.msra.mxu2 %v6726_v15 }
 0x4d3   : > { %3593 = vst [vmem:[#allocation1 + $0x22] ss:$4 sm:$0xff] %v7878_v25  ;;  %3549 = vmatmul.f32.gmra.mxu3 %v10403_v49 }
 0x4d4   : > { %3595 = vst [vmem:[#allocation1 + $0x23] ss:$4 sm:$0xff] %v8160_v30 }
 0x4d5   : > { %v10598_v53 = vld.sshfl [vmem:[#allocation1] sm:$0xff pattern:$0x73625140]  ;;  %14179 = vst [vmem:[#allocation158_spill] sm:$0xff] %v10624_v17 }
 0x4d6   : > { %3702 = vst [vmem:[#allocation1] ss:$4 sm:$0xff] %v14102_v38  ;;  %v6725_v38 = vld [vmem:[%s13541_s3 + $0xb48] sm:$0xff] }
 0x4d7   : > { %3704 = vst [vmem:[#allocation1 + $0x1] ss:$4 sm:$0xff] %v14103_v37  ;;  %3891 = vmatpush.msra.mxu2 %v6725_v38  ;;  %v10634_v38 = vpop.f32.mrf.mxu0 }
 0x4d8   : > { %3706 = vst [vmem:[#allocation1 + $0x2] ss:$4 sm:$0xff] %v7862_v19 }
 0x4d9   : > { %3708 = vst [vmem:[#allocation1 + $0x3] ss:$4 sm:$0xff] %v7865_v20 }
 0x4da   : > { %v10632_v15 = vpop.f32.mrf.mxu3 }
 0x4db   : > { %v3597_v29 = vld.sshfl [vmem:[#allocation1 + $0x20] sm:$0xff pattern:$0x73625140]  ;;  %3552 = vmatmul.f32.gmra.mxu3 %v3506_v39  ;;  %14180 = vst [vmem:[#allocation159_spill] sm:$0xff] %v10632_v15 }
 0x4dc   : > { %3655 = vmatmul.f32.gmra.mxu0 %v3597_v29  ;;  %3602 = vst [vmem:[#allocation1 + $0x20] ss:$4 sm:$0xff] %v7945_v21  ;;  %v10640_v29 = vpop.f32.mrf.mxu1 }
 0x4dd   : > { %3603 = vst [vmem:[#allocation1 + $0x21] ss:$4 sm:$0xff] %v14089_v1 }
 0x4de   : > { %3604 = vst [vmem:[#allocation1 + $0x22] ss:$4 sm:$0xff] %v8071_v16 }
 0x4df   : > { %3605 = vst [vmem:[#allocation1 + $0x23] ss:$4 sm:$0xff] %v8204_v43  ;;  %v10652_v40 = vpop.f32.mrf.mxu0 }
 0x4e0   : > { %v3717_v49 = vld.sshfl [vmem:[#allocation1] sm:$0xff pattern:$0x73625140]  ;;  %14181 = vst [vmem:[#allocation160_spill] sm:$0xff] %v10640_v29  ;;  %v6723_v29 = vld [vmem:[%s13541_s3 + $0xb38] sm:$0xff] }
 0x4e1   : > { %3773 = vmatmul.f32.vlgmr.msra.gmra.mxu1 %v3717_v49  ;;  %3719 = vst [vmem:[#allocation1] ss:$4 sm:$0xff] %v14108_v50  ;;  %v10644_v50 = vpop.f32.mrf.mxu2 }
 0x4e2   : > { %3720 = vst [vmem:[#allocation1 + $0x1] ss:$4 sm:$0xff] %v14109_v23  ;;  %v10650_v49 = vpop.f32.mrf.mxu3 }
 0x4e3   : > { %3721 = vst [vmem:[#allocation1 + $0x2] ss:$4 sm:$0xff] %v7933_v10 }
 0x4e4   : > { %3722 = vst [vmem:[#allocation1 + $0x3] ss:$4 sm:$0xff] %v7945_v21  ;;  %3658 = vmatmul.f32.gmra.mxu0 %v10493_v44  ;;  %v6724_v44 = vld [vmem:[%s13541_s3 + $0xb40] sm:$0xff] }
 0x4e5   : > { %14182 = vst [vmem:[#allocation161_spill] sm:$0xff] %v10644_v50  ;;  %3892 = vmatpush.msra.mxu2 %v6724_v44  ;;  %v10662_v50 = vpop.f32.mrf.mxu1 }
 0x4e6   : > { %v3607_v17 = vld.sshfl [vmem:[#allocation1 + $0x20] sm:$0xff pattern:$0x73625140]  ;;  %14183 = vst [vmem:[#allocation162_spill] sm:$0xff] %v10650_v49  ;;  %v6722_v49 = vld [vmem:[%s13541_s3 + $0xb30] sm:$0xff] }
 0x4e7   : > { %3612 = vst [vmem:[#allocation1 + $0x20] ss:$4 sm:$0xff] %v9220_v47  ;;  %3893 = vmatpush.msra.mxu2 %v6723_v29  ;;  %v6719_v29 = vld [vmem:[%s13541_s3 + $0xb18] sm:$0xff] }
 0x4e8   : > { %3613 = vst [vmem:[#allocation1 + $0x21] ss:$4 sm:$0xff] %v14095_v60 }
 0x4e9   : > { %3614 = vst [vmem:[#allocation1 + $0x22] ss:$4 sm:$0xff] %v9228_v45  ;;  %3894 = vmatpush.msra.mxu2 %v6722_v49  ;;  %v10676_v44 = vpop.f32.mrf.mxu2 }
 0x4ea   : > { %3615 = vst [vmem:[#allocation1 + $0x23] ss:$4 sm:$0xff] %v9299_v58  ;;  %v10684_v49 = vpop.f32.mrf.mxu3 }
 0x4eb   : > { %v10648_v39 = vld.sshfl [vmem:[#allocation1] sm:$0xff pattern:$0x73625140]  ;;  %14184 = vst [vmem:[#allocation163_spill] sm:$0xff] %v10652_v40  ;;  %3895 = vmatpush.msra.mxu2 %v6721_v62  ;;  %v6718_v62 = vld [vmem:[%s13541_s3 + $0xb10] sm:$0xff] }
 0x4ec   : > { %3729 = vst [vmem:[#allocation1] ss:$4 sm:$0xff] %v14114_v3  ;;  %3661 = vmatmul.f32.gmra.mxu0 %v3607_v17  ;;  %v6720_v17 = vld [vmem:[%s13541_s3 + $0xb20] sm:$0xff] }
 0x4ed   : > { %3730 = vst [vmem:[#allocation1 + $0x1] ss:$4 sm:$0xff] %v14115_v2  ;;  %3896 = vmatpush.msra.mxu2 %v6720_v17  ;;  %v10695_v40 = vpop.f32.mrf.mxu1  ;;  %v6747_v17 = vld [vmem:[%s13541_s3 + $0xbf8] sm:$0xff] }
 0x4ee   : > { %14185 = vst [vmem:[#allocation164_spill] sm:$0xff] %v10662_v50  ;;  %v10686_v50 = vpop.f32.mrf.mxu0  ;;  %4006 = vmatpush.msra.mxu3 %v6747_v17  ;;  %v14193_v17 = vld [vmem:[#allocation67_spill] sm:$0xff] }
 0x4ef   : > { %3731 = vst [vmem:[#allocation1 + $0x2] ss:$4 sm:$0xff] %v9213_v48  ;;  %3897 = vmatpush.msra.mxu2 %v6719_v29  ;;  %v6746_v29 = vld [vmem:[%s13541_s3 + $0xbf0] sm:$0xff] }
 0x4f0   : > { %3732 = vst [vmem:[#allocation1 + $0x3] ss:$4 sm:$0xff] %v9220_v47  ;;  %4007 = vmatpush.msra.mxu3 %v6746_v29 }
 0x4f1   : > { %v3617_v3 = vld.sshfl [vmem:[#allocation1 + $0x20] sm:$0xff pattern:$0x73625140]  ;;  %14186 = vst [vmem:[#allocation165_spill] sm:$0xff] %v10676_v44  ;;  %3898 = vmatpush.msra.mxu2 %v6718_v62  ;;  %v6745_v62 = vld [vmem:[%s13541_s3 + $0xbe8] sm:$0xff] }
 0x4f2   : > { %3622 = vst [vmem:[#allocation1 + $0x20] ss:$4 sm:$0xff] %v10383_v9  ;;  %4008 = vmatpush.msra.mxu3 %v6745_v62  ;;  %v6743_v62 = vld [vmem:[%s13541_s3 + $0xbd8] sm:$0xff] }
 0x4f3   : > { %3623 = vst [vmem:[#allocation1 + $0x21] ss:$4 sm:$0xff] %v10497_v36 }
 0x4f4   : > { %3664 = vmatmul.f32.gmra.mxu0 %v10565_v11  ;;  %3624 = vst [vmem:[#allocation1 + $0x22] ss:$4 sm:$0xff] %v10394_v8  ;;  %v6717_v11 = vld [vmem:[%s13541_s3 + $0xb08] sm:$0xff] }
 0x4f5   : > { %14187 = vst [vmem:[#allocation166_spill] sm:$0xff] %v10684_v49  ;;  %3899 = vmatpush.msra.mxu2 %v6717_v11  ;;  %v14192_v11 = vld [vmem:[#allocation66_spill] sm:$0xff]  ;;  %v10730_v29 = vpop.f32.mrf.mxu1 }
 0x4f6   : > { %14188 = vst [vmem:[#allocation167_spill] sm:$0xff] %v10686_v50  ;;  %v10721_v50 = vpop.f32.mrf.mxu0 }
 0x4f7   : > { %3625 = vst [vmem:[#allocation1 + $0x23] ss:$4 sm:$0xff] %v10511_v56  ;;  %v10692_v44 = vld.sshfl [vmem:[#allocation1] sm:$0xff pattern:$0x73625140]  ;;  %v10719_v56 = vpop.f32.mrf.mxu3 }
 0x4f8   : > { %3739 = vst [vmem:[#allocation1] ss:$4 sm:$0xff] %v10204_v54  ;;  %v6716_v54 = vld [vmem:[%s13541_s3 + $0xb00] sm:$0xff] }
 0x4f9   : > { %3740 = vst [vmem:[#allocation1 + $0x1] ss:$4 sm:$0xff] %v10207_v24  ;;  %3900 = vmatpush.msra.mxu2 %v6716_v54  ;;  %v14194_v54 = vld [vmem:[#allocation40_spill] sm:$0xff] }
 0x4fa   : > { %3741 = vst [vmem:[#allocation1 + $0x2] ss:$4 sm:$0xff] %v10371_v52  ;;  %v10715_v52 = vpop.f32.mrf.mxu2 }
 0x4fb   : > { %3742 = vst [vmem:[#allocation1 + $0x3] ss:$4 sm:$0xff] %v10383_v9 }
 0x4fc   : > { %3667 = vmatmul.f32.gmra.mxu0 %v3617_v3  ;;  %14189 = vst [vmem:[#allocation168_spill] sm:$0xff] %v10715_v52  ;;  %v6744_v3 = vld [vmem:[%s13541_s3 + $0xbe0] sm:$0xff]  ;;  %v6742_v52 = vld [vmem:[%s13541_s3 + $0xbd0] sm:$0xff] }
 0x4fd   : > { %14190 = vst [vmem:[#allocation169_spill] sm:$0xff] %v10719_v56  ;;  %4009 = vmatpush.msra.mxu3 %v6744_v3  ;;  %v14195_v56 = vld [vmem:[#allocation41_spill] sm:$0xff] }
 0x4fe   : > { %v3627_v49 = vld.sshfl [vmem:[#allocation1 + $0x20] sm:$0xff pattern:$0x73625140]  ;;  %14191 = vst [vmem:[#allocation170_spill] sm:$0xff] %v10721_v50  ;;  %v6741_v3 = vld [vmem:[%s13541_s3 + $0xbc8] sm:$0xff] }
 0x4ff   : > { %3710 = vst [vmem:[#allocation1 + $0x20] ss:$4 sm:$0xff] %v14012_v33  ;;  %4010 = vmatpush.msra.mxu3 %v6743_v62  ;;  %v10748_v50 = vpop.f32.mrf.mxu3  ;;  %v10755_v62 = vpop.f32.mrf.mxu1 }
 0x500   : > { %3712 = vst [vmem:[#allocation1 + $0x21] ss:$4 sm:$0xff] %v7878_v25 }
 0x501   : > { %3714 = vst [vmem:[#allocation1 + $0x22] ss:$4 sm:$0xff] %v14192_v11  ;;  %4011 = vmatpush.msra.mxu3 %v6742_v52  ;;  %v14198_v11 = vld [vmem:[#allocation30_spill] sm:$0xff]  ;;  %v14202_v52 = vld [vmem:[#allocation45_spill] sm:$0xff] }
 0x502   : > { %3716 = vst [vmem:[#allocation1 + $0x23] ss:$4 sm:$0xff] %v14193_v17  ;;  %v10725_v48 = vld.sshfl [vmem:[#allocation1] sm:$0xff pattern:$0x73625140] }
 0x503   : > { %3830 = vst [vmem:[#allocation1] ss:$4 sm:$0xff] %v14194_v54  ;;  %v10746_v54 = vpop.f32.mrf.mxu2  ;;  %4012 = vmatpush.msra.mxu3 %v6741_v3  ;;  %v14204_v3 = vld [vmem:[#allocation46_spill] sm:$0xff] }
 0x504   : > { %3832 = vst [vmem:[#allocation1 + $0x1] ss:$4 sm:$0xff] %v14195_v56  ;;  %3670 = vmatmul.f32.gmra.mxu0 %v10598_v53  ;;  %v14200_v53 = vld [vmem:[#allocation50_spill] sm:$0xff] }
 0x505   : > { %3834 = vst [vmem:[#allocation1 + $0x2] ss:$4 sm:$0xff] %v13905_v32  ;;  %v10751_v32 = vpop.f32.mrf.mxu0 }
 0x506   : > { %3836 = vst [vmem:[#allocation1 + $0x3] ss:$4 sm:$0xff] %v13907_v57  ;;  %v14201_v57 = vld [vmem:[#allocation28_spill] sm:$0xff] }
 0x507   : > { %14196 = vst [vmem:[#allocation67_spill] sm:$0xff] %v10746_v54 }
 0x508   : > { %14197 = vst [vmem:[#allocation40_spill] sm:$0xff] %v10748_v50 }
 0x509   : > { %v3718_v56 = vld.sshfl [vmem:[#allocation1 + $0x20] sm:$0xff pattern:$0x73625140]  ;;  %14199 = vst [vmem:[#allocation41_spill] sm:$0xff] %v10751_v32 }
 0x50a   : > { %3776 = vmatmul.f32.gmra.mxu1 %v3718_v56  ;;  %3723 = vst [vmem:[#allocation1 + $0x20] ss:$4 sm:$0xff] %v14198_v11  ;;  %v10763_v56 = vpop.f32.mrf.mxu3 }
 0x50b   : > { %3724 = vst [vmem:[#allocation1 + $0x21] ss:$4 sm:$0xff] %v8071_v16  ;;  %v10759_v50 = vpop.f32.mrf.mxu2 }
 0x50c   : > { %3725 = vst [vmem:[#allocation1 + $0x22] ss:$4 sm:$0xff] %v14200_v53  ;;  %3673 = vmatmul.f32.gmra.mxu0 %v3627_v49  ;;  %v14208_v49 = vld [vmem:[#allocation86_spill] sm:$0xff] }
 0x50d   : > { %3726 = vst [vmem:[#allocation1 + $0x23] ss:$4 sm:$0xff] %v14201_v57  ;;  %v3845_v15 = vld.sshfl [vmem:[#allocation1] sm:$0xff pattern:$0x73625140]  ;;  %v10767_v32 = vpop.f32.mrf.mxu0  ;;  %v14211_v53 = vld [vmem:[#allocation94_spill] sm:$0xff] }
 0x50e   : > { %3901 = vmatmul.f32.vlgmr.msra.gmra.mxu2 %v3845_v15  ;;  %3847 = vst [vmem:[#allocation1] ss:$4 sm:$0xff] %v14202_v52  ;;  %v10771_v15 = vpop.f32.mrf.mxu1  ;;  %v14209_v52 = vld [vmem:[#allocation112_spill] sm:$0xff] }
 0x50f   : > { %14203 = vst [vmem:[#allocation30_spill] sm:$0xff] %v10759_v50 }
 0x510   : > { %3848 = vst [vmem:[#allocation1 + $0x1] ss:$4 sm:$0xff] %v14204_v3 }
 0x511   : > { %3849 = vst [vmem:[#allocation1 + $0x2] ss:$4 sm:$0xff] %v13911_v7 }
 0x512   : > { %14205 = vst [vmem:[#allocation28_spill] sm:$0xff] %v10763_v56  ;;  %3779 = vmatmul.f32.gmra.mxu1 %v10648_v39  ;;  %v6740_v39 = vld [vmem:[%s13541_s3 + $0xbc0] sm:$0xff] }
 0x513   : > { %3850 = vst [vmem:[#allocation1 + $0x3] ss:$4 sm:$0xff] %v13912_v6  ;;  %v10777_v7 = vpop.f32.mrf.mxu2  ;;  %v14210_v6 = vld [vmem:[#allocation93_spill] sm:$0xff]  ;;  %4013 = vmatpush.msra.mxu3 %v6740_v39  ;;  %v10803_v39 = vrot.slane %v10394_v8, 4 }
 0x514   : > { %14206 = vst [vmem:[#allocation45_spill] sm:$0xff] %v10767_v32  ;;  %v3728_v54 = vld.sshfl [vmem:[#allocation1 + $0x20] sm:$0xff pattern:$0x73625140]  ;;  %v6739_v32 = vld [vmem:[%s13541_s3 + $0xbb8] sm:$0xff] }
 0x515   : > { %3733 = vst [vmem:[#allocation1 + $0x20] ss:$4 sm:$0xff] %v9216_v22  ;;  %v10789_v56 = vpop.f32.mrf.mxu0  ;;  %4014 = vmatpush.msra.mxu3 %v6739_v32  ;;  %v10807_v32 = vrot.slane %v10394_v8, 6 }
 0x516   : > { %3734 = vst [vmem:[#allocation1 + $0x21] ss:$4 sm:$0xff] %v9228_v45 }
 0x517   : > { %14207 = vst [vmem:[#allocation46_spill] sm:$0xff] %v10771_v15  ;;  %v6738_v15 = vld [vmem:[%s13541_s3 + $0xbb0] sm:$0xff] }
 0x518   : > { %3735 = vst [vmem:[#allocation1 + $0x22] ss:$4 sm:$0xff] %v14208_v49  ;;  %v10787_v49 = vpop.f32.mrf.mxu3  ;;  %4015 = vmatpush.msra.mxu3 %v6738_v15  ;;  %v6735_v15 = vld [vmem:[%s13541_s3 + $0xb98] sm:$0xff] }
 0x519   : > { %3736 = vst [vmem:[#allocation1 + $0x23] ss:$4 sm:$0xff] %v14209_v52 }
 0x51a   : > { %v10775_v3 = vld.sshfl [vmem:[#allocation1] sm:$0xff pattern:$0x73625140]  ;;  %3782 = vmatmul.f32.gmra.mxu1 %v3728_v54  ;;  %14212 = vst [vmem:[#allocation112_spill] sm:$0xff] %v10789_v56 }
 0x51b   : > { %3857 = vst [vmem:[#allocation1] ss:$4 sm:$0xff] %v14210_v6  ;;  %v6737_v6 = vld [vmem:[%s13541_s3 + $0xba8] sm:$0xff] }
 0x51c   : > { %3858 = vst [vmem:[#allocation1 + $0x1] ss:$4 sm:$0xff] %v14211_v53  ;;  %v6736_v53 = vld [vmem:[%s13541_s3 + $0xba0] sm:$0xff]  ;;  %4016 = vmatpush.msra.mxu3 %v6737_v6  ;;  %v6734_v6 = vld [vmem:[%s13541_s3 + $0xb90] sm:$0xff] }
 0x51d   : > { %3859 = vst [vmem:[#allocation1 + $0x2] ss:$4 sm:$0xff] %v9318_v26  ;;  %v10817_v26 = vpop.f32.mrf.mxu2  ;;  %v10828_v56 = vpop.f32.mrf.mxu0 }
 0x51e   : > { %3860 = vst [vmem:[#allocation1 + $0x3] ss:$4 sm:$0xff] %v9324_v14  ;;  %v10809_v14 = vpop.f32.mrf.mxu1  ;;  %4017 = vmatpush.msra.mxu3 %v6736_v53  ;;  %v6763_v53 = vld [vmem:[%s13541_s3 + $0xc78] sm:$0xff] }
 0x51f   : > { %14213 = vst [vmem:[#allocation93_spill] sm:$0xff] %v10803_v39  ;;  %4127 = vmatpush.msra.mxu0 %v6763_v53 }
 0x520   : > { %v3738_v54 = vld.sshfl [vmem:[#allocation1 + $0x20] sm:$0xff pattern:$0x73625140]  ;;  %14214 = vst [vmem:[#allocation94_spill] sm:$0xff] %v10807_v32  ;;  %4018 = vmatpush.msra.mxu3 %v6735_v15 }
 0x521   : > { %3743 = vst [vmem:[#allocation1 + $0x20] ss:$4 sm:$0xff] %v10386_v42  ;;  %v10826_v42 = vpop.f32.mrf.mxu3  ;;  %v6732_v15 = vld [vmem:[%s13541_s3 + $0xb80] sm:$0xff] }
 0x522   : > { %14215 = vst [vmem:[#allocation171_spill] sm:$0xff] %v10809_v14  ;;  %3785 = vmatmul.f32.gmra.mxu1 %v10692_v44  ;;  %v6733_v44 = vld [vmem:[%s13541_s3 + $0xb88] sm:$0xff]  ;;  %4019 = vmatpush.msra.mxu3 %v6734_v6 }
 0x523   : > { %3744 = vst [vmem:[#allocation1 + $0x21] ss:$4 sm:$0xff] %v10394_v8 }
 0x524   : > { %3745 = vst [vmem:[#allocation1 + $0x22] ss:$4 sm:$0xff] %v10803_v39  ;;  %4020 = vmatpush.msra.mxu3 %v6733_v44  ;;  %v14218_v44 = vld [vmem:[#allocation72_spill] sm:$0xff] }
 0x525   : > { %3746 = vst [vmem:[#allocation1 + $0x23] ss:$4 sm:$0xff] %v10807_v32  ;;  %v10823_v14 = vld.sshfl [vmem:[#allocation1] sm:$0xff pattern:$0x73625140]  ;;  %v10852_v50 = vpop.f32.mrf.mxu2 }
 0x526   : > { %3867 = vst [vmem:[#allocation1] ss:$4 sm:$0xff] %v10358_v61  ;;  %v6762_v61 = vld [vmem:[%s13541_s3 + $0xc70] sm:$0xff]  ;;  %4021 = vmatpush.msra.mxu3 %v6732_v15  ;;  %v10863_v15 = vpop.f32.mrf.mxu0 }
 0x527   : > { %3868 = vst [vmem:[#allocation1 + $0x1] ss:$4 sm:$0xff] %v10367_v63  ;;  %v6761_v63 = vld [vmem:[%s13541_s3 + $0xc68] sm:$0xff]  ;;  %4128 = vmatpush.msra.mxu0 %v6762_v61 }
 0x528   : > { %3869 = vst [vmem:[#allocation1 + $0x2] ss:$4 sm:$0xff] %v10533_v34  ;;  %v10848_v34 = vpop.f32.mrf.mxu1 }
 0x529   : > { %3870 = vst [vmem:[#allocation1 + $0x3] ss:$4 sm:$0xff] %v10542_v46  ;;  %4129 = vmatpush.msra.mxu0 %v6761_v63  ;;  %v14217_v46 = vld [vmem:[#allocation71_spill] sm:$0xff]  ;;  %v10861_v61 = vpop.f32.mrf.mxu3 }
 0x52a   : > { %3788 = vmatmul.f32.gmra.mxu1 %v3738_v54  ;;  %14216 = vst [vmem:[#allocation172_spill] sm:$0xff] %v10848_v34  ;;  %v6760_v54 = vld [vmem:[%s13541_s3 + $0xc60] sm:$0xff]  ;;  %v6759_v63 = vld [vmem:[%s13541_s3 + $0xc58] sm:$0xff]  ;;  %v6758_v34 = vld [vmem:[%s13541_s3 + $0xc50] sm:$0xff] }
 0x52b   : > { %4130 = vmatpush.msra.mxu0 %v6760_v54 }
 0x52c   : > { %v3748_v6 = vld.sshfl [vmem:[#allocation1 + $0x20] sm:$0xff pattern:$0x73625140] }
 0x52d   : > { %3838 = vst [vmem:[#allocation1 + $0x20] ss:$4 sm:$0xff] %v14033_v4  ;;  %4131 = vmatpush.msra.mxu0 %v6759_v63  ;;  %v14223_v63 = vld [vmem:[#allocation5_spill] sm:$0xff]  ;;  %v14225_v4 = vld [vmem:[#allocation74_spill] sm:$0xff] }
 0x52e   : > { %3840 = vst [vmem:[#allocation1 + $0x21] ss:$4 sm:$0xff] %v14034_v35  ;;  %v14222_v35 = vld [vmem:[#allocation64_spill] sm:$0xff] }
 0x52f   : > { %3842 = vst [vmem:[#allocation1 + $0x22] ss:$4 sm:$0xff] %v14217_v46  ;;  %4132 = vmatpush.msra.mxu0 %v6758_v34  ;;  %v10882_v46 = vpop.f32.mrf.mxu2 }
 0x530   : > { %3844 = vst [vmem:[#allocation1 + $0x23] ss:$4 sm:$0xff] %v14218_v44  ;;  %v10856_v53 = vld.sshfl [vmem:[#allocation1] sm:$0xff pattern:$0x73625140]  ;;  %v10879_v54 = vpop.f32.mrf.mxu1 }
 0x531   : > { %3951 = vst [vmem:[#allocation1] ss:$4 sm:$0xff] %v14103_v37  ;;  %v6757_v37 = vld [vmem:[%s13541_s3 + $0xc48] sm:$0xff] }
 0x532   : > { %3953 = vst [vmem:[#allocation1 + $0x1] ss:$4 sm:$0xff] %v14153_v27  ;;  %3791 = vmatmul.f32.gmra.mxu1 %v10725_v48  ;;  %4133 = vmatpush.msra.mxu0 %v6757_v37  ;;  %v14220_v27 = vld [vmem:[#allocation63_spill] sm:$0xff]  ;;  %v10886_v48 = vpop.f32.mrf.mxu3 }
 0x533   : > { %3955 = vst [vmem:[#allocation1 + $0x2] ss:$4 sm:$0xff] %v7865_v20 }
 0x534   : > { %3957 = vst [vmem:[#allocation1 + $0x3] ss:$4 sm:$0xff] %v14083_v59  ;;  %v10888_v59 = vpop.f32.mrf.mxu0 }
 0x535   : > { %14219 = vst [vmem:[#allocation173_spill] sm:$0xff] %v10879_v54 }
 0x536   : > { %14221 = vst [vmem:[#allocation174_spill] sm:$0xff] %v10882_v46 }
 0x537   : > { %v3846_v44 = vld.sshfl [vmem:[#allocation1 + $0x20] sm:$0xff pattern:$0x73625140]  ;;  %14224 = vst [vmem:[#allocation175_spill] sm:$0xff] %v10886_v48  ;;  %v10898_v54 = vpop.f32.mrf.mxu2 }
 0x538   : > { %3904 = vmatmul.f32.gmra.mxu2 %v3846_v44  ;;  %3851 = vst [vmem:[#allocation1 + $0x20] ss:$4 sm:$0xff] %v14220_v27  ;;  %v10892_v34 = vpop.f32.mrf.mxu1  ;;  %v14227_v44 = vld [vmem:[#allocation42_spill] sm:$0xff]  ;;  %v3808_v27 = vrot.slane %v10807_v32, 7 }
 0x539   : > { %3852 = vst [vmem:[#allocation1 + $0x21] ss:$4 sm:$0xff] %v14222_v35 }
 0x53a   : > { %3853 = vst [vmem:[#allocation1 + $0x22] ss:$4 sm:$0xff] %v14223_v63  ;;  %3794 = vmatmul.f32.gmra.mxu1 %v3748_v6  ;;  %v14229_v63 = vld [vmem:[#allocation99_spill] sm:$0xff] }
 0x53b   : > { %3854 = vst [vmem:[#allocation1 + $0x23] ss:$4 sm:$0xff] %v14225_v4  ;;  %v3966_v8 = vld.sshfl [vmem:[#allocation1] sm:$0xff pattern:$0x73625140] }
 0x53c   : > { %4022 = vmatmul.f32.vlgmr.msra.gmra.mxu3 %v3966_v8  ;;  %3968 = vst [vmem:[#allocation1] ss:$4 sm:$0xff] %v14109_v23  ;;  %v14230_v4 = vld [vmem:[#allocation100_spill] sm:$0xff]  ;;  %v10902_v8 = vpop.f32.mrf.mxu3  ;;  %v10904_v23 = vpop.f32.mrf.mxu0  ;;  %v14233_v6 = vld [vmem:[#allocation115_spill] sm:$0xff] }
 0x53d   : > { %14226 = vst [vmem:[#allocation176_spill] sm:$0xff] %v10892_v34 }
 0x53e   : > { %3969 = vst [vmem:[#allocation1 + $0x1] ss:$4 sm:$0xff] %v14227_v44  ;;  %v14234_v44 = vld [vmem:[#allocation116_spill] sm:$0xff] }
 0x53f   : > { %3970 = vst [vmem:[#allocation1 + $0x2] ss:$4 sm:$0xff] %v7945_v21  ;;  %v10944_v34 = vpop.f32.mrf.mxu2 }
 0x540   : > { %3971 = vst [vmem:[#allocation1 + $0x3] ss:$4 sm:$0xff] %v14089_v1  ;;  %3907 = vmatmul.f32.gmra.mxu2 %v10775_v3  ;;  %v10910_v1 = vpop.f32.mrf.mxu1  ;;  %v6756_v3 = vld [vmem:[%s13541_s3 + $0xc40] sm:$0xff] }
 0x541   : > { %14228 = vst [vmem:[#allocation42_spill] sm:$0xff] %v10898_v54  ;;  %4134 = vmatpush.msra.mxu0 %v6756_v3  ;;  %v6754_v54 = vld [vmem:[%s13541_s3 + $0xc30] sm:$0xff]  ;;  %v3810_v3 = vrot.slane %v3808_v27, 2 }
 0x542   : > { %v3856_v37 = vld.sshfl [vmem:[#allocation1 + $0x20] sm:$0xff pattern:$0x73625140]  ;;  %14231 = vst [vmem:[#allocation177_spill] sm:$0xff] %v10902_v8 }
 0x543   : > { %3861 = vst [vmem:[#allocation1 + $0x20] ss:$4 sm:$0xff] %v14229_v63  ;;  %v14235_v63 = vld [vmem:[#allocation146_spill] sm:$0xff]  ;;  %v14237_v8 = vld [vmem:[#allocation88_spill] sm:$0xff] }
 0x544   : > { %3862 = vst [vmem:[#allocation1 + $0x21] ss:$4 sm:$0xff] %v14230_v4  ;;  %v6755_v4 = vld [vmem:[%s13541_s3 + $0xc38] sm:$0xff] }
 0x545   : > { %14232 = vst [vmem:[#allocation178_spill] sm:$0xff] %v10904_v23  ;;  %4135 = vmatpush.msra.mxu0 %v6755_v4  ;;  %v6752_v4 = vld [vmem:[%s13541_s3 + $0xc20] sm:$0xff] }
 0x546   : > { %3863 = vst [vmem:[#allocation1 + $0x22] ss:$4 sm:$0xff] %v14233_v6  ;;  %v7405_v6 = vld [vmem:[%s13540_s2] ss:$0 sm:$0xff] }
 0x547   : > { %3864 = vst [vmem:[#allocation1 + $0x23] ss:$4 sm:$0xff] %v14234_v44  ;;  %v10908_v35 = vld.sshfl [vmem:[#allocation1] sm:$0xff pattern:$0x73625140]  ;;  %v10923_v44 = vadd.f32 %v7405_v6, %v14235_v63  ;;  %v6715_v63 = vrot.slane %v10803_v39, 9  ;;  %4136 = vmatpush.msra.mxu0 %v6754_v54 }
 0x548   : > { %3978 = vst [vmem:[#allocation1] ss:$4 sm:$0xff] %v14115_v2  ;;  %3910 = vmatmul.f32.gmra.mxu2 %v3856_v37  ;;  %v10934_v2 = vld [vmem:[%s13542_s4] ss:$0 sm:$0xff]  ;;  %v6753_v37 = vld [vmem:[%s13541_s3 + $0xc28] sm:$0xff]  ;;  %v6751_v54 = vld [vmem:[%s13541_s3 + $0xc18] sm:$0xff] }
 0x549   : > { %14236 = vst [vmem:[#allocation146_spill] sm:$0xff] %v10923_v44  ;;  %v3811_v23 = vrot.slane %v10923_v44, 7  ;;  %4137 = vmatpush.msra.mxu0 %v6753_v37  ;;  %v10953_v46 = vsel %vm7924_vm6, %v6715_v63, %v3808_v27  ;;  %v10957_v44 = vpop.f32.mrf.mxu0  ;;  %v10970_v27 = vpop.f32.mrf.mxu1  ;;  %v6750_v63 = vld [vmem:[%s13541_s3 + $0xc10] sm:$0xff] }
 0x54a   : > { %3979 = vst [vmem:[#allocation1 + $0x1] ss:$4 sm:$0xff] %v14237_v8  ;;  %v14238_v8 = vld [vmem:[#allocation33_spill] sm:$0xff] }
 0x54b   : > { %3980 = vst [vmem:[#allocation1 + $0x2] ss:$4 sm:$0xff] %v9220_v47  ;;  %v1014_v6 = vadd.f32 %v10934_v2, %v14238_v8  ;;  %v10955_v8 = vpop.f32.mrf.mxu3  ;;  %4138 = vmatpush.msra.mxu0 %v6752_v4 }
 0x54c   : > { %3981 = vst [vmem:[#allocation1 + $0x3] ss:$4 sm:$0xff] %v14095_v60  ;;  %v14240_v60 = vld [vmem:[#allocation102_spill] sm:$0xff] }
 0x54d   : > { %14239 = vst [vmem:[#allocation88_spill] sm:$0xff] %v10944_v34  ;;  %v1254_v39 = vadd.f32 %v14240_v60, %v1014_v6  ;;  %v14243_v34 = vld [vmem:[#allocation108_spill] sm:$0xff]  ;;  %v10966_v60 = vsel %vm7924_vm6, %v3810_v3, %v3811_v23  ;;  %4139 = vmatpush.msra.mxu0 %v6751_v54  ;;  %v14247_v3 = vld [vmem:[#allocation121_spill] sm:$0xff]  ;;  %v10994_v54 = vpop.f32.mrf.mxu2 }
 0x54e   : > { %v3866_v48 = vld.sshfl [vmem:[#allocation1 + $0x20] sm:$0xff pattern:$0x73625140]  ;;  %14241 = vst [vmem:[#allocation33_spill] sm:$0xff] %v10953_v46 }
 0x54f   : > { %3871 = vst [vmem:[#allocation1 + $0x20] ss:$4 sm:$0xff] %v10547_v18  ;;  %v1375_v32 = vadd.f32 %v14243_v34, %v1254_v39  ;;  %v14245_v39 = vld [vmem:[#allocation114_spill] sm:$0xff]  ;;  %v14246_v23 = vld [vmem:[#allocation84_spill] sm:$0xff]  ;;  %4140 = vmatpush.msra.mxu0 %v6750_v63  ;;  %v14249_v63 = vld [vmem:[#allocation103_spill] sm:$0xff] }
 0x550   : > { %14242 = vst [vmem:[#allocation102_spill] sm:$0xff] %v10955_v8  ;;  %3913 = vmatmul.f32.gmra.mxu2 %v10823_v14  ;;  %v6749_v14 = vld [vmem:[%s13541_s3 + $0xc08] sm:$0xff]  ;;  %v1015_v6 = vadd.f32 %v10934_v2, %v14246_v23 }
 0x551   : > { %3872 = vst [vmem:[#allocation1 + $0x21] ss:$4 sm:$0xff] %v10555_v0  ;;  %v1496_v34 = vadd.f32 %v14245_v39, %v1375_v32  ;;  %v6780_v32 = vld [vmem:[%s13541_s3 + $0xcf8] sm:$0xff]  ;;  %4141 = vmatpush.msra.mxu0 %v6749_v14  ;;  %v14255_v14 = vld [vmem:[#allocation117_spill] sm:$0xff] }
 0x552   : > { %14244 = vst [vmem:[#allocation108_spill] sm:$0xff] %v10966_v60  ;;  %4255 = vmatpush.msrb.mxu1 %v6780_v32  ;;  %v1255_v39 = vadd.f32 %v14249_v63, %v1015_v6  ;;  %v11011_v32 = vpop.f32.mrf.mxu0 }
 0x553   : > { %3873 = vst [vmem:[#allocation1 + $0x22] ss:$4 sm:$0xff] %v10953_v46  ;;  %v10976_v37 = vld.sshfl [vmem:[#allocation1] sm:$0xff pattern:$0x73625140]  ;;  %v1645_v4 = vadd.f32 %v14247_v3, %v1496_v34  ;;  %v6778_v3 = vld [vmem:[%s13541_s3 + $0xce8] sm:$0xff]  ;;  %v11005_v8 = vpop.f32.mrf.mxu3 }
 0x554   : > { %3874 = vst [vmem:[#allocation1 + $0x23] ss:$4 sm:$0xff] %v10966_v60  ;;  %v14250_v34 = vld [vmem:[#allocation60_spill] sm:$0xff] }
 0x555   : > { %3988 = vst [vmem:[#allocation1] ss:$4 sm:$0xff] %v10207_v24  ;;  %v6779_v24 = vld [vmem:[%s13541_s3 + $0xcf0] sm:$0xff]  ;;  %v1766_v23 = vadd.f32 %v14250_v34, %v1645_v4  ;;  %v14256_v4 = vld [vmem:[#allocation48_spill] sm:$0xff] }
 0x556   : > { %3989 = vst [vmem:[#allocation1 + $0x1] ss:$4 sm:$0xff] %v10327_v12  ;;  %v6748_v12 = vld [vmem:[%s13541_s3 + $0xc00] sm:$0xff]  ;;  %4256 = vmatpush.msrb.mxu1 %v6779_v24  ;;  %v11017_v24 = vpop.f32.mrf.mxu1 }
 0x557   : > { %3990 = vst [vmem:[#allocation1 + $0x2] ss:$4 sm:$0xff] %v10383_v9  ;;  %v1887_v46 = vadd.f32 %v14253_v55, %v1766_v23  ;;  %4142 = vmatpush.msra.mxu0 %v6748_v12  ;;  %v14257_v55 = vld [vmem:[#allocation90_spill] sm:$0xff] }
 0x558   : > { %14248 = vst [vmem:[#allocation114_spill] sm:$0xff] %v10994_v54  ;;  %v14252_v54 = vld [vmem:[#allocation110_spill] sm:$0xff]  ;;  %3916 = vmatmul.f32.gmra.mxu2 %v3866_v48  ;;  %4257 = vmatpush.msrb.mxu1 %v6778_v3  ;;  %v1016_v48 = vadd.f32 %v10934_v2, %v14257_v55 }
 0x559   : > { %3991 = vst [vmem:[#allocation1 + $0x3] ss:$4 sm:$0xff] %v10497_v36  ;;  %v1376_v60 = vadd.f32 %v14252_v54, %v1255_v39  ;;  %v2036_v63 = vadd.f32 %v14256_v4, %v1887_v46  ;;  %v14258_v54 = vld [vmem:[#allocation123_spill] sm:$0xff]  ;;  %v14259_v39 = vld [vmem:[#allocation82_spill] sm:$0xff] }
 0x55a   : > { %14251 = vst [vmem:[#allocation84_spill] sm:$0xff] %v11005_v8  ;;  %v14260_v23 = vld [vmem:[#allocation70_spill] sm:$0xff] }
 0x55b   : > { %v11009_v0 = vld.sshfl [vmem:[#allocation1 + $0x20] sm:$0xff pattern:$0x73625140]  ;;  %14254 = vst [vmem:[#allocation121_spill] sm:$0xff] %v11011_v32  ;;  %v1497_v6 = vadd.f32 %v14255_v14, %v1376_v60  ;;  %v2157_v34 = vadd.f32 %v14259_v39, %v2036_v63  ;;  %v6796_v46 = vld [vmem:[%s13541_s3 + $0xd78] sm:$0xff]  ;;  %v11030_v60 = vpop.f32.mrf.mxu2  ;;  %v6795_v4 = vld [vmem:[%s13541_s3 + $0xd70] sm:$0xff] }
 0x55c   : > { %3959 = vst [vmem:[#allocation1 + $0x20] ss:$4 sm:$0xff] %v7878_v25  ;;  %4376 = vmatpush.msrb.mxu2 %v6796_v46  ;;  %v6777_v14 = vld [vmem:[%s13541_s3 + $0xce0] sm:$0xff]  ;;  %v14261_v63 = vld [vmem:[#allocation105_spill] sm:$0xff] }
 0x55d   : > { %3961 = vst [vmem:[#allocation1 + $0x21] ss:$4 sm:$0xff] %v8160_v30  ;;  %v1646_v12 = vadd.f32 %v14258_v54, %v1497_v6  ;;  %v6776_v6 = vld [vmem:[%s13541_s3 + $0xcd8] sm:$0xff]  ;;  %v1256_v55 = vadd.f32 %v14261_v63, %v1016_v48  ;;  %v14262_v54 = vld [vmem:[#allocation129_spill] sm:$0xff]  ;;  %4258 = vmatpush.msrb.mxu1 %v6777_v14 }
 0x55e   : > { %3963 = vst [vmem:[#allocation1 + $0x22] ss:$4 sm:$0xff] %v14193_v17  ;;  %v14263_v32 = vld [vmem:[#allocation141_spill] sm:$0xff]  ;;  %4377 = vmatpush.msrb.mxu2 %v6795_v4  ;;  %v14265_v48 = vld [vmem:[#allocation34_spill] sm:$0xff] }
 0x55f   : > { %3965 = vst [vmem:[#allocation1 + $0x23] ss:$4 sm:$0xff] %v14260_v23  ;;  %v1767_v39 = vadd.f32 %v14262_v54, %v1646_v12  ;;  %v2278_v8 = vadd.f32 %v14263_v32, %v2157_v34  ;;  %v11048_v23 = vpop.f32.mrf.mxu3  ;;  %v6775_v36 = vld [vmem:[%s13541_s3 + $0xcd0] sm:$0xff]  ;;  %v1377_v63 = vadd.f32 %v14265_v48, %v1256_v55  ;;  %v14266_v12 = vld [vmem:[#allocation16_spill] sm:$0xff]  ;;  %4259 = vmatpush.msrb.mxu1 %v6776_v6 }
 0x560   : > { %v11025_v3 = vld.sshfl [vmem:[#allocation1] sm:$0xff pattern:$0x73625140]  ;;  %3919 = vmatmul.f32.gmra.mxu2 %v10856_v53  ;;  %v14267_v34 = vld [vmem:[#allocation101_spill] sm:$0xff]  ;;  %v14269_v4 = vld [vmem:[#allocation118_spill] sm:$0xff] }
 0x561   : > { %4072 = vst [vmem:[#allocation1] ss:$4 sm:$0xff] %v7862_v19  ;;  %v14264_v19 = vld [vmem:[#allocation32_spill] sm:$0xff]  ;;  %v1888_v54 = vadd.f32 %v14266_v12, %v1767_v39  ;;  %v2427_v32 = vadd.f32 %v10568_v41, %v2278_v8  ;;  %v1498_v30 = vadd.f32 %v14269_v4, %v1377_v63  ;;  %v14270_v55 = vld [vmem:[#allocation38_spill] sm:$0xff]  ;;  %4260 = vmatpush.msrb.mxu1 %v6775_v36  ;;  %v14271_v41 = vld [vmem:[#allocation95_spill] sm:$0xff] }
 0x562   : > { %4074 = vst [vmem:[#allocation1 + $0x1] ss:$4 sm:$0xff] %v7865_v20  ;;  %v1013_v46 = vadd.f32 %v10934_v2, %v14264_v19  ;;  %v11060_v19 = vpop.f32.mrf.mxu0  ;;  %v1017_v53 = vadd.f32 %v10934_v2, %v14271_v41  ;;  %v14272_v8 = vld [vmem:[#allocation106_spill] sm:$0xff]  ;;  %v14275_v63 = vld [vmem:[#allocation107_spill] sm:$0xff] }
 0x563   : > { %4076 = vst [vmem:[#allocation1 + $0x2] ss:$4 sm:$0xff] %v14012_v33  ;;  %v6774_v33 = vld [vmem:[%s13541_s3 + $0xcc8] sm:$0xff]  ;;  %v2037_v48 = vadd.f32 %v14270_v55, %v1888_v54  ;;  %v2548_v39 = vadd.f32 %v10581_v13, %v2427_v32  ;;  %v11077_v32 = vpop.f32.mrf.mxu1  ;;  %v14278_v55 = vld [vmem:[#allocation143_spill] sm:$0xff]  ;;  %v3389_v41 = vpop.f32.mrf.mxu2 }
 0x564   : > { %4078 = vst [vmem:[#allocation1 + $0x3] ss:$4 sm:$0xff] %v7878_v25  ;;  %v1253_v14 = vadd.f32 %v14267_v34, %v1013_v46  ;;  %v14273_v46 = vld [vmem:[#allocation126_spill] sm:$0xff]  ;;  %4261 = vmatpush.msrb.mxu1 %v6774_v33  ;;  %v1257_v54 = vadd.f32 %v14275_v63, %v1017_v53  ;;  %v14276_v13 = vld [vmem:[#allocation52_spill] sm:$0xff]  ;;  %v14281_v53 = vld [vmem:[#allocation73_spill] sm:$0xff] }
 0x565   : > { %14268 = vst [vmem:[#allocation103_spill] sm:$0xff] %v11060_v19  ;;  %v1647_v34 = vadd.f32 %v14273_v46, %v1498_v30  ;;  %v14274_v19 = vld [vmem:[#allocation39_spill] sm:$0xff]  ;;  %v2669_v20 = vadd.f32 %v10615_v51, %v2548_v39 }
 0x566   : > { %v1374_v6 = vadd.f32 %v14272_v8, %v1253_v14  ;;  %v3967_v12 = vld.sshfl [vmem:[#allocation1 + $0x20] sm:$0xff pattern:$0x73625140]  ;;  %v2158_v25 = vadd.f32 %v14274_v19, %v2037_v48 }
 0x567   : > { %4025 = vmatmul.f32.gmra.mxu3 %v3967_v12  ;;  %3972 = vst [vmem:[#allocation1 + $0x20] ss:$4 sm:$0xff] %v8071_v16  ;;  %v14277_v14 = vld [vmem:[#allocation131_spill] sm:$0xff]  ;;  %v2797_v19 = vadd.f32 %v10695_v40, %v2669_v20  ;;  %v14283_v20 = vld [vmem:[#allocation120_spill] sm:$0xff] }
 0x568   : > { %v1495_v36 = vadd.f32 %v14276_v13, %v1374_v6  ;;  %3973 = vst [vmem:[#allocation1 + $0x21] ss:$4 sm:$0xff] %v8204_v43  ;;  %v1768_v4 = vadd.f32 %v14277_v14, %v1647_v34  ;;  %v2279_v30 = vadd.f32 %v14278_v55, %v2158_v25  ;;  %v14279_v51 = vld [vmem:[#allocation35_spill] sm:$0xff]  ;;  %v14282_v6 = vld [vmem:[#allocation17_spill] sm:$0xff]  ;;  %3922 = vmatmul.f32.gmra.mxu2 %v11009_v0 }
 0x569   : > { %3974 = vst [vmem:[#allocation1 + $0x22] ss:$4 sm:$0xff] %v14201_v57  ;;  %v1378_v48 = vadd.f32 %v14279_v51, %v1257_v54  ;;  %v14280_v39 = vld [vmem:[#allocation119_spill] sm:$0xff]  ;;  %v2918_v34 = vadd.f32 %v10777_v7, %v2797_v19  ;;  %v3538_v54 = vpop.f32.mrf.mxu3 }
 0x56a   : > { %v1644_v33 = vadd.f32 %v14280_v39, %v1495_v36  ;;  %3975 = vst [vmem:[#allocation1 + $0x23] ss:$4 sm:$0xff] %v14281_v53  ;;  %v1889_v12 = vadd.f32 %v14282_v6, %v1768_v4  ;;  %v2428_v46 = vadd.f32 %v10603_v5, %v2279_v30  ;;  %v14284_v40 = vld [vmem:[#allocation127_spill] sm:$0xff]  ;;  %v11095_v13 = vpop.f32.mrf.mxu0  ;;  %v14288_v30 = vld [vmem:[#allocation44_spill] sm:$0xff]  ;;  %v14289_v39 = vld [vmem:[#allocation49_spill] sm:$0xff] }
 0x56b   : > { %v4087_v8 = vld.sshfl [vmem:[#allocation1] sm:$0xff pattern:$0x73625140]  ;;  %v1499_v25 = vadd.f32 %v14283_v20, %v1378_v48  ;;  %v3039_v7 = vadd.f32 %v10787_v49, %v2918_v34 }
 0x56c   : > { %4143 = vmatmul.f32.vlgmr.msra.gmra.mxu0 %v4087_v8  ;;  %4089 = vst [vmem:[#allocation1] ss:$4 sm:$0xff] %v7933_v10  ;;  %v1765_v63 = vadd.f32 %v14284_v40, %v1644_v33  ;;  %v14285_v36 = vld [vmem:[#allocation43_spill] sm:$0xff]  ;;  %v2549_v5 = vadd.f32 %v10613_v31, %v2428_v46  ;;  %v14287_v10 = vld [vmem:[#allocation14_spill] sm:$0xff]  ;;  %v14291_v8 = vld [vmem:[#allocation148_spill] sm:$0xff] }
 0x56d   : > { %4090 = vst [vmem:[#allocation1 + $0x1] ss:$4 sm:$0xff] %v7945_v21  ;;  %v2038_v14 = vadd.f32 %v14285_v36, %v1889_v12  ;;  %v14286_v0 = vld [vmem:[#allocation7_spill] sm:$0xff]  ;;  %v3167_v48 = vadd.f32 %v10828_v56, %v3039_v7  ;;  %v14290_v33 = vld [vmem:[#allocation26_spill] sm:$0xff]  ;;  %v14292_v34 = vld [vmem:[#allocation24_spill] sm:$0xff] }
 0x56e   : > { %4091 = vst [vmem:[#allocation1 + $0x2] ss:$4 sm:$0xff] %v14198_v11  ;;  %v1648_v4 = vadd.f32 %v14286_v0, %v1499_v25  ;;  %v1886_v55 = vadd.f32 %v14287_v10, %v1765_v63  ;;  %v2670_v51 = vadd.f32 %v10634_v38, %v2549_v5  ;;  %v14293_v25 = vld [vmem:[#allocation27_spill] sm:$0xff]  ;;  %v11115_v38 = vpop.f32.mrf.mxu1  ;;  %v14294_v36 = vld [vmem:[#allocation138_spill] sm:$0xff]  ;;  %v3392_v5 = vpop.f32.mrf.mxu2 }
 0x56f   : > { %4092 = vst [vmem:[#allocation1 + $0x3] ss:$4 sm:$0xff] %v8071_v16  ;;  %v2159_v19 = vadd.f32 %v14288_v30, %v2038_v14  ;;  %4028 = vmatmul.f32.gmra.mxu3 %v10908_v35  ;;  %v3288_v12 = vadd.f32 %v10910_v1, %v3167_v48  ;;  %v14295_v14 = vld [vmem:[#allocation36_spill] sm:$0xff]  ;;  %v14296_v7 = vld [vmem:[#allocation159_spill] sm:$0xff]  ;;  %v14299_v30 = vld [vmem:[#allocation85_spill] sm:$0xff] }
 0x570   : > { %v1769_v31 = vadd.f32 %v14289_v39, %v1648_v4  ;;  %v2035_v49 = vadd.f32 %v14290_v33, %v1886_v55  ;;  %v2798_v6 = vadd.f32 %v10730_v29, %v2670_v51  ;;  %v14297_v55 = vld [vmem:[#allocation113_spill] sm:$0xff]  ;;  %v6773_v39 = vld [vmem:[%s13541_s3 + $0xcc0] sm:$0xff] }
 0x571   : > { %v2280_v11 = vadd.f32 %v14291_v8, %v2159_v19  ;;  %v3977_v46 = vld.sshfl [vmem:[#allocation1 + $0x20] sm:$0xff pattern:$0x73625140]  ;;  %v3409_v63 = vadd.f32 %v3389_v41, %v3288_v12  ;;  %v3541_v51 = vpop.f32.mrf.mxu3  ;;  %v6794_v48 = vld [vmem:[%s13541_s3 + $0xd68] sm:$0xff]  ;;  %v6772_v8 = vld [vmem:[%s13541_s3 + $0xcb8] sm:$0xff]  ;;  %4262 = vmatpush.msrb.mxu1 %v6773_v39 }
 0x572   : > { %v1890_v20 = vadd.f32 %v14292_v34, %v1769_v31  ;;  %v2156_v40 = vadd.f32 %v14293_v25, %v2035_v49  ;;  %3982 = vst [vmem:[#allocation1 + $0x20] ss:$4 sm:$0xff] %v9228_v45  ;;  %v2919_v56 = vadd.f32 %v10817_v26, %v2798_v6  ;;  %v14298_v26 = vld [vmem:[#allocation139_spill] sm:$0xff]  ;;  %v3659_v31 = vpop.f32.mrf.mxu0  ;;  %4378 = vmatpush.msrb.mxu2 %v6794_v48  ;;  %v14310_v39 = vld [vmem:[#allocation137_spill] sm:$0xff] }
 0x573   : > { %v2429_v35 = vadd.f32 %v10628_v28, %v2280_v11  ;;  %3983 = vst [vmem:[#allocation1 + $0x21] ss:$4 sm:$0xff] %v9299_v58  ;;  %v3558_v10 = vadd.f32 %v3538_v54, %v3409_v63  ;;  %v14301_v54 = vld [vmem:[#allocation163_spill] sm:$0xff]  ;;  %v14305_v63 = vld [vmem:[#allocation161_spill] sm:$0xff]  ;;  %4263 = vmatpush.msrb.mxu1 %v6772_v8 }
 0x574   : > { %v2039_v29 = vadd.f32 %v14294_v36, %v1890_v20  ;;  %v2277_v1 = vadd.f32 %v14295_v14, %v2156_v40  ;;  %3984 = vst [vmem:[#allocation1 + $0x22] ss:$4 sm:$0xff] %v14209_v52  ;;  %v3040_v4 = vadd.f32 %v10826_v42, %v2919_v56  ;;  %v14300_v42 = vld [vmem:[#allocation89_spill] sm:$0xff]  ;;  %v6793_v11 = vld [vmem:[%s13541_s3 + $0xd60] sm:$0xff] }
 0x575   : > { %v2550_v0 = vadd.f32 %v14296_v7, %v2429_v35  ;;  %3985 = vst [vmem:[#allocation1 + $0x23] ss:$4 sm:$0xff] %v14297_v55  ;;  %v11146_v6 = vadd.f32 %v3659_v31, %v3558_v10  ;;  %v14302_v12 = vld [vmem:[#allocation155_spill] sm:$0xff]  ;;  %4379 = vmatpush.msrb.mxu2 %v6793_v11  ;;  %v6771_v40 = vld [vmem:[%s13541_s3 + $0xcb0] sm:$0xff] }
 0x576   : > { %v11127_v28 = vld.sshfl [vmem:[#allocation1] sm:$0xff pattern:$0x73625140]  ;;  %v2160_v41 = vadd.f32 %v14298_v26, %v2039_v29  ;;  %v2426_v19 = vadd.f32 %v14299_v30, %v2277_v1  ;;  %v3168_v49 = vadd.f32 %v10863_v15, %v3040_v4  ;;  %v14303_v15 = vld [vmem:[#allocation150_spill] sm:$0xff]  ;;  %v14307_v7 = vld [vmem:[#allocation109_spill] sm:$0xff]  ;;  %v11171_v26 = vpop.f32.mrf.mxu1  ;;  %4264 = vmatpush.msrb.mxu1 %v6771_v40  ;;  %v3395_v8 = vpop.f32.mrf.mxu2 }
 0x577   : > { %4099 = vst [vmem:[#allocation1] ss:$4 sm:$0xff] %v14300_v42  ;;  %v2671_v33 = vadd.f32 %v14301_v54, %v2550_v0  ;;  %4031 = vmatmul.f32.gmra.mxu3 %v3977_v46  ;;  %v14304_v35 = vld [vmem:[#allocation10_spill] sm:$0xff]  ;;  %v6769_v31 = vld [vmem:[%s13541_s3 + $0xca0] sm:$0xff]  ;;  %v14313_v11 = vld [vmem:[#allocation149_spill] sm:$0xff] }
 0x578   : > { %4100 = vst [vmem:[#allocation1 + $0x1] ss:$4 sm:$0xff] %v9220_v47  ;;  %v2281_v34 = vadd.f32 %v14302_v12, %v2160_v41  ;;  %v2547_v46 = vadd.f32 %v14303_v15, %v2426_v19  ;;  %v3289_v25 = vadd.f32 %v10970_v27, %v3168_v49  ;;  %v1018_v56 = vadd.f32 %v10934_v2, %v14304_v35  ;;  %v6770_v27 = vld [vmem:[%s13541_s3 + $0xca8] sm:$0xff]  ;;  %v6792_v1 = vld [vmem:[%s13541_s3 + $0xd58] sm:$0xff] }
 0x579   : > { %4101 = vst [vmem:[#allocation1 + $0x2] ss:$4 sm:$0xff] %v9216_v22  ;;  %v2799_v20 = vadd.f32 %v10755_v62, %v2671_v33  ;;  %v14306_v22 = vld [vmem:[#allocation156_spill] sm:$0xff]  ;;  %v14308_v4 = vld [vmem:[#allocation162_spill] sm:$0xff]  ;;  %4380 = vmatpush.msrb.mxu2 %v6792_v1  ;;  %v14312_v33 = vld [vmem:[#allocation167_spill] sm:$0xff]  ;;  %4265 = vmatpush.msrb.mxu1 %v6770_v27 }
 0x57a   : > { %4102 = vst [vmem:[#allocation1 + $0x3] ss:$4 sm:$0xff] %v9228_v45  ;;  %v2430_v36 = vadd.f32 %v14305_v63, %v2281_v34  ;;  %v2668_v29 = vadd.f32 %v14306_v22, %v2547_v46  ;;  %v3410_v62 = vadd.f32 %v3392_v5, %v3289_v25  ;;  %v1258_v0 = vadd.f32 %v14307_v7, %v1018_v56  ;;  %v14309_v5 = vld [vmem:[#allocation164_spill] sm:$0xff]  ;;  %v3662_v12 = vpop.f32.mrf.mxu0  ;;  %v14314_v34 = vld [vmem:[#allocation30_spill] sm:$0xff]  ;;  %v3544_v25 = vpop.f32.mrf.mxu3 }
 0x57b   : > { %v2920_v14 = vadd.f32 %v10852_v50, %v2799_v20  ;;  %v6791_v50 = vld [vmem:[%s13541_s3 + $0xd50] sm:$0xff]  ;;  %v14311_v42 = vld [vmem:[#allocation20_spill] sm:$0xff]  ;;  %v6768_v46 = vld [vmem:[%s13541_s3 + $0xc98] sm:$0xff]  ;;  %4266 = vmatpush.msrb.mxu1 %v6769_v31 }
 0x57c   : > { %v2551_v10 = vadd.f32 %v14308_v4, %v2430_v36  ;;  %v3987_v41 = vld.sshfl [vmem:[#allocation1 + $0x20] sm:$0xff pattern:$0x73625140]  ;;  %v2796_v30 = vadd.f32 %v14309_v5, %v2668_v29  ;;  %v3559_v48 = vadd.f32 %v3541_v51, %v3410_v62  ;;  %v1379_v54 = vadd.f32 %v14311_v42, %v1258_v0  ;;  %4381 = vmatpush.msrb.mxu2 %v6791_v50  ;;  %v14315_v51 = vld [vmem:[#allocation94_spill] sm:$0xff]  ;;  %v6790_v5 = vld [vmem:[%s13541_s3 + $0xd48] sm:$0xff] }
 0x57d   : > { %v3041_v19 = vadd.f32 %v10861_v61, %v2920_v14  ;;  %3992 = vst [vmem:[#allocation1 + $0x20] ss:$4 sm:$0xff] %v14310_v39  ;;  %v14316_v40 = vld [vmem:[#allocation146_spill] sm:$0xff]  ;;  %v14319_v22 = vld [vmem:[#allocation28_spill] sm:$0xff]  ;;  %v14320_v62 = vld [vmem:[#allocation91_spill] sm:$0xff]  ;;  %4267 = vmatpush.msrb.mxu1 %v6768_v46 }
 0x57e   : > { %v2672_v49 = vadd.f32 %v14312_v33, %v2551_v10  ;;  %3993 = vst [vmem:[#allocation1 + $0x21] ss:$4 sm:$0xff] %v14313_v11  ;;  %v2917_v15 = vadd.f32 %v14314_v34, %v2796_v30  ;;  %v11192_v20 = vadd.f32 %v3662_v12, %v3559_v48  ;;  %v14317_v56 = vld [vmem:[#allocation122_spill] sm:$0xff]  ;;  %v14321_v27 = vld [vmem:[#allocation128_spill] sm:$0xff]  ;;  %v11219_v48 = vpop.f32.mrf.mxu1  ;;  %4382 = vmatpush.msrb.mxu2 %v6790_v5 }
 0x57f   : > { %v3169_v61 = vadd.f32 %v10888_v59, %v3041_v19  ;;  %4034 = vmatmul.f32.gmra.mxu3 %v10976_v37  ;;  %3994 = vst [vmem:[#allocation1 + $0x22] ss:$4 sm:$0xff] %v14315_v51  ;;  %v1500_v63 = vadd.f32 %v14317_v56, %v1379_v54  ;;  %v14318_v36 = vld [vmem:[#allocation46_spill] sm:$0xff]  ;;  %v14323_v4 = vld [vmem:[#allocation112_spill] sm:$0xff]  ;;  %v14326_v54 = vld [vmem:[#allocation175_spill] sm:$0xff] }
 0x580   : > { %3995 = vst [vmem:[#allocation1 + $0x23] ss:$4 sm:$0xff] %v14316_v40  ;;  %v2800_v59 = vadd.f32 %v14318_v36, %v2672_v49  ;;  %v3038_v37 = vadd.f32 %v14319_v22, %v2917_v15  ;;  %v6767_v14 = vld [vmem:[%s13541_s3 + $0xc90] sm:$0xff]  ;;  %v14324_v30 = vld [vmem:[#allocation136_spill] sm:$0xff] }
 0x581   : > { %v11195_v35 = vld.sshfl [vmem:[#allocation1] sm:$0xff pattern:$0x73625140]  ;;  %v3290_v29 = vadd.f32 %v11017_v24, %v3169_v61  ;;  %v1649_v1 = vadd.f32 %v14321_v27, %v1500_v63  ;;  %v14322_v7 = vld [vmem:[#allocation174_spill] sm:$0xff]  ;;  %v6766_v24 = vld [vmem:[%s13541_s3 + $0xc88] sm:$0xff]  ;;  %4268 = vmatpush.msrb.mxu1 %v6767_v14 }
 0x582   : > { %4109 = vst [vmem:[#allocation1] ss:$4 sm:$0xff] %v14320_v62  ;;  %v2921_v0 = vadd.f32 %v14322_v7, %v2800_v59  ;;  %v3166_v10 = vadd.f32 %v14323_v4, %v3038_v37  ;;  %v6789_v19 = vld [vmem:[%s13541_s3 + $0xd40] sm:$0xff]  ;;  %v3665_v15 = vpop.f32.mrf.mxu0  ;;  %v14329_v56 = vld [vmem:[#allocation178_spill] sm:$0xff]  ;;  %v3398_v37 = vpop.f32.mrf.mxu2 }
 0x583   : > { %4110 = vst [vmem:[#allocation1 + $0x1] ss:$4 sm:$0xff] %v10383_v9  ;;  %v3411_v50 = vadd.f32 %v3395_v8, %v3290_v29  ;;  %v14325_v31 = vld [vmem:[#allocation68_spill] sm:$0xff]  ;;  %4269 = vmatpush.msrb.mxu1 %v6766_v24  ;;  %4383 = vmatpush.msrb.mxu2 %v6789_v19  ;;  %v14330_v29 = vld [vmem:[#allocation66_spill] sm:$0xff]  ;;  %v3547_v7 = vpop.f32.mrf.mxu3  ;;  %v14335_v24 = vld [vmem:[#allocation55_spill] sm:$0xff] }
 0x584   : > { %4111 = vst [vmem:[#allocation1 + $0x2] ss:$4 sm:$0xff] %v14324_v30  ;;  %v1770_v42 = vadd.f32 %v14325_v31, %v1649_v1  ;;  %v3042_v33 = vadd.f32 %v14326_v54, %v2921_v0  ;;  %v14327_v49 = vld [vmem:[#allocation176_spill] sm:$0xff]  ;;  %v14332_v1 = vld [vmem:[#allocation75_spill] sm:$0xff]  ;;  %v14336_v30 = vld [vmem:[#allocation157_spill] sm:$0xff] }
 0x585   : > { %4112 = vst [vmem:[#allocation1 + $0x3] ss:$4 sm:$0xff] %v14310_v39  ;;  %v3287_v8 = vadd.f32 %v14327_v49, %v3166_v10  ;;  %v3560_v12 = vadd.f32 %v3544_v25, %v3411_v50  ;;  %v6765_v34 = vld [vmem:[%s13541_s3 + $0xc80] sm:$0xff]  ;;  %v14331_v25 = vld [vmem:[#allocation37_spill] sm:$0xff]  ;;  %v14334_v10 = vld [vmem:[#allocation22_spill] sm:$0xff] }
 0x586   : > { %v14328_v61 = vld [vmem:[#allocation12_spill] sm:$0xff]  ;;  %v3170_v63 = vadd.f32 %v14329_v56, %v3042_v33  ;;  %4270 = vmatpush.msrb.mxu1 %v6765_v34  ;;  %v14338_v54 = vld [vmem:[#allocation57_spill] sm:$0xff]  ;;  %v14342_v56 = vld [vmem:[#allocation170_spill] sm:$0xff] }
 0x587   : > { %v1891_v46 = vadd.f32 %v14328_v61, %v1770_v42  ;;  %v3408_v36 = vadd.f32 %v11030_v60, %v3287_v8  ;;  %4037 = vmatmul.f32.gmra.mxu3 %v3987_v41  ;;  %v3997_v59 = vld.sshfl [vmem:[#allocation1 + $0x20] sm:$0xff pattern:$0x73625140]  ;;  %v11231_v22 = vadd.f32 %v3665_v15, %v3560_v12  ;;  %v3777_v5 = vpop.f32.mrf.mxu1  ;;  %v14339_v49 = vld [vmem:[#allocation165_spill] sm:$0xff]  ;;  %v14340_v12 = vld [vmem:[#allocation58_spill] sm:$0xff] }
 0x588   : > { %4080 = vst [vmem:[#allocation1 + $0x20] ss:$4 sm:$0xff] %v14330_v29  ;;  %v3291_v62 = vadd.f32 %v11077_v32, %v3170_v63  ;;  %v14333_v60 = vld [vmem:[#allocation140_spill] sm:$0xff]  ;;  %v6788_v32 = vld [vmem:[%s13541_s3 + $0xd38] sm:$0xff] }
 0x589   : > { %v2040_v14 = vadd.f32 %v14331_v25, %v1891_v46  ;;  %v3557_v27 = vadd.f32 %v11048_v23, %v3408_v36  ;;  %4082 = vst [vmem:[#allocation1 + $0x21] ss:$4 sm:$0xff] %v14193_v17  ;;  %4384 = vmatpush.msrb.mxu2 %v6788_v32  ;;  %v6787_v23 = vld [vmem:[%s13541_s3 + $0xd30] sm:$0xff] }
 0x58a   : > { %4084 = vst [vmem:[#allocation1 + $0x22] ss:$4 sm:$0xff] %v14332_v1  ;;  %v3412_v0 = vadd.f32 %v3398_v37, %v3291_v62  ;;  %v3668_v33 = vpop.f32.mrf.mxu0  ;;  %v14341_v15 = vld [vmem:[#allocation166_spill] sm:$0xff]  ;;  %v14344_v37 = vld [vmem:[#allocation171_spill] sm:$0xff]  ;;  %v14348_v1 = vld [vmem:[#allocation61_spill] sm:$0xff] }
 0x58b   : > { %v2161_v41 = vadd.f32 %v14333_v60, %v2040_v14  ;;  %v3678_v4 = vadd.f32 %v11095_v13, %v3557_v27  ;;  %4086 = vst [vmem:[#allocation1 + $0x23] ss:$4 sm:$0xff] %v14334_v10  ;;  %v14337_v13 = vld [vmem:[#allocation56_spill] sm:$0xff]  ;;  %4385 = vmatpush.msrb.mxu2 %v6787_v23  ;;  %v14343_v36 = vld [vmem:[#allocation50_spill] sm:$0xff]  ;;  %v14350_v60 = vld [vmem:[#allocation177_spill] sm:$0xff] }
 0x58c   : > { %v11242_v50 = vld.sshfl [vmem:[#allocation1] sm:$0xff pattern:$0x73625140]  ;;  %v3561_v31 = vadd.f32 %v3547_v7, %v3412_v0  ;;  %v14345_v25 = vld [vmem:[#allocation6_spill] sm:$0xff] }
 0x58d   : > { %4200 = vst [vmem:[#allocation1] ss:$4 sm:$0xff] %v14335_v24  ;;  %v2282_v19 = vadd.f32 %v14336_v30, %v2161_v41  ;;  %v11253_v42 = vadd.f32 %v3777_v5, %v3678_v4  ;;  %v14346_v14 = vld [vmem:[#allocation76_spill] sm:$0xff]  ;;  %v14347_v62 = vld [vmem:[#allocation42_spill] sm:$0xff]  ;;  %v14351_v0 = vld [vmem:[#allocation63_spill] sm:$0xff]  ;;  %v3401_v24 = vpop.f32.mrf.mxu2 }
 0x58e   : > { %4202 = vst [vmem:[#allocation1 + $0x1] ss:$4 sm:$0xff] %v14337_v13  ;;  %v11259_v34 = vadd.f32 %v3668_v33, %v3561_v31  ;;  %v14349_v7 = vld [vmem:[#allocation62_spill] sm:$0xff]  ;;  %v14352_v4 = vld [vmem:[#allocation64_spill] sm:$0xff] }
 0x58f   : > { %4204 = vst [vmem:[#allocation1 + $0x2] ss:$4 sm:$0xff] %v14338_v54  ;;  %v2431_v8 = vadd.f32 %v14339_v49, %v2282_v19  ;;  %4040 = vmatmul.f32.gmra.mxu3 %v11025_v3  ;;  %v14353_v30 = vld [vmem:[#allocation86_spill] sm:$0xff]  ;;  %v14354_v31 = vld [vmem:[#allocation132_spill] sm:$0xff]  ;;  %v14355_v54 = vld [vmem:[#allocation133_spill] sm:$0xff]  ;;  %v3780_v49 = vpop.f32.mrf.mxu1 }
 0x590   : > { %4206 = vst [vmem:[#allocation1 + $0x3] ss:$4 sm:$0xff] %v14340_v12 }
 0x591   : > { %v2552_v61 = vadd.f32 %v14341_v15, %v2431_v8  ;;  %v14356_v8 = vld [vmem:[#allocation97_spill] sm:$0xff]  ;;  %v11293_v15 = vadd.f32 %v3780_v49, %v11146_v6  ;;  %v893_v6 = vrot.slane %v14316_v40, 2  ;;  %v14373_v49 = vld [vmem:[#allocation74_spill] sm:$0xff] }
 0x592   : > { %v4088_v46 = vld.sshfl [vmem:[#allocation1 + $0x20] sm:$0xff pattern:$0x73625140] }
 0x593   : > { %v2673_v63 = vadd.f32 %v14342_v56, %v2552_v61  ;;  %4146 = vmatmul.f32.gmra.mxu0 %v4088_v46  ;;  %4093 = vst [vmem:[#allocation1 + $0x20] ss:$4 sm:$0xff] %v14343_v36  ;;  %v14357_v61 = vld [vmem:[#allocation98_spill] sm:$0xff]  ;;  %v14358_v46 = vld [vmem:[#allocation99_spill] sm:$0xff]  ;;  %v14359_v56 = vld [vmem:[#allocation100_spill] sm:$0xff] }
 0x594   : > { %4094 = vst [vmem:[#allocation1 + $0x21] ss:$4 sm:$0xff] %v14201_v57  ;;  %v6783_v36 = vld [vmem:[%s13541_s3 + $0xd10] sm:$0xff] }
 0x595   : > { %v2801_v29 = vadd.f32 %v14344_v37, %v2673_v63  ;;  %4095 = vst [vmem:[#allocation1 + $0x22] ss:$4 sm:$0xff] %v14345_v25  ;;  %v6784_v63 = vld [vmem:[%s13541_s3 + $0xd18] sm:$0xff]  ;;  %v6782_v25 = vld [vmem:[%s13541_s3 + $0xd08] sm:$0xff] }
 0x596   : > { %4096 = vst [vmem:[#allocation1 + $0x23] ss:$4 sm:$0xff] %v14346_v14 }
 0x597   : > { %v4215_v3 = vld.sshfl [vmem:[#allocation1] sm:$0xff pattern:$0x73625140]  ;;  %v2922_v27 = vadd.f32 %v14347_v62, %v2801_v29  ;;  %4043 = vmatmul.f32.gmra.mxu3 %v3997_v59  ;;  %v3550_v59 = vpop.f32.mrf.mxu3  ;;  %v14360_v29 = vld [vmem:[#allocation93_spill] sm:$0xff]  ;;  %v3783_v62 = vpop.f32.mrf.mxu1 }
 0x598   : > { %4271 = vmatmul.f32.vlgmr.msrb.gmra.mxu1 %v4215_v3  ;;  %4217 = vst [vmem:[#allocation1] ss:$4 sm:$0xff] %v14348_v1  ;;  %v11310_v3 = vrot.slane %v14316_v40, 4 }
 0x599   : > { %4218 = vst [vmem:[#allocation1 + $0x1] ss:$4 sm:$0xff] %v14349_v7  ;;  %v3043_v41 = vadd.f32 %v14350_v60, %v2922_v27  ;;  %v11317_v27 = vadd.f32 %v3783_v62, %v11192_v20  ;;  %v14361_v7 = vld [vmem:[#allocation151_spill] sm:$0xff]  ;;  %v14362_v60 = vld [vmem:[#allocation153_spill] sm:$0xff] }
 0x59a   : > { %4219 = vst [vmem:[#allocation1 + $0x2] ss:$4 sm:$0xff] %v14351_v0 }
 0x59b   : > { %4220 = vst [vmem:[#allocation1 + $0x3] ss:$4 sm:$0xff] %v14352_v4  ;;  %v3171_v32 = vadd.f32 %v10957_v44, %v3043_v41  ;;  %4149 = vmatmul.f32.gmra.mxu0 %v11127_v28  ;;  %v6786_v44 = vld [vmem:[%s13541_s3 + $0xd28] sm:$0xff]  ;;  %v3671_v28 = vpop.f32.mrf.mxu0  ;;  %v6781_v41 = vld [vmem:[%s13541_s3 + $0xd00] sm:$0xff] }
 0x59c   : > { %4386 = vmatpush.msrb.mxu2 %v6786_v44  ;;  %v11346_v44 = vpop.f32.mrf.mxu2 }
 0x59d   : > { %v3292_v23 = vadd.f32 %v11115_v38, %v3171_v32  ;;  %v4098_v5 = vld.sshfl [vmem:[#allocation1 + $0x20] sm:$0xff pattern:$0x73625140] }
 0x59e   : > { %4103 = vst [vmem:[#allocation1 + $0x20] ss:$4 sm:$0xff] %v14353_v30  ;;  %v6785_v38 = vld [vmem:[%s13541_s3 + $0xd20] sm:$0xff] }
 0x59f   : > { %v3413_v19 = vadd.f32 %v3401_v24, %v3292_v23  ;;  %4104 = vst [vmem:[#allocation1 + $0x21] ss:$4 sm:$0xff] %v14209_v52  ;;  %4387 = vmatpush.msrb.mxu2 %v6785_v38  ;;  %v3786_v20 = vpop.f32.mrf.mxu1  ;;  %v14364_v32 = vld [vmem:[#allocation71_spill] sm:$0xff]  ;;  %v14365_v24 = vld [vmem:[#allocation72_spill] sm:$0xff] }
 0x5a0   : > { %4105 = vst [vmem:[#allocation1 + $0x22] ss:$4 sm:$0xff] %v14354_v31  ;;  %v11330_v4 = vadd.f32 %v3786_v20, %v11231_v22  ;;  %v14366_v23 = vld [vmem:[#allocation79_spill] sm:$0xff]  ;;  %v14371_v22 = vld [vmem:[#allocation54_spill] sm:$0xff] }
 0x5a1   : > { %v3562_v13 = vadd.f32 %v3550_v59, %v3413_v19  ;;  %4106 = vst [vmem:[#allocation1 + $0x23] ss:$4 sm:$0xff] %v14355_v54  ;;  %4388 = vmatpush.msrb.mxu2 %v6784_v63  ;;  %v14369_v30 = vld [vmem:[#allocation19_spill] sm:$0xff]  ;;  %v14370_v19 = vld [vmem:[#allocation21_spill] sm:$0xff] }
 0x5a2   : > { %v11281_v33 = vld.sshfl [vmem:[#allocation1] sm:$0xff pattern:$0x73625140] }
 0x5a3   : > { %4227 = vst [vmem:[#allocation1] ss:$4 sm:$0xff] %v14356_v8  ;;  %4152 = vmatmul.f32.gmra.mxu0 %v4098_v5  ;;  %v11290_v12 = vadd.f32 %v3671_v28, %v3562_v13  ;;  %4389 = vmatpush.msrb.mxu2 %v6783_v36  ;;  %v14367_v5 = vld [vmem:[#allocation80_spill] sm:$0xff]  ;;  %v14372_v28 = vld [vmem:[#allocation5_spill] sm:$0xff]  ;;  %v14377_v63 = vld [vmem:[#allocation115_spill] sm:$0xff] }
 0x5a4   : > { %4228 = vst [vmem:[#allocation1 + $0x1] ss:$4 sm:$0xff] %v14357_v61  ;;  %v14374_v8 = vld [vmem:[#allocation8_spill] sm:$0xff]  ;;  %v14375_v61 = vld [vmem:[#allocation9_spill] sm:$0xff] }
 0x5a5   : > { %4229 = vst [vmem:[#allocation1 + $0x2] ss:$4 sm:$0xff] %v14358_v46  ;;  %4390 = vmatpush.msrb.mxu2 %v6782_v25  ;;  %v14378_v36 = vld [vmem:[#allocation116_spill] sm:$0xff] }
 0x5a6   : > { %4230 = vst [vmem:[#allocation1 + $0x3] ss:$4 sm:$0xff] %v14359_v56 }
 0x5a7   : > { %4391 = vmatpush.msrb.mxu2 %v6781_v41  ;;  %v3789_v31 = vpop.f32.mrf.mxu1  ;;  %v6764_v41 = vrot.slane %v893_v6, 9 }
 0x5a8   : > { %v4108_v37 = vld.sshfl [vmem:[#allocation1 + $0x20] sm:$0xff pattern:$0x73625140]  ;;  %v11344_v13 = vadd.f32 %v3789_v31, %v11259_v34  ;;  %v11356_v34 = vpop.f32.mrf.mxu2 }
 0x5a9   : > { %4113 = vst [vmem:[#allocation1 + $0x20] ss:$4 sm:$0xff] %v14360_v29  ;;  %v14380_v29 = vld [vmem:[#allocation135_spill] sm:$0xff]  ;;  %v14391_v31 = vld [vmem:[#allocation96_spill] sm:$0xff] }
 0x5aa   : > { %4114 = vst [vmem:[#allocation1 + $0x21] ss:$4 sm:$0xff] %v14315_v51 }
 0x5ab   : > { %4155 = vmatmul.f32.gmra.mxu0 %v11195_v35  ;;  %4115 = vst [vmem:[#allocation1 + $0x22] ss:$4 sm:$0xff] %v893_v6  ;;  %v14363_v35 = vld [vmem:[#allocation154_spill] sm:$0xff]  ;;  %v14385_v6 = vld [vmem:[#allocation147_spill] sm:$0xff] }
 0x5ac   : > { %4116 = vst [vmem:[#allocation1 + $0x23] ss:$4 sm:$0xff] %v11310_v3 }
 0x5ad   : > { %v11320_v1 = vld.sshfl [vmem:[#allocation1] sm:$0xff pattern:$0x73625140] }
 0x5ae   : > { %4237 = vst [vmem:[#allocation1] ss:$4 sm:$0xff] %v14361_v7 }
 0x5af   : > { %4238 = vst [vmem:[#allocation1 + $0x1] ss:$4 sm:$0xff] %v14362_v60  ;;  %v3792_v62 = vpop.f32.mrf.mxu1  ;;  %v14381_v60 = vld [vmem:[#allocation87_spill] sm:$0xff] }
 0x5b0   : > { %4239 = vst [vmem:[#allocation1 + $0x2] ss:$4 sm:$0xff] %v10547_v18  ;;  %v14368_v18 = vld [vmem:[#allocation18_spill] sm:$0xff]  ;;  %v3804_v7 = vadd.f32 %v3792_v62, %v11290_v12 }
 0x5b1   : > { %4240 = vst [vmem:[#allocation1 + $0x3] ss:$4 sm:$0xff] %v14363_v35 }
 0x5b3   : > { %4158 = vmatmul.f32.gmra.mxu0 %v4108_v37  ;;  %v4118_v0 = vld.sshfl [vmem:[#allocation1 + $0x20] sm:$0xff pattern:$0x73625140]  ;;  %v14379_v37 = vld [vmem:[#allocation77_spill] sm:$0xff] }
 0x5b4   : > { %4208 = vst [vmem:[#allocation1 + $0x20] ss:$4 sm:$0xff] %v14364_v32  ;;  %v5968_v32 = vld [vmem:[%s13545_s7 + $0x78] sm:$0xff] }
 0x5b5   : > { %4210 = vst [vmem:[#allocation1 + $0x21] ss:$4 sm:$0xff] %v14365_v24  ;;  %v14384_v24 = vld [vmem:[#allocation108_spill] sm:$0xff] }
 0x5b6   : > { %4212 = vst [vmem:[#allocation1 + $0x22] ss:$4 sm:$0xff] %v14366_v23 }
 0x5b7   : > { %4214 = vst [vmem:[#allocation1 + $0x23] ss:$4 sm:$0xff] %v14367_v5 }
 0x5b8   : > { %v11336_v59 = vld.sshfl [vmem:[#allocation1] sm:$0xff pattern:$0x73625140] }
 0x5b9   : > { %4321 = vst [vmem:[#allocation1] ss:$4 sm:$0xff] %v14368_v18 }
 0x5ba   : > { %4323 = vst [vmem:[#allocation1 + $0x1] ss:$4 sm:$0xff] %v14369_v30 }
 0x5bb   : > { %4325 = vst [vmem:[#allocation1 + $0x2] ss:$4 sm:$0xff] %v14370_v19  ;;  %4161 = vmatmul.f32.gmra.mxu0 %v11242_v50  ;;  %v14376_v50 = vld [vmem:[#allocation59_spill] sm:$0xff]  ;;  %v3905_v25 = vpop.f32.mrf.mxu2 }
 0x5bc   : > { %4327 = vst [vmem:[#allocation1 + $0x3] ss:$4 sm:$0xff] %v14371_v22  ;;  %v14392_v22 = vld [vmem:[#allocation104_spill] sm:$0xff] }
 0x5be   : > { %v4216_v38 = vld.sshfl [vmem:[#allocation1 + $0x20] sm:$0xff pattern:$0x73625140] }
 0x5bf   : > { %4274 = vmatmul.f32.gmra.mxu1 %v4216_v38  ;;  %4221 = vst [vmem:[#allocation1 + $0x20] ss:$4 sm:$0xff] %v14372_v28  ;;  %v14393_v38 = vld [vmem:[#allocation51_spill] sm:$0xff] }
 0x5c0   : > { %4222 = vst [vmem:[#allocation1 + $0x21] ss:$4 sm:$0xff] %v14373_v49 }
 0x5c1   : > { %4223 = vst [vmem:[#allocation1 + $0x22] ss:$4 sm:$0xff] %v14374_v8 }
 0x5c2   : > { %4224 = vst [vmem:[#allocation1 + $0x23] ss:$4 sm:$0xff] %v14375_v61 }
 0x5c3   : > { %v4336_v46 = vld.sshfl [vmem:[#allocation1] sm:$0xff pattern:$0x73625140]  ;;  %4164 = vmatmul.f32.gmra.mxu0 %v4118_v0  ;;  %v14382_v0 = vld [vmem:[#allocation33_spill] sm:$0xff]  ;;  %v3908_v12 = vpop.f32.mrf.mxu2 }
 0x5c4   : > { %4392 = vmatmul.f32.vlgmr.msrb.gmra.mxu2 %v4336_v46  ;;  %4338 = vst [vmem:[#allocation1] ss:$4 sm:$0xff] %v7945_v21 }
 0x5c5   : > { %4339 = vst [vmem:[#allocation1 + $0x1] ss:$4 sm:$0xff] %v14376_v50  ;;  %v14397_v50 = vld [vmem:[#allocation53_spill] sm:$0xff] }
 0x5c6   : > { %4340 = vst [vmem:[#allocation1 + $0x2] ss:$4 sm:$0xff] %v8071_v16  ;;  %v895_v16 = vrot.slane %v14316_v40, 6 }
 0x5c7   : > { %4341 = vst [vmem:[#allocation1 + $0x3] ss:$4 sm:$0xff] %v8204_v43  ;;  %4277 = vmatmul.f32.gmra.mxu1 %v11281_v33  ;;  %v4178_v43 = vrot.slane %v11310_v3, 7  ;;  %v11367_v33 = vadd.f32 %v3905_v25, %v11253_v42  ;;  %v14401_v25 = vld [vmem:[#allocation145_spill] sm:$0xff] }
 0x5c8   : > { %v4181_v35 = vrot.slane %v895_v16, 7 }
 0x5c9   : > { %v4226_v56 = vld.sshfl [vmem:[#allocation1 + $0x20] sm:$0xff pattern:$0x73625140]  ;;  %v4179_v42 = vsel %vm7924_vm6, %v6764_v41, %v4178_v43  ;;  %v4460_v41 = vld [vmem:[%s13543_s5 + $0x78] sm:$0xff] }
 0x5ca   : > { %4231 = vst [vmem:[#allocation1 + $0x20] ss:$4 sm:$0xff] %v14377_v63  ;;  %v14398_v63 = vld [vmem:[#allocation23_spill] sm:$0xff]  ;;  %4470 = vmatpush.msrb.mxu3 %v4460_v41 }
 0x5cb   : > { %4232 = vst [vmem:[#allocation1 + $0x21] ss:$4 sm:$0xff] %v14378_v36  ;;  %v3911_v5 = vpop.f32.mrf.mxu2  ;;  %v4445_v41 = vld [vmem:[%s13543_s5] sm:$0xff] }
 0x5cc   : > { %4233 = vst [vmem:[#allocation1 + $0x22] ss:$4 sm:$0xff] %v14379_v37  ;;  %v11390_v30 = vadd.f32 %v3911_v5, %v11317_v27  ;;  %v4457_v5 = vld [vmem:[%s13543_s5 + $0x60] sm:$0xff] }
 0x5cd   : > { %4234 = vst [vmem:[#allocation1 + $0x23] ss:$4 sm:$0xff] %v14380_v29  ;;  %v14400_v29 = vld [vmem:[#allocation144_spill] sm:$0xff] }
 0x5ce   : > { %v4346_v21 = vld.sshfl [vmem:[#allocation1] sm:$0xff pattern:$0x73625140] }
 0x5cf   : > { %4348 = vst [vmem:[#allocation1] ss:$4 sm:$0xff] %v9220_v47  ;;  %4280 = vmatmul.f32.gmra.mxu1 %v4226_v56  ;;  %v4180_v47 = vrot.slane %v4178_v43, 2 }
 0x5d0   : > { %4349 = vst [vmem:[#allocation1 + $0x1] ss:$4 sm:$0xff] %v14381_v60 }
 0x5d1   : > { %4350 = vst [vmem:[#allocation1 + $0x2] ss:$4 sm:$0xff] %v9228_v45  ;;  %v4182_v23 = vsel %vm7924_vm6, %v4180_v47, %v4181_v35  ;;  %v11383_v45 = vadd.f32 %v3908_v12, %v11293_v15  ;;  %v14386_v15 = vld [vmem:[#allocation70_spill] sm:$0xff]  ;;  %v14404_v35 = vld [vmem:[#allocation67_spill] sm:$0xff] }
 0x5d2   : > { %4351 = vst [vmem:[#allocation1 + $0x3] ss:$4 sm:$0xff] %v9299_v58  ;;  %v4459_v47 = vld [vmem:[%s13543_s5 + $0x70] sm:$0xff] }
 0x5d3   : > { %4471 = vmatpush.msrb.mxu3 %v4459_v47  ;;  %v6809_v47 = vld [vmem:[%s13543_s5 + $0xa0] sm:$0xff] }
 0x5d4   : > { %v4236_v20 = vld.sshfl [vmem:[#allocation1 + $0x20] sm:$0xff pattern:$0x73625140] }
 0x5d5   : > { %4241 = vst [vmem:[#allocation1 + $0x20] ss:$4 sm:$0xff] %v14382_v0  ;;  %v14405_v0 = vld [vmem:[#allocation40_spill] sm:$0xff] }
 0x5d6   : > { %4242 = vst [vmem:[#allocation1 + $0x21] ss:$4 sm:$0xff] %v14384_v24  ;;  %v14406_v24 = vld [vmem:[#allocation45_spill] sm:$0xff] }
 0x5d7   : > { %4283 = vmatmul.f32.gmra.mxu1 %v11320_v1  ;;  %4243 = vst [vmem:[#allocation1 + $0x22] ss:$4 sm:$0xff] %v4179_v42  ;;  %v14387_v1 = vld [vmem:[#allocation78_spill] sm:$0xff] }
 0x5d8   : > { %4244 = vst [vmem:[#allocation1 + $0x23] ss:$4 sm:$0xff] %v4182_v23  ;;  %v14407_v23 = vld [vmem:[#allocation173_spill] sm:$0xff] }
 0x5d9   : > { %v4356_v58 = vld.sshfl [vmem:[#allocation1] sm:$0xff pattern:$0x73625140] }
 0x5da   : > { %4358 = vst [vmem:[#allocation1] ss:$4 sm:$0xff] %v10383_v9  ;;  %v3914_v9 = vpop.f32.mrf.mxu2 }
 0x5db   : > { %4359 = vst [vmem:[#allocation1 + $0x1] ss:$4 sm:$0xff] %v14385_v6  ;;  %v4458_v6 = vld [vmem:[%s13543_s5 + $0x68] sm:$0xff] }
 0x5dc   : > { %4360 = vst [vmem:[#allocation1 + $0x2] ss:$4 sm:$0xff] %v14310_v39  ;;  %v11398_v39 = vadd.f32 %v3914_v9, %v11330_v4  ;;  %4472 = vmatpush.msrb.mxu3 %v4458_v6  ;;  %v14408_v9 = vld [vmem:[#allocation114_spill] sm:$0xff] }
 0x5dd   : > { %4361 = vst [vmem:[#allocation1 + $0x3] ss:$4 sm:$0xff] %v14313_v11 }
 0x5de   : > { %4473 = vmatpush.msrb.mxu3 %v4457_v5  ;;  %v6833_v5 = vld [vmem:[%s13543_s5 + $0x160] sm:$0xff] }
 0x5df   : > { %4286 = vmatmul.f32.gmra.mxu1 %v4236_v20  ;;  %v4246_v18 = vld.sshfl [vmem:[#allocation1 + $0x20] sm:$0xff pattern:$0x73625140] }
 0x5e0   : > { %4329 = vst [vmem:[#allocation1 + $0x20] ss:$4 sm:$0xff] %v14193_v17  ;;  %v14388_v17 = vld [vmem:[#allocation81_spill] sm:$0xff] }
 0x5e1   : > { %4331 = vst [vmem:[#allocation1 + $0x21] ss:$4 sm:$0xff] %v14386_v15  ;;  %v6820_v15 = vld [vmem:[%s13543_s5 + $0xf8] sm:$0xff] }
 0x5e2   : > { %4333 = vst [vmem:[#allocation1 + $0x22] ss:$4 sm:$0xff] %v14334_v10  ;;  %v3917_v27 = vpop.f32.mrf.mxu2  ;;  %4551 = vmatpush.msrb.mxu0 %v6820_v15  ;;  %v6805_v15 = vld [vmem:[%s13543_s5 + $0x80] sm:$0xff] }
 0x5e3   : > { %4335 = vst [vmem:[#allocation1 + $0x23] ss:$4 sm:$0xff] %v14387_v1  ;;  %v11405_v10 = vadd.f32 %v3917_v27, %v11344_v13  ;;  %v6819_v1 = vld [vmem:[%s13543_s5 + $0xf0] sm:$0xff]  ;;  %v11459_v27 = vpop.f32.mrf.mxu0 }
 0x5e4   : > { %4552 = vmatpush.msrb.mxu0 %v6819_v1  ;;  %v6832_v1 = vld [vmem:[%s13543_s5 + $0x158] sm:$0xff] }
 0x5e7   : > { %4289 = vmatmul.f32.gmra.mxu1 %v11336_v59 }
 0x5ea   : > { %v4337_v11 = vld.sshfl [vmem:[#allocation1 + $0x20] sm:$0xff pattern:$0x73625140]  ;;  %v3920_v4 = vpop.f32.mrf.mxu2 }
 0x5eb   : > { %4395 = vmatmul.f32.gmra.mxu2 %v4337_v11  ;;  %4342 = vst [vmem:[#allocation1 + $0x20] ss:$4 sm:$0xff] %v14201_v57  ;;  %v11409_v19 = vadd.f32 %v3920_v4, %v3804_v7  ;;  %v14389_v57 = vld [vmem:[#allocation47_spill] sm:$0xff]  ;;  %v14403_v7 = vld [vmem:[#allocation160_spill] sm:$0xff] }
 0x5ec   : > { %4343 = vst [vmem:[#allocation1 + $0x21] ss:$4 sm:$0xff] %v14281_v53 }
 0x5ed   : > { %4344 = vst [vmem:[#allocation1 + $0x22] ss:$4 sm:$0xff] %v14346_v14  ;;  %v14390_v14 = vld [vmem:[#allocation11_spill] sm:$0xff] }
 0x5ee   : > { %4345 = vst [vmem:[#allocation1 + $0x23] ss:$4 sm:$0xff] %v14388_v17  ;;  %v4456_v17 = vld [vmem:[%s13543_s5 + $0x58] sm:$0xff] }
 0x5ef   : > { %4292 = vmatmul.f32.gmra.mxu1 %v4246_v18  ;;  %v11447_v18 = vpop.f32.mrf.mxu3  ;;  %4474 = vmatpush.msrb.mxu3 %v4456_v17 }
 0x5f3   : > { %4398 = vmatmul.f32.gmra.mxu2 %v4346_v21 }
 0x5f5   : > { %v4347_v59 = vld.sshfl [vmem:[#allocation1 + $0x20] sm:$0xff pattern:$0x73625140] }
 0x5f6   : > { %4352 = vst [vmem:[#allocation1 + $0x20] ss:$4 sm:$0xff] %v14209_v52  ;;  %v4366_v52 = vld.sshfl [vmem:[#allocation1] sm:$0xff pattern:$0x73625140] }
 0x5f7   : > { %4353 = vst [vmem:[#allocation1 + $0x21] ss:$4 sm:$0xff] %v14297_v55  ;;  %v1012_v55 = vadd.f32 %v10934_v2, %v14390_v14  ;;  %v14399_v2 = vld [vmem:[#allocation92_spill] sm:$0xff] }
 0x5f8   : > { %4354 = vst [vmem:[#allocation1 + $0x22] ss:$4 sm:$0xff] %v14355_v54 }
 0x5f9   : > { %4355 = vst [vmem:[#allocation1 + $0x23] ss:$4 sm:$0xff] %v14389_v57  ;;  %v1252_v54 = vadd.f32 %v14391_v31, %v1012_v55  ;;  %v4455_v57 = vld [vmem:[%s13543_s5 + $0x50] sm:$0xff]  ;;  %v4454_v31 = vld [vmem:[%s13543_s5 + $0x48] sm:$0xff] }
 0x5fa   : > { %4475 = vmatpush.msrb.mxu3 %v4455_v57 }
 0x5fb   : > { %4401 = vmatmul.f32.gmra.mxu2 %v4347_v59  ;;  %v1373_v13 = vadd.f32 %v14392_v22, %v1252_v54  ;;  %v14409_v59 = vld [vmem:[#allocation84_spill] sm:$0xff] }
 0x5fc   : > { %v6818_v54 = vld [vmem:[%s13543_s5 + $0xe8] sm:$0xff]  ;;  %v4453_v22 = vld [vmem:[%s13543_s5 + $0x40] sm:$0xff]  ;;  %4476 = vmatpush.msrb.mxu3 %v4454_v31 }
 0x5fd   : > { %v1494_v28 = vadd.f32 %v14393_v38, %v1373_v13  ;;  %v4023_v13 = vpop.f32.mrf.mxu3  ;;  %v11478_v38 = vpop.f32.mrf.mxu2  ;;  %4553 = vmatpush.msrb.mxu0 %v6818_v54  ;;  %v6829_v54 = vld [vmem:[%s13543_s5 + $0x140] sm:$0xff] }
 0x5fe   : > { %4477 = vmatpush.msrb.mxu3 %v4453_v22  ;;  %v6849_v22 = vld [vmem:[%s13543_s5 + $0x1e0] sm:$0xff] }
 0x600   : > { %v4357_v53 = vld.sshfl [vmem:[#allocation1 + $0x20] sm:$0xff pattern:$0x73625140] }
 0x601   : > { %4362 = vst [vmem:[#allocation1 + $0x20] ss:$4 sm:$0xff] %v14315_v51  ;;  %v14394_v51 = vld [vmem:[#allocation13_spill] sm:$0xff] }
 0x602   : > { %4363 = vst [vmem:[#allocation1 + $0x21] ss:$4 sm:$0xff] %v14316_v40  ;;  %v1643_v8 = vadd.f32 %v14394_v51, %v1494_v28  ;;  %v14395_v40 = vld [vmem:[#allocation124_spill] sm:$0xff]  ;;  %v6816_v51 = vld [vmem:[%s13543_s5 + $0xd8] sm:$0xff] }
 0x603   : > { %4404 = vmatmul.f32.gmra.mxu2 %v4356_v58  ;;  %4364 = vst [vmem:[#allocation1 + $0x22] ss:$4 sm:$0xff] %v11310_v3  ;;  %v14396_v3 = vld [vmem:[#allocation134_spill] sm:$0xff] }
 0x604   : > { %4365 = vst [vmem:[#allocation1 + $0x23] ss:$4 sm:$0xff] %v895_v16  ;;  %v1764_v61 = vadd.f32 %v14395_v40, %v1643_v8  ;;  %v14402_v16 = vld [vmem:[#allocation152_spill] sm:$0xff]  ;;  %v4144_v8 = vpop.f32.mrf.mxu0 }
 0x606   : > { %v1885_v46 = vadd.f32 %v14396_v3, %v1764_v61 }
 0x608   : > { %v2034_v56 = vadd.f32 %v14397_v50, %v1885_v46 }
 0x60a   : > { %v2155_v36 = vadd.f32 %v14398_v63, %v2034_v56  ;;  %v4451_v63 = vld [vmem:[%s13543_s5 + $0x30] sm:$0xff] }
 0x60b   : > { %4407 = vmatmul.f32.gmra.mxu2 %v4357_v53  ;;  %v4367_v49 = vld.sshfl [vmem:[#allocation1 + $0x20] sm:$0xff pattern:$0x73625140]  ;;  %v11465_v53 = vpop.f32.mrf.mxu1 }
 0x60c   : > { %v2276_v37 = vadd.f32 %v14399_v2, %v2155_v36  ;;  %v6815_v36 = vld [vmem:[%s13543_s5 + $0xd0] sm:$0xff]  ;;  %v4450_v2 = vld [vmem:[%s13543_s5 + $0x28] sm:$0xff] }
 0x60e   : > { %v2425_v21 = vadd.f32 %v14400_v29, %v2276_v37  ;;  %v6814_v37 = vld [vmem:[%s13543_s5 + $0xc8] sm:$0xff]  ;;  %v4449_v29 = vld [vmem:[%s13543_s5 + $0x20] sm:$0xff] }
 0x610   : > { %v2546_v62 = vadd.f32 %v14401_v25, %v2425_v21  ;;  %v6813_v21 = vld [vmem:[%s13543_s5 + $0xc0] sm:$0xff]  ;;  %v4448_v25 = vld [vmem:[%s13543_s5 + $0x18] sm:$0xff] }
 0x612   : > { %v2667_v43 = vadd.f32 %v14402_v16, %v2546_v62  ;;  %v6812_v62 = vld [vmem:[%s13543_s5 + $0xb8] sm:$0xff]  ;;  %v4447_v16 = vld [vmem:[%s13543_s5 + $0x10] sm:$0xff] }
 0x613   : > { %4410 = vmatmul.f32.gmra.mxu2 %v4366_v52  ;;  %v14410_v52 = vld [vmem:[#allocation103_spill] sm:$0xff] }
 0x614   : > { %v2795_v60 = vadd.f32 %v14403_v7, %v2667_v43  ;;  %v6811_v43 = vld [vmem:[%s13543_s5 + $0xb0] sm:$0xff]  ;;  %v4446_v7 = vld [vmem:[%s13543_s5 + $0x8] sm:$0xff] }
 0x615   : > { %v4272_v61 = vpop.f32.mrf.mxu1 }
 0x616   : > { %v2916_v20 = vadd.f32 %v14404_v35, %v2795_v60  ;;  %v6810_v60 = vld [vmem:[%s13543_s5 + $0xa8] sm:$0xff]  ;;  %v6836_v35 = vld [vmem:[%s13543_s5 + $0x178] sm:$0xff] }
 0x618   : > { %v3037_v42 = vadd.f32 %v14405_v0, %v2916_v20  ;;  %v6808_v20 = vld [vmem:[%s13543_s5 + $0x98] sm:$0xff]  ;;  %v11545_v0 = vpop.f32.mrf.mxu3 }
 0x61a   : > { %v3165_v12 = vadd.f32 %v14406_v24, %v3037_v42  ;;  %v6835_v42 = vld [vmem:[%s13543_s5 + $0x170] sm:$0xff] }
 0x61b   : > { %4413 = vmatmul.f32.gmra.mxu2 %v4367_v49  ;;  %v4452_v49 = vld [vmem:[%s13543_s5 + $0x38] sm:$0xff]  ;;  %v6807_v24 = vld [vmem:[%s13543_s5 + $0x90] sm:$0xff] }
 0x61c   : > { %v3286_v58 = vadd.f32 %v14407_v23, %v3165_v12  ;;  %4478 = vmatpush.msrb.mxu3 %v4452_v49  ;;  %v11553_v12 = vpop.f32.mrf.mxu0  ;;  %v6834_v23 = vld [vmem:[%s13543_s5 + $0x168] sm:$0xff] }
 0x61e   : > { %v3407_v11 = vadd.f32 %v14408_v9, %v3286_v58  ;;  %4479 = vmatpush.msrb.mxu3 %v4451_v63  ;;  %v6806_v58 = vld [vmem:[%s13543_s5 + $0x88] sm:$0xff]  ;;  %v6852_v9 = vld [vmem:[%s13543_s5 + $0x1f8] sm:$0xff] }
 0x61f   : > { %v6826_v63 = vld [vmem:[%s13543_s5 + $0x128] sm:$0xff] }
 0x620   : > { %v3556_v4 = vadd.f32 %v14409_v59, %v3407_v11  ;;  %4480 = vmatpush.msrb.mxu3 %v4450_v2  ;;  %v4029_v11 = vpop.f32.mrf.mxu3  ;;  %v6831_v59 = vld [vmem:[%s13543_s5 + $0x150] sm:$0xff]  ;;  %v6870_v2 = vld [vmem:[%s13543_s5 + $0x268] sm:$0xff] }
 0x622   : > { %v3677_v14 = vadd.f32 %v14410_v52, %v3556_v4  ;;  %4481 = vmatpush.msrb.mxu3 %v4449_v29  ;;  %v6851_v4 = vld [vmem:[%s13543_s5 + $0x1f0] sm:$0xff]  ;;  %v6830_v52 = vld [vmem:[%s13543_s5 + $0x148] sm:$0xff] }
 0x624   : > { %v3798_v55 = vadd.f32 %v11219_v48, %v3677_v14  ;;  %v6817_v48 = vld [vmem:[%s13543_s5 + $0xe0] sm:$0xff]  ;;  %4482 = vmatpush.msrb.mxu3 %v4448_v25  ;;  %v4150_v57 = vpop.f32.mrf.mxu0  ;;  %v6850_v14 = vld [vmem:[%s13543_s5 + $0x1e8] sm:$0xff] }
 0x625   : > { %4554 = vmatpush.msrb.mxu0 %v6817_v48  ;;  %v6828_v48 = vld [vmem:[%s13543_s5 + $0x138] sm:$0xff]  ;;  %v6845_v25 = vld [vmem:[%s13543_s5 + $0x1c0] sm:$0xff] }
 0x626   : > { %v3926_v28 = vadd.f32 %v11356_v34, %v3798_v55  ;;  %4483 = vmatpush.msrb.mxu3 %v4447_v16  ;;  %v4049_v55 = vadd.f32 %v4029_v11, %v11383_v45  ;;  %v6848_v45 = vld [vmem:[%s13543_s5 + $0x1d8] sm:$0xff]  ;;  %v6843_v11 = vld [vmem:[%s13543_s5 + $0x1b0] sm:$0xff] }
 0x627   : > { %4555 = vmatpush.msrb.mxu0 %v6816_v51 }
 0x628   : > { %v4047_v40 = vadd.f32 %v4023_v13, %v3926_v28  ;;  %4484 = vmatpush.msrb.mxu3 %v4446_v7  ;;  %v4170_v13 = vadd.f32 %v4150_v57, %v4049_v55  ;;  %v6872_v28 = vld [vmem:[%s13543_s5 + $0x278] sm:$0xff] }
 0x629   : > { %4556 = vmatpush.msrb.mxu0 %v6815_v36  ;;  %4720 = vmatpush.msra.mxu1 %v6872_v28  ;;  %v6846_v36 = vld [vmem:[%s13543_s5 + $0x1c8] sm:$0xff] }
 0x62a   : > { %v4168_v3 = vadd.f32 %v4144_v8, %v4047_v40  ;;  %4485 = vmatpush.msrb.mxu3 %v4445_v41  ;;  %v6827_v8 = vld [vmem:[%s13543_s5 + $0x130] sm:$0xff]  ;;  %v6844_v41 = vld [vmem:[%s13543_s5 + $0x1b8] sm:$0xff] }
 0x62b   : > { %4557 = vmatpush.msrb.mxu0 %v6814_v37  ;;  %v6847_v40 = vld [vmem:[%s13543_s5 + $0x1d0] sm:$0xff] }
 0x62c   : > { %v4296_v46 = vadd.f32 %v4272_v61, %v4168_v3  ;;  %4610 = vmatpush.msra.mxu3 %v6836_v35  ;;  %v6871_v61 = vld [vmem:[%s13543_s5 + $0x270] sm:$0xff] }
 0x62d   : > { %4558 = vmatpush.msrb.mxu0 %v6813_v21  ;;  %4721 = vmatpush.msra.mxu1 %v6871_v61  ;;  %v6825_v21 = vld [vmem:[%s13543_s5 + $0x120] sm:$0xff] }
 0x62e   : > { %4611 = vmatpush.msra.mxu3 %v6835_v42  ;;  %v4032_v42 = vpop.f32.mrf.mxu3  ;;  %v14411_v61 = vld [vmem:[#allocation31_spill] sm:$0xff] }
 0x62f   : > { %4559 = vmatpush.msrb.mxu0 %v6812_v62  ;;  %4722 = vmatpush.msra.mxu1 %v6870_v2  ;;  %v6869_v62 = vld [vmem:[%s13543_s5 + $0x260] sm:$0xff] }
 0x630   : > { %4612 = vmatpush.msra.mxu3 %v6834_v23  ;;  %v6841_v2 = vld [vmem:[%s13543_s5 + $0x1a0] sm:$0xff] }
 0x631   : > { %4560 = vmatpush.msrb.mxu0 %v6811_v43  ;;  %4723 = vmatpush.msra.mxu1 %v6869_v62  ;;  %v6865_v62 = vld [vmem:[%s13543_s5 + $0x240] sm:$0xff] }
 0x632   : > { %4613 = vmatpush.msra.mxu3 %v6833_v5 }
 0x633   : > { %4561 = vmatpush.msrb.mxu0 %v6810_v60  ;;  %v6824_v60 = vld [vmem:[%s13543_s5 + $0x118] sm:$0xff] }
 0x634   : > { %4614 = vmatpush.msra.mxu3 %v6832_v1 }
 0x635   : > { %4562 = vmatpush.msrb.mxu0 %v6809_v47  ;;  %v6868_v47 = vld [vmem:[%s13543_s5 + $0x258] sm:$0xff] }
 0x636   : > { %4615 = vmatpush.msra.mxu3 %v6831_v59  ;;  %4724 = vmatpush.msra.mxu1 %v6868_v47  ;;  %v6867_v59 = vld [vmem:[%s13543_s5 + $0x250] sm:$0xff]  ;;  %v6888_v47 = vld [vmem:[%s13543_s5 + $0x2f8] sm:$0xff] }
 0x637   : > { %4563 = vmatpush.msrb.mxu0 %v6808_v20  ;;  %4779 = vmatpush.msra.mxu2 %v6888_v47  ;;  %v6903_v47 = vld [vmem:[%s13543_s5 + $0x370] sm:$0xff] }
 0x638   : > { %4616 = vmatpush.msra.mxu3 %v6830_v52  ;;  %4725 = vmatpush.msra.mxu1 %v6867_v59  ;;  %v6838_v59 = vld [vmem:[%s13543_s5 + $0x188] sm:$0xff] }
 0x639   : > { %4564 = vmatpush.msrb.mxu0 %v6807_v24 }
 0x63a   : > { %4617 = vmatpush.msra.mxu3 %v6829_v54  ;;  %v6822_v54 = vld [vmem:[%s13543_s5 + $0x108] sm:$0xff] }
 0x63b   : > { %4565 = vmatpush.msrb.mxu0 %v6806_v58 }
 0x63c   : > { %v11561_v6 = vpop.f32.mrf.mxu1  ;;  %4618 = vmatpush.msra.mxu3 %v6828_v48 }
 0x63d   : > { %4566 = vmatpush.msrb.mxu0 %v6805_v15 }
 0x63e   : > { %4619 = vmatpush.msra.mxu3 %v6827_v8 }
 0x63f   : > { %4657 = vmatpush.msra.mxu0 %v6852_v9  ;;  %v6823_v9 = vld [vmem:[%s13543_s5 + $0x110] sm:$0xff] }
 0x640   : > { %4620 = vmatpush.msra.mxu3 %v6826_v63 }
 0x641   : > { %4658 = vmatpush.msra.mxu0 %v6851_v4  ;;  %v4153_v4 = vpop.f32.mrf.mxu0 }
 0x642   : > { %4621 = vmatpush.msra.mxu3 %v6825_v21 }
 0x643   : > { %4659 = vmatpush.msra.mxu0 %v6850_v14  ;;  %v4050_v14 = vadd.f32 %v4032_v42, %v11390_v30 }
 0x644   : > { %v4278_v31 = vpop.f32.mrf.mxu1  ;;  %4622 = vmatpush.msra.mxu3 %v6824_v60  ;;  %v6840_v60 = vld [vmem:[%s13543_s5 + $0x198] sm:$0xff] }
 0x645   : > { %4660 = vmatpush.msra.mxu0 %v6849_v22  ;;  %v4298_v49 = vadd.f32 %v4278_v31, %v4170_v13  ;;  %v6842_v22 = vld [vmem:[%s13543_s5 + $0x1a8] sm:$0xff]  ;;  %v4171_v30 = vadd.f32 %v4153_v4, %v4050_v14  ;;  %v14415_v14 = vld [vmem:[#allocation130_spill] sm:$0xff] }
 0x646   : > { %4623 = vmatpush.msra.mxu3 %v6823_v9  ;;  %v6866_v13 = vld [vmem:[%s13543_s5 + $0x248] sm:$0xff] }
 0x647   : > { %v4393_v50 = vpop.f32.mrf.mxu2  ;;  %4661 = vmatpush.msra.mxu0 %v6848_v45  ;;  %4726 = vmatpush.msra.mxu1 %v6866_v13  ;;  %v6862_v4 = vld [vmem:[%s13543_s5 + $0x228] sm:$0xff] }
 0x648   : > { %v11490_v56 = vadd.f32 %v4393_v50, %v4296_v46  ;;  %4624 = vmatpush.msra.mxu3 %v6822_v54  ;;  %v6837_v54 = vld [vmem:[%s13543_s5 + $0x180] sm:$0xff] }
 0x649   : > { %4662 = vmatpush.msra.mxu0 %v6847_v40  ;;  %v7406_v40 = vld [vmem:[%s13542_s4] ss:$0 sm:$0xff]  ;;  %4727 = vmatpush.msra.mxu1 %v6865_v62  ;;  %v4156_v9 = vpop.f32.mrf.mxu0  ;;  %v6904_v62 = vld [vmem:[%s13543_s5 + $0x378] sm:$0xff] }
 0x64a   : > { %v11493_v34 = vrot.slane %v11490_v56, 4  ;;  %4461 = vst [vmem:[#allocation1] ss:$4 sm:$0xff] %v11490_v56  ;;  %v4491_v3 = vrot.slane %v11490_v56, 2 }
 0x64b   : > { %4663 = vmatpush.msra.mxu0 %v6846_v36  ;;  %v6821_v36 = vld [vmem:[%s13543_s5 + $0x100] sm:$0xff] }
 0x64c   : > { %4463 = vst [vmem:[#allocation1 + $0x1] ss:$4 sm:$0xff] %v11493_v34  ;;  %v4492_v50 = vrot.slane %v11493_v34, 2  ;;  %v4496_v16 = vsel %vm4495_vm7, %v11490_v56, %v4491_v3  ;;  %v4498_v43 = vsel %vm4497_vm8, %v11490_v56, %v4491_v3  ;;  %v4281_v48 = vpop.f32.mrf.mxu1  ;;  %v1019_v3 = vadd.f32 %v7406_v40, %v14411_v61  ;;  %4625 = vmatpush.msra.mxu3 %v6821_v36  ;;  %v14417_v40 = vld [vmem:[#allocation83_spill] sm:$0xff]  ;;  %v14418_v36 = vld [vmem:[#allocation25_spill] sm:$0xff] }
 0x64d   : > { %4664 = vmatpush.msra.mxu0 %v6845_v25  ;;  %v6797_v58 = vrot.slane %v4496_v16, 9  ;;  %v6798_v5 = vrot.slane %v4498_v43, 9  ;;  %v14412_v16 = vld [vmem:[#allocation65_spill] sm:$0xff] }
 0x64e   : > { %v4500_v35 = vsel %vm4495_vm7, %v11493_v34, %v4492_v50  ;;  %v4501_v20 = vsel %vm4497_vm8, %v11493_v34, %v4492_v50  ;;  %v1259_v43 = vadd.f32 %v14412_v16, %v1019_v3  ;;  %v14419_v16 = vld [vmem:[#allocation142_spill] sm:$0xff] }
 0x64f   : > { %4665 = vmatpush.msra.mxu0 %v6844_v41  ;;  %v6799_v57 = vrot.slane %v4500_v35, 9  ;;  %v6800_v52 = vrot.slane %v4501_v20, 9  ;;  %v6864_v41 = vld [vmem:[%s13543_s5 + $0x238] sm:$0xff] }
 0x650   : > { %v14413_v20 = vld [vmem:[#allocation111_spill] sm:$0xff]  ;;  %4728 = vmatpush.msra.mxu1 %v6864_v41  ;;  %v6883_v41 = vld [vmem:[%s13543_s5 + $0x2d0] sm:$0xff] }
 0x651   : > { %4666 = vmatpush.msra.mxu0 %v6843_v11  ;;  %v11700_v50 = vsel %vm7924_vm6, %v6799_v57, %v6800_v52  ;;  %v1380_v42 = vadd.f32 %v14413_v20, %v1259_v43  ;;  %v6886_v52 = vld [vmem:[%s13543_s5 + $0x2e8] sm:$0xff]  ;;  %v14420_v20 = vld [vmem:[#allocation158_spill] sm:$0xff] }
 0x653   : > { %4667 = vmatpush.msra.mxu0 %v6842_v22  ;;  %v6885_v22 = vld [vmem:[%s13543_s5 + $0x2e0] sm:$0xff] }
 0x655   : > { %4668 = vmatpush.msra.mxu0 %v6841_v2 }
 0x657   : > { %4669 = vmatpush.msra.mxu0 %v6840_v60  ;;  %v6859_v60 = vld [vmem:[%s13543_s5 + $0x210] sm:$0xff] }
 0x66e   : > { %v11575_v17 = vpop.f32.mrf.mxu2 }
 0x676   : > { %v4399_v51 = vpop.f32.mrf.mxu2 }
 0x677   : > { %v11615_v46 = vadd.f32 %v4399_v51, %v4298_v49  ;;  %v4512_v51 = vsel %vm7924_vm6, %v6797_v58, %v6798_v5  ;;  %v6863_v58 = vld [vmem:[%s13543_s5 + $0x230] sm:$0xff] }
 0x678   : > { %v6887_v5 = vld [vmem:[%s13543_s5 + $0x2f0] sm:$0xff]  ;;  %4729 = vmatpush.msra.mxu1 %v6863_v58 }
 0x679   : > { %v11628_v37 = vrot.slane %v11615_v46, 4  ;;  %v4493_v29 = vrot.slane %v11615_v46, 2  ;;  %4465 = vst [vmem:[#allocation1 + $0x2] ss:$4 sm:$0xff] %v11615_v46  ;;  %4780 = vmatpush.msra.mxu2 %v6887_v5  ;;  %v4048_v5 = vadd.f32 %v11545_v0, %v11367_v33 }
 0x67a   : > { %4578 = vst.sshfl [vmem:[#allocation1 + $0x20] sm:$0xff pattern:$0x75643120] %v11615_v46  ;;  %4730 = vmatpush.msra.mxu1 %v6862_v4 }
 0x67b   : > { %v4494_v7 = vrot.slane %v11628_v37, 2  ;;  %4467 = vst [vmem:[#allocation1 + $0x3] ss:$4 sm:$0xff] %v11628_v37  ;;  %v4503_v24 = vsel %vm4495_vm7, %v11615_v46, %v4493_v29  ;;  %v4504_v23 = vsel %vm4497_vm8, %v11615_v46, %v4493_v29  ;;  %v4299_v29 = vadd.f32 %v4281_v48, %v4171_v30  ;;  %4781 = vmatpush.msra.mxu2 %v6886_v52  ;;  %v14416_v48 = vld [vmem:[#allocation69_spill] sm:$0xff] }
 0x67c   : > { %4581 = vst.sshfl [vmem:[#allocation1 + $0x30] sm:$0xff pattern:$0x75643120] %v11628_v37  ;;  %v6801_v55 = vrot.slane %v4503_v24, 9  ;;  %v6802_v31 = vrot.slane %v4504_v23, 9  ;;  %v4035_v24 = vpop.f32.mrf.mxu3  ;;  %v6839_v23 = vld [vmem:[%s13543_s5 + $0x190] sm:$0xff]  ;;  %v4169_v0 = vadd.f32 %v11553_v12, %v4048_v5 }
 0x67d   : > { %v4506_v15 = vsel %vm4495_vm7, %v11628_v37, %v4494_v7  ;;  %v4507_v1 = vsel %vm4497_vm8, %v11628_v37, %v4494_v7  ;;  %4670 = vmatpush.msra.mxu0 %v6839_v23  ;;  %v4051_v57 = vadd.f32 %v4035_v24, %v11398_v39  ;;  %v6861_v39 = vld [vmem:[%s13543_s5 + $0x220] sm:$0xff]  ;;  %4782 = vmatpush.msra.mxu2 %v6885_v22 }
 0x67e   : > { %v6803_v45 = vrot.slane %v4506_v15, 9  ;;  %v6804_v28 = vrot.slane %v4507_v1, 9  ;;  %v4402_v63 = vpop.f32.mrf.mxu2  ;;  %v11710_v21 = vsel %vm7924_vm6, %v6801_v55, %v6802_v31  ;;  %v14414_v15 = vld [vmem:[#allocation125_spill] sm:$0xff]  ;;  %v4284_v31 = vpop.f32.mrf.mxu1  ;;  %4731 = vmatpush.msra.mxu1 %v6861_v39 }
 0x67f   : > { %v11733_v35 = vadd.f32 %v4402_v63, %v4299_v29  ;;  %v1501_v1 = vadd.f32 %v14414_v15, %v1380_v42  ;;  %4671 = vmatpush.msra.mxu0 %v6838_v59  ;;  %v4172_v13 = vadd.f32 %v4156_v9, %v4051_v57  ;;  %v6858_v15 = vld [vmem:[%s13543_s5 + $0x208] sm:$0xff]  ;;  %v4159_v57 = vpop.f32.mrf.mxu0 }
 0x680   : > { %v11721_v7 = vsel %vm7924_vm6, %v6803_v45, %v6804_v28  ;;  %v6902_v9 = vld [vmem:[%s13543_s5 + $0x368] sm:$0xff] }
 0x681   : > { %v11689_v49 = vld [vmem:[#allocation1 + $0x21] ss:$2 sm:$0xff]  ;;  %v1650_v55 = vadd.f32 %v14415_v14, %v1501_v1  ;;  %4672 = vmatpush.msra.mxu0 %v6837_v54 }
 0x682   : > { %v4468_v8 = vld.sshfl [vmem:[#allocation1] sm:$0xff pattern:$0x73625140]  ;;  %4747 = vst.sshfl [vmem:[#allocation1 + $0x20] sm:$0xff pattern:$0x75643120] %v11628_v37 }
 0x683   : > { %4486 = vmatmul.f32.vlgmr.msrb.gmra.mxu3 %v4468_v8  ;;  %4542 = vst [vmem:[#allocation1] ss:$4 sm:$0xff] %v4512_v51  ;;  %v11713_v25 = vld [vmem:[#allocation1 + $0x31] ss:$2 sm:$0xff]  ;;  %v1771_v45 = vadd.f32 %v14416_v48, %v1650_v55  ;;  %v4300_v51 = vadd.f32 %v4284_v31, %v4172_v13  ;;  %v11774_v8 = vrot.slane %v11733_v35, 4  ;;  %v6882_v1 = vld [vmem:[%s13543_s5 + $0x2c8] sm:$0xff] }
 0x684   : > { %4544 = vst [vmem:[#allocation1 + $0x1] ss:$4 sm:$0xff] %v11700_v50  ;;  %4826 = vmatpush.msrb.mxu3 %v6904_v62  ;;  %v4038_v24 = vpop.f32.mrf.mxu3  ;;  %v14421_v59 = vld [vmem:[#allocation168_spill] sm:$0xff]  ;;  %v14422_v54 = vld [vmem:[#allocation169_spill] sm:$0xff] }
 0x685   : > { %4546 = vst [vmem:[#allocation1 + $0x2] ss:$4 sm:$0xff] %v11710_v21  ;;  %v1892_v61 = vadd.f32 %v14417_v40, %v1771_v45  ;;  %v6857_v14 = vld [vmem:[%s13543_s5 + $0x200] sm:$0xff]  ;;  %v4052_v22 = vadd.f32 %v4038_v24, %v11405_v10  ;;  %v14423_v48 = vld [vmem:[#allocation41_spill] sm:$0xff]  ;;  %v6880_v10 = vld [vmem:[%s13543_s5 + $0x2b8] sm:$0xff] }
 0x686   : > { %4548 = vst [vmem:[#allocation1 + $0x3] ss:$4 sm:$0xff] %v11721_v7  ;;  %v4405_v28 = vpop.f32.mrf.mxu2  ;;  %4827 = vmatpush.msrb.mxu3 %v6903_v47  ;;  %v6881_v55 = vld [vmem:[%s13543_s5 + $0x2c0] sm:$0xff]  ;;  %v4287_v12 = vpop.f32.mrf.mxu1  ;;  %v6924_v40 = vld [vmem:[%s13543_s5 + $0x3f8] sm:$0xff]  ;;  %v6923_v62 = vld [vmem:[%s13543_s5 + $0x3f0] sm:$0xff] }
 0x687   : > { %4575 = vst.sshfl [vmem:[#allocation1 + $0x10] sm:$0xff pattern:$0x75643120] %v11493_v34  ;;  %v11781_v63 = vadd.f32 %v4405_v28, %v4300_v51  ;;  %v2041_v2 = vadd.f32 %v14418_v36, %v1892_v61  ;;  %v6901_v31 = vld [vmem:[%s13543_s5 + $0x360] sm:$0xff]  ;;  %v4173_v28 = vadd.f32 %v4159_v57, %v4052_v22  ;;  %v6900_v51 = vld [vmem:[%s13543_s5 + $0x358] sm:$0xff]  ;;  %v6878_v47 = vld [vmem:[%s13543_s5 + $0x2a8] sm:$0xff] }
 0x688   : > { %4750 = vst.sshfl [vmem:[#allocation1 + $0x30] sm:$0xff pattern:$0x75643120] %v11733_v35  ;;  %4828 = vmatpush.msrb.mxu3 %v6902_v9  ;;  %v14424_v61 = vld [vmem:[#allocation172_spill] sm:$0xff]  ;;  %v14427_v57 = vld [vmem:[#allocation121_spill] sm:$0xff] }
 0x689   : > { %v11749_v11 = vld [vmem:[#allocation1 + $0x21] ss:$2 sm:$0xff]  ;;  %v2162_v43 = vadd.f32 %v14419_v16, %v2041_v2  ;;  %v11821_v52 = vrot.slane %v11781_v63, 4  ;;  %v4301_v2 = vadd.f32 %v4287_v12, %v4173_v28  ;;  %v6920_v12 = vld [vmem:[%s13543_s5 + $0x3d8] sm:$0xff]  ;;  %v6875_v28 = vld [vmem:[%s13543_s5 + $0x290] sm:$0xff] }
 0x68a   : > { %4916 = vst.sshfl [vmem:[#allocation1 + $0x20] sm:$0xff pattern:$0x75643120] %v11733_v35  ;;  %4829 = vmatpush.msrb.mxu3 %v6901_v31  ;;  %v6896_v31 = vld [vmem:[%s13543_s5 + $0x338] sm:$0xff] }
 0x68b   : > { %v2283_v42 = vadd.f32 %v14420_v20, %v2162_v43  ;;  %v6898_v20 = vld [vmem:[%s13543_s5 + $0x348] sm:$0xff] }
 0x68c   : > { %4830 = vmatpush.msrb.mxu3 %v6900_v51  ;;  %v4041_v43 = vpop.f32.mrf.mxu3 }
 0x68d   : > { %v4549_v30 = vld.sshfl [vmem:[#allocation1] sm:$0xff pattern:$0x73625140]  ;;  %v2432_v4 = vadd.f32 %v14421_v59, %v2283_v42  ;;  %v4053_v9 = vadd.f32 %v4041_v43, %v11409_v19 }
 0x68e   : > { %4567 = vmatmul.f32.vlgmr.msrb.gmra.mxu0 %v4549_v30  ;;  %4572 = vst.sshfl [vmem:[#allocation1] sm:$0xff pattern:$0x75643120] %v11490_v56  ;;  %v6860_v56 = vld [vmem:[%s13543_s5 + $0x218] sm:$0xff]  ;;  %v4408_v30 = vpop.f32.mrf.mxu2  ;;  %v6877_v59 = vld [vmem:[%s13543_s5 + $0x2a0] sm:$0xff] }
 0x68f   : > { %4605 = vst [vmem:[#allocation1 + $0x2] ss:$4 sm:$0xff] %v11689_v49  ;;  %v11779_v3 = vld [vmem:[#allocation1 + $0x31] ss:$2 sm:$0xff]  ;;  %4732 = vmatpush.msra.mxu1 %v6860_v56  ;;  %v2553_v39 = vadd.f32 %v14422_v54, %v2432_v4  ;;  %4889 = vmatpush.msrb.mxu0 %v6924_v40  ;;  %v6897_v4 = vld [vmem:[%s13543_s5 + $0x340] sm:$0xff] }
 0x690   : > { %4919 = vst.sshfl [vmem:[#allocation1 + $0x30] sm:$0xff pattern:$0x75643120] %v11774_v8  ;;  %v6884_v49 = vld [vmem:[%s13543_s5 + $0x2d8] sm:$0xff]  ;;  %v6879_v56 = vld [vmem:[%s13543_s5 + $0x2b0] sm:$0xff]  ;;  %v6921_v19 = vld [vmem:[%s13543_s5 + $0x3e0] sm:$0xff] }
 0x691   : > { %v11785_v29 = vld [vmem:[#allocation1 + $0x21] ss:$2 sm:$0xff]  ;;  %4783 = vmatpush.msra.mxu2 %v6884_v49  ;;  %v4577_v58 = vld [vmem:[#allocation1 + $0x11] ss:$2 sm:$0xff]  ;;  %4733 = vmatpush.msra.mxu1 %v6859_v60  ;;  %v2674_v45 = vadd.f32 %v14423_v48, %v2553_v39  ;;  %v11867_v60 = vadd.f32 %v4408_v30, %v4301_v2  ;;  %v4679_v39 = vrot.slane %v11733_v35, 2 }
 0x692   : > { %5085 = vst.sshfl [vmem:[#allocation1 + $0x20] sm:$0xff pattern:$0x75643120] %v11781_v63  ;;  %v6899_v49 = vld [vmem:[%s13543_s5 + $0x350] sm:$0xff]  ;;  %4890 = vmatpush.msrb.mxu0 %v6923_v62  ;;  %v6894_v2 = vld [vmem:[%s13543_s5 + $0x328] sm:$0xff]  ;;  %v6873_v43 = vld [vmem:[%s13543_s5 + $0x280] sm:$0xff] }
 0x693   : > { %4784 = vmatpush.msra.mxu2 %v6883_v41  ;;  %4734 = vmatpush.msra.mxu1 %v6858_v15  ;;  %v2802_v36 = vadd.f32 %v14424_v61, %v2674_v45  ;;  %v4162_v15 = vpop.f32.mrf.mxu0  ;;  %v6895_v30 = vld [vmem:[%s13543_s5 + $0x330] sm:$0xff]  ;;  %v11927_v40 = vrot.slane %v11867_v60, 4  ;;  %v4683_v62 = vsel %vm4495_vm7, %v11733_v35, %v4679_v39 }
 0x694   : > { %4831 = vmatpush.msrb.mxu3 %v6899_v49  ;;  %v4174_v54 = vadd.f32 %v4162_v15, %v4053_v9 }
 0x695   : > { %v4574_v23 = vld [vmem:[#allocation1 + $0x1] ss:$2 sm:$0xff]  ;;  %4785 = vmatpush.msra.mxu2 %v6882_v1  ;;  %4735 = vmatpush.msra.mxu1 %v6857_v14  ;;  %v4290_v14 = vpop.f32.mrf.mxu1 }
 0x696   : > { %4601 = vst [vmem:[#allocation1] ss:$4 sm:$0xff] %v4574_v23  ;;  %v6922_v23 = vld [vmem:[%s13543_s5 + $0x3e8] sm:$0xff]  ;;  %4832 = vmatpush.msrb.mxu3 %v6898_v20  ;;  %v4411_v48 = vpop.f32.mrf.mxu2 }
 0x697   : > { %4603 = vst [vmem:[#allocation1 + $0x1] ss:$4 sm:$0xff] %v4577_v58  ;;  %v11823_v33 = vld [vmem:[#allocation1 + $0x31] ss:$2 sm:$0xff]  ;;  %4786 = vmatpush.msra.mxu2 %v6881_v55  ;;  %4891 = vmatpush.msrb.mxu0 %v6922_v23 }
 0x698   : > { %4607 = vst [vmem:[#allocation1 + $0x3] ss:$4 sm:$0xff] %v11713_v25  ;;  %v4297_v25 = vadd.f32 %v11561_v6, %v4169_v0  ;;  %v14426_v58 = vld [vmem:[#allocation102_spill] sm:$0xff]  ;;  %4833 = vmatpush.msrb.mxu3 %v6897_v4 }
 0x699   : > { %v11838_v13 = vld [vmem:[#allocation1 + $0x21] ss:$2 sm:$0xff]  ;;  %5088 = vst.sshfl [vmem:[#allocation1 + $0x30] sm:$0xff pattern:$0x75643120] %v11821_v52  ;;  %4787 = vmatpush.msra.mxu2 %v6880_v10  ;;  %v6876_v55 = vld [vmem:[%s13543_s5 + $0x298] sm:$0xff]  ;;  %4892 = vmatpush.msrb.mxu0 %v6921_v19  ;;  %v4302_v10 = vadd.f32 %v4290_v14, %v4174_v54 }
 0x69a   : > { %5246 = vst.sshfl [vmem:[#allocation1 + $0x20] sm:$0xff pattern:$0x75643120] %v11821_v52  ;;  %v11854_v6 = vadd.f32 %v11575_v17, %v4297_v25  ;;  %v14425_v17 = vld [vmem:[#allocation88_spill] sm:$0xff]  ;;  %4834 = vmatpush.msrb.mxu3 %v6896_v31  ;;  %v6916_v4 = vld [vmem:[%s13543_s5 + $0x3b8] sm:$0xff]  ;;  %v6891_v14 = vld [vmem:[%s13543_s5 + $0x310] sm:$0xff] }
 0x69b   : > { %4788 = vmatpush.msra.mxu2 %v6879_v56  ;;  %v2923_v16 = vadd.f32 %v14425_v17, %v2802_v36  ;;  %4893 = vmatpush.msrb.mxu0 %v6920_v12  ;;  %v6874_v36 = vld [vmem:[%s13543_s5 + $0x288] sm:$0xff]  ;;  %v11938_v49 = vadd.f32 %v4411_v48, %v4302_v10  ;;  %v4684_v17 = vsel %vm4497_vm8, %v11733_v35, %v4679_v39  ;;  %v6915_v19 = vld [vmem:[%s13543_s5 + $0x3b0] sm:$0xff]  ;;  %v6937_v10 = vld [vmem:[%s13543_s5 + $0x460] sm:$0xff] }
 0x69c   : > { %v4678_v42 = vrot.slane %v11854_v6, 2  ;;  %4835 = vmatpush.msrb.mxu3 %v6895_v30  ;;  %v6918_v56 = vld [vmem:[%s13543_s5 + $0x3c8] sm:$0xff] }
 0x69d   : > { %4789 = vmatpush.msra.mxu2 %v6878_v47  ;;  %v3044_v5 = vadd.f32 %v14426_v58, %v2923_v16  ;;  %v6855_v58 = vrot.slane %v4683_v62, 9  ;;  %v6890_v54 = vld [vmem:[%s13543_s5 + $0x308] sm:$0xff]  ;;  %v4293_v48 = vpop.f32.mrf.mxu1  ;;  %v6912_v62 = vld [vmem:[%s13543_s5 + $0x398] sm:$0xff] }
 0x69e   : > { %v4680_v22 = vsel %vm4495_vm7, %v11854_v6, %v4678_v42  ;;  %v4681_v45 = vsel %vm4497_vm8, %v11854_v6, %v4678_v42  ;;  %4836 = vmatpush.msrb.mxu3 %v6894_v2  ;;  %v6917_v42 = vld [vmem:[%s13543_s5 + $0x3c0] sm:$0xff]  ;;  %v6914_v39 = vld [vmem:[%s13543_s5 + $0x3a8] sm:$0xff] }
 0x69f   : > { %v4608_v41 = vld.sshfl [vmem:[#allocation1] sm:$0xff pattern:$0x73625140]  ;;  %v3172_v0 = vadd.f32 %v14427_v57, %v3044_v5  ;;  %4790 = vmatpush.msra.mxu2 %v6877_v59  ;;  %v6853_v61 = vrot.slane %v4680_v22, 9  ;;  %v6854_v16 = vrot.slane %v4681_v45, 9  ;;  %v6856_v5 = vrot.slane %v4684_v17, 9  ;;  %v4044_v59 = vpop.f32.mrf.mxu3 }
 0x6a0   : > { %v11876_v24 = vld [vmem:[#allocation1 + $0x31] ss:$2 sm:$0xff]  ;;  %4626 = vmatmul.f32.vlgmr.msra.gmra.mxu3 %v4608_v41  ;;  %4648 = vst [vmem:[#allocation1] ss:$4 sm:$0xff] %v11493_v34  ;;  %v6893_v41 = vld [vmem:[%s13543_s5 + $0x320] sm:$0xff] }
 0x6a1   : > { %v11883_v1 = vld [vmem:[#allocation1 + $0x21] ss:$2 sm:$0xff]  ;;  %5249 = vst.sshfl [vmem:[#allocation1 + $0x30] sm:$0xff pattern:$0x75643120] %v11867_v60  ;;  %v3293_v25 = vadd.f32 %v11171_v26, %v3172_v0  ;;  %4791 = vmatpush.msra.mxu2 %v6876_v55  ;;  %v6919_v26 = vld [vmem:[%s13543_s5 + $0x3d0] sm:$0xff]  ;;  %4837 = vmatpush.msrb.mxu3 %v6893_v41  ;;  %v11964_v9 = vsel %vm7924_vm6, %v6853_v61, %v6854_v16  ;;  %v4165_v55 = vpop.f32.mrf.mxu0 }
 0x6a2   : > { %5407 = vst.sshfl [vmem:[#allocation1 + $0x20] sm:$0xff pattern:$0x75643120] %v11867_v60  ;;  %4894 = vmatpush.msrb.mxu0 %v6919_v26  ;;  %v11979_v0 = vrot.slane %v11938_v49, 4  ;;  %v6889_v45 = vld [vmem:[%s13543_s5 + $0x300] sm:$0xff]  ;;  %v4414_v26 = vpop.f32.mrf.mxu2  ;;  %v6936_v17 = vld [vmem:[%s13543_s5 + $0x458] sm:$0xff] }
 0x6a3   : > { %4650 = vst [vmem:[#allocation1 + $0x1] ss:$4 sm:$0xff] %v11854_v6  ;;  %v3414_v51 = vadd.f32 %v11346_v44, %v3293_v25  ;;  %4792 = vmatpush.msra.mxu2 %v6875_v28  ;;  %v6938_v25 = vld [vmem:[%s13543_s5 + $0x468] sm:$0xff]  ;;  %v6913_v28 = vld [vmem:[%s13543_s5 + $0x3a0] sm:$0xff]  ;;  %v6911_v16 = vld [vmem:[%s13543_s5 + $0x390] sm:$0xff] }
 0x6a4   : > { %4652 = vst [vmem:[#allocation1 + $0x2] ss:$4 sm:$0xff] %v11628_v37  ;;  %4895 = vmatpush.msrb.mxu0 %v6918_v56  ;;  %v6955_v41 = vld [vmem:[%s13543_s5 + $0x4f0] sm:$0xff] }
 0x6a5   : > { %4654 = vst [vmem:[#allocation1 + $0x3] ss:$4 sm:$0xff] %v11733_v35  ;;  %v3563_v47 = vadd.f32 %v11447_v18, %v3414_v51  ;;  %4793 = vmatpush.msra.mxu2 %v6874_v36 }
 0x6a6   : > { %4896 = vmatpush.msrb.mxu0 %v6917_v42  ;;  %v6954_v42 = vld [vmem:[%s13543_s5 + $0x4e8] sm:$0xff] }
 0x6a7   : > { %v3684_v23 = vadd.f32 %v11459_v27, %v3563_v47  ;;  %4794 = vmatpush.msra.mxu2 %v6873_v43  ;;  %v6892_v27 = vld [vmem:[%s13543_s5 + $0x318] sm:$0xff]  ;;  %v6935_v43 = vld [vmem:[%s13543_s5 + $0x450] sm:$0xff]  ;;  %v6934_v47 = vld [vmem:[%s13543_s5 + $0x448] sm:$0xff] }
 0x6a8   : > { %v11940_v44 = vld [vmem:[#allocation1 + $0x31] ss:$2 sm:$0xff]  ;;  %4838 = vmatpush.msrb.mxu3 %v6892_v27  ;;  %4897 = vmatpush.msrb.mxu0 %v6916_v4 }
 0x6a9   : > { %v11953_v20 = vld [vmem:[#allocation1 + $0x21] ss:$2 sm:$0xff]  ;;  %5410 = vst.sshfl [vmem:[#allocation1 + $0x30] sm:$0xff pattern:$0x75643120] %v11927_v40  ;;  %v3805_v15 = vadd.f32 %v11465_v53, %v3684_v23  ;;  %v6940_v53 = vld [vmem:[%s13543_s5 + $0x478] sm:$0xff] }
 0x6aa   : > { %5576 = vst.sshfl [vmem:[#allocation1 + $0x20] sm:$0xff pattern:$0x75643120] %v11938_v49  ;;  %4948 = vmatpush.msrb.mxu1 %v6940_v53  ;;  %4839 = vmatpush.msrb.mxu3 %v6891_v14  ;;  %v6932_v4 = vld [vmem:[%s13543_s5 + $0x438] sm:$0xff]  ;;  %v6931_v14 = vld [vmem:[%s13543_s5 + $0x430] sm:$0xff] }
 0x6ab   : > { %v3933_v57 = vadd.f32 %v11478_v38, %v3805_v15  ;;  %v6939_v38 = vld [vmem:[%s13543_s5 + $0x470] sm:$0xff]  ;;  %4898 = vmatpush.msrb.mxu0 %v6915_v19  ;;  %v6952_v53 = vld [vmem:[%s13543_s5 + $0x4d8] sm:$0xff] }
 0x6ac   : > { %v4655_v18 = vld.sshfl [vmem:[#allocation1] sm:$0xff pattern:$0x73625140]  ;;  %4949 = vmatpush.msrb.mxu1 %v6939_v38  ;;  %4840 = vmatpush.msrb.mxu3 %v6890_v54  ;;  %v6975_v19 = vld [vmem:[%s13543_s5 + $0x570] sm:$0xff]  ;;  %v12093_v38 = vrot.slane %v11854_v6, 4  ;;  %v6950_v54 = vld [vmem:[%s13543_s5 + $0x4c8] sm:$0xff] }
 0x6ad   : > { %4673 = vmatmul.f32.vlgmr.msra.gmra.mxu0 %v4655_v18  ;;  %4711 = vst [vmem:[#allocation1] ss:$4 sm:$0xff] %v11700_v50  ;;  %v11983_v50 = vsel %vm7924_vm6, %v6855_v58, %v6856_v5  ;;  %v4054_v22 = vadd.f32 %v4044_v59, %v3933_v57  ;;  %v6909_v5 = vld [vmem:[%s13543_s5 + $0x380] sm:$0xff]  ;;  %v6976_v57 = vld [vmem:[%s13543_s5 + $0x578] sm:$0xff] }
 0x6ae   : > { %4713 = vst [vmem:[#allocation1 + $0x1] ss:$4 sm:$0xff] %v11964_v9  ;;  %4899 = vmatpush.msrb.mxu0 %v6914_v39  ;;  %4950 = vmatpush.msrb.mxu1 %v6938_v25  ;;  %v6933_v18 = vld [vmem:[%s13543_s5 + $0x440] sm:$0xff]  ;;  %v6974_v39 = vld [vmem:[%s13543_s5 + $0x568] sm:$0xff] }
 0x6af   : > { %4715 = vst [vmem:[#allocation1 + $0x2] ss:$4 sm:$0xff] %v11721_v7  ;;  %v4175_v30 = vadd.f32 %v4165_v55, %v4054_v22  ;;  %4841 = vmatpush.msrb.mxu3 %v6889_v45  ;;  %v6953_v59 = vld [vmem:[%s13543_s5 + $0x4e0] sm:$0xff]  ;;  %v6930_v55 = vld [vmem:[%s13543_s5 + $0x428] sm:$0xff] }
 0x6b0   : > { %v11995_v31 = vld [vmem:[#allocation1 + $0x31] ss:$2 sm:$0xff]  ;;  %4717 = vst [vmem:[#allocation1 + $0x3] ss:$4 sm:$0xff] %v11983_v50  ;;  %4900 = vmatpush.msrb.mxu0 %v6913_v28  ;;  %4951 = vmatpush.msrb.mxu1 %v6937_v10  ;;  %v6929_v22 = vld [vmem:[%s13543_s5 + $0x420] sm:$0xff]  ;;  %v4847_v28 = vrot.slane %v12093_v38, 2 }
 0x6b1   : > { %v12004_v12 = vld [vmem:[#allocation1 + $0x21] ss:$2 sm:$0xff]  ;;  %5579 = vst.sshfl [vmem:[#allocation1 + $0x30] sm:$0xff pattern:$0x75643120] %v11979_v0  ;;  %v4303_v51 = vadd.f32 %v4293_v48, %v4175_v30  ;;  %5058 = vmatpush.msra.mxu3 %v6976_v57  ;;  %v6928_v30 = vld [vmem:[%s13543_s5 + $0x418] sm:$0xff] }
 0x6b2   : > { %5737 = vst.sshfl [vmem:[#allocation1 + $0x20] sm:$0xff pattern:$0x75643120] %v11979_v0  ;;  %4901 = vmatpush.msrb.mxu0 %v6912_v62  ;;  %4952 = vmatpush.msrb.mxu1 %v6936_v17  ;;  %v6949_v25 = vld [vmem:[%s13543_s5 + $0x4c0] sm:$0xff]  ;;  %v6948_v10 = vld [vmem:[%s13543_s5 + $0x4b8] sm:$0xff]  ;;  %v6971_v62 = vld [vmem:[%s13543_s5 + $0x550] sm:$0xff] }
 0x6b3   : > { %4744 = vst.sshfl [vmem:[#allocation1 + $0x10] sm:$0xff pattern:$0x75643120] %v11854_v6  ;;  %v12021_v61 = vadd.f32 %v4414_v26, %v4303_v51  ;;  %5059 = vmatpush.msra.mxu3 %v6975_v19  ;;  %v6973_v48 = vld [vmem:[%s13543_s5 + $0x560] sm:$0xff]  ;;  %v6972_v26 = vld [vmem:[%s13543_s5 + $0x558] sm:$0xff]  ;;  %v6927_v51 = vld [vmem:[%s13543_s5 + $0x410] sm:$0xff] }
 0x6b4   : > { %4902 = vmatpush.msrb.mxu0 %v6911_v16  ;;  %4953 = vmatpush.msrb.mxu1 %v6935_v43  ;;  %v4848_v17 = vrot.slane %v11774_v8, 2  ;;  %v6946_v16 = vld [vmem:[%s13543_s5 + $0x4a8] sm:$0xff]  ;;  %v6968_v19 = vld [vmem:[%s13543_s5 + $0x538] sm:$0xff] }
 0x6b5   : > { %v12059_v23 = vrot.slane %v12021_v61, 4  ;;  %5060 = vmatpush.msra.mxu3 %v6974_v39  ;;  %v6970_v43 = vld [vmem:[%s13543_s5 + $0x548] sm:$0xff]  ;;  %v6991_v39 = vld [vmem:[%s13543_s5 + $0x5f0] sm:$0xff] }
 0x6b6   : > { %4954 = vmatpush.msrb.mxu1 %v6934_v47  ;;  %v6925_v47 = vld [vmem:[%s13543_s5 + $0x400] sm:$0xff] }
 0x6b7   : > { %v4718_v36 = vld.sshfl [vmem:[#allocation1] sm:$0xff pattern:$0x73625140]  ;;  %5061 = vmatpush.msra.mxu3 %v6973_v48  ;;  %v6966_v48 = vld [vmem:[%s13543_s5 + $0x528] sm:$0xff] }
 0x6b8   : > { %v12023_v2 = vld [vmem:[#allocation1 + $0x31] ss:$2 sm:$0xff]  ;;  %4736 = vmatmul.f32.vlgmr.msra.gmra.mxu1 %v4718_v36  ;;  %4741 = vst.sshfl [vmem:[#allocation1] sm:$0xff pattern:$0x75643120] %v11493_v34 }
 0x6b9   : > { %v12026_v56 = vld [vmem:[#allocation1 + $0x21] ss:$2 sm:$0xff]  ;;  %5740 = vst.sshfl [vmem:[#allocation1 + $0x30] sm:$0xff pattern:$0x75643120] %v12021_v61  ;;  %v6956_v34 = vld [vmem:[%s13543_s5 + $0x4f8] sm:$0xff]  ;;  %4955 = vmatpush.msrb.mxu1 %v6933_v18  ;;  %5062 = vmatpush.msra.mxu3 %v6972_v26  ;;  %v4853_v18 = vsel %vm4497_vm8, %v11774_v8, %v4848_v17 }
 0x6ba   : > { %5898 = vst.sshfl [vmem:[#allocation1 + $0x20] sm:$0xff pattern:$0x75643120] %v12021_v61  ;;  %4995 = vmatpush.msrb.mxu2 %v6956_v34  ;;  %v4746_v27 = vld [vmem:[#allocation1 + $0x11] ss:$2 sm:$0xff]  ;;  %v6926_v34 = vld [vmem:[%s13543_s5 + $0x408] sm:$0xff] }
 0x6bb   : > { %4774 = vst [vmem:[#allocation1 + $0x2] ss:$4 sm:$0xff] %v11749_v11  ;;  %v6910_v11 = vld [vmem:[%s13543_s5 + $0x388] sm:$0xff]  ;;  %4956 = vmatpush.msrb.mxu1 %v6932_v4  ;;  %v6947_v36 = vld [vmem:[%s13543_s5 + $0x4b0] sm:$0xff]  ;;  %5063 = vmatpush.msra.mxu3 %v6971_v62  ;;  %v6964_v26 = vld [vmem:[%s13543_s5 + $0x518] sm:$0xff] }
 0x6bc   : > { %4996 = vmatpush.msrb.mxu2 %v6955_v41  ;;  %4903 = vmatpush.msrb.mxu0 %v6910_v11  ;;  %v4849_v41 = vsel %vm4495_vm7, %v12093_v38, %v4847_v28  ;;  %v4850_v11 = vsel %vm4497_vm8, %v12093_v38, %v4847_v28  ;;  %v6941_v28 = vld [vmem:[%s13543_s5 + $0x480] sm:$0xff]  ;;  %v6987_v62 = vld [vmem:[%s13543_s5 + $0x5d0] sm:$0xff] }
 0x6bd   : > { %4957 = vmatpush.msrb.mxu1 %v6931_v14  ;;  %5064 = vmatpush.msra.mxu3 %v6970_v43  ;;  %v6961_v43 = vld [vmem:[%s13543_s5 + $0x500] sm:$0xff] }
 0x6be   : > { %4997 = vmatpush.msrb.mxu2 %v6954_v42  ;;  %4904 = vmatpush.msrb.mxu0 %v6909_v5  ;;  %v6945_v42 = vld [vmem:[%s13543_s5 + $0x4a0] sm:$0xff]  ;;  %v4852_v5 = vsel %vm4495_vm7, %v11774_v8, %v4848_v17  ;;  %v6962_v17 = vld [vmem:[%s13543_s5 + $0x508] sm:$0xff] }
 0x6bf   : > { %v4743_v58 = vld [vmem:[#allocation1 + $0x1] ss:$2 sm:$0xff]  ;;  %4958 = vmatpush.msrb.mxu1 %v6930_v55  ;;  %v6907_v4 = vrot.slane %v4852_v5, 9  ;;  %v6992_v55 = vld [vmem:[%s13543_s5 + $0x5f8] sm:$0xff] }
 0x6c0   : > { %v12067_v15 = vld [vmem:[#allocation1 + $0x31] ss:$2 sm:$0xff]  ;;  %4770 = vst [vmem:[#allocation1] ss:$4 sm:$0xff] %v4743_v58  ;;  %4998 = vmatpush.msrb.mxu2 %v6953_v59  ;;  %v6969_v58 = vld [vmem:[%s13543_s5 + $0x540] sm:$0xff]  ;;  %v6905_v59 = vrot.slane %v4849_v41, 9  ;;  %5117 = vmatpush.msra.mxu0 %v6992_v55 }
 0x6c1   : > { %5901 = vst.sshfl [vmem:[#allocation1 + $0x30] sm:$0xff pattern:$0x75643120] %v12059_v23  ;;  %4959 = vmatpush.msrb.mxu1 %v6929_v22  ;;  %5065 = vmatpush.msra.mxu3 %v6969_v58  ;;  %v6985_v41 = vld [vmem:[%s13543_s5 + $0x5c0] sm:$0xff]  ;;  %v6984_v58 = vld [vmem:[%s13543_s5 + $0x5b8] sm:$0xff] }
 0x6c2   : > { %4772 = vst [vmem:[#allocation1 + $0x1] ss:$4 sm:$0xff] %v4746_v27  ;;  %4999 = vmatpush.msrb.mxu2 %v6952_v53  ;;  %v6906_v27 = vrot.slane %v4850_v11, 9  ;;  %v6908_v53 = vrot.slane %v4853_v18, 9  ;;  %5118 = vmatpush.msra.mxu0 %v6991_v39  ;;  %v7005_v11 = vld [vmem:[%s13543_s5 + $0x660] sm:$0xff]  ;;  %v7004_v5 = vld [vmem:[%s13543_s5 + $0x658] sm:$0xff] }
 0x6c3   : > { %4776 = vst [vmem:[#allocation1 + $0x3] ss:$4 sm:$0xff] %v11779_v3  ;;  %v6951_v3 = vld [vmem:[%s13543_s5 + $0x4d0] sm:$0xff]  ;;  %4960 = vmatpush.msrb.mxu1 %v6928_v30  ;;  %5066 = vmatpush.msra.mxu3 %v6968_v19  ;;  %v6965_v30 = vld [vmem:[%s13543_s5 + $0x520] sm:$0xff]  ;;  %v7026_v18 = vld [vmem:[%s13543_s5 + $0x6f8] sm:$0xff] }
 0x6c4   : > { %5000 = vmatpush.msrb.mxu2 %v6951_v3  ;;  %v4858_v14 = vsel %vm7924_vm6, %v6905_v59, %v6906_v27  ;;  %v6944_v3 = vld [vmem:[%s13543_s5 + $0x498] sm:$0xff]  ;;  %v12186_v22 = vsel %vm7924_vm6, %v6907_v4, %v6908_v53  ;;  %v6983_v59 = vld [vmem:[%s13543_s5 + $0x5b0] sm:$0xff]  ;;  %v6982_v4 = vld [vmem:[%s13543_s5 + $0x5a8] sm:$0xff] }
 0x6c5   : > { %4961 = vmatpush.msrb.mxu1 %v6927_v51  ;;  %v6988_v51 = vld [vmem:[%s13543_s5 + $0x5d8] sm:$0xff]  ;;  %v7025_v27 = vld [vmem:[%s13543_s5 + $0x6f0] sm:$0xff]  ;;  %v7002_v53 = vld [vmem:[%s13543_s5 + $0x648] sm:$0xff] }
 0x6c6   : > { %5001 = vmatpush.msrb.mxu2 %v6950_v54  ;;  %v6943_v54 = vld [vmem:[%s13543_s5 + $0x490] sm:$0xff]  ;;  %v7023_v19 = vld [vmem:[%s13543_s5 + $0x6e0] sm:$0xff]  ;;  %v7022_v39 = vld [vmem:[%s13543_s5 + $0x6d8] sm:$0xff] }
 0x6c7   : > { %4962 = vmatpush.msrb.mxu1 %v6926_v34  ;;  %v6986_v34 = vld [vmem:[%s13543_s5 + $0x5c8] sm:$0xff] }
 0x6c8   : > { %5002 = vmatpush.msrb.mxu2 %v6949_v25  ;;  %v6942_v25 = vld [vmem:[%s13543_s5 + $0x488] sm:$0xff] }
 0x6c9   : > { %4963 = vmatpush.msrb.mxu1 %v6925_v47 }
 0x6ca   : > { %v4777_v45 = vld.sshfl [vmem:[#allocation1] sm:$0xff pattern:$0x73625140]  ;;  %5003 = vmatpush.msrb.mxu2 %v6948_v10 }
 0x6cb   : > { %4795 = vmatmul.f32.vlgmr.msra.gmra.mxu2 %v4777_v45  ;;  %4817 = vst [vmem:[#allocation1] ss:$4 sm:$0xff] %v11854_v6  ;;  %v6990_v45 = vld [vmem:[%s13543_s5 + $0x5e8] sm:$0xff]  ;;  %v6989_v10 = vld [vmem:[%s13543_s5 + $0x5e0] sm:$0xff] }
 0x6cc   : > { %4819 = vst [vmem:[#allocation1 + $0x1] ss:$4 sm:$0xff] %v12093_v38  ;;  %5004 = vmatpush.msrb.mxu2 %v6947_v36  ;;  %5119 = vmatpush.msra.mxu0 %v6990_v45  ;;  %v7008_v36 = vld [vmem:[%s13543_s5 + $0x678] sm:$0xff]  ;;  %v6999_v45 = vld [vmem:[%s13543_s5 + $0x630] sm:$0xff] }
 0x6cd   : > { %4821 = vst [vmem:[#allocation1 + $0x2] ss:$4 sm:$0xff] %v11733_v35  ;;  %5164 = vmatpush.msra.mxu1 %v7008_v36  ;;  %v6997_v36 = vld [vmem:[%s13543_s5 + $0x620] sm:$0xff] }
 0x6ce   : > { %4823 = vst [vmem:[#allocation1 + $0x3] ss:$4 sm:$0xff] %v11774_v8  ;;  %5005 = vmatpush.msrb.mxu2 %v6946_v16  ;;  %5120 = vmatpush.msra.mxu0 %v6989_v10  ;;  %v7006_v16 = vld [vmem:[%s13543_s5 + $0x668] sm:$0xff] }
 0x6cf   : > { %v6978_v10 = vld [vmem:[%s13543_s5 + $0x588] sm:$0xff] }
 0x6d0   : > { %5006 = vmatpush.msrb.mxu2 %v6945_v42  ;;  %5121 = vmatpush.msra.mxu0 %v6988_v51  ;;  %v6977_v51 = vld [vmem:[%s13543_s5 + $0x580] sm:$0xff] }
 0x6d2   : > { %5007 = vmatpush.msrb.mxu2 %v6944_v3  ;;  %5122 = vmatpush.msra.mxu0 %v6987_v62  ;;  %v7001_v3 = vld [vmem:[%s13543_s5 + $0x640] sm:$0xff] }
 0x6d4   : > { %5008 = vmatpush.msrb.mxu2 %v6943_v54  ;;  %5123 = vmatpush.msra.mxu0 %v6986_v34  ;;  %v6980_v54 = vld [vmem:[%s13543_s5 + $0x598] sm:$0xff] }
 0x6d5   : > { %v4824_v57 = vld.sshfl [vmem:[#allocation1] sm:$0xff pattern:$0x73625140] }
 0x6d6   : > { %4842 = vmatmul.f32.vlgmr.msrb.gmra.mxu3 %v4824_v57  ;;  %4880 = vst [vmem:[#allocation1] ss:$4 sm:$0xff] %v11964_v9  ;;  %v6967_v9 = vld [vmem:[%s13543_s5 + $0x530] sm:$0xff]  ;;  %5009 = vmatpush.msrb.mxu2 %v6942_v25  ;;  %v7024_v57 = vld [vmem:[%s13543_s5 + $0x6e8] sm:$0xff]  ;;  %v5016_v25 = vrot.slane %v11781_v63, 2 }
 0x6d7   : > { %4882 = vst [vmem:[#allocation1 + $0x1] ss:$4 sm:$0xff] %v4858_v14  ;;  %5067 = vmatpush.msra.mxu3 %v6967_v9  ;;  %5124 = vmatpush.msra.mxu0 %v6985_v41  ;;  %v6981_v14 = vld [vmem:[%s13543_s5 + $0x5a0] sm:$0xff]  ;;  %v7000_v9 = vld [vmem:[%s13543_s5 + $0x638] sm:$0xff] }
 0x6d8   : > { %4884 = vst [vmem:[#allocation1 + $0x2] ss:$4 sm:$0xff] %v11983_v50  ;;  %5010 = vmatpush.msrb.mxu2 %v6941_v28  ;;  %v7021_v28 = vld [vmem:[%s13543_s5 + $0x6d0] sm:$0xff]  ;;  %v5019_v62 = vsel %vm4497_vm8, %v11781_v63, %v5016_v25 }
 0x6d9   : > { %4886 = vst [vmem:[#allocation1 + $0x3] ss:$4 sm:$0xff] %v12186_v22  ;;  %5068 = vmatpush.msra.mxu3 %v6966_v48  ;;  %5125 = vmatpush.msra.mxu0 %v6984_v58  ;;  %v6979_v48 = vld [vmem:[%s13543_s5 + $0x590] sm:$0xff]  ;;  %v7018_v58 = vld [vmem:[%s13543_s5 + $0x6b8] sm:$0xff] }
 0x6da   : > { %4913 = vst.sshfl [vmem:[#allocation1 + $0x10] sm:$0xff pattern:$0x75643120] %v12093_v38  ;;  %5219 = vmatpush.msra.mxu2 %v7026_v18 }
 0x6db   : > { %5069 = vmatpush.msra.mxu3 %v6965_v30  ;;  %5126 = vmatpush.msra.mxu0 %v6983_v59  ;;  %v5017_v30 = vrot.slane %v11821_v52, 2  ;;  %v7017_v59 = vld [vmem:[%s13543_s5 + $0x6b0] sm:$0xff] }
 0x6dc   : > { %5220 = vmatpush.msra.mxu2 %v7025_v27 }
 0x6dd   : > { %5070 = vmatpush.msra.mxu3 %v6964_v26  ;;  %5127 = vmatpush.msra.mxu0 %v6982_v4  ;;  %v7020_v26 = vld [vmem:[%s13543_s5 + $0x6c8] sm:$0xff]  ;;  %v5022_v34 = vsel %vm4497_vm8, %v11821_v52, %v5017_v30 }
 0x6de   : > { %5221 = vmatpush.msra.mxu2 %v7024_v57  ;;  %v6994_v4 = vld [vmem:[%s13543_s5 + $0x608] sm:$0xff] }
 0x6df   : > { %5128 = vmatpush.msra.mxu0 %v6981_v14  ;;  %v7040_v57 = vld [vmem:[%s13543_s5 + $0x768] sm:$0xff]  ;;  %v6993_v14 = vld [vmem:[%s13543_s5 + $0x600] sm:$0xff] }
 0x6e0   : > { %v4887_v38 = vld.sshfl [vmem:[#allocation1] sm:$0xff pattern:$0x73625140]  ;;  %5222 = vmatpush.msra.mxu2 %v7023_v19 }
 0x6e1   : > { %4905 = vmatmul.f32.vlgmr.msrb.gmra.mxu0 %v4887_v38  ;;  %4910 = vst.sshfl [vmem:[#allocation1] sm:$0xff pattern:$0x75643120] %v11854_v6  ;;  %v6963_v6 = vld [vmem:[%s13543_s5 + $0x510] sm:$0xff]  ;;  %v6998_v38 = vld [vmem:[%s13543_s5 + $0x628] sm:$0xff]  ;;  %v7039_v19 = vld [vmem:[%s13543_s5 + $0x760] sm:$0xff] }
 0x6e2   : > { %4943 = vst [vmem:[#allocation1 + $0x2] ss:$4 sm:$0xff] %v11785_v29  ;;  %v7007_v29 = vld [vmem:[%s13543_s5 + $0x670] sm:$0xff]  ;;  %5071 = vmatpush.msra.mxu3 %v6963_v6  ;;  %5129 = vmatpush.msra.mxu0 %v6980_v54  ;;  %v5018_v6 = vsel %vm4495_vm7, %v11781_v63, %v5016_v25  ;;  %v7014_v54 = vld [vmem:[%s13543_s5 + $0x698] sm:$0xff] }
 0x6e3   : > { %5165 = vmatpush.msra.mxu1 %v7007_v29  ;;  %v4915_v42 = vld [vmem:[#allocation1 + $0x11] ss:$2 sm:$0xff]  ;;  %5223 = vmatpush.msra.mxu2 %v7022_v39  ;;  %v7019_v29 = vld [vmem:[%s13543_s5 + $0x6c0] sm:$0xff] }
 0x6e4   : > { %5072 = vmatpush.msra.mxu3 %v6962_v17  ;;  %5130 = vmatpush.msra.mxu0 %v6979_v48  ;;  %v5021_v17 = vsel %vm4495_vm7, %v11821_v52, %v5017_v30  ;;  %v7058_v39 = vld [vmem:[%s13543_s5 + $0x7f8] sm:$0xff]  ;;  %v7037_v25 = vld [vmem:[%s13543_s5 + $0x750] sm:$0xff]  ;;  %v7012_v48 = vld [vmem:[%s13543_s5 + $0x688] sm:$0xff] }
 0x6e5   : > { %5166 = vmatpush.msra.mxu1 %v7006_v16  ;;  %5224 = vmatpush.msra.mxu2 %v7021_v28  ;;  %v6957_v16 = vrot.slane %v5018_v6, 9  ;;  %v6959_v41 = vrot.slane %v5021_v17, 9  ;;  %v7056_v28 = vld [vmem:[%s13543_s5 + $0x7e8] sm:$0xff]  ;;  %v7011_v30 = vld [vmem:[%s13543_s5 + $0x680] sm:$0xff]  ;;  %v7054_v6 = vld [vmem:[%s13543_s5 + $0x7d8] sm:$0xff] }
 0x6e6   : > { %5073 = vmatpush.msra.mxu3 %v6961_v43  ;;  %5131 = vmatpush.msra.mxu0 %v6978_v10  ;;  %v6958_v43 = vrot.slane %v5019_v62, 9  ;;  %v7035_v10 = vld [vmem:[%s13543_s5 + $0x740] sm:$0xff]  ;;  %v7076_v62 = vld [vmem:[%s13543_s5 + $0x878] sm:$0xff]  ;;  %v7075_v17 = vld [vmem:[%s13543_s5 + $0x870] sm:$0xff] }
 0x6e7   : > { %5167 = vmatpush.msra.mxu1 %v7005_v11  ;;  %5225 = vmatpush.msra.mxu2 %v7020_v26  ;;  %v6960_v11 = vrot.slane %v5022_v34, 9  ;;  %v7032_v34 = vld [vmem:[%s13543_s5 + $0x728] sm:$0xff] }
 0x6e8   : > { %v4912_v47 = vld [vmem:[#allocation1 + $0x1] ss:$2 sm:$0xff]  ;;  %5132 = vmatpush.msra.mxu0 %v6977_v51  ;;  %v12346_v18 = vsel %vm7924_vm6, %v6957_v16, %v6958_v43 }
 0x6e9   : > { %4939 = vst [vmem:[#allocation1] ss:$4 sm:$0xff] %v4912_v47  ;;  %5168 = vmatpush.msra.mxu1 %v7004_v5  ;;  %5226 = vmatpush.msra.mxu2 %v7019_v29  ;;  %v7042_v5 = vld [vmem:[%s13543_s5 + $0x778] sm:$0xff]  ;;  %v12360_v27 = vsel %vm7924_vm6, %v6959_v41, %v6960_v11  ;;  %v7033_v29 = vld [vmem:[%s13543_s5 + $0x730] sm:$0xff]  ;;  %v7052_v16 = vld [vmem:[%s13543_s5 + $0x7c8] sm:$0xff] }
 0x6ea   : > { %4941 = vst [vmem:[#allocation1 + $0x1] ss:$4 sm:$0xff] %v4915_v42  ;;  %v6996_v42 = vld [vmem:[%s13543_s5 + $0x618] sm:$0xff]  ;;  %5278 = vmatpush.msrb.mxu3 %v7042_v5  ;;  %5325 = vmatpush.msrb.mxu0 %v7058_v39  ;;  %v7074_v43 = vld [vmem:[%s13543_s5 + $0x868] sm:$0xff]  ;;  %v7031_v41 = vld [vmem:[%s13543_s5 + $0x720] sm:$0xff] }
 0x6eb   : > { %4945 = vst [vmem:[#allocation1 + $0x3] ss:$4 sm:$0xff] %v11823_v33  ;;  %v7003_v33 = vld [vmem:[%s13543_s5 + $0x650] sm:$0xff]  ;;  %5227 = vmatpush.msra.mxu2 %v7018_v58  ;;  %v7051_v11 = vld [vmem:[%s13543_s5 + $0x7c0] sm:$0xff]  ;;  %v7030_v58 = vld [vmem:[%s13543_s5 + $0x718] sm:$0xff] }
 0x6ec   : > { %5169 = vmatpush.msra.mxu1 %v7003_v33  ;;  %v7041_v33 = vld [vmem:[%s13543_s5 + $0x770] sm:$0xff]  ;;  %v7050_v5 = vld [vmem:[%s13543_s5 + $0x7b8] sm:$0xff] }
 0x6ed   : > { %5228 = vmatpush.msra.mxu2 %v7017_v59  ;;  %5279 = vmatpush.msrb.mxu3 %v7041_v33  ;;  %v7029_v59 = vld [vmem:[%s13543_s5 + $0x710] sm:$0xff] }
 0x6ee   : > { %5170 = vmatpush.msra.mxu1 %v7002_v53  ;;  %v7016_v53 = vld [vmem:[%s13543_s5 + $0x6a8] sm:$0xff]  ;;  %v7049_v33 = vld [vmem:[%s13543_s5 + $0x7b0] sm:$0xff] }
 0x6ef   : > { %5229 = vmatpush.msra.mxu2 %v7016_v53  ;;  %5280 = vmatpush.msrb.mxu3 %v7040_v57  ;;  %v5185_v53 = vrot.slane %v11867_v60, 2  ;;  %v7028_v57 = vld [vmem:[%s13543_s5 + $0x708] sm:$0xff] }
 0x6f0   : > { %5171 = vmatpush.msra.mxu1 %v7001_v3  ;;  %v7015_v3 = vld [vmem:[%s13543_s5 + $0x6a0] sm:$0xff] }
 0x6f1   : > { %5230 = vmatpush.msra.mxu2 %v7015_v3  ;;  %5281 = vmatpush.msrb.mxu3 %v7039_v19  ;;  %v7070_v3 = vld [vmem:[%s13543_s5 + $0x848] sm:$0xff]  ;;  %v7027_v19 = vld [vmem:[%s13543_s5 + $0x700] sm:$0xff]  ;;  %v5187_v39 = vsel %vm4497_vm8, %v11867_v60, %v5185_v53 }
 0x6f2   : > { %v4946_v55 = vld.sshfl [vmem:[#allocation1] sm:$0xff pattern:$0x73625140]  ;;  %5172 = vmatpush.msra.mxu1 %v7000_v9  ;;  %v7038_v9 = vld [vmem:[%s13543_s5 + $0x758] sm:$0xff] }
 0x6f3   : > { %4964 = vmatmul.f32.vlgmr.msrb.gmra.mxu1 %v4946_v55  ;;  %4986 = vst [vmem:[#allocation1] ss:$4 sm:$0xff] %v11615_v46  ;;  %5231 = vmatpush.msra.mxu2 %v7014_v54  ;;  %v7069_v54 = vld [vmem:[%s13543_s5 + $0x840] sm:$0xff] }
 0x6f4   : > { %4988 = vst [vmem:[#allocation1 + $0x1] ss:$4 sm:$0xff] %v11628_v37  ;;  %5173 = vmatpush.msra.mxu1 %v6999_v45  ;;  %5282 = vmatpush.msrb.mxu3 %v7038_v9  ;;  %v7036_v45 = vld [vmem:[%s13543_s5 + $0x748] sm:$0xff]  ;;  %v5186_v9 = vsel %vm4495_vm7, %v11867_v60, %v5185_v53  ;;  %v7128_v53 = vld [vmem:[%s13543_s5 + $0x9f8] sm:$0xff] }
 0x6f5   : > { %4990 = vst [vmem:[#allocation1 + $0x2] ss:$4 sm:$0xff] %v11781_v63 }
 0x6f6   : > { %4992 = vst [vmem:[#allocation1 + $0x3] ss:$4 sm:$0xff] %v11821_v52  ;;  %5174 = vmatpush.msra.mxu1 %v6998_v38  ;;  %5283 = vmatpush.msrb.mxu3 %v7037_v25  ;;  %v7055_v38 = vld [vmem:[%s13543_s5 + $0x7e0] sm:$0xff]  ;;  %v7010_v25 = vrot.slane %v5187_v39, 9 }
 0x6f7   : > { %v7125_v39 = vld [vmem:[%s13543_s5 + $0x9e0] sm:$0xff] }
 0x6f8   : > { %5175 = vmatpush.msra.mxu1 %v6997_v36  ;;  %5284 = vmatpush.msrb.mxu3 %v7036_v45  ;;  %v7034_v36 = vld [vmem:[%s13543_s5 + $0x738] sm:$0xff] }
 0x6f9   : > { %v7068_v45 = vld [vmem:[%s13543_s5 + $0x838] sm:$0xff] }
 0x6fa   : > { %5176 = vmatpush.msra.mxu1 %v6996_v42  ;;  %5285 = vmatpush.msrb.mxu3 %v7035_v10  ;;  %v7091_v10 = vld [vmem:[%s13543_s5 + $0x8f0] sm:$0xff] }
 0x6fc   : > { %5286 = vmatpush.msrb.mxu3 %v7034_v36  ;;  %v7090_v36 = vld [vmem:[%s13543_s5 + $0x8e8] sm:$0xff] }
 0x6fd   : > { %v4993_v47 = vld.sshfl [vmem:[#allocation1] sm:$0xff pattern:$0x73625140] }
 0x6fe   : > { %5011 = vmatmul.f32.vlgmr.msrb.gmra.mxu2 %v4993_v47  ;;  %5049 = vst [vmem:[#allocation1] ss:$4 sm:$0xff] %v11710_v21  ;;  %v6995_v21 = vld [vmem:[%s13543_s5 + $0x610] sm:$0xff]  ;;  %5287 = vmatpush.msrb.mxu3 %v7033_v29  ;;  %v7073_v47 = vld [vmem:[%s13543_s5 + $0x860] sm:$0xff] }
 0x6ff   : > { %5051 = vst [vmem:[#allocation1 + $0x1] ss:$4 sm:$0xff] %v11721_v7  ;;  %5177 = vmatpush.msra.mxu1 %v6995_v21  ;;  %v7072_v21 = vld [vmem:[%s13543_s5 + $0x858] sm:$0xff]  ;;  %v7089_v29 = vld [vmem:[%s13543_s5 + $0x8e0] sm:$0xff] }
 0x700   : > { %5053 = vst [vmem:[#allocation1 + $0x2] ss:$4 sm:$0xff] %v12346_v18  ;;  %5288 = vmatpush.msrb.mxu3 %v7032_v34  ;;  %v7088_v34 = vld [vmem:[%s13543_s5 + $0x8d8] sm:$0xff] }
 0x701   : > { %5055 = vst [vmem:[#allocation1 + $0x3] ss:$4 sm:$0xff] %v12360_v27  ;;  %5178 = vmatpush.msra.mxu1 %v6994_v4  ;;  %v7071_v4 = vld [vmem:[%s13543_s5 + $0x850] sm:$0xff] }
 0x702   : > { %5082 = vst.sshfl [vmem:[#allocation1 + $0x10] sm:$0xff pattern:$0x75643120] %v11628_v37  ;;  %5289 = vmatpush.msrb.mxu3 %v7031_v41  ;;  %v7087_v41 = vld [vmem:[%s13543_s5 + $0x8d0] sm:$0xff] }
 0x703   : > { %5179 = vmatpush.msra.mxu1 %v6993_v14  ;;  %v7048_v14 = vld [vmem:[%s13543_s5 + $0x7a8] sm:$0xff] }
 0x704   : > { %5290 = vmatpush.msrb.mxu3 %v7030_v58  ;;  %v7085_v58 = vld [vmem:[%s13543_s5 + $0x8c0] sm:$0xff] }
 0x705   : > { %5380 = vmatpush.msrb.mxu1 %v7076_v62  ;;  %v7065_v62 = vld [vmem:[%s13543_s5 + $0x820] sm:$0xff] }
 0x706   : > { %5291 = vmatpush.msrb.mxu3 %v7029_v59 }
 0x707   : > { %5381 = vmatpush.msrb.mxu1 %v7075_v17  ;;  %v7064_v17 = vld [vmem:[%s13543_s5 + $0x818] sm:$0xff] }
 0x708   : > { %v5056_v55 = vld.sshfl [vmem:[#allocation1] sm:$0xff pattern:$0x73625140]  ;;  %5292 = vmatpush.msrb.mxu3 %v7028_v57  ;;  %v7083_v57 = vld [vmem:[%s13543_s5 + $0x8b0] sm:$0xff] }
 0x709   : > { %5074 = vmatmul.f32.vlgmr.msra.gmra.mxu3 %v5056_v55  ;;  %5079 = vst.sshfl [vmem:[#allocation1] sm:$0xff pattern:$0x75643120] %v11615_v46  ;;  %v7013_v46 = vld [vmem:[%s13543_s5 + $0x690] sm:$0xff]  ;;  %5382 = vmatpush.msrb.mxu1 %v7074_v43  ;;  %v7047_v55 = vld [vmem:[%s13543_s5 + $0x7a0] sm:$0xff] }
 0x70a   : > { %5112 = vst [vmem:[#allocation1 + $0x2] ss:$4 sm:$0xff] %v11838_v13  ;;  %5232 = vmatpush.msra.mxu2 %v7013_v46  ;;  %v7057_v13 = vld [vmem:[%s13543_s5 + $0x7f0] sm:$0xff]  ;;  %5293 = vmatpush.msrb.mxu3 %v7027_v19  ;;  %v7009_v46 = vrot.slane %v5186_v9, 9  ;;  %v7102_v19 = vld [vmem:[%s13543_s5 + $0x948] sm:$0xff]  ;;  %v7101_v9 = vld [vmem:[%s13543_s5 + $0x940] sm:$0xff] }
 0x70b   : > { %5326 = vmatpush.msrb.mxu0 %v7057_v13  ;;  %v5084_v51 = vld [vmem:[#allocation1 + $0x11] ss:$2 sm:$0xff]  ;;  %5383 = vmatpush.msrb.mxu1 %v7073_v47  ;;  %v7106_v47 = vld [vmem:[%s13543_s5 + $0x968] sm:$0xff] }
 0x70c   : > { %5233 = vmatpush.msra.mxu2 %v7012_v48  ;;  %v7046_v48 = vld [vmem:[%s13543_s5 + $0x798] sm:$0xff]  ;;  %v7063_v43 = vld [vmem:[%s13543_s5 + $0x810] sm:$0xff] }
 0x70d   : > { %5327 = vmatpush.msrb.mxu0 %v7056_v28  ;;  %5384 = vmatpush.msrb.mxu1 %v7072_v21  ;;  %v7092_v28 = vld [vmem:[%s13543_s5 + $0x8f8] sm:$0xff] }
 0x70e   : > { %5234 = vmatpush.msra.mxu2 %v7011_v30  ;;  %v7067_v30 = vld [vmem:[%s13543_s5 + $0x830] sm:$0xff] }
 0x70f   : > { %5328 = vmatpush.msrb.mxu0 %v7055_v38  ;;  %5385 = vmatpush.msrb.mxu1 %v7071_v4  ;;  %v12525_v38 = vsel %vm7924_vm6, %v7009_v46, %v7010_v25  ;;  %v7104_v4 = vld [vmem:[%s13543_s5 + $0x958] sm:$0xff] }
 0x710   : > { %v5081_v26 = vld [vmem:[#allocation1 + $0x1] ss:$2 sm:$0xff]  ;;  %5439 = vmatpush.msrb.mxu2 %v7092_v28  ;;  %v7080_v46 = vld [vmem:[%s13543_s5 + $0x898] sm:$0xff]  ;;  %v7099_v28 = vld [vmem:[%s13543_s5 + $0x930] sm:$0xff] }
 0x711   : > { %5108 = vst [vmem:[#allocation1] ss:$4 sm:$0xff] %v5081_v26  ;;  %5329 = vmatpush.msrb.mxu0 %v7054_v6  ;;  %5386 = vmatpush.msrb.mxu1 %v7070_v3  ;;  %v7044_v26 = vld [vmem:[%s13543_s5 + $0x788] sm:$0xff]  ;;  %v7043_v6 = vld [vmem:[%s13543_s5 + $0x780] sm:$0xff]  ;;  %v7127_v3 = vld [vmem:[%s13543_s5 + $0x9f0] sm:$0xff] }
 0x712   : > { %5110 = vst [vmem:[#allocation1 + $0x1] ss:$4 sm:$0xff] %v5084_v51  ;;  %v7066_v51 = vld [vmem:[%s13543_s5 + $0x828] sm:$0xff]  ;;  %5440 = vmatpush.msrb.mxu2 %v7091_v10  ;;  %v7100_v25 = vld [vmem:[%s13543_s5 + $0x938] sm:$0xff] }
 0x713   : > { %5114 = vst [vmem:[#allocation1 + $0x3] ss:$4 sm:$0xff] %v11876_v24  ;;  %v7053_v24 = vld [vmem:[%s13543_s5 + $0x7d0] sm:$0xff]  ;;  %5387 = vmatpush.msrb.mxu1 %v7069_v54  ;;  %v7081_v54 = vld [vmem:[%s13543_s5 + $0x8a0] sm:$0xff]  ;;  %v7098_v10 = vld [vmem:[%s13543_s5 + $0x928] sm:$0xff] }
 0x714   : > { %5330 = vmatpush.msrb.mxu0 %v7053_v24  ;;  %5441 = vmatpush.msrb.mxu2 %v7090_v36  ;;  %v7077_v36 = vld [vmem:[%s13543_s5 + $0x880] sm:$0xff] }
 0x715   : > { %5388 = vmatpush.msrb.mxu1 %v7068_v45  ;;  %v7079_v45 = vld [vmem:[%s13543_s5 + $0x890] sm:$0xff] }
 0x716   : > { %5331 = vmatpush.msrb.mxu0 %v7052_v16  ;;  %5442 = vmatpush.msrb.mxu2 %v7089_v29  ;;  %v7108_v16 = vld [vmem:[%s13543_s5 + $0x978] sm:$0xff] }
 0x717   : > { %5389 = vmatpush.msrb.mxu1 %v7067_v30  ;;  %5486 = vmatpush.msra.mxu3 %v7108_v16  ;;  %v7078_v30 = vld [vmem:[%s13543_s5 + $0x888] sm:$0xff] }
 0x718   : > { %5332 = vmatpush.msrb.mxu0 %v7051_v11  ;;  %5443 = vmatpush.msrb.mxu2 %v7088_v34  ;;  %v7062_v11 = vld [vmem:[%s13543_s5 + $0x808] sm:$0xff] }
 0x719   : > { %5390 = vmatpush.msrb.mxu1 %v7066_v51  ;;  %v5346_v51 = vrot.slane %v11927_v40, 2 }
 0x71a   : > { %v5115_v42 = vld.sshfl [vmem:[#allocation1] sm:$0xff pattern:$0x73625140]  ;;  %5333 = vmatpush.msrb.mxu0 %v7050_v5  ;;  %5444 = vmatpush.msrb.mxu2 %v7087_v41  ;;  %v7120_v41 = vld [vmem:[%s13543_s5 + $0x9b8] sm:$0xff] }
 0x71b   : > { %5133 = vmatmul.f32.vlgmr.msra.gmra.mxu0 %v5115_v42  ;;  %5155 = vst [vmem:[#allocation1] ss:$4 sm:$0xff] %v11628_v37  ;;  %5391 = vmatpush.msrb.mxu1 %v7065_v62  ;;  %v7061_v42 = vld [vmem:[%s13543_s5 + $0x800] sm:$0xff]  ;;  %v5347_v29 = vsel %vm4495_vm7, %v11927_v40, %v5346_v51 }
 0x71c   : > { %5157 = vst [vmem:[#allocation1 + $0x1] ss:$4 sm:$0xff] %v11733_v35  ;;  %5334 = vmatpush.msrb.mxu0 %v7049_v33  ;;  %v7105_v5 = vld [vmem:[%s13543_s5 + $0x960] sm:$0xff]  ;;  %v7084_v33 = vld [vmem:[%s13543_s5 + $0x8b8] sm:$0xff] }
 0x71d   : > { %5159 = vst [vmem:[#allocation1 + $0x2] ss:$4 sm:$0xff] %v11821_v52  ;;  %5392 = vmatpush.msrb.mxu1 %v7064_v17  ;;  %v7121_v62 = vld [vmem:[%s13543_s5 + $0x9c0] sm:$0xff]  ;;  %v7059_v17 = vrot.slane %v5347_v29, 9 }
 0x71e   : > { %5161 = vst [vmem:[#allocation1 + $0x3] ss:$4 sm:$0xff] %v11867_v60  ;;  %5335 = vmatpush.msrb.mxu0 %v7048_v14  ;;  %v7103_v14 = vld [vmem:[%s13543_s5 + $0x950] sm:$0xff] }
 0x71f   : > { %5393 = vmatpush.msrb.mxu1 %v7063_v43  ;;  %v7096_v43 = vld [vmem:[%s13543_s5 + $0x918] sm:$0xff] }
 0x720   : > { %5336 = vmatpush.msrb.mxu0 %v7047_v55  ;;  %v7126_v55 = vld [vmem:[%s13543_s5 + $0x9e8] sm:$0xff] }
 0x721   : > { %5394 = vmatpush.msrb.mxu1 %v7062_v11  ;;  %v7119_v11 = vld [vmem:[%s13543_s5 + $0x9b0] sm:$0xff] }
 0x722   : > { %5337 = vmatpush.msrb.mxu0 %v7046_v48 }
 0x723   : > { %5395 = vmatpush.msrb.mxu1 %v7061_v42  ;;  %v7094_v42 = vld [vmem:[%s13543_s5 + $0x908] sm:$0xff] }
 0x725   : > { %v5162_v13 = vld.sshfl [vmem:[#allocation1] sm:$0xff pattern:$0x73625140] }
 0x726   : > { %5180 = vmatmul.f32.vlgmr.msra.gmra.mxu1 %v5162_v13  ;;  %5210 = vst [vmem:[#allocation1] ss:$4 sm:$0xff] %v11721_v7  ;;  %v7045_v7 = vld [vmem:[%s13543_s5 + $0x790] sm:$0xff]  ;;  %v7124_v13 = vld [vmem:[%s13543_s5 + $0x9d8] sm:$0xff] }
 0x727   : > { %5212 = vst [vmem:[#allocation1 + $0x1] ss:$4 sm:$0xff] %v11983_v50  ;;  %5338 = vmatpush.msrb.mxu0 %v7045_v7  ;;  %v7123_v7 = vld [vmem:[%s13543_s5 + $0x9d0] sm:$0xff] }
 0x728   : > { %5214 = vst [vmem:[#allocation1 + $0x2] ss:$4 sm:$0xff] %v12360_v27 }
 0x729   : > { %5216 = vst [vmem:[#allocation1 + $0x3] ss:$4 sm:$0xff] %v12525_v38  ;;  %5339 = vmatpush.msrb.mxu0 %v7044_v26  ;;  %v7122_v26 = vld [vmem:[%s13543_s5 + $0x9c8] sm:$0xff] }
 0x72a   : > { %5243 = vst.sshfl [vmem:[#allocation1 + $0x10] sm:$0xff pattern:$0x75643120] %v11733_v35 }
 0x72b   : > { %5340 = vmatpush.msrb.mxu0 %v7043_v6  ;;  %v7097_v6 = vld [vmem:[%s13543_s5 + $0x920] sm:$0xff] }
 0x72d   : > { %5549 = vmatpush.msra.mxu0 %v7128_v53  ;;  %v7160_v53 = vld [vmem:[%s13543_s5 + $0xaf8] sm:$0xff] }
 0x72f   : > { %5550 = vmatpush.msra.mxu0 %v7127_v3  ;;  %v7138_v3 = vld [vmem:[%s13543_s5 + $0xa48] sm:$0xff] }
 0x730   : > { %v5217_v24 = vld.sshfl [vmem:[#allocation1] sm:$0xff pattern:$0x73625140] }
 0x731   : > { %5235 = vmatmul.f32.vlgmr.msra.gmra.mxu2 %v5217_v24  ;;  %5240 = vst.sshfl [vmem:[#allocation1] sm:$0xff pattern:$0x75643120] %v11628_v37  ;;  %v7107_v37 = vld [vmem:[%s13543_s5 + $0x970] sm:$0xff]  ;;  %5551 = vmatpush.msra.mxu0 %v7126_v55  ;;  %v5348_v24 = vsel %vm4497_vm8, %v11927_v40, %v5346_v51  ;;  %v7137_v55 = vld [vmem:[%s13543_s5 + $0xa40] sm:$0xff] }
 0x732   : > { %5273 = vst [vmem:[#allocation1 + $0x2] ss:$4 sm:$0xff] %v11883_v1  ;;  %v7086_v1 = vld [vmem:[%s13543_s5 + $0x8c8] sm:$0xff]  ;;  %5487 = vmatpush.msra.mxu3 %v7107_v37  ;;  %v5245_v21 = vld [vmem:[#allocation1 + $0x11] ss:$2 sm:$0xff]  ;;  %v7060_v34 = vrot.slane %v5348_v24, 9 }
 0x733   : > { %5445 = vmatpush.msrb.mxu2 %v7086_v1  ;;  %5552 = vmatpush.msra.mxu0 %v7125_v39  ;;  %v7144_v37 = vld [vmem:[%s13543_s5 + $0xa78] sm:$0xff]  ;;  %v7143_v1 = vld [vmem:[%s13543_s5 + $0xa70] sm:$0xff]  ;;  %v7175_v51 = vld [vmem:[%s13543_s5 + $0xb60] sm:$0xff] }
 0x734   : > { %5488 = vmatpush.msra.mxu3 %v7106_v47  ;;  %v12691_v47 = vsel %vm7924_vm6, %v7059_v17, %v7060_v34  ;;  %5608 = vmatpush.msra.mxu1 %v7144_v37  ;;  %v7131_v24 = vld [vmem:[%s13543_s5 + $0xa10] sm:$0xff]  ;;  %v5507_v17 = vrot.slane %v11938_v49, 2  ;;  %v5508_v37 = vrot.slane %v11979_v0, 2 }
 0x735   : > { %5446 = vmatpush.msrb.mxu2 %v7085_v58  ;;  %5553 = vmatpush.msra.mxu0 %v7124_v13  ;;  %v7118_v58 = vld [vmem:[%s13543_s5 + $0x9a8] sm:$0xff]  ;;  %v7178_v13 = vld [vmem:[%s13543_s5 + $0xb78] sm:$0xff]  ;;  %v7151_v34 = vld [vmem:[%s13543_s5 + $0xab0] sm:$0xff] }
 0x736   : > { %5489 = vmatpush.msra.mxu3 %v7105_v5  ;;  %5609 = vmatpush.msra.mxu1 %v7143_v1  ;;  %v7093_v5 = vld [vmem:[%s13543_s5 + $0x900] sm:$0xff] }
 0x737   : > { %5447 = vmatpush.msrb.mxu2 %v7084_v33  ;;  %5554 = vmatpush.msra.mxu0 %v7123_v7  ;;  %v7116_v33 = vld [vmem:[%s13543_s5 + $0x998] sm:$0xff]  ;;  %v7154_v7 = vld [vmem:[%s13543_s5 + $0xac8] sm:$0xff]  ;;  %v7129_v1 = vld [vmem:[%s13543_s5 + $0xa00] sm:$0xff] }
 0x738   : > { %v5242_v59 = vld [vmem:[#allocation1 + $0x1] ss:$2 sm:$0xff]  ;;  %5490 = vmatpush.msra.mxu3 %v7104_v4  ;;  %v7140_v4 = vld [vmem:[%s13543_s5 + $0xa58] sm:$0xff] }
 0x739   : > { %5269 = vst [vmem:[#allocation1] ss:$4 sm:$0xff] %v5242_v59  ;;  %5448 = vmatpush.msrb.mxu2 %v7083_v57  ;;  %5555 = vmatpush.msra.mxu0 %v7122_v26  ;;  %v7141_v59 = vld [vmem:[%s13543_s5 + $0xa60] sm:$0xff]  ;;  %v7115_v57 = vld [vmem:[%s13543_s5 + $0x990] sm:$0xff] }
 0x73a   : > { %5271 = vst [vmem:[#allocation1 + $0x1] ss:$4 sm:$0xff] %v5245_v21  ;;  %5491 = vmatpush.msra.mxu3 %v7103_v14  ;;  %v7117_v21 = vld [vmem:[%s13543_s5 + $0x9a0] sm:$0xff]  ;;  %v7114_v14 = vld [vmem:[%s13543_s5 + $0x988] sm:$0xff] }
 0x73b   : > { %5275 = vst [vmem:[#allocation1 + $0x3] ss:$4 sm:$0xff] %v11940_v44  ;;  %v7082_v44 = vld [vmem:[%s13543_s5 + $0x8a8] sm:$0xff]  ;;  %5556 = vmatpush.msra.mxu0 %v7121_v62  ;;  %v7153_v26 = vld [vmem:[%s13543_s5 + $0xac0] sm:$0xff]  ;;  %v7174_v62 = vld [vmem:[%s13543_s5 + $0xb58] sm:$0xff] }
 0x73c   : > { %5449 = vmatpush.msrb.mxu2 %v7082_v44  ;;  %5492 = vmatpush.msra.mxu3 %v7102_v19  ;;  %v7158_v44 = vld [vmem:[%s13543_s5 + $0xae8] sm:$0xff]  ;;  %v7113_v19 = vld [vmem:[%s13543_s5 + $0x980] sm:$0xff] }
 0x73d   : > { %5557 = vmatpush.msra.mxu0 %v7120_v41  ;;  %v7172_v41 = vld [vmem:[%s13543_s5 + $0xb48] sm:$0xff] }
 0x73e   : > { %5450 = vmatpush.msrb.mxu2 %v7081_v54  ;;  %5493 = vmatpush.msra.mxu3 %v7101_v9  ;;  %v7157_v54 = vld [vmem:[%s13543_s5 + $0xae0] sm:$0xff] }
 0x73f   : > { %5558 = vmatpush.msra.mxu0 %v7119_v11  ;;  %v7171_v11 = vld [vmem:[%s13543_s5 + $0xb40] sm:$0xff] }
 0x740   : > { %5451 = vmatpush.msrb.mxu2 %v7080_v46  ;;  %5494 = vmatpush.msra.mxu3 %v7100_v25  ;;  %v7136_v46 = vld [vmem:[%s13543_s5 + $0xa38] sm:$0xff] }
 0x741   : > { %5559 = vmatpush.msra.mxu0 %v7118_v58  ;;  %v7156_v25 = vld [vmem:[%s13543_s5 + $0xad8] sm:$0xff]  ;;  %v5510_v58 = vsel %vm4497_vm8, %v11938_v49, %v5507_v17 }
 0x742   : > { %v5276_v48 = vld.sshfl [vmem:[#allocation1] sm:$0xff pattern:$0x73625140]  ;;  %5452 = vmatpush.msrb.mxu2 %v7079_v45  ;;  %5495 = vmatpush.msra.mxu3 %v7099_v28  ;;  %v7155_v45 = vld [vmem:[%s13543_s5 + $0xad0] sm:$0xff] }
 0x743   : > { %5294 = vmatmul.f32.vlgmr.msrb.gmra.mxu3 %v5276_v48  ;;  %5316 = vst [vmem:[#allocation1] ss:$4 sm:$0xff] %v11733_v35  ;;  %5560 = vmatpush.msra.mxu0 %v7117_v21  ;;  %v7135_v48 = vld [vmem:[%s13543_s5 + $0xa30] sm:$0xff]  ;;  %v5513_v21 = vsel %vm4497_vm8, %v11979_v0, %v5508_v37 }
 0x744   : > { %5318 = vst [vmem:[#allocation1 + $0x1] ss:$4 sm:$0xff] %v11774_v8  ;;  %5453 = vmatpush.msrb.mxu2 %v7078_v30  ;;  %5496 = vmatpush.msra.mxu3 %v7098_v10  ;;  %v7177_v28 = vld [vmem:[%s13543_s5 + $0xb70] sm:$0xff]  ;;  %v7176_v30 = vld [vmem:[%s13543_s5 + $0xb68] sm:$0xff]  ;;  %v7133_v10 = vld [vmem:[%s13543_s5 + $0xa20] sm:$0xff] }
 0x745   : > { %5320 = vst [vmem:[#allocation1 + $0x2] ss:$4 sm:$0xff] %v11867_v60  ;;  %5561 = vmatpush.msra.mxu0 %v7116_v33 }
 0x746   : > { %5322 = vst [vmem:[#allocation1 + $0x3] ss:$4 sm:$0xff] %v11927_v40  ;;  %5454 = vmatpush.msrb.mxu2 %v7077_v36  ;;  %5497 = vmatpush.msra.mxu3 %v7097_v6  ;;  %v7132_v36 = vld [vmem:[%s13543_s5 + $0xa18] sm:$0xff] }
 0x747   : > { %5562 = vmatpush.msra.mxu0 %v7115_v57  ;;  %v7152_v6 = vld [vmem:[%s13543_s5 + $0xab8] sm:$0xff] }
 0x748   : > { %5498 = vmatpush.msra.mxu3 %v7096_v43  ;;  %5655 = vmatpush.msra.mxu2 %v7160_v53  ;;  %v7130_v43 = vld [vmem:[%s13543_s5 + $0xa08] sm:$0xff]  ;;  %v7148_v57 = vld [vmem:[%s13543_s5 + $0xa98] sm:$0xff] }
 0x749   : > { %5563 = vmatpush.msra.mxu0 %v7114_v14  ;;  %v7147_v14 = vld [vmem:[%s13543_s5 + $0xa90] sm:$0xff] }
 0x74b   : > { %5564 = vmatpush.msra.mxu0 %v7113_v19  ;;  %v7146_v19 = vld [vmem:[%s13543_s5 + $0xa88] sm:$0xff] }
 0x74d   : > { %v5323_v16 = vld.sshfl [vmem:[#allocation1] sm:$0xff pattern:$0x73625140] }
 0x74e   : > { %5341 = vmatmul.f32.vlgmr.msrb.gmra.mxu0 %v5323_v16  ;;  %5371 = vst [vmem:[#allocation1] ss:$4 sm:$0xff] %v11983_v50  ;;  %v7095_v50 = vld [vmem:[%s13543_s5 + $0x910] sm:$0xff] }
 0x74f   : > { %5375 = vst [vmem:[#allocation1 + $0x2] ss:$4 sm:$0xff] %v12525_v38  ;;  %5499 = vmatpush.msra.mxu3 %v7095_v50  ;;  %v7173_v16 = vld [vmem:[%s13543_s5 + $0xb50] sm:$0xff]  ;;  %v7150_v50 = vld [vmem:[%s13543_s5 + $0xaa8] sm:$0xff] }
 0x750   : > { %5373 = vst [vmem:[#allocation1 + $0x1] ss:$4 sm:$0xff] %v12186_v22  ;;  %v7142_v22 = vld [vmem:[%s13543_s5 + $0xa68] sm:$0xff] }
 0x751   : > { %5377 = vst [vmem:[#allocation1 + $0x3] ss:$4 sm:$0xff] %v12691_v47  ;;  %5500 = vmatpush.msra.mxu3 %v7094_v42  ;;  %5610 = vmatpush.msra.mxu1 %v7142_v22  ;;  %v5509_v42 = vsel %vm4495_vm7, %v11938_v49, %v5507_v17  ;;  %v7149_v22 = vld [vmem:[%s13543_s5 + $0xaa0] sm:$0xff]  ;;  %v7185_v17 = vld [vmem:[%s13543_s5 + $0xbb0] sm:$0xff] }
 0x752   : > { %5404 = vst.sshfl [vmem:[#allocation1 + $0x10] sm:$0xff pattern:$0x75643120] %v11774_v8 }
 0x753   : > { %5501 = vmatpush.msra.mxu3 %v7093_v5  ;;  %5611 = vmatpush.msra.mxu1 %v7141_v59  ;;  %v5512_v5 = vsel %vm4495_vm7, %v11979_v0, %v5508_v37  ;;  %v7109_v59 = vrot.slane %v5509_v42, 9  ;;  %v7183_v37 = vld [vmem:[%s13543_s5 + $0xba0] sm:$0xff]  ;;  %v7202_v42 = vld [vmem:[%s13543_s5 + $0xc38] sm:$0xff] }
 0x754   : > { %v7111_v33 = vrot.slane %v5512_v5, 9  ;;  %v7181_v5 = vld [vmem:[%s13543_s5 + $0xb90] sm:$0xff] }
 0x755   : > { %5612 = vmatpush.msra.mxu1 %v7140_v4  ;;  %5710 = vmatpush.msrb.mxu3 %v7178_v13  ;;  %v7112_v4 = vrot.slane %v5513_v21, 9  ;;  %v7166_v13 = vld [vmem:[%s13543_s5 + $0xb18] sm:$0xff]  ;;  %v7201_v21 = vld [vmem:[%s13543_s5 + $0xc30] sm:$0xff] }
 0x757   : > { %5711 = vmatpush.msrb.mxu3 %v7177_v28  ;;  %v7165_v28 = vld [vmem:[%s13543_s5 + $0xb10] sm:$0xff] }
 0x758   : > { %v5378_v8 = vld.sshfl [vmem:[#allocation1] sm:$0xff pattern:$0x73625140] }
 0x759   : > { %5396 = vmatmul.f32.vlgmr.msrb.gmra.mxu1 %v5378_v8  ;;  %5401 = vst.sshfl [vmem:[#allocation1] sm:$0xff pattern:$0x75643120] %v11733_v35  ;;  %v7139_v35 = vld [vmem:[%s13543_s5 + $0xa50] sm:$0xff]  ;;  %5712 = vmatpush.msrb.mxu3 %v7176_v30  ;;  %v7110_v8 = vrot.slane %v5510_v58, 9  ;;  %v7208_v30 = vld [vmem:[%s13543_s5 + $0xc68] sm:$0xff] }
 0x75a   : > { %5434 = vst [vmem:[#allocation1 + $0x2] ss:$4 sm:$0xff] %v11953_v20  ;;  %v7159_v20 = vld [vmem:[%s13543_s5 + $0xaf0] sm:$0xff]  ;;  %5613 = vmatpush.msra.mxu1 %v7139_v35  ;;  %v7170_v35 = vld [vmem:[%s13543_s5 + $0xb38] sm:$0xff] }
 0x75b   : > { %5656 = vmatpush.msra.mxu2 %v7159_v20  ;;  %v5406_v39 = vld [vmem:[#allocation1 + $0x11] ss:$2 sm:$0xff]  ;;  %5713 = vmatpush.msrb.mxu3 %v7175_v51  ;;  %v5518_v53 = vsel %vm7924_vm6, %v7109_v59, %v7110_v8  ;;  %v7207_v51 = vld [vmem:[%s13543_s5 + $0xc60] sm:$0xff]  ;;  %v7180_v8 = vld [vmem:[%s13543_s5 + $0xb88] sm:$0xff] }
 0x75c   : > { %5614 = vmatpush.msra.mxu1 %v7138_v3  ;;  %v7194_v20 = vld [vmem:[%s13543_s5 + $0xbf8] sm:$0xff]  ;;  %v7193_v3 = vld [vmem:[%s13543_s5 + $0xbf0] sm:$0xff] }
 0x75d   : > { %5657 = vmatpush.msra.mxu2 %v7158_v44  ;;  %5714 = vmatpush.msrb.mxu3 %v7174_v62  ;;  %v12861_v44 = vsel %vm7924_vm6, %v7111_v33, %v7112_v4  ;;  %v7186_v62 = vld [vmem:[%s13543_s5 + $0xbb8] sm:$0xff]  ;;  %v7223_v59 = vld [vmem:[%s13543_s5 + $0xcd0] sm:$0xff]  ;;  %v7222_v33 = vld [vmem:[%s13543_s5 + $0xcc8] sm:$0xff]  ;;  %v5676_v4 = vrot.slane %v12021_v61, 2 }
 0x75e   : > { %5615 = vmatpush.msra.mxu1 %v7137_v55  ;;  %5769 = vmatpush.msrb.mxu0 %v7194_v20  ;;  %v7168_v55 = vld [vmem:[%s13543_s5 + $0xb28] sm:$0xff]  ;;  %v7224_v58 = vld [vmem:[%s13543_s5 + $0xcd8] sm:$0xff] }
 0x75f   : > { %5658 = vmatpush.msra.mxu2 %v7157_v54  ;;  %5715 = vmatpush.msrb.mxu3 %v7173_v16  ;;  %v7192_v54 = vld [vmem:[%s13543_s5 + $0xbe8] sm:$0xff]  ;;  %v7227_v16 = vld [vmem:[%s13543_s5 + $0xcf0] sm:$0xff]  ;;  %v5678_v20 = vsel %vm4497_vm8, %v12021_v61, %v5676_v4 }
 0x760   : > { %v5403_v9 = vld [vmem:[#allocation1 + $0x1] ss:$2 sm:$0xff]  ;;  %5616 = vmatpush.msra.mxu1 %v7136_v46  ;;  %5770 = vmatpush.msrb.mxu0 %v7193_v3 }
 0x761   : > { %5430 = vst [vmem:[#allocation1] ss:$4 sm:$0xff] %v5403_v9  ;;  %5659 = vmatpush.msra.mxu2 %v7156_v25  ;;  %5716 = vmatpush.msrb.mxu3 %v7172_v41  ;;  %v7145_v9 = vld [vmem:[%s13543_s5 + $0xa80] sm:$0xff]  ;;  %v7226_v41 = vld [vmem:[%s13543_s5 + $0xce8] sm:$0xff] }
 0x762   : > { %5432 = vst [vmem:[#allocation1 + $0x1] ss:$4 sm:$0xff] %v5406_v39  ;;  %5617 = vmatpush.msra.mxu1 %v7135_v48  ;;  %v7167_v39 = vld [vmem:[%s13543_s5 + $0xb20] sm:$0xff]  ;;  %5771 = vmatpush.msrb.mxu0 %v7192_v54  ;;  %v7190_v48 = vld [vmem:[%s13543_s5 + $0xbd8] sm:$0xff] }
 0x763   : > { %5436 = vst [vmem:[#allocation1 + $0x3] ss:$4 sm:$0xff] %v11995_v31  ;;  %5660 = vmatpush.msra.mxu2 %v7155_v45  ;;  %v7134_v31 = vld [vmem:[%s13543_s5 + $0xa28] sm:$0xff]  ;;  %5717 = vmatpush.msrb.mxu3 %v7171_v11  ;;  %v7191_v46 = vld [vmem:[%s13543_s5 + $0xbe0] sm:$0xff]  ;;  %v7210_v45 = vld [vmem:[%s13543_s5 + $0xc78] sm:$0xff] }
 0x764   : > { %5618 = vmatpush.msra.mxu1 %v7134_v31  ;;  %5772 = vmatpush.msrb.mxu0 %v7191_v46  ;;  %v7164_v31 = vld [vmem:[%s13543_s5 + $0xb08] sm:$0xff]  ;;  %v7225_v11 = vld [vmem:[%s13543_s5 + $0xce0] sm:$0xff]  ;;  %v7244_v54 = vld [vmem:[%s13543_s5 + $0xd78] sm:$0xff] }
 0x765   : > { %5661 = vmatpush.msra.mxu2 %v7154_v7  ;;  %5718 = vmatpush.msrb.mxu3 %v7170_v35  ;;  %v7188_v7 = vld [vmem:[%s13543_s5 + $0xbc8] sm:$0xff]  ;;  %v5677_v35 = vsel %vm4495_vm7, %v12021_v61, %v5676_v4  ;;  %v7291_v4 = vld [vmem:[%s13545_s7 + $0x1f0] sm:$0xff] }
 0x766   : > { %5619 = vmatpush.msra.mxu1 %v7133_v10  ;;  %5773 = vmatpush.msrb.mxu0 %v7190_v48  ;;  %v7163_v10 = vld [vmem:[%s13543_s5 + $0xb00] sm:$0xff] }
 0x767   : > { %5662 = vmatpush.msra.mxu2 %v7153_v26  ;;  %v7187_v26 = vld [vmem:[%s13543_s5 + $0xbc0] sm:$0xff] }
 0x768   : > { %5620 = vmatpush.msra.mxu1 %v7132_v36  ;;  %v7195_v48 = vld [vmem:[%s13543_s5 + $0xc00] sm:$0xff] }
 0x769   : > { %5663 = vmatpush.msra.mxu2 %v7152_v6 }
 0x76a   : > { %v5437_v29 = vld.sshfl [vmem:[#allocation1] sm:$0xff pattern:$0x73625140]  ;;  %5621 = vmatpush.msra.mxu1 %v7131_v24  ;;  %v7228_v24 = vld [vmem:[%s13543_s5 + $0xcf8] sm:$0xff] }
 0x76b   : > { %5455 = vmatmul.f32.vlgmr.msrb.gmra.mxu2 %v5437_v29  ;;  %5477 = vst [vmem:[#allocation1] ss:$4 sm:$0xff] %v11781_v63  ;;  %v7206_v29 = vld [vmem:[%s13543_s5 + $0xc58] sm:$0xff] }
 0x76c   : > { %5479 = vst [vmem:[#allocation1 + $0x1] ss:$4 sm:$0xff] %v11821_v52  ;;  %5664 = vmatpush.msra.mxu2 %v7151_v34  ;;  %5622 = vmatpush.msra.mxu1 %v7130_v43  ;;  %v7205_v34 = vld [vmem:[%s13543_s5 + $0xc50] sm:$0xff]  ;;  %v7204_v43 = vld [vmem:[%s13543_s5 + $0xc48] sm:$0xff] }
 0x76d   : > { %5481 = vst [vmem:[#allocation1 + $0x2] ss:$4 sm:$0xff] %v11938_v49 }
 0x76e   : > { %5483 = vst [vmem:[#allocation1 + $0x3] ss:$4 sm:$0xff] %v11979_v0  ;;  %5665 = vmatpush.msra.mxu2 %v7150_v50  ;;  %5623 = vmatpush.msra.mxu1 %v7129_v1  ;;  %v7203_v50 = vld [vmem:[%s13543_s5 + $0xc40] sm:$0xff]  ;;  %v7182_v1 = vld [vmem:[%s13543_s5 + $0xb98] sm:$0xff] }
 0x770   : > { %5666 = vmatpush.msra.mxu2 %v7149_v22  ;;  %5816 = vmatpush.msrb.mxu1 %v7210_v45  ;;  %v7217_v45 = vld [vmem:[%s13543_s5 + $0xca0] sm:$0xff] }
 0x772   : > { %5667 = vmatpush.msra.mxu2 %v7148_v57  ;;  %v7179_v57 = vld [vmem:[%s13543_s5 + $0xb80] sm:$0xff] }
 0x774   : > { %5668 = vmatpush.msra.mxu2 %v7147_v14  ;;  %v7161_v14 = vrot.slane %v5677_v35, 9  ;;  %v5964_v35 = vld [vmem:[%s13545_s7 + $0x58] sm:$0xff] }
 0x775   : > { %v5484_v49 = vld.sshfl [vmem:[#allocation1] sm:$0xff pattern:$0x73625140] }
 0x776   : > { %5502 = vmatmul.f32.vlgmr.msra.gmra.mxu3 %v5484_v49  ;;  %5540 = vst [vmem:[#allocation1] ss:$4 sm:$0xff] %v12346_v18  ;;  %v7169_v18 = vld [vmem:[%s13543_s5 + $0xb30] sm:$0xff]  ;;  %5669 = vmatpush.msra.mxu2 %v7146_v19  ;;  %v7200_v49 = vld [vmem:[%s13543_s5 + $0xc28] sm:$0xff]  ;;  %v7198_v19 = vld [vmem:[%s13543_s5 + $0xc18] sm:$0xff] }
 0x777   : > { %5544 = vst [vmem:[#allocation1 + $0x2] ss:$4 sm:$0xff] %v5518_v53  ;;  %5719 = vmatpush.msrb.mxu3 %v7169_v18  ;;  %v7221_v53 = vld [vmem:[%s13543_s5 + $0xcc0] sm:$0xff]  ;;  %v7162_v18 = vrot.slane %v5678_v20, 9 }
 0x778   : > { %5542 = vst [vmem:[#allocation1 + $0x1] ss:$4 sm:$0xff] %v12360_v27  ;;  %5670 = vmatpush.msra.mxu2 %v7145_v9  ;;  %v7219_v9 = vld [vmem:[%s13543_s5 + $0xcb0] sm:$0xff]  ;;  %v7257_v20 = vld [vmem:[%s13545_s7 + $0xe0] sm:$0xff] }
 0x779   : > { %5546 = vst [vmem:[#allocation1 + $0x3] ss:$4 sm:$0xff] %v12861_v44  ;;  %5720 = vmatpush.msrb.mxu3 %v7168_v55  ;;  %v7220_v55 = vld [vmem:[%s13543_s5 + $0xcb8] sm:$0xff]  ;;  %v13026_v46 = vsel %vm7924_vm6, %v7161_v14, %v7162_v18  ;;  %v7273_v14 = vld [vmem:[%s13545_s7 + $0x160] sm:$0xff] }
 0x77a   : > { %5573 = vst.sshfl [vmem:[#allocation1 + $0x10] sm:$0xff pattern:$0x75643120] %v11821_v52  ;;  %5871 = vmatpush.msrb.mxu2 %v7228_v24  ;;  %v7233_v24 = vld [vmem:[%s13543_s5 + $0xd20] sm:$0xff] }
 0x77b   : > { %5721 = vmatpush.msrb.mxu3 %v7167_v39  ;;  %v7243_v39 = vld [vmem:[%s13543_s5 + $0xd70] sm:$0xff]  ;;  %v7289_v18 = vld [vmem:[%s13545_s7 + $0x1e0] sm:$0xff] }
 0x77c   : > { %5872 = vmatpush.msrb.mxu2 %v7227_v16  ;;  %v7230_v16 = vld [vmem:[%s13543_s5 + $0xd08] sm:$0xff] }
 0x77d   : > { %5722 = vmatpush.msrb.mxu3 %v7166_v13  ;;  %v7242_v13 = vld [vmem:[%s13543_s5 + $0xd68] sm:$0xff] }
 0x77e   : > { %5873 = vmatpush.msrb.mxu2 %v7226_v41 }
 0x77f   : > { %5723 = vmatpush.msrb.mxu3 %v7165_v28  ;;  %v7241_v28 = vld [vmem:[%s13543_s5 + $0xd60] sm:$0xff] }
 0x780   : > { %v5547_v25 = vld.sshfl [vmem:[#allocation1] sm:$0xff pattern:$0x73625140]  ;;  %5874 = vmatpush.msrb.mxu2 %v7225_v11 }
 0x781   : > { %5565 = vmatmul.f32.vlgmr.msra.gmra.mxu0 %v5547_v25  ;;  %5570 = vst.sshfl [vmem:[#allocation1] sm:$0xff pattern:$0x75643120] %v11781_v63  ;;  %v7189_v63 = vld [vmem:[%s13543_s5 + $0xbd0] sm:$0xff]  ;;  %5724 = vmatpush.msrb.mxu3 %v7164_v31  ;;  %v7218_v25 = vld [vmem:[%s13543_s5 + $0xca8] sm:$0xff]  ;;  %v7240_v31 = vld [vmem:[%s13543_s5 + $0xd58] sm:$0xff] }
 0x782   : > { %5603 = vst [vmem:[#allocation1 + $0x2] ss:$4 sm:$0xff] %v12004_v12  ;;  %v7209_v12 = vld [vmem:[%s13543_s5 + $0xc70] sm:$0xff]  ;;  %5774 = vmatpush.msrb.mxu0 %v7189_v63  ;;  %5875 = vmatpush.msrb.mxu2 %v7224_v58 }
 0x783   : > { %5817 = vmatpush.msrb.mxu1 %v7209_v12  ;;  %v5575_v6 = vld [vmem:[#allocation1 + $0x11] ss:$2 sm:$0xff]  ;;  %5725 = vmatpush.msrb.mxu3 %v7163_v10  ;;  %v7213_v10 = vld [vmem:[%s13543_s5 + $0xc80] sm:$0xff] }
 0x784   : > { %5775 = vmatpush.msrb.mxu0 %v7188_v7  ;;  %5876 = vmatpush.msrb.mxu2 %v7223_v59  ;;  %v7216_v12 = vld [vmem:[%s13543_s5 + $0xc98] sm:$0xff]  ;;  %v7215_v7 = vld [vmem:[%s13543_s5 + $0xc90] sm:$0xff]  ;;  %v5966_v59 = vld [vmem:[%s13545_s7 + $0x68] sm:$0xff] }
 0x785   : > { %5818 = vmatpush.msrb.mxu1 %v7208_v30  ;;  %5930 = vmatpush.msra.mxu3 %v7244_v54  ;;  %v7239_v30 = vld [vmem:[%s13543_s5 + $0xd50] sm:$0xff]  ;;  %v7288_v54 = vld [vmem:[%s13545_s7 + $0x1d8] sm:$0xff] }
 0x786   : > { %5776 = vmatpush.msrb.mxu0 %v7187_v26  ;;  %5877 = vmatpush.msrb.mxu2 %v7222_v33  ;;  %v7237_v26 = vld [vmem:[%s13543_s5 + $0xd40] sm:$0xff]  ;;  %v7275_v33 = vld [vmem:[%s13545_s7 + $0x170] sm:$0xff] }
 0x787   : > { %5819 = vmatpush.msrb.mxu1 %v7207_v51  ;;  %5931 = vmatpush.msra.mxu3 %v7243_v39  ;;  %v7271_v39 = vld [vmem:[%s13545_s7 + $0x150] sm:$0xff] }
 0x788   : > { %v5572_v36 = vld [vmem:[#allocation1 + $0x1] ss:$2 sm:$0xff]  ;;  %5777 = vmatpush.msrb.mxu0 %v7186_v62  ;;  %5878 = vmatpush.msrb.mxu2 %v7221_v53  ;;  %v7235_v62 = vld [vmem:[%s13543_s5 + $0xd30] sm:$0xff] }
 0x789   : > { %5599 = vst [vmem:[#allocation1] ss:$4 sm:$0xff] %v5572_v36  ;;  %5820 = vmatpush.msrb.mxu1 %v7206_v29  ;;  %5932 = vmatpush.msra.mxu3 %v7242_v13  ;;  %v7234_v29 = vld [vmem:[%s13543_s5 + $0xd28] sm:$0xff] }
 0x78a   : > { %5601 = vst [vmem:[#allocation1 + $0x1] ss:$4 sm:$0xff] %v5575_v6  ;;  %5778 = vmatpush.msrb.mxu0 %v7185_v17  ;;  %5879 = vmatpush.msrb.mxu2 %v7220_v55  ;;  %v7236_v6 = vld [vmem:[%s13543_s5 + $0xd38] sm:$0xff]  ;;  %v7258_v53 = vld [vmem:[%s13545_s7 + $0xe8] sm:$0xff] }
 0x78b   : > { %5605 = vst [vmem:[#allocation1 + $0x3] ss:$4 sm:$0xff] %v12023_v2  ;;  %5821 = vmatpush.msrb.mxu1 %v7205_v34  ;;  %v7184_v2 = vld [vmem:[%s13543_s5 + $0xba8] sm:$0xff]  ;;  %5933 = vmatpush.msra.mxu3 %v7241_v28  ;;  %v7232_v17 = vld [vmem:[%s13543_s5 + $0xd18] sm:$0xff]  ;;  %v7253_v28 = vld [vmem:[%s13545_s7 + $0xc0] sm:$0xff] }
 0x78c   : > { %5779 = vmatpush.msrb.mxu0 %v7184_v2  ;;  %5880 = vmatpush.msrb.mxu2 %v7219_v9  ;;  %v5837_v2 = vrot.slane %v12059_v23, 2  ;;  %v7272_v55 = vld [vmem:[%s13545_s7 + $0x158] sm:$0xff]  ;;  %v7255_v9 = vld [vmem:[%s13545_s7 + $0xd0] sm:$0xff]  ;;  %v7270_v13 = vld [vmem:[%s13545_s7 + $0x148] sm:$0xff] }
 0x78d   : > { %5822 = vmatpush.msrb.mxu1 %v7204_v43  ;;  %5934 = vmatpush.msra.mxu3 %v7240_v31  ;;  %v7229_v43 = vld [vmem:[%s13543_s5 + $0xd00] sm:$0xff]  ;;  %v5959_v31 = vld [vmem:[%s13545_s7 + $0x30] sm:$0xff] }
 0x78e   : > { %5780 = vmatpush.msrb.mxu0 %v7183_v37  ;;  %5881 = vmatpush.msrb.mxu2 %v7218_v25  ;;  %v5838_v41 = vsel %vm4495_vm7, %v12059_v23, %v5837_v2  ;;  %v5839_v37 = vsel %vm4497_vm8, %v12059_v23, %v5837_v2  ;;  %v7254_v25 = vld [vmem:[%s13545_s7 + $0xc8] sm:$0xff]  ;;  %v7281_v2 = vld [vmem:[%s13545_s7 + $0x1a0] sm:$0xff] }
 0x78f   : > { %5823 = vmatpush.msrb.mxu1 %v7203_v50  ;;  %5935 = vmatpush.msra.mxu3 %v7239_v30  ;;  %v7211_v50 = vrot.slane %v5838_v41, 9  ;;  %v7212_v11 = vrot.slane %v5839_v37, 9  ;;  %v7268_v30 = vld [vmem:[%s13545_s7 + $0x138] sm:$0xff]  ;;  %v5955_v41 = vld [vmem:[%s13545_s7 + $0x10] sm:$0xff] }
 0x790   : > { %5781 = vmatpush.msrb.mxu0 %v7182_v1  ;;  %5882 = vmatpush.msrb.mxu2 %v7217_v45  ;;  %v5960_v45 = vld [vmem:[%s13545_s7 + $0x38] sm:$0xff] }
 0x791   : > { %5824 = vmatpush.msrb.mxu1 %v7202_v42  ;;  %v7248_v37 = vld [vmem:[%s13545_s7 + $0x98] sm:$0xff] }
 0x792   : > { %v5606_v22 = vld.sshfl [vmem:[#allocation1] sm:$0xff pattern:$0x73625140]  ;;  %5782 = vmatpush.msrb.mxu0 %v7181_v5  ;;  %5883 = vmatpush.msrb.mxu2 %v7216_v12 }
 0x793   : > { %5624 = vmatmul.f32.vlgmr.msra.gmra.mxu1 %v5606_v22  ;;  %5646 = vst [vmem:[#allocation1] ss:$4 sm:$0xff] %v11821_v52  ;;  %v7285_v12 = vld [vmem:[%s13545_s7 + $0x1c0] sm:$0xff] }
 0x794   : > { %5648 = vst [vmem:[#allocation1 + $0x1] ss:$4 sm:$0xff] %v11867_v60  ;;  %5825 = vmatpush.msrb.mxu1 %v7201_v21  ;;  %5783 = vmatpush.msrb.mxu0 %v7180_v8  ;;  %v7292_v21 = vld [vmem:[%s13545_s7 + $0x1f8] sm:$0xff]  ;;  %v7259_v8 = vld [vmem:[%s13545_s7 + $0xf0] sm:$0xff] }
 0x795   : > { %5650 = vst [vmem:[#allocation1 + $0x2] ss:$4 sm:$0xff] %v11979_v0  ;;  %v7199_v0 = vld [vmem:[%s13543_s5 + $0xc20] sm:$0xff]  ;;  %5884 = vmatpush.msrb.mxu2 %v7215_v7  ;;  %v7252_v7 = vld [vmem:[%s13545_s7 + $0xb8] sm:$0xff] }
 0x796   : > { %5652 = vst [vmem:[#allocation1 + $0x3] ss:$4 sm:$0xff] %v12021_v61  ;;  %5826 = vmatpush.msrb.mxu1 %v7200_v49  ;;  %5784 = vmatpush.msrb.mxu0 %v7179_v57  ;;  %v5965_v49 = vld [vmem:[%s13545_s7 + $0x60] sm:$0xff]  ;;  %v7274_v57 = vld [vmem:[%s13545_s7 + $0x168] sm:$0xff] }
 0x798   : > { %5827 = vmatpush.msrb.mxu1 %v7199_v0  ;;  %5969 = vmatpush.msra.mxu0 %v5968_v32  ;;  %v7290_v0 = vld [vmem:[%s13545_s7 + $0x1e8] sm:$0xff] }
 0x79a   : > { %5828 = vmatpush.msrb.mxu1 %v7198_v19  ;;  %v7256_v19 = vld [vmem:[%s13545_s7 + $0xd8] sm:$0xff] }
 0x79d   : > { %v5653_v3 = vld.sshfl [vmem:[#allocation1] sm:$0xff pattern:$0x73625140] }
 0x79e   : > { %5671 = vmatmul.f32.vlgmr.msra.gmra.mxu2 %v5653_v3  ;;  %5701 = vst [vmem:[#allocation1] ss:$4 sm:$0xff] %v12360_v27  ;;  %v7197_v27 = vld [vmem:[%s13543_s5 + $0xc10] sm:$0xff] }
 0x79f   : > { %5705 = vst [vmem:[#allocation1 + $0x2] ss:$4 sm:$0xff] %v12861_v44  ;;  %v7196_v44 = vld [vmem:[%s13543_s5 + $0xc08] sm:$0xff]  ;;  %5829 = vmatpush.msrb.mxu1 %v7197_v27  ;;  %v5963_v3 = vld [vmem:[%s13545_s7 + $0x50] sm:$0xff] }
 0x7a0   : > { %5703 = vst [vmem:[#allocation1 + $0x1] ss:$4 sm:$0xff] %v12525_v38  ;;  %v5962_v27 = vld [vmem:[%s13545_s7 + $0x48] sm:$0xff] }
 0x7a1   : > { %5707 = vst [vmem:[#allocation1 + $0x3] ss:$4 sm:$0xff] %v13026_v46  ;;  %5830 = vmatpush.msrb.mxu1 %v7196_v44  ;;  %v5961_v44 = vld [vmem:[%s13545_s7 + $0x40] sm:$0xff] }
 0x7a2   : > { %5734 = vst.sshfl [vmem:[#allocation1 + $0x10] sm:$0xff pattern:$0x75643120] %v11867_v60 }
 0x7a3   : > { %5831 = vmatpush.msrb.mxu1 %v7195_v48  ;;  %v7286_v48 = vld [vmem:[%s13545_s7 + $0x1c8] sm:$0xff] }
 0x7a8   : > { %v5708_v63 = vld.sshfl [vmem:[#allocation1] sm:$0xff pattern:$0x73625140] }
 0x7a9   : > { %5726 = vmatmul.f32.vlgmr.msrb.gmra.mxu3 %v5708_v63  ;;  %5731 = vst.sshfl [vmem:[#allocation1] sm:$0xff pattern:$0x75643120] %v11821_v52  ;;  %v7214_v52 = vld [vmem:[%s13543_s5 + $0xc88] sm:$0xff]  ;;  %v5736_v36 = vld [vmem:[#allocation1 + $0x11] ss:$2 sm:$0xff] }
 0x7aa   : > { %5764 = vst [vmem:[#allocation1 + $0x2] ss:$4 sm:$0xff] %v12026_v56  ;;  %v7238_v56 = vld [vmem:[%s13543_s5 + $0xd48] sm:$0xff]  ;;  %5885 = vmatpush.msrb.mxu2 %v7214_v52  ;;  %v7269_v63 = vld [vmem:[%s13545_s7 + $0x140] sm:$0xff]  ;;  %v7284_v52 = vld [vmem:[%s13545_s7 + $0x1b8] sm:$0xff] }
 0x7ab   : > { %5936 = vmatpush.msra.mxu3 %v7238_v56  ;;  %v7401_v56 = vld [vmem:[%s13544_s6] ss:$0 sm:$0xff] }
 0x7ac   : > { %5886 = vmatpush.msrb.mxu2 %v7213_v10  ;;  %v4487_v10 = vpop.f32.mrf.mxu3 }
 0x7ad   : > { %5937 = vmatpush.msra.mxu3 %v7237_v26  ;;  %v5958_v26 = vld [vmem:[%s13545_s7 + $0x28] sm:$0xff] }
 0x7af   : > { %5938 = vmatpush.msra.mxu3 %v7236_v6  ;;  %v7283_v6 = vld [vmem:[%s13545_s7 + $0x1b0] sm:$0xff] }
 0x7b0   : > { %v5733_v51 = vld [vmem:[#allocation1 + $0x1] ss:$2 sm:$0xff] }
 0x7b1   : > { %5760 = vst [vmem:[#allocation1] ss:$4 sm:$0xff] %v5733_v51  ;;  %5939 = vmatpush.msra.mxu3 %v7235_v62  ;;  %v7251_v51 = vld [vmem:[%s13545_s7 + $0xb0] sm:$0xff]  ;;  %v5957_v62 = vld [vmem:[%s13545_s7 + $0x20] sm:$0xff] }
 0x7b2   : > { %5762 = vst [vmem:[#allocation1 + $0x1] ss:$4 sm:$0xff] %v5736_v36  ;;  %v7267_v36 = vld [vmem:[%s13545_s7 + $0x130] sm:$0xff] }
 0x7b3   : > { %5766 = vst [vmem:[#allocation1 + $0x3] ss:$4 sm:$0xff] %v12067_v15  ;;  %5940 = vmatpush.msra.mxu3 %v7234_v29  ;;  %v7231_v15 = vld [vmem:[%s13543_s5 + $0xd10] sm:$0xff]  ;;  %v7250_v29 = vld [vmem:[%s13545_s7 + $0xa8] sm:$0xff] }
 0x7b5   : > { %5941 = vmatpush.msra.mxu3 %v7233_v24  ;;  %v7266_v24 = vld [vmem:[%s13545_s7 + $0x128] sm:$0xff] }
 0x7b7   : > { %5942 = vmatpush.msra.mxu3 %v7232_v17  ;;  %v7282_v17 = vld [vmem:[%s13545_s7 + $0x1a8] sm:$0xff] }
 0x7b9   : > { %5943 = vmatpush.msra.mxu3 %v7231_v15  ;;  %v7249_v15 = vld [vmem:[%s13545_s7 + $0xa0] sm:$0xff] }
 0x7ba   : > { %v5767_v34 = vld.sshfl [vmem:[#allocation1] sm:$0xff pattern:$0x73625140] }
 0x7bb   : > { %5785 = vmatmul.f32.vlgmr.msrb.gmra.mxu0 %v5767_v34  ;;  %5807 = vst [vmem:[#allocation1] ss:$4 sm:$0xff] %v11867_v60  ;;  %5944 = vmatpush.msra.mxu3 %v7230_v16  ;;  %v5956_v34 = vld [vmem:[%s13545_s7 + $0x18] sm:$0xff]  ;;  %v7265_v16 = vld [vmem:[%s13545_s7 + $0x120] sm:$0xff] }
 0x7bc   : > { %5809 = vst [vmem:[#allocation1 + $0x1] ss:$4 sm:$0xff] %v11927_v40 }
 0x7bd   : > { %5811 = vst [vmem:[#allocation1 + $0x2] ss:$4 sm:$0xff] %v12021_v61  ;;  %5945 = vmatpush.msra.mxu3 %v7229_v43  ;;  %v5844_v61 = vsel %vm7924_vm6, %v7211_v50, %v7212_v11  ;;  %v4568_v43 = vpop.f32.mrf.mxu0  ;;  %v4490_v50 = vadd.f32 %v7401_v56, %v4487_v10  ;;  %v7264_v11 = vld [vmem:[%s13545_s7 + $0x118] sm:$0xff] }
 0x7be   : > { %5813 = vst [vmem:[#allocation1 + $0x3] ss:$4 sm:$0xff] %v12059_v23  ;;  %v5900_v23 = vld [vmem:[#allocation1 + $0x21] ss:$2 sm:$0xff]  ;;  %v7352_v56 = vld [vmem:[%s13545_s7 + $0x3d8] sm:$0xff] }
 0x7bf   : > { %6090 = vmatpush.msrb.mxu3 %v7292_v21  ;;  %v4571_v32 = vadd.f32 %v4568_v43, %v4490_v50  ;;  %v7245_v21 = vld [vmem:[%s13545_s7 + $0x80] sm:$0xff]  ;;  %v7300_v43 = vld [vmem:[%s13545_s7 + $0x238] sm:$0xff] }
 0x7c0   : > { %v7333_v50 = vld [vmem:[%s13545_s7 + $0x340] sm:$0xff] }
 0x7c1   : > { %6091 = vmatpush.msrb.mxu3 %v7291_v4 }
 0x7c3   : > { %6092 = vmatpush.msrb.mxu3 %v7290_v0 }
 0x7c5   : > { %v5814_v1 = vld.sshfl [vmem:[#allocation1] sm:$0xff pattern:$0x73625140]  ;;  %6093 = vmatpush.msrb.mxu3 %v7289_v18  ;;  %v4674_v4 = vpop.f32.mrf.mxu0 }
 0x7c6   : > { %5832 = vmatmul.f32.vlgmr.msrb.gmra.mxu1 %v5814_v1  ;;  %5862 = vst [vmem:[#allocation1] ss:$4 sm:$0xff] %v12525_v38  ;;  %v5903_v38 = vld [vmem:[#allocation1 + $0x31] ss:$2 sm:$0xff] }
 0x7c7   : > { %5866 = vst [vmem:[#allocation1 + $0x2] ss:$4 sm:$0xff] %v13026_v46  ;;  %6094 = vmatpush.msrb.mxu3 %v7288_v54  ;;  %v7287_v46 = vld [vmem:[%s13545_s7 + $0x1d0] sm:$0xff]  ;;  %v7280_v1 = vld [vmem:[%s13545_s7 + $0x198] sm:$0xff] }
 0x7c8   : > { %5864 = vst [vmem:[#allocation1 + $0x1] ss:$4 sm:$0xff] %v12691_v47  ;;  %v7276_v47 = vld [vmem:[%s13545_s7 + $0x178] sm:$0xff] }
 0x7c9   : > { %5868 = vst [vmem:[#allocation1 + $0x3] ss:$4 sm:$0xff] %v5844_v61  ;;  %6050 = vmatpush.msra.mxu2 %v7276_v47  ;;  %6095 = vmatpush.msrb.mxu3 %v7287_v46  ;;  %v5954_v61 = vld [vmem:[%s13545_s7 + $0x8] sm:$0xff]  ;;  %v7308_v47 = vld [vmem:[%s13545_s7 + $0x278] sm:$0xff] }
 0x7ca   : > { %5895 = vst.sshfl [vmem:[#allocation1 + $0x10] sm:$0xff pattern:$0x75643120] %v11927_v40  ;;  %v5967_v40 = vld [vmem:[%s13545_s7 + $0x70] sm:$0xff]  ;;  %v7322_v46 = vld [vmem:[%s13545_s7 + $0x2e8] sm:$0xff] }
 0x7cb   : > { %5970 = vmatpush.msra.mxu0 %v5967_v40  ;;  %6051 = vmatpush.msra.mxu2 %v7275_v33  ;;  %v7262_v40 = vld [vmem:[%s13545_s7 + $0x108] sm:$0xff]  ;;  %v7277_v33 = vld [vmem:[%s13545_s7 + $0x180] sm:$0xff] }
 0x7cc   : > { %6096 = vmatpush.msrb.mxu3 %v7286_v48  ;;  %v7304_v48 = vld [vmem:[%s13545_s7 + $0x258] sm:$0xff] }
 0x7cd   : > { %5971 = vmatpush.msra.mxu0 %v5966_v59  ;;  %6052 = vmatpush.msra.mxu2 %v7274_v57  ;;  %v4796_v57 = vpop.f32.mrf.mxu2 }
 0x7ce   : > { %6097 = vmatpush.msrb.mxu3 %v7285_v12  ;;  %v7353_v12 = vld [vmem:[%s13545_s7 + $0x3e0] sm:$0xff] }
 0x7cf   : > { %5972 = vmatpush.msra.mxu0 %v5965_v49  ;;  %6053 = vmatpush.msra.mxu2 %v7273_v14  ;;  %v4737_v49 = vpop.f32.mrf.mxu1  ;;  %v7340_v14 = vld [vmem:[%s13545_s7 + $0x378] sm:$0xff] }
 0x7d0   : > { %v5869_v42 = vld.sshfl [vmem:[#allocation1] sm:$0xff pattern:$0x73625140]  ;;  %6098 = vmatpush.msrb.mxu3 %v7284_v52  ;;  %v7336_v52 = vld [vmem:[%s13545_s7 + $0x358] sm:$0xff] }
 0x7d1   : > { %5887 = vmatmul.f32.vlgmr.msrb.gmra.mxu2 %v5869_v42  ;;  %5892 = vst.sshfl [vmem:[#allocation1] sm:$0xff pattern:$0x75643120] %v11867_v60  ;;  %v5897_v22 = vld [vmem:[#allocation1 + $0x11] ss:$2 sm:$0xff]  ;;  %5973 = vmatpush.msra.mxu0 %v5964_v35 }
 0x7d2   : > { %5925 = vst [vmem:[#allocation1 + $0x2] ss:$4 sm:$0xff] %v5900_v23  ;;  %v7260_v60 = vld [vmem:[%s13545_s7 + $0xf8] sm:$0xff]  ;;  %6054 = vmatpush.msra.mxu2 %v7272_v55  ;;  %6099 = vmatpush.msrb.mxu3 %v7283_v6  ;;  %v7247_v42 = vld [vmem:[%s13545_s7 + $0x90] sm:$0xff] }
 0x7d3   : > { %6010 = vmatpush.msra.mxu1 %v7260_v60  ;;  %5974 = vmatpush.msra.mxu0 %v5963_v3  ;;  %v7263_v23 = vld [vmem:[%s13545_s7 + $0x110] sm:$0xff]  ;;  %v7278_v60 = vld [vmem:[%s13545_s7 + $0x188] sm:$0xff]  ;;  %v7356_v3 = vld [vmem:[%s13545_s7 + $0x3f8] sm:$0xff] }
 0x7d4   : > { %6055 = vmatpush.msra.mxu2 %v7271_v39  ;;  %6100 = vmatpush.msrb.mxu3 %v7282_v17  ;;  %v7307_v35 = vld [vmem:[%s13545_s7 + $0x270] sm:$0xff]  ;;  %v7305_v39 = vld [vmem:[%s13545_s7 + $0x260] sm:$0xff]  ;;  %v7318_v17 = vld [vmem:[%s13545_s7 + $0x2c8] sm:$0xff] }
 0x7d5   : > { %6011 = vmatpush.msra.mxu1 %v7259_v8  ;;  %5975 = vmatpush.msra.mxu0 %v5962_v27  ;;  %v7261_v8 = vld [vmem:[%s13545_s7 + $0x100] sm:$0xff]  ;;  %v7323_v55 = vld [vmem:[%s13545_s7 + $0x2f0] sm:$0xff] }
 0x7d6   : > { %6056 = vmatpush.msra.mxu2 %v7270_v13  ;;  %6101 = vmatpush.msrb.mxu3 %v7281_v2  ;;  %v7339_v27 = vld [vmem:[%s13545_s7 + $0x370] sm:$0xff] }
 0x7d7   : > { %6012 = vmatpush.msra.mxu1 %v7258_v53  ;;  %5976 = vmatpush.msra.mxu0 %v5961_v44  ;;  %v7338_v44 = vld [vmem:[%s13545_s7 + $0x368] sm:$0xff]  ;;  %v7335_v6 = vld [vmem:[%s13545_s7 + $0x350] sm:$0xff] }
 0x7d8   : > { %v5894_v58 = vld [vmem:[#allocation1 + $0x1] ss:$2 sm:$0xff]  ;;  %6057 = vmatpush.msra.mxu2 %v7269_v63  ;;  %6102 = vmatpush.msrb.mxu3 %v7280_v1 }
 0x7d9   : > { %5921 = vst [vmem:[#allocation1] ss:$4 sm:$0xff] %v5894_v58  ;;  %6013 = vmatpush.msra.mxu1 %v7257_v20  ;;  %5977 = vmatpush.msra.mxu0 %v5960_v45  ;;  %v7279_v58 = vld [vmem:[%s13545_s7 + $0x190] sm:$0xff]  ;;  %v7324_v20 = vld [vmem:[%s13545_s7 + $0x2f8] sm:$0xff]  ;;  %v7321_v45 = vld [vmem:[%s13545_s7 + $0x2e0] sm:$0xff] }
 0x7da   : > { %5923 = vst [vmem:[#allocation1 + $0x1] ss:$4 sm:$0xff] %v5897_v22  ;;  %6058 = vmatpush.msra.mxu2 %v7268_v30  ;;  %v4627_v22 = vpop.f32.mrf.mxu3  ;;  %6103 = vmatpush.msrb.mxu3 %v7279_v58  ;;  %v7337_v63 = vld [vmem:[%s13545_s7 + $0x360] sm:$0xff]  ;;  %v4965_v30 = vpop.f32.mrf.mxu1  ;;  %v7316_v58 = vld [vmem:[%s13545_s7 + $0x2b8] sm:$0xff] }
 0x7db   : > { %5927 = vst [vmem:[#allocation1 + $0x3] ss:$4 sm:$0xff] %v5903_v38  ;;  %6014 = vmatpush.msra.mxu1 %v7256_v19  ;;  %5978 = vmatpush.msra.mxu0 %v5959_v31  ;;  %v5953_v38 = vld [vmem:[%s13545_s7] sm:$0xff]  ;;  %v4630_v59 = vadd.f32 %v4627_v22, %v4571_v32  ;;  %v7306_v19 = vld [vmem:[%s13545_s7 + $0x268] sm:$0xff]  ;;  %v7303_v31 = vld [vmem:[%s13545_s7 + $0x250] sm:$0xff] }
 0x7dc   : > { %6059 = vmatpush.msra.mxu2 %v7267_v36  ;;  %6104 = vmatpush.msrb.mxu3 %v7278_v60  ;;  %v5012_v36 = vpop.f32.mrf.mxu2  ;;  %v7332_v22 = vld [vmem:[%s13545_s7 + $0x338] sm:$0xff]  ;;  %v7315_v60 = vld [vmem:[%s13545_s7 + $0x2b0] sm:$0xff] }
 0x7dd   : > { %6015 = vmatpush.msra.mxu1 %v7255_v9  ;;  %5979 = vmatpush.msra.mxu0 %v5958_v26  ;;  %v4677_v53 = vadd.f32 %v4674_v4, %v4630_v59  ;;  %v7355_v9 = vld [vmem:[%s13545_s7 + $0x3f0] sm:$0xff]  ;;  %v7302_v26 = vld [vmem:[%s13545_s7 + $0x248] sm:$0xff] }
 0x7de   : > { %6060 = vmatpush.msra.mxu2 %v7266_v24  ;;  %6105 = vmatpush.msrb.mxu3 %v7277_v33  ;;  %v7301_v24 = vld [vmem:[%s13545_s7 + $0x240] sm:$0xff]  ;;  %v7347_v59 = vld [vmem:[%s13545_s7 + $0x3b0] sm:$0xff]  ;;  %v7314_v4 = vld [vmem:[%s13545_s7 + $0x2a8] sm:$0xff] }
 0x7df   : > { %6016 = vmatpush.msra.mxu1 %v7254_v25  ;;  %5980 = vmatpush.msra.mxu0 %v5957_v62  ;;  %v4740_v0 = vadd.f32 %v4737_v49, %v4677_v53  ;;  %v7354_v25 = vld [vmem:[%s13545_s7 + $0x3e8] sm:$0xff]  ;;  %v7351_v62 = vld [vmem:[%s13545_s7 + $0x3d0] sm:$0xff]  ;;  %v7297_v33 = vld [vmem:[%s13545_s7 + $0x220] sm:$0xff] }
 0x7e0   : > { %6061 = vmatpush.msra.mxu2 %v7265_v16  ;;  %v7350_v16 = vld [vmem:[%s13545_s7 + $0x3c8] sm:$0xff] }
 0x7e1   : > { %6017 = vmatpush.msra.mxu1 %v7253_v28  ;;  %5981 = vmatpush.msra.mxu0 %v5956_v34  ;;  %v4799_v54 = vadd.f32 %v4796_v57, %v4740_v0  ;;  %v4906_v28 = vpop.f32.mrf.mxu0  ;;  %v7330_v49 = vld [vmem:[%s13545_s7 + $0x328] sm:$0xff]  ;;  %v7296_v0 = vld [vmem:[%s13545_s7 + $0x218] sm:$0xff] }
 0x7e2   : > { %v5928_v5 = vld.sshfl [vmem:[#allocation1] sm:$0xff pattern:$0x73625140]  ;;  %6062 = vmatpush.msra.mxu2 %v7264_v11  ;;  %v4843_v18 = vpop.f32.mrf.mxu3  ;;  %v7346_v53 = vld [vmem:[%s13545_s7 + $0x3a8] sm:$0xff] }
 0x7e3   : > { %5946 = vmatmul.f32.vlgmr.msra.gmra.mxu3 %v5928_v5  ;;  %6018 = vmatpush.msra.mxu1 %v7252_v7  ;;  %v7246_v5 = vld [vmem:[%s13545_s7 + $0x88] sm:$0xff]  ;;  %v4846_v13 = vadd.f32 %v4843_v18, %v4799_v54  ;;  %v7320_v7 = vld [vmem:[%s13545_s7 + $0x2d8] sm:$0xff]  ;;  %v7349_v11 = vld [vmem:[%s13545_s7 + $0x3c0] sm:$0xff] }
 0x7e4   : > { %5982 = vmatpush.msra.mxu0 %v5955_v41  ;;  %6063 = vmatpush.msra.mxu2 %v7263_v23  ;;  %v7317_v41 = vld [vmem:[%s13545_s7 + $0x2c0] sm:$0xff]  ;;  %v7299_v23 = vld [vmem:[%s13545_s7 + $0x230] sm:$0xff]  ;;  %v7328_v54 = vld [vmem:[%s13545_s7 + $0x318] sm:$0xff] }
 0x7e5   : > { %6019 = vmatpush.msra.mxu1 %v7251_v51  ;;  %6250 = vmatpush.msra.mxu3 %v7356_v3  ;;  %v4909_v10 = vadd.f32 %v4906_v28, %v4846_v13  ;;  %v7319_v51 = vld [vmem:[%s13545_s7 + $0x2d0] sm:$0xff]  ;;  %v7345_v18 = vld [vmem:[%s13545_s7 + $0x3a0] sm:$0xff]  ;;  %v7310_v28 = vld [vmem:[%s13545_s7 + $0x288] sm:$0xff] }
 0x7e6   : > { %5983 = vmatpush.msra.mxu0 %v5954_v61  ;;  %6064 = vmatpush.msra.mxu2 %v7262_v40  ;;  %v5181_v61 = vpop.f32.mrf.mxu1  ;;  %v7298_v40 = vld [vmem:[%s13545_s7 + $0x228] sm:$0xff]  ;;  %v7343_v13 = vld [vmem:[%s13545_s7 + $0x390] sm:$0xff] }
 0x7e7   : > { %6020 = vmatpush.msra.mxu1 %v7250_v29  ;;  %6251 = vmatpush.msra.mxu3 %v7355_v9  ;;  %v4968_v29 = vadd.f32 %v4965_v30, %v4909_v10  ;;  %v7344_v9 = vld [vmem:[%s13545_s7 + $0x398] sm:$0xff]  ;;  %v7309_v30 = vld [vmem:[%s13545_s7 + $0x280] sm:$0xff] }
 0x7e8   : > { %5984 = vmatpush.msra.mxu0 %v5953_v38  ;;  %6065 = vmatpush.msra.mxu2 %v7261_v8  ;;  %v5236_v38 = vpop.f32.mrf.mxu2 }
 0x7e9   : > { %6021 = vmatpush.msra.mxu1 %v7249_v15  ;;  %6252 = vmatpush.msra.mxu3 %v7354_v25  ;;  %v7334_v15 = vld [vmem:[%s13545_s7 + $0x348] sm:$0xff]  ;;  %v5015_v2 = vadd.f32 %v5012_v36, %v4968_v29  ;;  %v7327_v25 = vld [vmem:[%s13545_s7 + $0x310] sm:$0xff] }
 0x7ea   : > { %6130 = vmatpush.msrb.mxu0 %v7308_v47  ;;  %6210 = vmatpush.msrb.mxu2 %v7340_v14  ;;  %v5075_v34 = vpop.f32.mrf.mxu3  ;;  %v7331_v47 = vld [vmem:[%s13545_s7 + $0x330] sm:$0xff] }
 0x7eb   : > { %6022 = vmatpush.msra.mxu1 %v7248_v37  ;;  %6253 = vmatpush.msra.mxu3 %v7353_v12  ;;  %v5134_v37 = vpop.f32.mrf.mxu0  ;;  %v5078_v1 = vadd.f32 %v5075_v34, %v5015_v2  ;;  %v7342_v12 = vld [vmem:[%s13545_s7 + $0x388] sm:$0xff] }
 0x7ec   : > { %6131 = vmatpush.msrb.mxu0 %v7307_v35  ;;  %6211 = vmatpush.msrb.mxu2 %v7339_v27  ;;  %v7313_v35 = vld [vmem:[%s13545_s7 + $0x2a0] sm:$0xff] }
 0x7ed   : > { %6023 = vmatpush.msra.mxu1 %v7247_v42  ;;  %6254 = vmatpush.msra.mxu3 %v7352_v56  ;;  %v5137_v42 = vadd.f32 %v5134_v37, %v5078_v1  ;;  %v7341_v56 = vld [vmem:[%s13545_s7 + $0x380] sm:$0xff] }
 0x7ee   : > { %6132 = vmatpush.msrb.mxu0 %v7306_v19  ;;  %6212 = vmatpush.msrb.mxu2 %v7338_v44  ;;  %v5397_v3 = vpop.f32.mrf.mxu1  ;;  %v7295_v19 = vld [vmem:[%s13545_s7 + $0x210] sm:$0xff] }
 0x7ef   : > { %6024 = vmatpush.msra.mxu1 %v7246_v5  ;;  %6255 = vmatpush.msra.mxu3 %v7351_v62  ;;  %v7348_v5 = vld [vmem:[%s13545_s7 + $0x3b8] sm:$0xff]  ;;  %v5184_v32 = vadd.f32 %v5181_v61, %v5137_v42 }
 0x7f0   : > { %6133 = vmatpush.msrb.mxu0 %v7305_v39  ;;  %6213 = vmatpush.msrb.mxu2 %v7337_v63  ;;  %v7294_v39 = vld [vmem:[%s13545_s7 + $0x208] sm:$0xff]  ;;  %v5456_v44 = vpop.f32.mrf.mxu2 }
 0x7f1   : > { %6025 = vmatpush.msra.mxu1 %v7245_v21  ;;  %6256 = vmatpush.msra.mxu3 %v7350_v16  ;;  %v5239_v8 = vadd.f32 %v5236_v38, %v5184_v32  ;;  %v7326_v63 = vld [vmem:[%s13545_s7 + $0x308] sm:$0xff] }
 0x7f2   : > { %6134 = vmatpush.msrb.mxu0 %v7304_v48  ;;  %6214 = vmatpush.msrb.mxu2 %v7336_v52  ;;  %v5295_v21 = vpop.f32.mrf.mxu3  ;;  %v7293_v48 = vld [vmem:[%s13545_s7 + $0x200] sm:$0xff] }
 0x7f3   : > { %6170 = vmatpush.msrb.mxu1 %v7324_v20  ;;  %6257 = vmatpush.msra.mxu3 %v7349_v11  ;;  %v5298_v57 = vadd.f32 %v5295_v21, %v5239_v8  ;;  %v7329_v20 = vld [vmem:[%s13545_s7 + $0x320] sm:$0xff]  ;;  %v5342_v14 = vpop.f32.mrf.mxu0 }
 0x7f4   : > { %6135 = vmatpush.msrb.mxu0 %v7303_v31  ;;  %6215 = vmatpush.msrb.mxu2 %v7335_v6  ;;  %v7325_v52 = vld [vmem:[%s13545_s7 + $0x300] sm:$0xff] }
 0x7f5   : > { %6171 = vmatpush.msrb.mxu1 %v7323_v55  ;;  %6258 = vmatpush.msra.mxu3 %v7348_v5  ;;  %v7312_v55 = vld [vmem:[%s13545_s7 + $0x298] sm:$0xff]  ;;  %v5345_v27 = vadd.f32 %v5342_v14, %v5298_v57  ;;  %v5952_v5 = vld [vmem:[%s13546_s8] sm:$0x1] }
 0x7f6   : > { %6136 = vmatpush.msrb.mxu0 %v7302_v26  ;;  %6216 = vmatpush.msrb.mxu2 %v7334_v15 }
 0x7f7   : > { %6172 = vmatpush.msrb.mxu1 %v7322_v46  ;;  %6259 = vmatpush.msra.mxu3 %v7347_v59  ;;  %v7311_v46 = vld [vmem:[%s13545_s7 + $0x290] sm:$0xff] }
 0x7f8   : > { %6137 = vmatpush.msrb.mxu0 %v7301_v24  ;;  %6217 = vmatpush.msrb.mxu2 %v7333_v50 }
 0x7f9   : > { %6173 = vmatpush.msrb.mxu1 %v7321_v45  ;;  %6260 = vmatpush.msra.mxu3 %v7346_v53  ;;  %v5400_v45 = vadd.f32 %v5397_v3, %v5345_v27 }
 0x7fa   : > { %6138 = vmatpush.msrb.mxu0 %v7300_v43  ;;  %6218 = vmatpush.msrb.mxu2 %v7332_v22  ;;  %v5503_v31 = vpop.f32.mrf.mxu3 }
 0x7fb   : > { %6174 = vmatpush.msrb.mxu1 %v7320_v7  ;;  %6261 = vmatpush.msra.mxu3 %v7345_v18  ;;  %v5459_v7 = vadd.f32 %v5456_v44, %v5400_v45 }
 0x7fc   : > { %6139 = vmatpush.msrb.mxu0 %v7299_v23  ;;  %6219 = vmatpush.msrb.mxu2 %v7331_v47 }
 0x7fd   : > { %6175 = vmatpush.msrb.mxu1 %v7319_v51  ;;  %6262 = vmatpush.msra.mxu3 %v7344_v9  ;;  %v5506_v10 = vadd.f32 %v5503_v31, %v5459_v7 }
 0x7fe   : > { %6140 = vmatpush.msrb.mxu0 %v7298_v40  ;;  %6220 = vmatpush.msrb.mxu2 %v7330_v49  ;;  %v5566_v26 = vpop.f32.mrf.mxu0 }
 0x7ff   : > { %6176 = vmatpush.msrb.mxu1 %v7318_v17  ;;  %6263 = vmatpush.msra.mxu3 %v7343_v13  ;;  %v5569_v36 = vadd.f32 %v5566_v26, %v5506_v10 }
 0x800   : > { %6141 = vmatpush.msrb.mxu0 %v7297_v33  ;;  %6221 = vmatpush.msrb.mxu2 %v7329_v20 }
 0x801   : > { %6177 = vmatpush.msrb.mxu1 %v7317_v41  ;;  %6264 = vmatpush.msra.mxu3 %v7342_v12 }
 0x802   : > { %6142 = vmatpush.msrb.mxu0 %v7296_v0  ;;  %6222 = vmatpush.msrb.mxu2 %v7328_v54 }
 0x803   : > { %6178 = vmatpush.msrb.mxu1 %v7316_v58  ;;  %6265 = vmatpush.msra.mxu3 %v7341_v56 }
 0x804   : > { %6143 = vmatpush.msrb.mxu0 %v7295_v19  ;;  %6223 = vmatpush.msrb.mxu2 %v7327_v25 }
 0x805   : > { %6179 = vmatpush.msrb.mxu1 %v7315_v60 }
 0x806   : > { %6144 = vmatpush.msrb.mxu0 %v7294_v39  ;;  %6224 = vmatpush.msrb.mxu2 %v7326_v63 }
 0x807   : > { %6180 = vmatpush.msrb.mxu1 %v7314_v4 }
 0x808   : > { %6145 = vmatpush.msrb.mxu0 %v7293_v48  ;;  %6225 = vmatpush.msrb.mxu2 %v7325_v52 }
 0x809   : > { %6181 = vmatpush.msrb.mxu1 %v7313_v35 }
 0x80b   : > { %6182 = vmatpush.msrb.mxu1 %v7312_v55 }
 0x80d   : > { %6183 = vmatpush.msrb.mxu1 %v7311_v46 }
 0x80f   : > { %6184 = vmatpush.msrb.mxu1 %v7310_v28 }
 0x810   : > { %v5625_v51 = vpop.f32.mrf.mxu1 }
 0x811   : > { %6185 = vmatpush.msrb.mxu1 %v7309_v30  ;;  %v5628_v62 = vadd.f32 %v5625_v51, %v5569_v36 }
 0x821   : > { %v5672_v6 = vpop.f32.mrf.mxu2 }
 0x822   : > { %v5675_v24 = vadd.f32 %v5672_v6, %v5628_v62 }
 0x82c   : > { %v5727_v29 = vpop.f32.mrf.mxu3 }
 0x82d   : > { %v5730_v34 = vadd.f32 %v5727_v29, %v5675_v24 }
 0x838   : > { %v5786_v17 = vpop.f32.mrf.mxu0 }
 0x839   : > { %v5789_v16 = vadd.f32 %v5786_v17, %v5730_v34 }
 0x843   : > { %v5833_v15 = vpop.f32.mrf.mxu1 }
 0x844   : > { %v5836_v43 = vadd.f32 %v5833_v15, %v5789_v16 }
 0x854   : > { %v5888_v2 = vpop.f32.mrf.mxu2 }
 0x855   : > { %v5891_v41 = vadd.f32 %v5888_v2, %v5836_v43 }
 0x866   : > { %v5947_v37 = vpop.f32.mrf.mxu3 }
 0x867   : > { %v5950_v50 = vadd.f32 %v5947_v37, %v5891_v41 }
 0x869   : > { %v5951_v11 = vmax.f32 %v5950_v50, 0.0 }
 0x86b   : > { %5985 = vmatmul.f32.vlgmr.msra.gmra.mxu0 %v5951_v11  ;;  %v6008_v1 = vrot.slane %v5951_v11, 1  ;;  %v6048_v61 = vrot.slane %v5951_v11, 2  ;;  %v6088_v42 = vrot.slane %v5951_v11, 3  ;;  %v6128_v23 = vrot.slane %v5951_v11, 4 }
 0x86c   : > { %v6168_v58 = vrot.slane %v5951_v11, 5  ;;  %v6208_v22 = vrot.slane %v5951_v11, 6  ;;  %v6248_v38 = vrot.slane %v5951_v11, 7 }
 0x86d   : > { %6026 = vmatmul.f32.vlgmr.msra.gmra.mxu1 %v6008_v1  ;;  %6066 = vmatmul.f32.vlgmr.msra.gmra.mxu2 %v6048_v61 }
 0x86e   : > { %6106 = vmatmul.f32.vlgmr.msrb.gmra.mxu3 %v6088_v42 }
 0x873   : > { %6146 = vmatmul.f32.vlgmr.msrb.gmra.mxu0 %v6128_v23 }
 0x875   : > { %6186 = vmatmul.f32.vlgmr.msrb.gmra.mxu1 %v6168_v58  ;;  %6226 = vmatmul.f32.vlgmr.msrb.gmra.mxu2 %v6208_v22 }
 0x876   : > { %6266 = vmatmul.f32.vlgmr.msra.gmra.mxu3 %v6248_v38 }
 0x8e8   : > { %v5986_v32 = vpop.f32.mrf.mxu0 }
 0x8e9   : > { %v5989_v40 = vadd.f32 %v5986_v32, %v5952_v5 }
 0x8ea   : > { %v6027_v60 = vpop.f32.mrf.mxu1 }
 0x8eb   : > { %v6030_v47 = vadd.f32 %v6027_v60, %v5989_v40 }
 0x8f0   : > { %v6067_v21 = vpop.f32.mrf.mxu2  ;;  %v6147_v4 = vpop.f32.mrf.mxu0 }
 0x8f1   : > { %v6070_v59 = vadd.f32 %v6067_v21, %v6030_v47  ;;  %v6107_v8 = vpop.f32.mrf.mxu3 }
 0x8f2   : > { %v6187_v53 = vpop.f32.mrf.mxu1 }
 0x8f3   : > { %v6110_v33 = vadd.f32 %v6107_v8, %v6070_v59 }
 0x8f5   : > { %v6150_v49 = vadd.f32 %v6147_v4, %v6110_v33 }
 0x8f7   : > { %v6190_v57 = vadd.f32 %v6187_v53, %v6150_v49 }
 0x8f8   : > { %v6227_v0 = vpop.f32.mrf.mxu2 }
 0x8f9   : > { %v6230_v35 = vadd.f32 %v6227_v0, %v6190_v57  ;;  %v6267_v20 = vpop.f32.mrf.mxu3 }
 0x8fb   : > { %v6270_v14 = vadd.f32 %v6267_v20, %v6230_v35 }
 0x8fd   : > { %6271 = vst [vmem:[%s324_s28] sm:$0x1] %v6270_v14 }
 0x8fe   : > { %7434 = shalt.err (!%p7431_p3)
}
 0x8ff   : > { %7360 = dma.vmem_to_hbm [thread:$0]  (%p7559_p5), %s6284_s29, 16, %s6286_s14, %s6273_s16  }
 0x900 PF: > { %p7366_p4 = scmp.ge.s32.totalorder %s7469_s12, 2  ;;  %s6297_s23 = sand.u32 1, %s7457_s30  }
 0x901   : > { %s6298_s27 = scalar_lea.sflag [#allocation3], %s6297_s23 }
 0x902   : > { %p7363_p7 = pnand %p7366_p4, %p7563_p6 }
 0x904   : > { %p7364_p8 = pneg %p7363_p7 }
 0x906   : > { %7452 = dma.done.wait (%p7364_p8), %s6298_s27, 16  }
 0x907   : > { %7454 = vsyncadd (%p7364_p8), %s6298_s27, 4294967280  ;;  %p19_p9 = scmp.ge.s32.totalorder %s7546_s15, 4   ;;  %s14428_s30 = smov %s7461_s10 }
 0x908   : > { %s14429_s10 = smov %s7465_s11  ;;  %s14430_s11 = smov %s7557_s18 }
 0x909   : > { %s14431_s12 = smov %s7546_s15  ;;  %21 = sbr.rel (!%p19_p9) target bundleno = 3 (0x3), region = 463 }
 0x90e   :  { %6303 = vsyncpa [#allocation3], 1 }
 0x90f   :  { %6305 = vsyncpa [#allocation3 + $0x1], 1 }

</bundles_post_ra>
